<compile_context>
chip_gen: v7x
topology: tpu7x:2x2x1
jax: 0.10.0
libtpu: 0.0.40
codegen_flags: <defaults>
</compile_context>

<pallas_src>
import functools

import numpy as np
import jax
import jax.numpy as jnp
from jax.experimental import pallas as pl
from jax.experimental.pallas import tpu as pltpu

EPS = float(np.finfo(float).eps)      # same eps the PyTorch module adds
_HI = jax.lax.Precision.HIGHEST       # keep f32 accuracy on the MXU


def _fused_kernel(pat_ref, w_ref, x1_ref, x2_ref,
                  x1p_ref, acrop_ref, strip_ref, bwin_ref, *,
                  F, Ft, Hout, Wout, cy, cx, Hc, Wc, Dy, Dx, inv_norm):
    """Fused conv(+relu/scale/channel-norm) for both clips + cross-filter corr.

    pat_ref : (2, C*T*KH*KW, Hout*Wout) f32  im2col patches (clip 0 = x, 1 = x_prev)
    w_ref   : (F, C*T*KH*KW)            f32  conv weights (non-temporal at t=T-1)
    x1_ref  : (F, Hout*Wout)            f32  OUT: normalized conv of current clip
    x2_ref  : (F, F*Dy*Dx)              f32  OUT: correlation, cols = (j, dy, dx)
    scratch : x1p (F, HW), acrop (F, Hc*Wc), strip (F, Hout*Wc),
              bwin (Dy*Dx*F, Hc*Wc)
    """
    HcWc = Hc * Wc
    Ndisp = Dy * Dx

    w = w_ref[...]                                            # (F, CK)
    # relu(.)/2 for the temporal filters, relu(.) for the non-temporal ones
    scale = jnp.where(
        jax.lax.broadcasted_iota(jnp.int32, (F, 1), 0) < Ft, 0.5, 1.0)

    def branch(g):
        z = jnp.dot(w, pat_ref[g], preferred_element_type=jnp.float32,
                    precision=_HI)                            # (F, HW), MXU
        act = jnp.maximum(z, 0.0) * scale
        denom = jnp.sum(act, axis=0, keepdims=True) + EPS     # channel-sum norm
        return act / denom

    x1_ref[...] = branch(0)        # current clip -> lane-dense output
    x1p_ref[...] = branch(1)       # previous clip -> stays in VMEM scratch

    # acrop[i, h*Wc+w] = x1[i, cy+h, cx+w]   (cropped "filter" of the correlation)
    for h in range(Hc):
        s = (cy + h) * Wout + cx
        acrop_ref[:, h * Wc:(h + 1) * Wc] = x1_ref[:, s:s + Wc]

    # Window bank: bwin[(dy*Dx+dx)*F + j, h*Wc+w] = x1_prev[j, dy+h, dx+w]
    for dx in range(Dx):
        # strip[:, r*Wc+w] = x1_prev[:, r, dx+w]  (all rows, fixed dx shift)
        for r in range(Hout):
            s = r * Wout + dx
            strip_ref[:, r * Wc:(r + 1) * Wc] = x1p_ref[:, s:s + Wc]
        for dy in range(Dy):
            d = dy * Dx + dx
            bwin_ref[d * F:(d + 1) * F, :] = strip_ref[:, dy * Wc:dy * Wc + HcWc]

    # One MXU contraction over the window pixels: res[i, d*F + j]
    res = jax.lax.dot_general(
        acrop_ref[...], bwin_ref[...], (((1,), (1,)), ((), ())),
        preferred_element_type=jnp.float32, precision=_HI)    # (F, Ndisp*F)

    # Column permutation (d, j) -> (j, d) done on the MXU with a 0/1 matrix,
    # so x2 is stored once, lane-dense, already in (i, j, dy, dx) order.
    NF = Ndisp * F
    rows = jax.lax.broadcasted_iota(jnp.int32, (NF, NF), 0).astype(jnp.float32)
    cols = jax.lax.broadcasted_iota(jnp.int32, (NF, NF), 1).astype(jnp.float32)
    j_b = jnp.floor((cols + 0.5) * (1.0 / Ndisp))             # b // Ndisp (exact)
    d_b = cols - j_b * Ndisp                                  # b %  Ndisp (exact)
    perm = (rows == d_b * F + j_b).astype(jnp.float32)        # (NF, NF) 0/1
    x2_ref[...] = jnp.dot(res, perm, preferred_element_type=jnp.float32,
                          precision=_HI) * inv_norm


def net_forward(x, x_prev, filts_temp, filts_notemp, num_rfs):
    """x, x_prev: (1, C, T, H, W) f32; filters already in (F, C, kT, kH, kW)."""
    N, C, T, H, W = x.shape
    assert N == 1, "the module's .view() calls require batch size 1"
    Ft, _, Tt, KH, KW = filts_temp.shape
    Fnt = filts_notemp.shape[0]
    F = Ft + Fnt
    assert Tt == T, "temporal conv must collapse the time dim (needed by torch.cat)"
    Hout, Wout = H - KH + 1, W - KW + 1

    corr_x = num_rfs * filts_temp.shape[3]   # num_rfs * kH (as in PyTorch)
    corr_y = num_rfs * filts_temp.shape[4]   # num_rfs * kW
    y_max, x_max = Hout, Wout
    Hc, Wc = y_max - 2 * corr_y, x_max - 2 * corr_x
    Dy, Dx = 2 * corr_y + 1, 2 * corr_x + 1
    # NOTE: PyTorch divides by (y_max-2*corr_y)*(x_max-2*corr_y) -- corr_y twice (sic).
    norm = float((y_max - 2 * corr_y) * (x_max - 2 * corr_y))

    CK = C * T * KH * KW
    HW = Hout * Wout

    # Conv weights as one (F, CK) matrix; single-frame (non-temporal) filters are
    # embedded at t == T-1 so one matmul covers both conv branches.
    wt = jnp.asarray(filts_temp, jnp.float32)
    wn = jnp.asarray(filts_notemp, jnp.float32)
    wn_pad = jnp.zeros((Fnt, C, T, KH, KW), jnp.float32).at[:, :, T - 1].set(wn[:, :, 0])
    w_all = jnp.concatenate([wt.reshape(Ft, CK), wn_pad.reshape(Fnt, CK)], axis=0)

    # im2col patches (lane-dense (CK, Hout*Wout) slabs); rows ordered (c, t, kh, kw)
    def im2col(clip):                        # (C, T, H, W) -> (CK, HW)
        rows = []
        for c in range(C):
            for t in range(T):
                for kh in range(KH):
                    for kw in range(KW):
                        rows.append(clip[c, t, kh:kh + Hout, kw:kw + Wout].reshape(HW))
        return jnp.stack(rows, axis=0)

    patches = jnp.stack([im2col(x[0]), im2col(x_prev[0])], axis=0)   # (2, CK, HW)

    kernel = functools.partial(
        _fused_kernel, F=F, Ft=Ft, Hout=Hout, Wout=Wout,
        cy=corr_y, cx=corr_x, Hc=Hc, Wc=Wc, Dy=Dy, Dx=Dx, inv_norm=1.0 / norm)

    x1_k, x2_k = pl.pallas_call(
        kernel,
        out_shape=(jax.ShapeDtypeStruct((F, HW), jnp.float32),
                   jax.ShapeDtypeStruct((F, F * Dy * Dx), jnp.float32)),
        in_specs=[pl.BlockSpec(memory_space=pltpu.MemorySpace.VMEM),
                  pl.BlockSpec(memory_space=pltpu.MemorySpace.VMEM)],
        out_specs=(pl.BlockSpec(memory_space=pltpu.MemorySpace.VMEM),
                   pl.BlockSpec(memory_space=pltpu.MemorySpace.VMEM)),
        scratch_shapes=[
            pltpu.VMEM((F, HW), jnp.float32),                 # x1_prev
            pltpu.VMEM((F, Hc * Wc), jnp.float32),            # cropped x1
            pltpu.VMEM((F, Hout * Wc), jnp.float32),          # per-dx column strip
            pltpu.VMEM((Dy * Dx * F, Hc * Wc), jnp.float32),  # window bank
        ],
    )(patches, w_all)

    x1_out = x1_k.reshape(1, F, 1, Hout, Wout)     # == PyTorch x1 (contiguous reshape)
    x2_out = x2_k.reshape(1, F, F, Dy, Dx)         # == PyTorch x2 (contiguous reshape)
    return x1_out, x2_out


def _reference(x, x_prev, wt, wn, num_rfs):
    """Pure JAX/NumPy reference mirroring the PyTorch forward."""
    dn = ('NCDHW', 'OIDHW', 'NCDHW')

    def branch(inp):
        xt = jax.lax.conv_general_dilated(inp, wt, (1, 1, 1), 'VALID',
                                          dimension_numbers=dn, precision=_HI)
        xt = jnp.maximum(xt, 0.0) / 2
        last = inp[:, :, -1:, :, :]
        xn = jax.lax.conv_general_dilated(last, wn, (1, 1, 1), 'VALID',
                                          dimension_numbers=dn, precision=_HI)
        xn = jnp.maximum(xn, 0.0)
        xc = jnp.concatenate([xt, xn], axis=1)
        return xc / (jnp.sum(xc, axis=1, keepdims=True) + EPS)

    x1 = branch(x)
    x1p = branch(x_prev)
    F = wt.shape[0] + wn.shape[0]
    corr_x = num_rfs * wt.shape[3]
    corr_y = num_rfs * wt.shape[4]
    y_max, x_max = x1.shape[3], x1.shape[4]
    Hc, Wc = y_max - 2 * corr_y, x_max - 2 * corr_x
    a = np.asarray(x1[0, :, 0, corr_y:y_max - corr_y, corr_x:x_max - corr_x])
    b = np.asarray(x1p[0, :, 0, :, :])
    x2 = np.zeros((F, F, 2 * corr_y + 1, 2 * corr_x + 1), np.float32)
    for i in range(F):
        for j in range(F):
            for dy in range(2 * corr_y + 1):
                for dx in range(2 * corr_x + 1):
                    x2[i, j, dy, dx] = np.sum(a[i] * b[j, dy:dy + Hc, dx:dx + Wc])
    x2 = x2 / ((y_max - 2 * corr_y) * (x_max - 2 * corr_y))
    return np.asarray(x1), x2[None]


if __name__ == "__main__":
    key = jax.random.PRNGKey(0)
    k1, k2, k3, k4 = jax.random.split(key, 4)

    # small shapes consistent with the module's forward (batch must be 1)
    C, T, H, W = 1, 2, 18, 18
    Ft, Fnt, KH, KW = 3, 2, 3, 3
    num_rfs = 1

    # deterministic filters, already in the permuted (F, C, kT, kH, kW) layout
    filts_temp = jax.random.normal(k1, (Ft, C, T, KH, KW), jnp.float32)
    filts_notemp = jax.random.normal(k2, (Fnt, C, 1, KH, KW), jnp.float32)

    x = jax.random.normal(k3, (1, C, T, H, W), jnp.float32)
    x_prev = jax.random.normal(k4, (1, C, T, H, W), jnp.float32)

    fwd = jax.jit(net_forward, static_argnums=4)
    x1, x2 = fwd(x, x_prev, filts_temp, filts_notemp, num_rfs)
    jax.block_until_ready((x1, x2))

    x1_ref, x2_ref = _reference(x, x_prev, filts_temp, filts_notemp, num_rfs)
    assert np.allclose(np.asarray(x1), x1_ref, rtol=1e-4, atol=1e-4), "x1 mismatch"
    assert np.allclose(np.asarray(x2), x2_ref, rtol=1e-4, atol=1e-4), "x2 mismatch"

    print("KERNEL_OK")
</pallas_src>

<mosaic_0001>
module attributes {stable_mosaic.version = 11 : i64} {
  func.func @_fused_kernel(%arg0: memref<2x18x256xf32, #tpu.memory_space<vmem>>, %arg1: memref<5x18xf32, #tpu.memory_space<vmem>>, %arg2: memref<5x256xf32, #tpu.memory_space<vmem>>, %arg3: memref<5x245xf32, #tpu.memory_space<vmem>>, %arg4: memref<5x256xf32, #tpu.memory_space<vmem>>, %arg5: memref<5x100xf32, #tpu.memory_space<vmem>>, %arg6: memref<5x160xf32, #tpu.memory_space<vmem>>, %arg7: memref<245x100xf32, #tpu.memory_space<vmem>>) attributes {dimension_semantics = [], scalar_prefetch = 0 : i64, scratch_operands = 4 : i64, tpu.core_type = #tpu.core_type<tc>} {
    %c0 = arith.constant 0 : index
    %c0_0 = arith.constant 0 : index
    %0 = vector.load %arg1[%c0, %c0_0] : memref<5x18xf32, #tpu.memory_space<vmem>>, vector<5x18xf32>
    %1 = tpu.iota {dimensions = array<i32: 0>} : vector<5x1xi32>
    %c3_i32 = arith.constant 3 : i32
    %2 = vector.broadcast %c3_i32 : i32 to vector<5x1xi32>
    %3 = arith.cmpi slt, %1, %2 : vector<5x1xi32>
    %cst = arith.constant 5.000000e-01 : f32
    %cst_1 = arith.constant 1.000000e+00 : f32
    %4 = vector.broadcast %cst : f32 to vector<5x1xf32>
    %5 = vector.broadcast %cst_1 : f32 to vector<5x1xf32>
    %6 = arith.select %3, %4, %5 : vector<5x1xi1>, vector<5x1xf32>
    %c0_2 = arith.constant 0 : index
    %c0_3 = arith.constant 0 : index
    %c0_4 = arith.constant 0 : index
    %7 = vector.load %arg0[%c0_2, %c0_3, %c0_4] : memref<2x18x256xf32, #tpu.memory_space<vmem>>, vector<1x18x256xf32>
    %8 = vector.shape_cast %7 : vector<1x18x256xf32> to vector<18x256xf32>
    %cst_5 = arith.constant dense<0.000000e+00> : vector<5x256xf32>
    %9 = tpu.matmul %0, %8, %cst_5 {dimension_numbers = #tpu.dot_dimension_numbers<[1], [0], [0], [1], [0, 0, 1, 1], [], []>, precision = #tpu.contract_precision<fp32>} : vector<5x18xf32>, vector<18x256xf32>, vector<5x256xf32> -> vector<5x256xf32>
    %cst_6 = arith.constant 0.000000e+00 : f32
    %10 = vector.broadcast %cst_6 : f32 to vector<5x256xf32>
    %11 = arith.maximumf %9, %10 : vector<5x256xf32>
    %12 = vector.broadcast %6 : vector<5x1xf32> to vector<5x256xf32>
    %13 = arith.mulf %11, %12 : vector<5x256xf32>
    %cst_7 = arith.constant dense<0.000000e+00> : vector<256xf32>
    %14 = vector.multi_reduction <add>, %13, %cst_7 [0] : vector<5x256xf32> to vector<256xf32>
    %15 = vector.shape_cast %14 : vector<256xf32> to vector<1x256xf32>
    %cst_8 = arith.constant 2.22044605E-16 : f32
    %16 = vector.broadcast %cst_8 : f32 to vector<1x256xf32>
    %17 = arith.addf %15, %16 : vector<1x256xf32>
    %18 = vector.broadcast %17 : vector<1x256xf32> to vector<5x256xf32>
    %19 = arith.divf %13, %18 : vector<5x256xf32>
    %c0_9 = arith.constant 0 : index
    %c0_10 = arith.constant 0 : index
    %20 = vector.load %arg2[%c0_9, %c0_10] : memref<5x256xf32, #tpu.memory_space<vmem>>, vector<5x256xf32>
    tpu.vector_store %arg2[%c0_9, %c0_10], %19 {strides = array<i32>} : memref<5x256xf32, #tpu.memory_space<vmem>>, vector<5x256xf32>,
    %c1 = arith.constant 1 : index
    %c0_11 = arith.constant 0 : index
    %c0_12 = arith.constant 0 : index
    %21 = vector.load %arg0[%c1, %c0_11, %c0_12] : memref<2x18x256xf32, #tpu.memory_space<vmem>>, vector<1x18x256xf32>
    %22 = vector.shape_cast %21 : vector<1x18x256xf32> to vector<18x256xf32>
    %cst_13 = arith.constant dense<0.000000e+00> : vector<5x256xf32>
    %23 = tpu.matmul %0, %22, %cst_13 {dimension_numbers = #tpu.dot_dimension_numbers<[1], [0], [0], [1], [0, 0, 1, 1], [], []>, precision = #tpu.contract_precision<fp32>} : vector<5x18xf32>, vector<18x256xf32>, vector<5x256xf32> -> vector<5x256xf32>
    %cst_14 = arith.constant 0.000000e+00 : f32
    %24 = vector.broadcast %cst_14 : f32 to vector<5x256xf32>
    %25 = arith.maximumf %23, %24 : vector<5x256xf32>
    %26 = vector.broadcast %6 : vector<5x1xf32> to vector<5x256xf32>
    %27 = arith.mulf %25, %26 : vector<5x256xf32>
    %cst_15 = arith.constant dense<0.000000e+00> : vector<256xf32>
    %28 = vector.multi_reduction <add>, %27, %cst_15 [0] : vector<5x256xf32> to vector<256xf32>
    %29 = vector.shape_cast %28 : vector<256xf32> to vector<1x256xf32>
    %cst_16 = arith.constant 2.22044605E-16 : f32
    %30 = vector.broadcast %cst_16 : f32 to vector<1x256xf32>
    %31 = arith.addf %29, %30 : vector<1x256xf32>
    %32 = vector.broadcast %31 : vector<1x256xf32> to vector<5x256xf32>
    %33 = arith.divf %27, %32 : vector<5x256xf32>
    %c0_17 = arith.constant 0 : index
    %c0_18 = arith.constant 0 : index
    %34 = vector.load %arg4[%c0_17, %c0_18] : memref<5x256xf32, #tpu.memory_space<vmem>>, vector<5x256xf32>
    tpu.vector_store %arg4[%c0_17, %c0_18], %33 {strides = array<i32>} : memref<5x256xf32, #tpu.memory_space<vmem>>, vector<5x256xf32>,
    %c0_19 = arith.constant 0 : index
    %c51 = arith.constant 51 : index
    %35 = vector.load %arg2[%c0_19, %c51] : memref<5x256xf32, #tpu.memory_space<vmem>>, vector<5x10xf32>
    %c0_20 = arith.constant 0 : index
    %c0_21 = arith.constant 0 : index
    %36 = vector.load %arg5[%c0_20, %c0_21] : memref<5x100xf32, #tpu.memory_space<vmem>>, vector<5x10xf32>
    tpu.vector_store %arg5[%c0_20, %c0_21], %35 {strides = array<i32>} : memref<5x100xf32, #tpu.memory_space<vmem>>, vector<5x10xf32>,
    %c0_22 = arith.constant 0 : index
    %c67 = arith.constant 67 : index
    %37 = vector.load %arg2[%c0_22, %c67] : memref<5x256xf32, #tpu.memory_space<vmem>>, vector<5x10xf32>
    %c0_23 = arith.constant 0 : index
    %c10 = arith.constant 10 : index
    %38 = vector.load %arg5[%c0_23, %c10] : memref<5x100xf32, #tpu.memory_space<vmem>>, vector<5x10xf32>
    tpu.vector_store %arg5[%c0_23, %c10], %37 {strides = array<i32>} : memref<5x100xf32, #tpu.memory_space<vmem>>, vector<5x10xf32>,
    %c0_24 = arith.constant 0 : index
    %c83 = arith.constant 83 : index
    %39 = vector.load %arg2[%c0_24, %c83] : memref<5x256xf32, #tpu.memory_space<vmem>>, vector<5x10xf32>
    %c0_25 = arith.constant 0 : index
    %c20 = arith.constant 20 : index
    %40 = vector.load %arg5[%c0_25, %c20] : memref<5x100xf32, #tpu.memory_space<vmem>>, vector<5x10xf32>
    tpu.vector_store %arg5[%c0_25, %c20], %39 {strides = array<i32>} : memref<5x100xf32, #tpu.memory_space<vmem>>, vector<5x10xf32>,
    %c0_26 = arith.constant 0 : index
    %c99 = arith.constant 99 : index
    %41 = vector.load %arg2[%c0_26, %c99] : memref<5x256xf32, #tpu.memory_space<vmem>>, vector<5x10xf32>
    %c0_27 = arith.constant 0 : index
    %c30 = arith.constant 30 : index
    %42 = vector.load %arg5[%c0_27, %c30] : memref<5x100xf32, #tpu.memory_space<vmem>>, vector<5x10xf32>
    tpu.vector_store %arg5[%c0_27, %c30], %41 {strides = array<i32>} : memref<5x100xf32, #tpu.memory_space<vmem>>, vector<5x10xf32>,
    %c0_28 = arith.constant 0 : index
    %c115 = arith.constant 115 : index
    %43 = vector.load %arg2[%c0_28, %c115] : memref<5x256xf32, #tpu.memory_space<vmem>>, vector<5x10xf32>
    %c0_29 = arith.constant 0 : index
    %c40 = arith.constant 40 : index
    %44 = vector.load %arg5[%c0_29, %c40] : memref<5x100xf32, #tpu.memory_space<vmem>>, vector<5x10xf32>
    tpu.vector_store %arg5[%c0_29, %c40], %43 {strides = array<i32>} : memref<5x100xf32, #tpu.memory_space<vmem>>, vector<5x10xf32>,
    %c0_30 = arith.constant 0 : index
    %c131 = arith.constant 131 : index
    %45 = vector.load %arg2[%c0_30, %c131] : memref<5x256xf32, #tpu.memory_space<vmem>>, vector<5x10xf32>
    %c0_31 = arith.constant 0 : index
    %c50 = arith.constant 50 : index
    %46 = vector.load %arg5[%c0_31, %c50] : memref<5x100xf32, #tpu.memory_space<vmem>>, vector<5x10xf32>
    tpu.vector_store %arg5[%c0_31, %c50], %45 {strides = array<i32>} : memref<5x100xf32, #tpu.memory_space<vmem>>, vector<5x10xf32>,
    %c0_32 = arith.constant 0 : index
    %c147 = arith.constant 147 : index
    %47 = vector.load %arg2[%c0_32, %c147] : memref<5x256xf32, #tpu.memory_space<vmem>>, vector<5x10xf32>
    %c0_33 = arith.constant 0 : index
    %c60 = arith.constant 60 : index
    %48 = vector.load %arg5[%c0_33, %c60] : memref<5x100xf32, #tpu.memory_space<vmem>>, vector<5x10xf32>
    tpu.vector_store %arg5[%c0_33, %c60], %47 {strides = array<i32>} : memref<5x100xf32, #tpu.memory_space<vmem>>, vector<5x10xf32>,
    %c0_34 = arith.constant 0 : index
    %c163 = arith.constant 163 : index
    %49 = vector.load %arg2[%c0_34, %c163] : memref<5x256xf32, #tpu.memory_space<vmem>>, vector<5x10xf32>
    %c0_35 = arith.constant 0 : index
    %c70 = arith.constant 70 : index
    %50 = vector.load %arg5[%c0_35, %c70] : memref<5x100xf32, #tpu.memory_space<vmem>>, vector<5x10xf32>
    tpu.vector_store %arg5[%c0_35, %c70], %49 {strides = array<i32>} : memref<5x100xf32, #tpu.memory_space<vmem>>, vector<5x10xf32>,
    %c0_36 = arith.constant 0 : index
    %c179 = arith.constant 179 : index
    %51 = vector.load %arg2[%c0_36, %c179] : memref<5x256xf32, #tpu.memory_space<vmem>>, vector<5x10xf32>
    %c0_37 = arith.constant 0 : index
    %c80 = arith.constant 80 : index
    %52 = vector.load %arg5[%c0_37, %c80] : memref<5x100xf32, #tpu.memory_space<vmem>>, vector<5x10xf32>
    tpu.vector_store %arg5[%c0_37, %c80], %51 {strides = array<i32>} : memref<5x100xf32, #tpu.memory_space<vmem>>, vector<5x10xf32>,
    %c0_38 = arith.constant 0 : index
    %c195 = arith.constant 195 : index
    %53 = vector.load %arg2[%c0_38, %c195] : memref<5x256xf32, #tpu.memory_space<vmem>>, vector<5x10xf32>
    %c0_39 = arith.constant 0 : index
    %c90 = arith.constant 90 : index
    %54 = vector.load %arg5[%c0_39, %c90] : memref<5x100xf32, #tpu.memory_space<vmem>>, vector<5x10xf32>
    tpu.vector_store %arg5[%c0_39, %c90], %53 {strides = array<i32>} : memref<5x100xf32, #tpu.memory_space<vmem>>, vector<5x10xf32>,
    %c0_40 = arith.constant 0 : index
    %c0_41 = arith.constant 0 : index
    %55 = vector.load %arg4[%c0_40, %c0_41] : memref<5x256xf32, #tpu.memory_space<vmem>>, vector<5x10xf32>
    %c0_42 = arith.constant 0 : index
    %c0_43 = arith.constant 0 : index
    %56 = vector.load %arg6[%c0_42, %c0_43] : memref<5x160xf32, #tpu.memory_space<vmem>>, vector<5x10xf32>
    tpu.vector_store %arg6[%c0_42, %c0_43], %55 {strides = array<i32>} : memref<5x160xf32, #tpu.memory_space<vmem>>, vector<5x10xf32>,
    %c0_44 = arith.constant 0 : index
    %c16 = arith.constant 16 : index
    %57 = vector.load %arg4[%c0_44, %c16] : memref<5x256xf32, #tpu.memory_space<vmem>>, vector<5x10xf32>
    %c0_45 = arith.constant 0 : index
    %c10_46 = arith.constant 10 : index
    %58 = vector.load %arg6[%c0_45, %c10_46] : memref<5x160xf32, #tpu.memory_space<vmem>>, vector<5x10xf32>
    tpu.vector_store %arg6[%c0_45, %c10_46], %57 {strides = array<i32>} : memref<5x160xf32, #tpu.memory_space<vmem>>, vector<5x10xf32>,
    %c0_47 = arith.constant 0 : index
    %c32 = arith.constant 32 : index
    %59 = vector.load %arg4[%c0_47, %c32] : memref<5x256xf32, #tpu.memory_space<vmem>>, vector<5x10xf32>
    %c0_48 = arith.constant 0 : index
    %c20_49 = arith.constant 20 : index
    %60 = vector.load %arg6[%c0_48, %c20_49] : memref<5x160xf32, #tpu.memory_space<vmem>>, vector<5x10xf32>
    tpu.vector_store %arg6[%c0_48, %c20_49], %59 {strides = array<i32>} : memref<5x160xf32, #tpu.memory_space<vmem>>, vector<5x10xf32>,
    %c0_50 = arith.constant 0 : index
    %c48 = arith.constant 48 : index
    %61 = vector.load %arg4[%c0_50, %c48] : memref<5x256xf32, #tpu.memory_space<vmem>>, vector<5x10xf32>
    %c0_51 = arith.constant 0 : index
    %c30_52 = arith.constant 30 : index
    %62 = vector.load %arg6[%c0_51, %c30_52] : memref<5x160xf32, #tpu.memory_space<vmem>>, vector<5x10xf32>
    tpu.vector_store %arg6[%c0_51, %c30_52], %61 {strides = array<i32>} : memref<5x160xf32, #tpu.memory_space<vmem>>, vector<5x10xf32>,
    %c0_53 = arith.constant 0 : index
    %c64 = arith.constant 64 : index
    %63 = vector.load %arg4[%c0_53, %c64] : memref<5x256xf32, #tpu.memory_space<vmem>>, vector<5x10xf32>
    %c0_54 = arith.constant 0 : index
    %c40_55 = arith.constant 40 : index
    %64 = vector.load %arg6[%c0_54, %c40_55] : memref<5x160xf32, #tpu.memory_space<vmem>>, vector<5x10xf32>
    tpu.vector_store %arg6[%c0_54, %c40_55], %63 {strides = array<i32>} : memref<5x160xf32, #tpu.memory_space<vmem>>, vector<5x10xf32>,
    %c0_56 = arith.constant 0 : index
    %c80_57 = arith.constant 80 : index
    %65 = vector.load %arg4[%c0_56, %c80_57] : memref<5x256xf32, #tpu.memory_space<vmem>>, vector<5x10xf32>
    %c0_58 = arith.constant 0 : index
    %c50_59 = arith.constant 50 : index
    %66 = vector.load %arg6[%c0_58, %c50_59] : memref<5x160xf32, #tpu.memory_space<vmem>>, vector<5x10xf32>
    tpu.vector_store %arg6[%c0_58, %c50_59], %65 {strides = array<i32>} : memref<5x160xf32, #tpu.memory_space<vmem>>, vector<5x10xf32>,
    %c0_60 = arith.constant 0 : index
    %c96 = arith.constant 96 : index
    %67 = vector.load %arg4[%c0_60, %c96] : memref<5x256xf32, #tpu.memory_space<vmem>>, vector<5x10xf32>
    %c0_61 = arith.constant 0 : index
    %c60_62 = arith.constant 60 : index
    %68 = vector.load %arg6[%c0_61, %c60_62] : memref<5x160xf32, #tpu.memory_space<vmem>>, vector<5x10xf32>
    tpu.vector_store %arg6[%c0_61, %c60_62], %67 {strides = array<i32>} : memref<5x160xf32, #tpu.memory_space<vmem>>, vector<5x10xf32>,
    %c0_63 = arith.constant 0 : index
    %c112 = arith.constant 112 : index
    %69 = vector.load %arg4[%c0_63, %c112] : memref<5x256xf32, #tpu.memory_space<vmem>>, vector<5x10xf32>
    %c0_64 = arith.constant 0 : index
    %c70_65 = arith.constant 70 : index
    %70 = vector.load %arg6[%c0_64, %c70_65] : memref<5x160xf32, #tpu.memory_space<vmem>>, vector<5x10xf32>
    tpu.vector_store %arg6[%c0_64, %c70_65], %69 {strides = array<i32>} : memref<5x160xf32, #tpu.memory_space<vmem>>, vector<5x10xf32>,
    %c0_66 = arith.constant 0 : index
    %c128 = arith.constant 128 : index
    %71 = vector.load %arg4[%c0_66, %c128] : memref<5x256xf32, #tpu.memory_space<vmem>>, vector<5x10xf32>
    %c0_67 = arith.constant 0 : index
    %c80_68 = arith.constant 80 : index
    %72 = vector.load %arg6[%c0_67, %c80_68] : memref<5x160xf32, #tpu.memory_space<vmem>>, vector<5x10xf32>
    tpu.vector_store %arg6[%c0_67, %c80_68], %71 {strides = array<i32>} : memref<5x160xf32, #tpu.memory_space<vmem>>, vector<5x10xf32>,
    %c0_69 = arith.constant 0 : index
    %c144 = arith.constant 144 : index
    %73 = vector.load %arg4[%c0_69, %c144] : memref<5x256xf32, #tpu.memory_space<vmem>>, vector<5x10xf32>
    %c0_70 = arith.constant 0 : index
    %c90_71 = arith.constant 90 : index
    %74 = vector.load %arg6[%c0_70, %c90_71] : memref<5x160xf32, #tpu.memory_space<vmem>>, vector<5x10xf32>
    tpu.vector_store %arg6[%c0_70, %c90_71], %73 {strides = array<i32>} : memref<5x160xf32, #tpu.memory_space<vmem>>, vector<5x10xf32>,
    %c0_72 = arith.constant 0 : index
    %c160 = arith.constant 160 : index
    %75 = vector.load %arg4[%c0_72, %c160] : memref<5x256xf32, #tpu.memory_space<vmem>>, vector<5x10xf32>
    %c0_73 = arith.constant 0 : index
    %c100 = arith.constant 100 : index
    %76 = vector.load %arg6[%c0_73, %c100] : memref<5x160xf32, #tpu.memory_space<vmem>>, vector<5x10xf32>
    tpu.vector_store %arg6[%c0_73, %c100], %75 {strides = array<i32>} : memref<5x160xf32, #tpu.memory_space<vmem>>, vector<5x10xf32>,
    %c0_74 = arith.constant 0 : index
    %c176 = arith.constant 176 : index
    %77 = vector.load %arg4[%c0_74, %c176] : memref<5x256xf32, #tpu.memory_space<vmem>>, vector<5x10xf32>
    %c0_75 = arith.constant 0 : index
    %c110 = arith.constant 110 : index
    %78 = vector.load %arg6[%c0_75, %c110] : memref<5x160xf32, #tpu.memory_space<vmem>>, vector<5x10xf32>
    tpu.vector_store %arg6[%c0_75, %c110], %77 {strides = array<i32>} : memref<5x160xf32, #tpu.memory_space<vmem>>, vector<5x10xf32>,
    %c0_76 = arith.constant 0 : index
    %c192 = arith.constant 192 : index
    %79 = vector.load %arg4[%c0_76, %c192] : memref<5x256xf32, #tpu.memory_space<vmem>>, vector<5x10xf32>
    %c0_77 = arith.constant 0 : index
    %c120 = arith.constant 120 : index
    %80 = vector.load %arg6[%c0_77, %c120] : memref<5x160xf32, #tpu.memory_space<vmem>>, vector<5x10xf32>
    tpu.vector_store %arg6[%c0_77, %c120], %79 {strides = array<i32>} : memref<5x160xf32, #tpu.memory_space<vmem>>, vector<5x10xf32>,
    %c0_78 = arith.constant 0 : index
    %c208 = arith.constant 208 : index
    %81 = vector.load %arg4[%c0_78, %c208] : memref<5x256xf32, #tpu.memory_space<vmem>>, vector<5x10xf32>
    %c0_79 = arith.constant 0 : index
    %c130 = arith.constant 130 : index
    %82 = vector.load %arg6[%c0_79, %c130] : memref<5x160xf32, #tpu.memory_space<vmem>>, vector<5x10xf32>
    tpu.vector_store %arg6[%c0_79, %c130], %81 {strides = array<i32>} : memref<5x160xf32, #tpu.memory_space<vmem>>, vector<5x10xf32>,
    %c0_80 = arith.constant 0 : index
    %c224 = arith.constant 224 : index
    %83 = vector.load %arg4[%c0_80, %c224] : memref<5x256xf32, #tpu.memory_space<vmem>>, vector<5x10xf32>
    %c0_81 = arith.constant 0 : index
    %c140 = arith.constant 140 : index
    %84 = vector.load %arg6[%c0_81, %c140] : memref<5x160xf32, #tpu.memory_space<vmem>>, vector<5x10xf32>
    tpu.vector_store %arg6[%c0_81, %c140], %83 {strides = array<i32>} : memref<5x160xf32, #tpu.memory_space<vmem>>, vector<5x10xf32>,
    %c0_82 = arith.constant 0 : index
    %c240 = arith.constant 240 : index
    %85 = vector.load %arg4[%c0_82, %c240] : memref<5x256xf32, #tpu.memory_space<vmem>>, vector<5x10xf32>
    %c0_83 = arith.constant 0 : index
    %c150 = arith.constant 150 : index
    %86 = vector.load %arg6[%c0_83, %c150] : memref<5x160xf32, #tpu.memory_space<vmem>>, vector<5x10xf32>
    tpu.vector_store %arg6[%c0_83, %c150], %85 {strides = array<i32>} : memref<5x160xf32, #tpu.memory_space<vmem>>, vector<5x10xf32>,
    %c0_84 = arith.constant 0 : index
    %c0_85 = arith.constant 0 : index
    %87 = vector.load %arg6[%c0_84, %c0_85] : memref<5x160xf32, #tpu.memory_space<vmem>>, vector<5x100xf32>
    %c0_86 = arith.constant 0 : index
    %c0_87 = arith.constant 0 : index
    %88 = vector.load %arg7[%c0_86, %c0_87] : memref<245x100xf32, #tpu.memory_space<vmem>>, vector<5x100xf32>
    tpu.vector_store %arg7[%c0_86, %c0_87], %87 {strides = array<i32>} : memref<245x100xf32, #tpu.memory_space<vmem>>, vector<5x100xf32>,
    %c0_88 = arith.constant 0 : index
    %c10_89 = arith.constant 10 : index
    %89 = vector.load %arg6[%c0_88, %c10_89] : memref<5x160xf32, #tpu.memory_space<vmem>>, vector<5x100xf32>
    %c35 = arith.constant 35 : index
    %c0_90 = arith.constant 0 : index
    %90 = vector.load %arg7[%c35, %c0_90] : memref<245x100xf32, #tpu.memory_space<vmem>>, vector<5x100xf32>
    tpu.vector_store %arg7[%c35, %c0_90], %89 {strides = array<i32>} : memref<245x100xf32, #tpu.memory_space<vmem>>, vector<5x100xf32>,
    %c0_91 = arith.constant 0 : index
    %c20_92 = arith.constant 20 : index
    %91 = vector.load %arg6[%c0_91, %c20_92] : memref<5x160xf32, #tpu.memory_space<vmem>>, vector<5x100xf32>
    %c70_93 = arith.constant 70 : index
    %c0_94 = arith.constant 0 : index
    %92 = vector.load %arg7[%c70_93, %c0_94] : memref<245x100xf32, #tpu.memory_space<vmem>>, vector<5x100xf32>
    tpu.vector_store %arg7[%c70_93, %c0_94], %91 {strides = array<i32>} : memref<245x100xf32, #tpu.memory_space<vmem>>, vector<5x100xf32>,
    %c0_95 = arith.constant 0 : index
    %c30_96 = arith.constant 30 : index
    %93 = vector.load %arg6[%c0_95, %c30_96] : memref<5x160xf32, #tpu.memory_space<vmem>>, vector<5x100xf32>
    %c105 = arith.constant 105 : index
    %c0_97 = arith.constant 0 : index
    %94 = vector.load %arg7[%c105, %c0_97] : memref<245x100xf32, #tpu.memory_space<vmem>>, vector<5x100xf32>
    tpu.vector_store %arg7[%c105, %c0_97], %93 {strides = array<i32>} : memref<245x100xf32, #tpu.memory_space<vmem>>, vector<5x100xf32>,
    %c0_98 = arith.constant 0 : index
    %c40_99 = arith.constant 40 : index
    %95 = vector.load %arg6[%c0_98, %c40_99] : memref<5x160xf32, #tpu.memory_space<vmem>>, vector<5x100xf32>
    %c140_100 = arith.constant 140 : index
    %c0_101 = arith.constant 0 : index
    %96 = vector.load %arg7[%c140_100, %c0_101] : memref<245x100xf32, #tpu.memory_space<vmem>>, vector<5x100xf32>
    tpu.vector_store %arg7[%c140_100, %c0_101], %95 {strides = array<i32>} : memref<245x100xf32, #tpu.memory_space<vmem>>, vector<5x100xf32>,
    %c0_102 = arith.constant 0 : index
    %c50_103 = arith.constant 50 : index
    %97 = vector.load %arg6[%c0_102, %c50_103] : memref<5x160xf32, #tpu.memory_space<vmem>>, vector<5x100xf32>
    %c175 = arith.constant 175 : index
    %c0_104 = arith.constant 0 : index
    %98 = vector.load %arg7[%c175, %c0_104] : memref<245x100xf32, #tpu.memory_space<vmem>>, vector<5x100xf32>
    tpu.vector_store %arg7[%c175, %c0_104], %97 {strides = array<i32>} : memref<245x100xf32, #tpu.memory_space<vmem>>, vector<5x100xf32>,
    %c0_105 = arith.constant 0 : index
    %c60_106 = arith.constant 60 : index
    %99 = vector.load %arg6[%c0_105, %c60_106] : memref<5x160xf32, #tpu.memory_space<vmem>>, vector<5x100xf32>
    %c210 = arith.constant 210 : index
    %c0_107 = arith.constant 0 : index
    %100 = vector.load %arg7[%c210, %c0_107] : memref<245x100xf32, #tpu.memory_space<vmem>>, vector<5x100xf32>
    tpu.vector_store %arg7[%c210, %c0_107], %99 {strides = array<i32>} : memref<245x100xf32, #tpu.memory_space<vmem>>, vector<5x100xf32>,
    %c0_108 = arith.constant 0 : index
    %c1_109 = arith.constant 1 : index
    %101 = vector.load %arg4[%c0_108, %c1_109] : memref<5x256xf32, #tpu.memory_space<vmem>>, vector<5x10xf32>
    %c0_110 = arith.constant 0 : index
    %c0_111 = arith.constant 0 : index
    %102 = vector.load %arg6[%c0_110, %c0_111] : memref<5x160xf32, #tpu.memory_space<vmem>>, vector<5x10xf32>
    tpu.vector_store %arg6[%c0_110, %c0_111], %101 {strides = array<i32>} : memref<5x160xf32, #tpu.memory_space<vmem>>, vector<5x10xf32>,
    %c0_112 = arith.constant 0 : index
    %c17 = arith.constant 17 : index
    %103 = vector.load %arg4[%c0_112, %c17] : memref<5x256xf32, #tpu.memory_space<vmem>>, vector<5x10xf32>
    %c0_113 = arith.constant 0 : index
    %c10_114 = arith.constant 10 : index
    %104 = vector.load %arg6[%c0_113, %c10_114] : memref<5x160xf32, #tpu.memory_space<vmem>>, vector<5x10xf32>
    tpu.vector_store %arg6[%c0_113, %c10_114], %103 {strides = array<i32>} : memref<5x160xf32, #tpu.memory_space<vmem>>, vector<5x10xf32>,
    %c0_115 = arith.constant 0 : index
    %c33 = arith.constant 33 : index
    %105 = vector.load %arg4[%c0_115, %c33] : memref<5x256xf32, #tpu.memory_space<vmem>>, vector<5x10xf32>
    %c0_116 = arith.constant 0 : index
    %c20_117 = arith.constant 20 : index
    %106 = vector.load %arg6[%c0_116, %c20_117] : memref<5x160xf32, #tpu.memory_space<vmem>>, vector<5x10xf32>
    tpu.vector_store %arg6[%c0_116, %c20_117], %105 {strides = array<i32>} : memref<5x160xf32, #tpu.memory_space<vmem>>, vector<5x10xf32>,
    %c0_118 = arith.constant 0 : index
    %c49 = arith.constant 49 : index
    %107 = vector.load %arg4[%c0_118, %c49] : memref<5x256xf32, #tpu.memory_space<vmem>>, vector<5x10xf32>
    %c0_119 = arith.constant 0 : index
    %c30_120 = arith.constant 30 : index
    %108 = vector.load %arg6[%c0_119, %c30_120] : memref<5x160xf32, #tpu.memory_space<vmem>>, vector<5x10xf32>
    tpu.vector_store %arg6[%c0_119, %c30_120], %107 {strides = array<i32>} : memref<5x160xf32, #tpu.memory_space<vmem>>, vector<5x10xf32>,
    %c0_121 = arith.constant 0 : index
    %c65 = arith.constant 65 : index
    %109 = vector.load %arg4[%c0_121, %c65] : memref<5x256xf32, #tpu.memory_space<vmem>>, vector<5x10xf32>
    %c0_122 = arith.constant 0 : index
    %c40_123 = arith.constant 40 : index
    %110 = vector.load %arg6[%c0_122, %c40_123] : memref<5x160xf32, #tpu.memory_space<vmem>>, vector<5x10xf32>
    tpu.vector_store %arg6[%c0_122, %c40_123], %109 {strides = array<i32>} : memref<5x160xf32, #tpu.memory_space<vmem>>, vector<5x10xf32>,
    %c0_124 = arith.constant 0 : index
    %c81 = arith.constant 81 : index
    %111 = vector.load %arg4[%c0_124, %c81] : memref<5x256xf32, #tpu.memory_space<vmem>>, vector<5x10xf32>
    %c0_125 = arith.constant 0 : index
    %c50_126 = arith.constant 50 : index
    %112 = vector.load %arg6[%c0_125, %c50_126] : memref<5x160xf32, #tpu.memory_space<vmem>>, vector<5x10xf32>
    tpu.vector_store %arg6[%c0_125, %c50_126], %111 {strides = array<i32>} : memref<5x160xf32, #tpu.memory_space<vmem>>, vector<5x10xf32>,
    %c0_127 = arith.constant 0 : index
    %c97 = arith.constant 97 : index
    %113 = vector.load %arg4[%c0_127, %c97] : memref<5x256xf32, #tpu.memory_space<vmem>>, vector<5x10xf32>
    %c0_128 = arith.constant 0 : index
    %c60_129 = arith.constant 60 : index
    %114 = vector.load %arg6[%c0_128, %c60_129] : memref<5x160xf32, #tpu.memory_space<vmem>>, vector<5x10xf32>
    tpu.vector_store %arg6[%c0_128, %c60_129], %113 {strides = array<i32>} : memref<5x160xf32, #tpu.memory_space<vmem>>, vector<5x10xf32>,
    %c0_130 = arith.constant 0 : index
    %c113 = arith.constant 113 : index
    %115 = vector.load %arg4[%c0_130, %c113] : memref<5x256xf32, #tpu.memory_space<vmem>>, vector<5x10xf32>
    %c0_131 = arith.constant 0 : index
    %c70_132 = arith.constant 70 : index
    %116 = vector.load %arg6[%c0_131, %c70_132] : memref<5x160xf32, #tpu.memory_space<vmem>>, vector<5x10xf32>
    tpu.vector_store %arg6[%c0_131, %c70_132], %115 {strides = array<i32>} : memref<5x160xf32, #tpu.memory_space<vmem>>, vector<5x10xf32>,
    %c0_133 = arith.constant 0 : index
    %c129 = arith.constant 129 : index
    %117 = vector.load %arg4[%c0_133, %c129] : memref<5x256xf32, #tpu.memory_space<vmem>>, vector<5x10xf32>
    %c0_134 = arith.constant 0 : index
    %c80_135 = arith.constant 80 : index
    %118 = vector.load %arg6[%c0_134, %c80_135] : memref<5x160xf32, #tpu.memory_space<vmem>>, vector<5x10xf32>
    tpu.vector_store %arg6[%c0_134, %c80_135], %117 {strides = array<i32>} : memref<5x160xf32, #tpu.memory_space<vmem>>, vector<5x10xf32>,
    %c0_136 = arith.constant 0 : index
    %c145 = arith.constant 145 : index
    %119 = vector.load %arg4[%c0_136, %c145] : memref<5x256xf32, #tpu.memory_space<vmem>>, vector<5x10xf32>
    %c0_137 = arith.constant 0 : index
    %c90_138 = arith.constant 90 : index
    %120 = vector.load %arg6[%c0_137, %c90_138] : memref<5x160xf32, #tpu.memory_space<vmem>>, vector<5x10xf32>
    tpu.vector_store %arg6[%c0_137, %c90_138], %119 {strides = array<i32>} : memref<5x160xf32, #tpu.memory_space<vmem>>, vector<5x10xf32>,
    %c0_139 = arith.constant 0 : index
    %c161 = arith.constant 161 : index
    %121 = vector.load %arg4[%c0_139, %c161] : memref<5x256xf32, #tpu.memory_space<vmem>>, vector<5x10xf32>
    %c0_140 = arith.constant 0 : index
    %c100_141 = arith.constant 100 : index
    %122 = vector.load %arg6[%c0_140, %c100_141] : memref<5x160xf32, #tpu.memory_space<vmem>>, vector<5x10xf32>
    tpu.vector_store %arg6[%c0_140, %c100_141], %121 {strides = array<i32>} : memref<5x160xf32, #tpu.memory_space<vmem>>, vector<5x10xf32>,
    %c0_142 = arith.constant 0 : index
    %c177 = arith.constant 177 : index
    %123 = vector.load %arg4[%c0_142, %c177] : memref<5x256xf32, #tpu.memory_space<vmem>>, vector<5x10xf32>
    %c0_143 = arith.constant 0 : index
    %c110_144 = arith.constant 110 : index
    %124 = vector.load %arg6[%c0_143, %c110_144] : memref<5x160xf32, #tpu.memory_space<vmem>>, vector<5x10xf32>
    tpu.vector_store %arg6[%c0_143, %c110_144], %123 {strides = array<i32>} : memref<5x160xf32, #tpu.memory_space<vmem>>, vector<5x10xf32>,
    %c0_145 = arith.constant 0 : index
    %c193 = arith.constant 193 : index
    %125 = vector.load %arg4[%c0_145, %c193] : memref<5x256xf32, #tpu.memory_space<vmem>>, vector<5x10xf32>
    %c0_146 = arith.constant 0 : index
    %c120_147 = arith.constant 120 : index
    %126 = vector.load %arg6[%c0_146, %c120_147] : memref<5x160xf32, #tpu.memory_space<vmem>>, vector<5x10xf32>
    tpu.vector_store %arg6[%c0_146, %c120_147], %125 {strides = array<i32>} : memref<5x160xf32, #tpu.memory_space<vmem>>, vector<5x10xf32>,
    %c0_148 = arith.constant 0 : index
    %c209 = arith.constant 209 : index
    %127 = vector.load %arg4[%c0_148, %c209] : memref<5x256xf32, #tpu.memory_space<vmem>>, vector<5x10xf32>
    %c0_149 = arith.constant 0 : index
    %c130_150 = arith.constant 130 : index
    %128 = vector.load %arg6[%c0_149, %c130_150] : memref<5x160xf32, #tpu.memory_space<vmem>>, vector<5x10xf32>
    tpu.vector_store %arg6[%c0_149, %c130_150], %127 {strides = array<i32>} : memref<5x160xf32, #tpu.memory_space<vmem>>, vector<5x10xf32>,
    %c0_151 = arith.constant 0 : index
    %c225 = arith.constant 225 : index
    %129 = vector.load %arg4[%c0_151, %c225] : memref<5x256xf32, #tpu.memory_space<vmem>>, vector<5x10xf32>
    %c0_152 = arith.constant 0 : index
    %c140_153 = arith.constant 140 : index
    %130 = vector.load %arg6[%c0_152, %c140_153] : memref<5x160xf32, #tpu.memory_space<vmem>>, vector<5x10xf32>
    tpu.vector_store %arg6[%c0_152, %c140_153], %129 {strides = array<i32>} : memref<5x160xf32, #tpu.memory_space<vmem>>, vector<5x10xf32>,
    %c0_154 = arith.constant 0 : index
    %c241 = arith.constant 241 : index
    %131 = vector.load %arg4[%c0_154, %c241] : memref<5x256xf32, #tpu.memory_space<vmem>>, vector<5x10xf32>
    %c0_155 = arith.constant 0 : index
    %c150_156 = arith.constant 150 : index
    %132 = vector.load %arg6[%c0_155, %c150_156] : memref<5x160xf32, #tpu.memory_space<vmem>>, vector<5x10xf32>
    tpu.vector_store %arg6[%c0_155, %c150_156], %131 {strides = array<i32>} : memref<5x160xf32, #tpu.memory_space<vmem>>, vector<5x10xf32>,
    %c0_157 = arith.constant 0 : index
    %c0_158 = arith.constant 0 : index
    %133 = vector.load %arg6[%c0_157, %c0_158] : memref<5x160xf32, #tpu.memory_space<vmem>>, vector<5x100xf32>
    %c5 = arith.constant 5 : index
    %c0_159 = arith.constant 0 : index
    %134 = vector.load %arg7[%c5, %c0_159] : memref<245x100xf32, #tpu.memory_space<vmem>>, vector<5x100xf32>
    tpu.vector_store %arg7[%c5, %c0_159], %133 {strides = array<i32>} : memref<245x100xf32, #tpu.memory_space<vmem>>, vector<5x100xf32>,
    %c0_160 = arith.constant 0 : index
    %c10_161 = arith.constant 10 : index
    %135 = vector.load %arg6[%c0_160, %c10_161] : memref<5x160xf32, #tpu.memory_space<vmem>>, vector<5x100xf32>
    %c40_162 = arith.constant 40 : index
    %c0_163 = arith.constant 0 : index
    %136 = vector.load %arg7[%c40_162, %c0_163] : memref<245x100xf32, #tpu.memory_space<vmem>>, vector<5x100xf32>
    tpu.vector_store %arg7[%c40_162, %c0_163], %135 {strides = array<i32>} : memref<245x100xf32, #tpu.memory_space<vmem>>, vector<5x100xf32>,
    %c0_164 = arith.constant 0 : index
    %c20_165 = arith.constant 20 : index
    %137 = vector.load %arg6[%c0_164, %c20_165] : memref<5x160xf32, #tpu.memory_space<vmem>>, vector<5x100xf32>
    %c75 = arith.constant 75 : index
    %c0_166 = arith.constant 0 : index
    %138 = vector.load %arg7[%c75, %c0_166] : memref<245x100xf32, #tpu.memory_space<vmem>>, vector<5x100xf32>
    tpu.vector_store %arg7[%c75, %c0_166], %137 {strides = array<i32>} : memref<245x100xf32, #tpu.memory_space<vmem>>, vector<5x100xf32>,
    %c0_167 = arith.constant 0 : index
    %c30_168 = arith.constant 30 : index
    %139 = vector.load %arg6[%c0_167, %c30_168] : memref<5x160xf32, #tpu.memory_space<vmem>>, vector<5x100xf32>
    %c110_169 = arith.constant 110 : index
    %c0_170 = arith.constant 0 : index
    %140 = vector.load %arg7[%c110_169, %c0_170] : memref<245x100xf32, #tpu.memory_space<vmem>>, vector<5x100xf32>
    tpu.vector_store %arg7[%c110_169, %c0_170], %139 {strides = array<i32>} : memref<245x100xf32, #tpu.memory_space<vmem>>, vector<5x100xf32>,
    %c0_171 = arith.constant 0 : index
    %c40_172 = arith.constant 40 : index
    %141 = vector.load %arg6[%c0_171, %c40_172] : memref<5x160xf32, #tpu.memory_space<vmem>>, vector<5x100xf32>
    %c145_173 = arith.constant 145 : index
    %c0_174 = arith.constant 0 : index
    %142 = vector.load %arg7[%c145_173, %c0_174] : memref<245x100xf32, #tpu.memory_space<vmem>>, vector<5x100xf32>
    tpu.vector_store %arg7[%c145_173, %c0_174], %141 {strides = array<i32>} : memref<245x100xf32, #tpu.memory_space<vmem>>, vector<5x100xf32>,
    %c0_175 = arith.constant 0 : index
    %c50_176 = arith.constant 50 : index
    %143 = vector.load %arg6[%c0_175, %c50_176] : memref<5x160xf32, #tpu.memory_space<vmem>>, vector<5x100xf32>
    %c180 = arith.constant 180 : index
    %c0_177 = arith.constant 0 : index
    %144 = vector.load %arg7[%c180, %c0_177] : memref<245x100xf32, #tpu.memory_space<vmem>>, vector<5x100xf32>
    tpu.vector_store %arg7[%c180, %c0_177], %143 {strides = array<i32>} : memref<245x100xf32, #tpu.memory_space<vmem>>, vector<5x100xf32>,
    %c0_178 = arith.constant 0 : index
    %c60_179 = arith.constant 60 : index
    %145 = vector.load %arg6[%c0_178, %c60_179] : memref<5x160xf32, #tpu.memory_space<vmem>>, vector<5x100xf32>
    %c215 = arith.constant 215 : index
    %c0_180 = arith.constant 0 : index
    %146 = vector.load %arg7[%c215, %c0_180] : memref<245x100xf32, #tpu.memory_space<vmem>>, vector<5x100xf32>
    tpu.vector_store %arg7[%c215, %c0_180], %145 {strides = array<i32>} : memref<245x100xf32, #tpu.memory_space<vmem>>, vector<5x100xf32>,
    %c0_181 = arith.constant 0 : index
    %c2 = arith.constant 2 : index
    %147 = vector.load %arg4[%c0_181, %c2] : memref<5x256xf32, #tpu.memory_space<vmem>>, vector<5x10xf32>
    %c0_182 = arith.constant 0 : index
    %c0_183 = arith.constant 0 : index
    %148 = vector.load %arg6[%c0_182, %c0_183] : memref<5x160xf32, #tpu.memory_space<vmem>>, vector<5x10xf32>
    tpu.vector_store %arg6[%c0_182, %c0_183], %147 {strides = array<i32>} : memref<5x160xf32, #tpu.memory_space<vmem>>, vector<5x10xf32>,
    %c0_184 = arith.constant 0 : index
    %c18 = arith.constant 18 : index
    %149 = vector.load %arg4[%c0_184, %c18] : memref<5x256xf32, #tpu.memory_space<vmem>>, vector<5x10xf32>
    %c0_185 = arith.constant 0 : index
    %c10_186 = arith.constant 10 : index
    %150 = vector.load %arg6[%c0_185, %c10_186] : memref<5x160xf32, #tpu.memory_space<vmem>>, vector<5x10xf32>
    tpu.vector_store %arg6[%c0_185, %c10_186], %149 {strides = array<i32>} : memref<5x160xf32, #tpu.memory_space<vmem>>, vector<5x10xf32>,
    %c0_187 = arith.constant 0 : index
    %c34 = arith.constant 34 : index
    %151 = vector.load %arg4[%c0_187, %c34] : memref<5x256xf32, #tpu.memory_space<vmem>>, vector<5x10xf32>
    %c0_188 = arith.constant 0 : index
    %c20_189 = arith.constant 20 : index
    %152 = vector.load %arg6[%c0_188, %c20_189] : memref<5x160xf32, #tpu.memory_space<vmem>>, vector<5x10xf32>
    tpu.vector_store %arg6[%c0_188, %c20_189], %151 {strides = array<i32>} : memref<5x160xf32, #tpu.memory_space<vmem>>, vector<5x10xf32>,
    %c0_190 = arith.constant 0 : index
    %c50_191 = arith.constant 50 : index
    %153 = vector.load %arg4[%c0_190, %c50_191] : memref<5x256xf32, #tpu.memory_space<vmem>>, vector<5x10xf32>
    %c0_192 = arith.constant 0 : index
    %c30_193 = arith.constant 30 : index
    %154 = vector.load %arg6[%c0_192, %c30_193] : memref<5x160xf32, #tpu.memory_space<vmem>>, vector<5x10xf32>
    tpu.vector_store %arg6[%c0_192, %c30_193], %153 {strides = array<i32>} : memref<5x160xf32, #tpu.memory_space<vmem>>, vector<5x10xf32>,
    %c0_194 = arith.constant 0 : index
    %c66 = arith.constant 66 : index
    %155 = vector.load %arg4[%c0_194, %c66] : memref<5x256xf32, #tpu.memory_space<vmem>>, vector<5x10xf32>
    %c0_195 = arith.constant 0 : index
    %c40_196 = arith.constant 40 : index
    %156 = vector.load %arg6[%c0_195, %c40_196] : memref<5x160xf32, #tpu.memory_space<vmem>>, vector<5x10xf32>
    tpu.vector_store %arg6[%c0_195, %c40_196], %155 {strides = array<i32>} : memref<5x160xf32, #tpu.memory_space<vmem>>, vector<5x10xf32>,
    %c0_197 = arith.constant 0 : index
    %c82 = arith.constant 82 : index
    %157 = vector.load %arg4[%c0_197, %c82] : memref<5x256xf32, #tpu.memory_space<vmem>>, vector<5x10xf32>
    %c0_198 = arith.constant 0 : index
    %c50_199 = arith.constant 50 : index
    %158 = vector.load %arg6[%c0_198, %c50_199] : memref<5x160xf32, #tpu.memory_space<vmem>>, vector<5x10xf32>
    tpu.vector_store %arg6[%c0_198, %c50_199], %157 {strides = array<i32>} : memref<5x160xf32, #tpu.memory_space<vmem>>, vector<5x10xf32>,
    %c0_200 = arith.constant 0 : index
    %c98 = arith.constant 98 : index
    %159 = vector.load %arg4[%c0_200, %c98] : memref<5x256xf32, #tpu.memory_space<vmem>>, vector<5x10xf32>
    %c0_201 = arith.constant 0 : index
    %c60_202 = arith.constant 60 : index
    %160 = vector.load %arg6[%c0_201, %c60_202] : memref<5x160xf32, #tpu.memory_space<vmem>>, vector<5x10xf32>
    tpu.vector_store %arg6[%c0_201, %c60_202], %159 {strides = array<i32>} : memref<5x160xf32, #tpu.memory_space<vmem>>, vector<5x10xf32>,
    %c0_203 = arith.constant 0 : index
    %c114 = arith.constant 114 : index
    %161 = vector.load %arg4[%c0_203, %c114] : memref<5x256xf32, #tpu.memory_space<vmem>>, vector<5x10xf32>
    %c0_204 = arith.constant 0 : index
    %c70_205 = arith.constant 70 : index
    %162 = vector.load %arg6[%c0_204, %c70_205] : memref<5x160xf32, #tpu.memory_space<vmem>>, vector<5x10xf32>
    tpu.vector_store %arg6[%c0_204, %c70_205], %161 {strides = array<i32>} : memref<5x160xf32, #tpu.memory_space<vmem>>, vector<5x10xf32>,
    %c0_206 = arith.constant 0 : index
    %c130_207 = arith.constant 130 : index
    %163 = vector.load %arg4[%c0_206, %c130_207] : memref<5x256xf32, #tpu.memory_space<vmem>>, vector<5x10xf32>
    %c0_208 = arith.constant 0 : index
    %c80_209 = arith.constant 80 : index
    %164 = vector.load %arg6[%c0_208, %c80_209] : memref<5x160xf32, #tpu.memory_space<vmem>>, vector<5x10xf32>
    tpu.vector_store %arg6[%c0_208, %c80_209], %163 {strides = array<i32>} : memref<5x160xf32, #tpu.memory_space<vmem>>, vector<5x10xf32>,
    %c0_210 = arith.constant 0 : index
    %c146 = arith.constant 146 : index
    %165 = vector.load %arg4[%c0_210, %c146] : memref<5x256xf32, #tpu.memory_space<vmem>>, vector<5x10xf32>
    %c0_211 = arith.constant 0 : index
    %c90_212 = arith.constant 90 : index
    %166 = vector.load %arg6[%c0_211, %c90_212] : memref<5x160xf32, #tpu.memory_space<vmem>>, vector<5x10xf32>
    tpu.vector_store %arg6[%c0_211, %c90_212], %165 {strides = array<i32>} : memref<5x160xf32, #tpu.memory_space<vmem>>, vector<5x10xf32>,
    %c0_213 = arith.constant 0 : index
    %c162 = arith.constant 162 : index
    %167 = vector.load %arg4[%c0_213, %c162] : memref<5x256xf32, #tpu.memory_space<vmem>>, vector<5x10xf32>
    %c0_214 = arith.constant 0 : index
    %c100_215 = arith.constant 100 : index
    %168 = vector.load %arg6[%c0_214, %c100_215] : memref<5x160xf32, #tpu.memory_space<vmem>>, vector<5x10xf32>
    tpu.vector_store %arg6[%c0_214, %c100_215], %167 {strides = array<i32>} : memref<5x160xf32, #tpu.memory_space<vmem>>, vector<5x10xf32>,
    %c0_216 = arith.constant 0 : index
    %c178 = arith.constant 178 : index
    %169 = vector.load %arg4[%c0_216, %c178] : memref<5x256xf32, #tpu.memory_space<vmem>>, vector<5x10xf32>
    %c0_217 = arith.constant 0 : index
    %c110_218 = arith.constant 110 : index
    %170 = vector.load %arg6[%c0_217, %c110_218] : memref<5x160xf32, #tpu.memory_space<vmem>>, vector<5x10xf32>
    tpu.vector_store %arg6[%c0_217, %c110_218], %169 {strides = array<i32>} : memref<5x160xf32, #tpu.memory_space<vmem>>, vector<5x10xf32>,
    %c0_219 = arith.constant 0 : index
    %c194 = arith.constant 194 : index
    %171 = vector.load %arg4[%c0_219, %c194] : memref<5x256xf32, #tpu.memory_space<vmem>>, vector<5x10xf32>
    %c0_220 = arith.constant 0 : index
    %c120_221 = arith.constant 120 : index
    %172 = vector.load %arg6[%c0_220, %c120_221] : memref<5x160xf32, #tpu.memory_space<vmem>>, vector<5x10xf32>
    tpu.vector_store %arg6[%c0_220, %c120_221], %171 {strides = array<i32>} : memref<5x160xf32, #tpu.memory_space<vmem>>, vector<5x10xf32>,
    %c0_222 = arith.constant 0 : index
    %c210_223 = arith.constant 210 : index
    %173 = vector.load %arg4[%c0_222, %c210_223] : memref<5x256xf32, #tpu.memory_space<vmem>>, vector<5x10xf32>
    %c0_224 = arith.constant 0 : index
    %c130_225 = arith.constant 130 : index
    %174 = vector.load %arg6[%c0_224, %c130_225] : memref<5x160xf32, #tpu.memory_space<vmem>>, vector<5x10xf32>
    tpu.vector_store %arg6[%c0_224, %c130_225], %173 {strides = array<i32>} : memref<5x160xf32, #tpu.memory_space<vmem>>, vector<5x10xf32>,
    %c0_226 = arith.constant 0 : index
    %c226 = arith.constant 226 : index
    %175 = vector.load %arg4[%c0_226, %c226] : memref<5x256xf32, #tpu.memory_space<vmem>>, vector<5x10xf32>
    %c0_227 = arith.constant 0 : index
    %c140_228 = arith.constant 140 : index
    %176 = vector.load %arg6[%c0_227, %c140_228] : memref<5x160xf32, #tpu.memory_space<vmem>>, vector<5x10xf32>
    tpu.vector_store %arg6[%c0_227, %c140_228], %175 {strides = array<i32>} : memref<5x160xf32, #tpu.memory_space<vmem>>, vector<5x10xf32>,
    %c0_229 = arith.constant 0 : index
    %c242 = arith.constant 242 : index
    %177 = vector.load %arg4[%c0_229, %c242] : memref<5x256xf32, #tpu.memory_space<vmem>>, vector<5x10xf32>
    %c0_230 = arith.constant 0 : index
    %c150_231 = arith.constant 150 : index
    %178 = vector.load %arg6[%c0_230, %c150_231] : memref<5x160xf32, #tpu.memory_space<vmem>>, vector<5x10xf32>
    tpu.vector_store %arg6[%c0_230, %c150_231], %177 {strides = array<i32>} : memref<5x160xf32, #tpu.memory_space<vmem>>, vector<5x10xf32>,
    %c0_232 = arith.constant 0 : index
    %c0_233 = arith.constant 0 : index
    %179 = vector.load %arg6[%c0_232, %c0_233] : memref<5x160xf32, #tpu.memory_space<vmem>>, vector<5x100xf32>
    %c10_234 = arith.constant 10 : index
    %c0_235 = arith.constant 0 : index
    %180 = vector.load %arg7[%c10_234, %c0_235] : memref<245x100xf32, #tpu.memory_space<vmem>>, vector<5x100xf32>
    tpu.vector_store %arg7[%c10_234, %c0_235], %179 {strides = array<i32>} : memref<245x100xf32, #tpu.memory_space<vmem>>, vector<5x100xf32>,
    %c0_236 = arith.constant 0 : index
    %c10_237 = arith.constant 10 : index
    %181 = vector.load %arg6[%c0_236, %c10_237] : memref<5x160xf32, #tpu.memory_space<vmem>>, vector<5x100xf32>
    %c45 = arith.constant 45 : index
    %c0_238 = arith.constant 0 : index
    %182 = vector.load %arg7[%c45, %c0_238] : memref<245x100xf32, #tpu.memory_space<vmem>>, vector<5x100xf32>
    tpu.vector_store %arg7[%c45, %c0_238], %181 {strides = array<i32>} : memref<245x100xf32, #tpu.memory_space<vmem>>, vector<5x100xf32>,
    %c0_239 = arith.constant 0 : index
    %c20_240 = arith.constant 20 : index
    %183 = vector.load %arg6[%c0_239, %c20_240] : memref<5x160xf32, #tpu.memory_space<vmem>>, vector<5x100xf32>
    %c80_241 = arith.constant 80 : index
    %c0_242 = arith.constant 0 : index
    %184 = vector.load %arg7[%c80_241, %c0_242] : memref<245x100xf32, #tpu.memory_space<vmem>>, vector<5x100xf32>
    tpu.vector_store %arg7[%c80_241, %c0_242], %183 {strides = array<i32>} : memref<245x100xf32, #tpu.memory_space<vmem>>, vector<5x100xf32>,
    %c0_243 = arith.constant 0 : index
    %c30_244 = arith.constant 30 : index
    %185 = vector.load %arg6[%c0_243, %c30_244] : memref<5x160xf32, #tpu.memory_space<vmem>>, vector<5x100xf32>
    %c115_245 = arith.constant 115 : index
    %c0_246 = arith.constant 0 : index
    %186 = vector.load %arg7[%c115_245, %c0_246] : memref<245x100xf32, #tpu.memory_space<vmem>>, vector<5x100xf32>
    tpu.vector_store %arg7[%c115_245, %c0_246], %185 {strides = array<i32>} : memref<245x100xf32, #tpu.memory_space<vmem>>, vector<5x100xf32>,
    %c0_247 = arith.constant 0 : index
    %c40_248 = arith.constant 40 : index
    %187 = vector.load %arg6[%c0_247, %c40_248] : memref<5x160xf32, #tpu.memory_space<vmem>>, vector<5x100xf32>
    %c150_249 = arith.constant 150 : index
    %c0_250 = arith.constant 0 : index
    %188 = vector.load %arg7[%c150_249, %c0_250] : memref<245x100xf32, #tpu.memory_space<vmem>>, vector<5x100xf32>
    tpu.vector_store %arg7[%c150_249, %c0_250], %187 {strides = array<i32>} : memref<245x100xf32, #tpu.memory_space<vmem>>, vector<5x100xf32>,
    %c0_251 = arith.constant 0 : index
    %c50_252 = arith.constant 50 : index
    %189 = vector.load %arg6[%c0_251, %c50_252] : memref<5x160xf32, #tpu.memory_space<vmem>>, vector<5x100xf32>
    %c185 = arith.constant 185 : index
    %c0_253 = arith.constant 0 : index
    %190 = vector.load %arg7[%c185, %c0_253] : memref<245x100xf32, #tpu.memory_space<vmem>>, vector<5x100xf32>
    tpu.vector_store %arg7[%c185, %c0_253], %189 {strides = array<i32>} : memref<245x100xf32, #tpu.memory_space<vmem>>, vector<5x100xf32>,
    %c0_254 = arith.constant 0 : index
    %c60_255 = arith.constant 60 : index
    %191 = vector.load %arg6[%c0_254, %c60_255] : memref<5x160xf32, #tpu.memory_space<vmem>>, vector<5x100xf32>
    %c220 = arith.constant 220 : index
    %c0_256 = arith.constant 0 : index
    %192 = vector.load %arg7[%c220, %c0_256] : memref<245x100xf32, #tpu.memory_space<vmem>>, vector<5x100xf32>
    tpu.vector_store %arg7[%c220, %c0_256], %191 {strides = array<i32>} : memref<245x100xf32, #tpu.memory_space<vmem>>, vector<5x100xf32>,
    %c0_257 = arith.constant 0 : index
    %c3 = arith.constant 3 : index
    %193 = vector.load %arg4[%c0_257, %c3] : memref<5x256xf32, #tpu.memory_space<vmem>>, vector<5x10xf32>
    %c0_258 = arith.constant 0 : index
    %c0_259 = arith.constant 0 : index
    %194 = vector.load %arg6[%c0_258, %c0_259] : memref<5x160xf32, #tpu.memory_space<vmem>>, vector<5x10xf32>
    tpu.vector_store %arg6[%c0_258, %c0_259], %193 {strides = array<i32>} : memref<5x160xf32, #tpu.memory_space<vmem>>, vector<5x10xf32>,
    %c0_260 = arith.constant 0 : index
    %c19 = arith.constant 19 : index
    %195 = vector.load %arg4[%c0_260, %c19] : memref<5x256xf32, #tpu.memory_space<vmem>>, vector<5x10xf32>
    %c0_261 = arith.constant 0 : index
    %c10_262 = arith.constant 10 : index
    %196 = vector.load %arg6[%c0_261, %c10_262] : memref<5x160xf32, #tpu.memory_space<vmem>>, vector<5x10xf32>
    tpu.vector_store %arg6[%c0_261, %c10_262], %195 {strides = array<i32>} : memref<5x160xf32, #tpu.memory_space<vmem>>, vector<5x10xf32>,
    %c0_263 = arith.constant 0 : index
    %c35_264 = arith.constant 35 : index
    %197 = vector.load %arg4[%c0_263, %c35_264] : memref<5x256xf32, #tpu.memory_space<vmem>>, vector<5x10xf32>
    %c0_265 = arith.constant 0 : index
    %c20_266 = arith.constant 20 : index
    %198 = vector.load %arg6[%c0_265, %c20_266] : memref<5x160xf32, #tpu.memory_space<vmem>>, vector<5x10xf32>
    tpu.vector_store %arg6[%c0_265, %c20_266], %197 {strides = array<i32>} : memref<5x160xf32, #tpu.memory_space<vmem>>, vector<5x10xf32>,
    %c0_267 = arith.constant 0 : index
    %c51_268 = arith.constant 51 : index
    %199 = vector.load %arg4[%c0_267, %c51_268] : memref<5x256xf32, #tpu.memory_space<vmem>>, vector<5x10xf32>
    %c0_269 = arith.constant 0 : index
    %c30_270 = arith.constant 30 : index
    %200 = vector.load %arg6[%c0_269, %c30_270] : memref<5x160xf32, #tpu.memory_space<vmem>>, vector<5x10xf32>
    tpu.vector_store %arg6[%c0_269, %c30_270], %199 {strides = array<i32>} : memref<5x160xf32, #tpu.memory_space<vmem>>, vector<5x10xf32>,
    %c0_271 = arith.constant 0 : index
    %c67_272 = arith.constant 67 : index
    %201 = vector.load %arg4[%c0_271, %c67_272] : memref<5x256xf32, #tpu.memory_space<vmem>>, vector<5x10xf32>
    %c0_273 = arith.constant 0 : index
    %c40_274 = arith.constant 40 : index
    %202 = vector.load %arg6[%c0_273, %c40_274] : memref<5x160xf32, #tpu.memory_space<vmem>>, vector<5x10xf32>
    tpu.vector_store %arg6[%c0_273, %c40_274], %201 {strides = array<i32>} : memref<5x160xf32, #tpu.memory_space<vmem>>, vector<5x10xf32>,
    %c0_275 = arith.constant 0 : index
    %c83_276 = arith.constant 83 : index
    %203 = vector.load %arg4[%c0_275, %c83_276] : memref<5x256xf32, #tpu.memory_space<vmem>>, vector<5x10xf32>
    %c0_277 = arith.constant 0 : index
    %c50_278 = arith.constant 50 : index
    %204 = vector.load %arg6[%c0_277, %c50_278] : memref<5x160xf32, #tpu.memory_space<vmem>>, vector<5x10xf32>
    tpu.vector_store %arg6[%c0_277, %c50_278], %203 {strides = array<i32>} : memref<5x160xf32, #tpu.memory_space<vmem>>, vector<5x10xf32>,
    %c0_279 = arith.constant 0 : index
    %c99_280 = arith.constant 99 : index
    %205 = vector.load %arg4[%c0_279, %c99_280] : memref<5x256xf32, #tpu.memory_space<vmem>>, vector<5x10xf32>
    %c0_281 = arith.constant 0 : index
    %c60_282 = arith.constant 60 : index
    %206 = vector.load %arg6[%c0_281, %c60_282] : memref<5x160xf32, #tpu.memory_space<vmem>>, vector<5x10xf32>
    tpu.vector_store %arg6[%c0_281, %c60_282], %205 {strides = array<i32>} : memref<5x160xf32, #tpu.memory_space<vmem>>, vector<5x10xf32>,
    %c0_283 = arith.constant 0 : index
    %c115_284 = arith.constant 115 : index
    %207 = vector.load %arg4[%c0_283, %c115_284] : memref<5x256xf32, #tpu.memory_space<vmem>>, vector<5x10xf32>
    %c0_285 = arith.constant 0 : index
    %c70_286 = arith.constant 70 : index
    %208 = vector.load %arg6[%c0_285, %c70_286] : memref<5x160xf32, #tpu.memory_space<vmem>>, vector<5x10xf32>
    tpu.vector_store %arg6[%c0_285, %c70_286], %207 {strides = array<i32>} : memref<5x160xf32, #tpu.memory_space<vmem>>, vector<5x10xf32>,
    %c0_287 = arith.constant 0 : index
    %c131_288 = arith.constant 131 : index
    %209 = vector.load %arg4[%c0_287, %c131_288] : memref<5x256xf32, #tpu.memory_space<vmem>>, vector<5x10xf32>
    %c0_289 = arith.constant 0 : index
    %c80_290 = arith.constant 80 : index
    %210 = vector.load %arg6[%c0_289, %c80_290] : memref<5x160xf32, #tpu.memory_space<vmem>>, vector<5x10xf32>
    tpu.vector_store %arg6[%c0_289, %c80_290], %209 {strides = array<i32>} : memref<5x160xf32, #tpu.memory_space<vmem>>, vector<5x10xf32>,
    %c0_291 = arith.constant 0 : index
    %c147_292 = arith.constant 147 : index
    %211 = vector.load %arg4[%c0_291, %c147_292] : memref<5x256xf32, #tpu.memory_space<vmem>>, vector<5x10xf32>
    %c0_293 = arith.constant 0 : index
    %c90_294 = arith.constant 90 : index
    %212 = vector.load %arg6[%c0_293, %c90_294] : memref<5x160xf32, #tpu.memory_space<vmem>>, vector<5x10xf32>
    tpu.vector_store %arg6[%c0_293, %c90_294], %211 {strides = array<i32>} : memref<5x160xf32, #tpu.memory_space<vmem>>, vector<5x10xf32>,
    %c0_295 = arith.constant 0 : index
    %c163_296 = arith.constant 163 : index
    %213 = vector.load %arg4[%c0_295, %c163_296] : memref<5x256xf32, #tpu.memory_space<vmem>>, vector<5x10xf32>
    %c0_297 = arith.constant 0 : index
    %c100_298 = arith.constant 100 : index
    %214 = vector.load %arg6[%c0_297, %c100_298] : memref<5x160xf32, #tpu.memory_space<vmem>>, vector<5x10xf32>
    tpu.vector_store %arg6[%c0_297, %c100_298], %213 {strides = array<i32>} : memref<5x160xf32, #tpu.memory_space<vmem>>, vector<5x10xf32>,
    %c0_299 = arith.constant 0 : index
    %c179_300 = arith.constant 179 : index
    %215 = vector.load %arg4[%c0_299, %c179_300] : memref<5x256xf32, #tpu.memory_space<vmem>>, vector<5x10xf32>
    %c0_301 = arith.constant 0 : index
    %c110_302 = arith.constant 110 : index
    %216 = vector.load %arg6[%c0_301, %c110_302] : memref<5x160xf32, #tpu.memory_space<vmem>>, vector<5x10xf32>
    tpu.vector_store %arg6[%c0_301, %c110_302], %215 {strides = array<i32>} : memref<5x160xf32, #tpu.memory_space<vmem>>, vector<5x10xf32>,
    %c0_303 = arith.constant 0 : index
    %c195_304 = arith.constant 195 : index
    %217 = vector.load %arg4[%c0_303, %c195_304] : memref<5x256xf32, #tpu.memory_space<vmem>>, vector<5x10xf32>
    %c0_305 = arith.constant 0 : index
    %c120_306 = arith.constant 120 : index
    %218 = vector.load %arg6[%c0_305, %c120_306] : memref<5x160xf32, #tpu.memory_space<vmem>>, vector<5x10xf32>
    tpu.vector_store %arg6[%c0_305, %c120_306], %217 {strides = array<i32>} : memref<5x160xf32, #tpu.memory_space<vmem>>, vector<5x10xf32>,
    %c0_307 = arith.constant 0 : index
    %c211 = arith.constant 211 : index
    %219 = vector.load %arg4[%c0_307, %c211] : memref<5x256xf32, #tpu.memory_space<vmem>>, vector<5x10xf32>
    %c0_308 = arith.constant 0 : index
    %c130_309 = arith.constant 130 : index
    %220 = vector.load %arg6[%c0_308, %c130_309] : memref<5x160xf32, #tpu.memory_space<vmem>>, vector<5x10xf32>
    tpu.vector_store %arg6[%c0_308, %c130_309], %219 {strides = array<i32>} : memref<5x160xf32, #tpu.memory_space<vmem>>, vector<5x10xf32>,
    %c0_310 = arith.constant 0 : index
    %c227 = arith.constant 227 : index
    %221 = vector.load %arg4[%c0_310, %c227] : memref<5x256xf32, #tpu.memory_space<vmem>>, vector<5x10xf32>
    %c0_311 = arith.constant 0 : index
    %c140_312 = arith.constant 140 : index
    %222 = vector.load %arg6[%c0_311, %c140_312] : memref<5x160xf32, #tpu.memory_space<vmem>>, vector<5x10xf32>
    tpu.vector_store %arg6[%c0_311, %c140_312], %221 {strides = array<i32>} : memref<5x160xf32, #tpu.memory_space<vmem>>, vector<5x10xf32>,
    %c0_313 = arith.constant 0 : index
    %c243 = arith.constant 243 : index
    %223 = vector.load %arg4[%c0_313, %c243] : memref<5x256xf32, #tpu.memory_space<vmem>>, vector<5x10xf32>
    %c0_314 = arith.constant 0 : index
    %c150_315 = arith.constant 150 : index
    %224 = vector.load %arg6[%c0_314, %c150_315] : memref<5x160xf32, #tpu.memory_space<vmem>>, vector<5x10xf32>
    tpu.vector_store %arg6[%c0_314, %c150_315], %223 {strides = array<i32>} : memref<5x160xf32, #tpu.memory_space<vmem>>, vector<5x10xf32>,
    %c0_316 = arith.constant 0 : index
    %c0_317 = arith.constant 0 : index
    %225 = vector.load %arg6[%c0_316, %c0_317] : memref<5x160xf32, #tpu.memory_space<vmem>>, vector<5x100xf32>
    %c15 = arith.constant 15 : index
    %c0_318 = arith.constant 0 : index
    %226 = vector.load %arg7[%c15, %c0_318] : memref<245x100xf32, #tpu.memory_space<vmem>>, vector<5x100xf32>
    tpu.vector_store %arg7[%c15, %c0_318], %225 {strides = array<i32>} : memref<245x100xf32, #tpu.memory_space<vmem>>, vector<5x100xf32>,
    %c0_319 = arith.constant 0 : index
    %c10_320 = arith.constant 10 : index
    %227 = vector.load %arg6[%c0_319, %c10_320] : memref<5x160xf32, #tpu.memory_space<vmem>>, vector<5x100xf32>
    %c50_321 = arith.constant 50 : index
    %c0_322 = arith.constant 0 : index
    %228 = vector.load %arg7[%c50_321, %c0_322] : memref<245x100xf32, #tpu.memory_space<vmem>>, vector<5x100xf32>
    tpu.vector_store %arg7[%c50_321, %c0_322], %227 {strides = array<i32>} : memref<245x100xf32, #tpu.memory_space<vmem>>, vector<5x100xf32>,
    %c0_323 = arith.constant 0 : index
    %c20_324 = arith.constant 20 : index
    %229 = vector.load %arg6[%c0_323, %c20_324] : memref<5x160xf32, #tpu.memory_space<vmem>>, vector<5x100xf32>
    %c85 = arith.constant 85 : index
    %c0_325 = arith.constant 0 : index
    %230 = vector.load %arg7[%c85, %c0_325] : memref<245x100xf32, #tpu.memory_space<vmem>>, vector<5x100xf32>
    tpu.vector_store %arg7[%c85, %c0_325], %229 {strides = array<i32>} : memref<245x100xf32, #tpu.memory_space<vmem>>, vector<5x100xf32>,
    %c0_326 = arith.constant 0 : index
    %c30_327 = arith.constant 30 : index
    %231 = vector.load %arg6[%c0_326, %c30_327] : memref<5x160xf32, #tpu.memory_space<vmem>>, vector<5x100xf32>
    %c120_328 = arith.constant 120 : index
    %c0_329 = arith.constant 0 : index
    %232 = vector.load %arg7[%c120_328, %c0_329] : memref<245x100xf32, #tpu.memory_space<vmem>>, vector<5x100xf32>
    tpu.vector_store %arg7[%c120_328, %c0_329], %231 {strides = array<i32>} : memref<245x100xf32, #tpu.memory_space<vmem>>, vector<5x100xf32>,
    %c0_330 = arith.constant 0 : index
    %c40_331 = arith.constant 40 : index
    %233 = vector.load %arg6[%c0_330, %c40_331] : memref<5x160xf32, #tpu.memory_space<vmem>>, vector<5x100xf32>
    %c155 = arith.constant 155 : index
    %c0_332 = arith.constant 0 : index
    %234 = vector.load %arg7[%c155, %c0_332] : memref<245x100xf32, #tpu.memory_space<vmem>>, vector<5x100xf32>
    tpu.vector_store %arg7[%c155, %c0_332], %233 {strides = array<i32>} : memref<245x100xf32, #tpu.memory_space<vmem>>, vector<5x100xf32>,
    %c0_333 = arith.constant 0 : index
    %c50_334 = arith.constant 50 : index
    %235 = vector.load %arg6[%c0_333, %c50_334] : memref<5x160xf32, #tpu.memory_space<vmem>>, vector<5x100xf32>
    %c190 = arith.constant 190 : index
    %c0_335 = arith.constant 0 : index
    %236 = vector.load %arg7[%c190, %c0_335] : memref<245x100xf32, #tpu.memory_space<vmem>>, vector<5x100xf32>
    tpu.vector_store %arg7[%c190, %c0_335], %235 {strides = array<i32>} : memref<245x100xf32, #tpu.memory_space<vmem>>, vector<5x100xf32>,
    %c0_336 = arith.constant 0 : index
    %c60_337 = arith.constant 60 : index
    %237 = vector.load %arg6[%c0_336, %c60_337] : memref<5x160xf32, #tpu.memory_space<vmem>>, vector<5x100xf32>
    %c225_338 = arith.constant 225 : index
    %c0_339 = arith.constant 0 : index
    %238 = vector.load %arg7[%c225_338, %c0_339] : memref<245x100xf32, #tpu.memory_space<vmem>>, vector<5x100xf32>
    tpu.vector_store %arg7[%c225_338, %c0_339], %237 {strides = array<i32>} : memref<245x100xf32, #tpu.memory_space<vmem>>, vector<5x100xf32>,
    %c0_340 = arith.constant 0 : index
    %c4 = arith.constant 4 : index
    %239 = vector.load %arg4[%c0_340, %c4] : memref<5x256xf32, #tpu.memory_space<vmem>>, vector<5x10xf32>
    %c0_341 = arith.constant 0 : index
    %c0_342 = arith.constant 0 : index
    %240 = vector.load %arg6[%c0_341, %c0_342] : memref<5x160xf32, #tpu.memory_space<vmem>>, vector<5x10xf32>
    tpu.vector_store %arg6[%c0_341, %c0_342], %239 {strides = array<i32>} : memref<5x160xf32, #tpu.memory_space<vmem>>, vector<5x10xf32>,
    %c0_343 = arith.constant 0 : index
    %c20_344 = arith.constant 20 : index
    %241 = vector.load %arg4[%c0_343, %c20_344] : memref<5x256xf32, #tpu.memory_space<vmem>>, vector<5x10xf32>
    %c0_345 = arith.constant 0 : index
    %c10_346 = arith.constant 10 : index
    %242 = vector.load %arg6[%c0_345, %c10_346] : memref<5x160xf32, #tpu.memory_space<vmem>>, vector<5x10xf32>
    tpu.vector_store %arg6[%c0_345, %c10_346], %241 {strides = array<i32>} : memref<5x160xf32, #tpu.memory_space<vmem>>, vector<5x10xf32>,
    %c0_347 = arith.constant 0 : index
    %c36 = arith.constant 36 : index
    %243 = vector.load %arg4[%c0_347, %c36] : memref<5x256xf32, #tpu.memory_space<vmem>>, vector<5x10xf32>
    %c0_348 = arith.constant 0 : index
    %c20_349 = arith.constant 20 : index
    %244 = vector.load %arg6[%c0_348, %c20_349] : memref<5x160xf32, #tpu.memory_space<vmem>>, vector<5x10xf32>
    tpu.vector_store %arg6[%c0_348, %c20_349], %243 {strides = array<i32>} : memref<5x160xf32, #tpu.memory_space<vmem>>, vector<5x10xf32>,
    %c0_350 = arith.constant 0 : index
    %c52 = arith.constant 52 : index
    %245 = vector.load %arg4[%c0_350, %c52] : memref<5x256xf32, #tpu.memory_space<vmem>>, vector<5x10xf32>
    %c0_351 = arith.constant 0 : index
    %c30_352 = arith.constant 30 : index
    %246 = vector.load %arg6[%c0_351, %c30_352] : memref<5x160xf32, #tpu.memory_space<vmem>>, vector<5x10xf32>
    tpu.vector_store %arg6[%c0_351, %c30_352], %245 {strides = array<i32>} : memref<5x160xf32, #tpu.memory_space<vmem>>, vector<5x10xf32>,
    %c0_353 = arith.constant 0 : index
    %c68 = arith.constant 68 : index
    %247 = vector.load %arg4[%c0_353, %c68] : memref<5x256xf32, #tpu.memory_space<vmem>>, vector<5x10xf32>
    %c0_354 = arith.constant 0 : index
    %c40_355 = arith.constant 40 : index
    %248 = vector.load %arg6[%c0_354, %c40_355] : memref<5x160xf32, #tpu.memory_space<vmem>>, vector<5x10xf32>
    tpu.vector_store %arg6[%c0_354, %c40_355], %247 {strides = array<i32>} : memref<5x160xf32, #tpu.memory_space<vmem>>, vector<5x10xf32>,
    %c0_356 = arith.constant 0 : index
    %c84 = arith.constant 84 : index
    %249 = vector.load %arg4[%c0_356, %c84] : memref<5x256xf32, #tpu.memory_space<vmem>>, vector<5x10xf32>
    %c0_357 = arith.constant 0 : index
    %c50_358 = arith.constant 50 : index
    %250 = vector.load %arg6[%c0_357, %c50_358] : memref<5x160xf32, #tpu.memory_space<vmem>>, vector<5x10xf32>
    tpu.vector_store %arg6[%c0_357, %c50_358], %249 {strides = array<i32>} : memref<5x160xf32, #tpu.memory_space<vmem>>, vector<5x10xf32>,
    %c0_359 = arith.constant 0 : index
    %c100_360 = arith.constant 100 : index
    %251 = vector.load %arg4[%c0_359, %c100_360] : memref<5x256xf32, #tpu.memory_space<vmem>>, vector<5x10xf32>
    %c0_361 = arith.constant 0 : index
    %c60_362 = arith.constant 60 : index
    %252 = vector.load %arg6[%c0_361, %c60_362] : memref<5x160xf32, #tpu.memory_space<vmem>>, vector<5x10xf32>
    tpu.vector_store %arg6[%c0_361, %c60_362], %251 {strides = array<i32>} : memref<5x160xf32, #tpu.memory_space<vmem>>, vector<5x10xf32>,
    %c0_363 = arith.constant 0 : index
    %c116 = arith.constant 116 : index
    %253 = vector.load %arg4[%c0_363, %c116] : memref<5x256xf32, #tpu.memory_space<vmem>>, vector<5x10xf32>
    %c0_364 = arith.constant 0 : index
    %c70_365 = arith.constant 70 : index
    %254 = vector.load %arg6[%c0_364, %c70_365] : memref<5x160xf32, #tpu.memory_space<vmem>>, vector<5x10xf32>
    tpu.vector_store %arg6[%c0_364, %c70_365], %253 {strides = array<i32>} : memref<5x160xf32, #tpu.memory_space<vmem>>, vector<5x10xf32>,
    %c0_366 = arith.constant 0 : index
    %c132 = arith.constant 132 : index
    %255 = vector.load %arg4[%c0_366, %c132] : memref<5x256xf32, #tpu.memory_space<vmem>>, vector<5x10xf32>
    %c0_367 = arith.constant 0 : index
    %c80_368 = arith.constant 80 : index
    %256 = vector.load %arg6[%c0_367, %c80_368] : memref<5x160xf32, #tpu.memory_space<vmem>>, vector<5x10xf32>
    tpu.vector_store %arg6[%c0_367, %c80_368], %255 {strides = array<i32>} : memref<5x160xf32, #tpu.memory_space<vmem>>, vector<5x10xf32>,
    %c0_369 = arith.constant 0 : index
    %c148 = arith.constant 148 : index
    %257 = vector.load %arg4[%c0_369, %c148] : memref<5x256xf32, #tpu.memory_space<vmem>>, vector<5x10xf32>
    %c0_370 = arith.constant 0 : index
    %c90_371 = arith.constant 90 : index
    %258 = vector.load %arg6[%c0_370, %c90_371] : memref<5x160xf32, #tpu.memory_space<vmem>>, vector<5x10xf32>
    tpu.vector_store %arg6[%c0_370, %c90_371], %257 {strides = array<i32>} : memref<5x160xf32, #tpu.memory_space<vmem>>, vector<5x10xf32>,
    %c0_372 = arith.constant 0 : index
    %c164 = arith.constant 164 : index
    %259 = vector.load %arg4[%c0_372, %c164] : memref<5x256xf32, #tpu.memory_space<vmem>>, vector<5x10xf32>
    %c0_373 = arith.constant 0 : index
    %c100_374 = arith.constant 100 : index
    %260 = vector.load %arg6[%c0_373, %c100_374] : memref<5x160xf32, #tpu.memory_space<vmem>>, vector<5x10xf32>
    tpu.vector_store %arg6[%c0_373, %c100_374], %259 {strides = array<i32>} : memref<5x160xf32, #tpu.memory_space<vmem>>, vector<5x10xf32>,
    %c0_375 = arith.constant 0 : index
    %c180_376 = arith.constant 180 : index
    %261 = vector.load %arg4[%c0_375, %c180_376] : memref<5x256xf32, #tpu.memory_space<vmem>>, vector<5x10xf32>
    %c0_377 = arith.constant 0 : index
    %c110_378 = arith.constant 110 : index
    %262 = vector.load %arg6[%c0_377, %c110_378] : memref<5x160xf32, #tpu.memory_space<vmem>>, vector<5x10xf32>
    tpu.vector_store %arg6[%c0_377, %c110_378], %261 {strides = array<i32>} : memref<5x160xf32, #tpu.memory_space<vmem>>, vector<5x10xf32>,
    %c0_379 = arith.constant 0 : index
    %c196 = arith.constant 196 : index
    %263 = vector.load %arg4[%c0_379, %c196] : memref<5x256xf32, #tpu.memory_space<vmem>>, vector<5x10xf32>
    %c0_380 = arith.constant 0 : index
    %c120_381 = arith.constant 120 : index
    %264 = vector.load %arg6[%c0_380, %c120_381] : memref<5x160xf32, #tpu.memory_space<vmem>>, vector<5x10xf32>
    tpu.vector_store %arg6[%c0_380, %c120_381], %263 {strides = array<i32>} : memref<5x160xf32, #tpu.memory_space<vmem>>, vector<5x10xf32>,
    %c0_382 = arith.constant 0 : index
    %c212 = arith.constant 212 : index
    %265 = vector.load %arg4[%c0_382, %c212] : memref<5x256xf32, #tpu.memory_space<vmem>>, vector<5x10xf32>
    %c0_383 = arith.constant 0 : index
    %c130_384 = arith.constant 130 : index
    %266 = vector.load %arg6[%c0_383, %c130_384] : memref<5x160xf32, #tpu.memory_space<vmem>>, vector<5x10xf32>
    tpu.vector_store %arg6[%c0_383, %c130_384], %265 {strides = array<i32>} : memref<5x160xf32, #tpu.memory_space<vmem>>, vector<5x10xf32>,
    %c0_385 = arith.constant 0 : index
    %c228 = arith.constant 228 : index
    %267 = vector.load %arg4[%c0_385, %c228] : memref<5x256xf32, #tpu.memory_space<vmem>>, vector<5x10xf32>
    %c0_386 = arith.constant 0 : index
    %c140_387 = arith.constant 140 : index
    %268 = vector.load %arg6[%c0_386, %c140_387] : memref<5x160xf32, #tpu.memory_space<vmem>>, vector<5x10xf32>
    tpu.vector_store %arg6[%c0_386, %c140_387], %267 {strides = array<i32>} : memref<5x160xf32, #tpu.memory_space<vmem>>, vector<5x10xf32>,
    %c0_388 = arith.constant 0 : index
    %c244 = arith.constant 244 : index
    %269 = vector.load %arg4[%c0_388, %c244] : memref<5x256xf32, #tpu.memory_space<vmem>>, vector<5x10xf32>
    %c0_389 = arith.constant 0 : index
    %c150_390 = arith.constant 150 : index
    %270 = vector.load %arg6[%c0_389, %c150_390] : memref<5x160xf32, #tpu.memory_space<vmem>>, vector<5x10xf32>
    tpu.vector_store %arg6[%c0_389, %c150_390], %269 {strides = array<i32>} : memref<5x160xf32, #tpu.memory_space<vmem>>, vector<5x10xf32>,
    %c0_391 = arith.constant 0 : index
    %c0_392 = arith.constant 0 : index
    %271 = vector.load %arg6[%c0_391, %c0_392] : memref<5x160xf32, #tpu.memory_space<vmem>>, vector<5x100xf32>
    %c20_393 = arith.constant 20 : index
    %c0_394 = arith.constant 0 : index
    %272 = vector.load %arg7[%c20_393, %c0_394] : memref<245x100xf32, #tpu.memory_space<vmem>>, vector<5x100xf32>
    tpu.vector_store %arg7[%c20_393, %c0_394], %271 {strides = array<i32>} : memref<245x100xf32, #tpu.memory_space<vmem>>, vector<5x100xf32>,
    %c0_395 = arith.constant 0 : index
    %c10_396 = arith.constant 10 : index
    %273 = vector.load %arg6[%c0_395, %c10_396] : memref<5x160xf32, #tpu.memory_space<vmem>>, vector<5x100xf32>
    %c55 = arith.constant 55 : index
    %c0_397 = arith.constant 0 : index
    %274 = vector.load %arg7[%c55, %c0_397] : memref<245x100xf32, #tpu.memory_space<vmem>>, vector<5x100xf32>
    tpu.vector_store %arg7[%c55, %c0_397], %273 {strides = array<i32>} : memref<245x100xf32, #tpu.memory_space<vmem>>, vector<5x100xf32>,
    %c0_398 = arith.constant 0 : index
    %c20_399 = arith.constant 20 : index
    %275 = vector.load %arg6[%c0_398, %c20_399] : memref<5x160xf32, #tpu.memory_space<vmem>>, vector<5x100xf32>
    %c90_400 = arith.constant 90 : index
    %c0_401 = arith.constant 0 : index
    %276 = vector.load %arg7[%c90_400, %c0_401] : memref<245x100xf32, #tpu.memory_space<vmem>>, vector<5x100xf32>
    tpu.vector_store %arg7[%c90_400, %c0_401], %275 {strides = array<i32>} : memref<245x100xf32, #tpu.memory_space<vmem>>, vector<5x100xf32>,
    %c0_402 = arith.constant 0 : index
    %c30_403 = arith.constant 30 : index
    %277 = vector.load %arg6[%c0_402, %c30_403] : memref<5x160xf32, #tpu.memory_space<vmem>>, vector<5x100xf32>
    %c125 = arith.constant 125 : index
    %c0_404 = arith.constant 0 : index
    %278 = vector.load %arg7[%c125, %c0_404] : memref<245x100xf32, #tpu.memory_space<vmem>>, vector<5x100xf32>
    tpu.vector_store %arg7[%c125, %c0_404], %277 {strides = array<i32>} : memref<245x100xf32, #tpu.memory_space<vmem>>, vector<5x100xf32>,
    %c0_405 = arith.constant 0 : index
    %c40_406 = arith.constant 40 : index
    %279 = vector.load %arg6[%c0_405, %c40_406] : memref<5x160xf32, #tpu.memory_space<vmem>>, vector<5x100xf32>
    %c160_407 = arith.constant 160 : index
    %c0_408 = arith.constant 0 : index
    %280 = vector.load %arg7[%c160_407, %c0_408] : memref<245x100xf32, #tpu.memory_space<vmem>>, vector<5x100xf32>
    tpu.vector_store %arg7[%c160_407, %c0_408], %279 {strides = array<i32>} : memref<245x100xf32, #tpu.memory_space<vmem>>, vector<5x100xf32>,
    %c0_409 = arith.constant 0 : index
    %c50_410 = arith.constant 50 : index
    %281 = vector.load %arg6[%c0_409, %c50_410] : memref<5x160xf32, #tpu.memory_space<vmem>>, vector<5x100xf32>
    %c195_411 = arith.constant 195 : index
    %c0_412 = arith.constant 0 : index
    %282 = vector.load %arg7[%c195_411, %c0_412] : memref<245x100xf32, #tpu.memory_space<vmem>>, vector<5x100xf32>
    tpu.vector_store %arg7[%c195_411, %c0_412], %281 {strides = array<i32>} : memref<245x100xf32, #tpu.memory_space<vmem>>, vector<5x100xf32>,
    %c0_413 = arith.constant 0 : index
    %c60_414 = arith.constant 60 : index
    %283 = vector.load %arg6[%c0_413, %c60_414] : memref<5x160xf32, #tpu.memory_space<vmem>>, vector<5x100xf32>
    %c230 = arith.constant 230 : index
    %c0_415 = arith.constant 0 : index
    %284 = vector.load %arg7[%c230, %c0_415] : memref<245x100xf32, #tpu.memory_space<vmem>>, vector<5x100xf32>
    tpu.vector_store %arg7[%c230, %c0_415], %283 {strides = array<i32>} : memref<245x100xf32, #tpu.memory_space<vmem>>, vector<5x100xf32>,
    %c0_416 = arith.constant 0 : index
    %c5_417 = arith.constant 5 : index
    %285 = vector.load %arg4[%c0_416, %c5_417] : memref<5x256xf32, #tpu.memory_space<vmem>>, vector<5x10xf32>
    %c0_418 = arith.constant 0 : index
    %c0_419 = arith.constant 0 : index
    %286 = vector.load %arg6[%c0_418, %c0_419] : memref<5x160xf32, #tpu.memory_space<vmem>>, vector<5x10xf32>
    tpu.vector_store %arg6[%c0_418, %c0_419], %285 {strides = array<i32>} : memref<5x160xf32, #tpu.memory_space<vmem>>, vector<5x10xf32>,
    %c0_420 = arith.constant 0 : index
    %c21 = arith.constant 21 : index
    %287 = vector.load %arg4[%c0_420, %c21] : memref<5x256xf32, #tpu.memory_space<vmem>>, vector<5x10xf32>
    %c0_421 = arith.constant 0 : index
    %c10_422 = arith.constant 10 : index
    %288 = vector.load %arg6[%c0_421, %c10_422] : memref<5x160xf32, #tpu.memory_space<vmem>>, vector<5x10xf32>
    tpu.vector_store %arg6[%c0_421, %c10_422], %287 {strides = array<i32>} : memref<5x160xf32, #tpu.memory_space<vmem>>, vector<5x10xf32>,
    %c0_423 = arith.constant 0 : index
    %c37 = arith.constant 37 : index
    %289 = vector.load %arg4[%c0_423, %c37] : memref<5x256xf32, #tpu.memory_space<vmem>>, vector<5x10xf32>
    %c0_424 = arith.constant 0 : index
    %c20_425 = arith.constant 20 : index
    %290 = vector.load %arg6[%c0_424, %c20_425] : memref<5x160xf32, #tpu.memory_space<vmem>>, vector<5x10xf32>
    tpu.vector_store %arg6[%c0_424, %c20_425], %289 {strides = array<i32>} : memref<5x160xf32, #tpu.memory_space<vmem>>, vector<5x10xf32>,
    %c0_426 = arith.constant 0 : index
    %c53 = arith.constant 53 : index
    %291 = vector.load %arg4[%c0_426, %c53] : memref<5x256xf32, #tpu.memory_space<vmem>>, vector<5x10xf32>
    %c0_427 = arith.constant 0 : index
    %c30_428 = arith.constant 30 : index
    %292 = vector.load %arg6[%c0_427, %c30_428] : memref<5x160xf32, #tpu.memory_space<vmem>>, vector<5x10xf32>
    tpu.vector_store %arg6[%c0_427, %c30_428], %291 {strides = array<i32>} : memref<5x160xf32, #tpu.memory_space<vmem>>, vector<5x10xf32>,
    %c0_429 = arith.constant 0 : index
    %c69 = arith.constant 69 : index
    %293 = vector.load %arg4[%c0_429, %c69] : memref<5x256xf32, #tpu.memory_space<vmem>>, vector<5x10xf32>
    %c0_430 = arith.constant 0 : index
    %c40_431 = arith.constant 40 : index
    %294 = vector.load %arg6[%c0_430, %c40_431] : memref<5x160xf32, #tpu.memory_space<vmem>>, vector<5x10xf32>
    tpu.vector_store %arg6[%c0_430, %c40_431], %293 {strides = array<i32>} : memref<5x160xf32, #tpu.memory_space<vmem>>, vector<5x10xf32>,
    %c0_432 = arith.constant 0 : index
    %c85_433 = arith.constant 85 : index
    %295 = vector.load %arg4[%c0_432, %c85_433] : memref<5x256xf32, #tpu.memory_space<vmem>>, vector<5x10xf32>
    %c0_434 = arith.constant 0 : index
    %c50_435 = arith.constant 50 : index
    %296 = vector.load %arg6[%c0_434, %c50_435] : memref<5x160xf32, #tpu.memory_space<vmem>>, vector<5x10xf32>
    tpu.vector_store %arg6[%c0_434, %c50_435], %295 {strides = array<i32>} : memref<5x160xf32, #tpu.memory_space<vmem>>, vector<5x10xf32>,
    %c0_436 = arith.constant 0 : index
    %c101 = arith.constant 101 : index
    %297 = vector.load %arg4[%c0_436, %c101] : memref<5x256xf32, #tpu.memory_space<vmem>>, vector<5x10xf32>
    %c0_437 = arith.constant 0 : index
    %c60_438 = arith.constant 60 : index
    %298 = vector.load %arg6[%c0_437, %c60_438] : memref<5x160xf32, #tpu.memory_space<vmem>>, vector<5x10xf32>
    tpu.vector_store %arg6[%c0_437, %c60_438], %297 {strides = array<i32>} : memref<5x160xf32, #tpu.memory_space<vmem>>, vector<5x10xf32>,
    %c0_439 = arith.constant 0 : index
    %c117 = arith.constant 117 : index
    %299 = vector.load %arg4[%c0_439, %c117] : memref<5x256xf32, #tpu.memory_space<vmem>>, vector<5x10xf32>
    %c0_440 = arith.constant 0 : index
    %c70_441 = arith.constant 70 : index
    %300 = vector.load %arg6[%c0_440, %c70_441] : memref<5x160xf32, #tpu.memory_space<vmem>>, vector<5x10xf32>
    tpu.vector_store %arg6[%c0_440, %c70_441], %299 {strides = array<i32>} : memref<5x160xf32, #tpu.memory_space<vmem>>, vector<5x10xf32>,
    %c0_442 = arith.constant 0 : index
    %c133 = arith.constant 133 : index
    %301 = vector.load %arg4[%c0_442, %c133] : memref<5x256xf32, #tpu.memory_space<vmem>>, vector<5x10xf32>
    %c0_443 = arith.constant 0 : index
    %c80_444 = arith.constant 80 : index
    %302 = vector.load %arg6[%c0_443, %c80_444] : memref<5x160xf32, #tpu.memory_space<vmem>>, vector<5x10xf32>
    tpu.vector_store %arg6[%c0_443, %c80_444], %301 {strides = array<i32>} : memref<5x160xf32, #tpu.memory_space<vmem>>, vector<5x10xf32>,
    %c0_445 = arith.constant 0 : index
    %c149 = arith.constant 149 : index
    %303 = vector.load %arg4[%c0_445, %c149] : memref<5x256xf32, #tpu.memory_space<vmem>>, vector<5x10xf32>
    %c0_446 = arith.constant 0 : index
    %c90_447 = arith.constant 90 : index
    %304 = vector.load %arg6[%c0_446, %c90_447] : memref<5x160xf32, #tpu.memory_space<vmem>>, vector<5x10xf32>
    tpu.vector_store %arg6[%c0_446, %c90_447], %303 {strides = array<i32>} : memref<5x160xf32, #tpu.memory_space<vmem>>, vector<5x10xf32>,
    %c0_448 = arith.constant 0 : index
    %c165 = arith.constant 165 : index
    %305 = vector.load %arg4[%c0_448, %c165] : memref<5x256xf32, #tpu.memory_space<vmem>>, vector<5x10xf32>
    %c0_449 = arith.constant 0 : index
    %c100_450 = arith.constant 100 : index
    %306 = vector.load %arg6[%c0_449, %c100_450] : memref<5x160xf32, #tpu.memory_space<vmem>>, vector<5x10xf32>
    tpu.vector_store %arg6[%c0_449, %c100_450], %305 {strides = array<i32>} : memref<5x160xf32, #tpu.memory_space<vmem>>, vector<5x10xf32>,
    %c0_451 = arith.constant 0 : index
    %c181 = arith.constant 181 : index
    %307 = vector.load %arg4[%c0_451, %c181] : memref<5x256xf32, #tpu.memory_space<vmem>>, vector<5x10xf32>
    %c0_452 = arith.constant 0 : index
    %c110_453 = arith.constant 110 : index
    %308 = vector.load %arg6[%c0_452, %c110_453] : memref<5x160xf32, #tpu.memory_space<vmem>>, vector<5x10xf32>
    tpu.vector_store %arg6[%c0_452, %c110_453], %307 {strides = array<i32>} : memref<5x160xf32, #tpu.memory_space<vmem>>, vector<5x10xf32>,
    %c0_454 = arith.constant 0 : index
    %c197 = arith.constant 197 : index
    %309 = vector.load %arg4[%c0_454, %c197] : memref<5x256xf32, #tpu.memory_space<vmem>>, vector<5x10xf32>
    %c0_455 = arith.constant 0 : index
    %c120_456 = arith.constant 120 : index
    %310 = vector.load %arg6[%c0_455, %c120_456] : memref<5x160xf32, #tpu.memory_space<vmem>>, vector<5x10xf32>
    tpu.vector_store %arg6[%c0_455, %c120_456], %309 {strides = array<i32>} : memref<5x160xf32, #tpu.memory_space<vmem>>, vector<5x10xf32>,
    %c0_457 = arith.constant 0 : index
    %c213 = arith.constant 213 : index
    %311 = vector.load %arg4[%c0_457, %c213] : memref<5x256xf32, #tpu.memory_space<vmem>>, vector<5x10xf32>
    %c0_458 = arith.constant 0 : index
    %c130_459 = arith.constant 130 : index
    %312 = vector.load %arg6[%c0_458, %c130_459] : memref<5x160xf32, #tpu.memory_space<vmem>>, vector<5x10xf32>
    tpu.vector_store %arg6[%c0_458, %c130_459], %311 {strides = array<i32>} : memref<5x160xf32, #tpu.memory_space<vmem>>, vector<5x10xf32>,
    %c0_460 = arith.constant 0 : index
    %c229 = arith.constant 229 : index
    %313 = vector.load %arg4[%c0_460, %c229] : memref<5x256xf32, #tpu.memory_space<vmem>>, vector<5x10xf32>
    %c0_461 = arith.constant 0 : index
    %c140_462 = arith.constant 140 : index
    %314 = vector.load %arg6[%c0_461, %c140_462] : memref<5x160xf32, #tpu.memory_space<vmem>>, vector<5x10xf32>
    tpu.vector_store %arg6[%c0_461, %c140_462], %313 {strides = array<i32>} : memref<5x160xf32, #tpu.memory_space<vmem>>, vector<5x10xf32>,
    %c0_463 = arith.constant 0 : index
    %c245 = arith.constant 245 : index
    %315 = vector.load %arg4[%c0_463, %c245] : memref<5x256xf32, #tpu.memory_space<vmem>>, vector<5x10xf32>
    %c0_464 = arith.constant 0 : index
    %c150_465 = arith.constant 150 : index
    %316 = vector.load %arg6[%c0_464, %c150_465] : memref<5x160xf32, #tpu.memory_space<vmem>>, vector<5x10xf32>
    tpu.vector_store %arg6[%c0_464, %c150_465], %315 {strides = array<i32>} : memref<5x160xf32, #tpu.memory_space<vmem>>, vector<5x10xf32>,
    %c0_466 = arith.constant 0 : index
    %c0_467 = arith.constant 0 : index
    %317 = vector.load %arg6[%c0_466, %c0_467] : memref<5x160xf32, #tpu.memory_space<vmem>>, vector<5x100xf32>
    %c25 = arith.constant 25 : index
    %c0_468 = arith.constant 0 : index
    %318 = vector.load %arg7[%c25, %c0_468] : memref<245x100xf32, #tpu.memory_space<vmem>>, vector<5x100xf32>
    tpu.vector_store %arg7[%c25, %c0_468], %317 {strides = array<i32>} : memref<245x100xf32, #tpu.memory_space<vmem>>, vector<5x100xf32>,
    %c0_469 = arith.constant 0 : index
    %c10_470 = arith.constant 10 : index
    %319 = vector.load %arg6[%c0_469, %c10_470] : memref<5x160xf32, #tpu.memory_space<vmem>>, vector<5x100xf32>
    %c60_471 = arith.constant 60 : index
    %c0_472 = arith.constant 0 : index
    %320 = vector.load %arg7[%c60_471, %c0_472] : memref<245x100xf32, #tpu.memory_space<vmem>>, vector<5x100xf32>
    tpu.vector_store %arg7[%c60_471, %c0_472], %319 {strides = array<i32>} : memref<245x100xf32, #tpu.memory_space<vmem>>, vector<5x100xf32>,
    %c0_473 = arith.constant 0 : index
    %c20_474 = arith.constant 20 : index
    %321 = vector.load %arg6[%c0_473, %c20_474] : memref<5x160xf32, #tpu.memory_space<vmem>>, vector<5x100xf32>
    %c95 = arith.constant 95 : index
    %c0_475 = arith.constant 0 : index
    %322 = vector.load %arg7[%c95, %c0_475] : memref<245x100xf32, #tpu.memory_space<vmem>>, vector<5x100xf32>
    tpu.vector_store %arg7[%c95, %c0_475], %321 {strides = array<i32>} : memref<245x100xf32, #tpu.memory_space<vmem>>, vector<5x100xf32>,
    %c0_476 = arith.constant 0 : index
    %c30_477 = arith.constant 30 : index
    %323 = vector.load %arg6[%c0_476, %c30_477] : memref<5x160xf32, #tpu.memory_space<vmem>>, vector<5x100xf32>
    %c130_478 = arith.constant 130 : index
    %c0_479 = arith.constant 0 : index
    %324 = vector.load %arg7[%c130_478, %c0_479] : memref<245x100xf32, #tpu.memory_space<vmem>>, vector<5x100xf32>
    tpu.vector_store %arg7[%c130_478, %c0_479], %323 {strides = array<i32>} : memref<245x100xf32, #tpu.memory_space<vmem>>, vector<5x100xf32>,
    %c0_480 = arith.constant 0 : index
    %c40_481 = arith.constant 40 : index
    %325 = vector.load %arg6[%c0_480, %c40_481] : memref<5x160xf32, #tpu.memory_space<vmem>>, vector<5x100xf32>
    %c165_482 = arith.constant 165 : index
    %c0_483 = arith.constant 0 : index
    %326 = vector.load %arg7[%c165_482, %c0_483] : memref<245x100xf32, #tpu.memory_space<vmem>>, vector<5x100xf32>
    tpu.vector_store %arg7[%c165_482, %c0_483], %325 {strides = array<i32>} : memref<245x100xf32, #tpu.memory_space<vmem>>, vector<5x100xf32>,
    %c0_484 = arith.constant 0 : index
    %c50_485 = arith.constant 50 : index
    %327 = vector.load %arg6[%c0_484, %c50_485] : memref<5x160xf32, #tpu.memory_space<vmem>>, vector<5x100xf32>
    %c200 = arith.constant 200 : index
    %c0_486 = arith.constant 0 : index
    %328 = vector.load %arg7[%c200, %c0_486] : memref<245x100xf32, #tpu.memory_space<vmem>>, vector<5x100xf32>
    tpu.vector_store %arg7[%c200, %c0_486], %327 {strides = array<i32>} : memref<245x100xf32, #tpu.memory_space<vmem>>, vector<5x100xf32>,
    %c0_487 = arith.constant 0 : index
    %c60_488 = arith.constant 60 : index
    %329 = vector.load %arg6[%c0_487, %c60_488] : memref<5x160xf32, #tpu.memory_space<vmem>>, vector<5x100xf32>
    %c235 = arith.constant 235 : index
    %c0_489 = arith.constant 0 : index
    %330 = vector.load %arg7[%c235, %c0_489] : memref<245x100xf32, #tpu.memory_space<vmem>>, vector<5x100xf32>
    tpu.vector_store %arg7[%c235, %c0_489], %329 {strides = array<i32>} : memref<245x100xf32, #tpu.memory_space<vmem>>, vector<5x100xf32>,
    %c0_490 = arith.constant 0 : index
    %c6 = arith.constant 6 : index
    %331 = vector.load %arg4[%c0_490, %c6] : memref<5x256xf32, #tpu.memory_space<vmem>>, vector<5x10xf32>
    %c0_491 = arith.constant 0 : index
    %c0_492 = arith.constant 0 : index
    %332 = vector.load %arg6[%c0_491, %c0_492] : memref<5x160xf32, #tpu.memory_space<vmem>>, vector<5x10xf32>
    tpu.vector_store %arg6[%c0_491, %c0_492], %331 {strides = array<i32>} : memref<5x160xf32, #tpu.memory_space<vmem>>, vector<5x10xf32>,
    %c0_493 = arith.constant 0 : index
    %c22 = arith.constant 22 : index
    %333 = vector.load %arg4[%c0_493, %c22] : memref<5x256xf32, #tpu.memory_space<vmem>>, vector<5x10xf32>
    %c0_494 = arith.constant 0 : index
    %c10_495 = arith.constant 10 : index
    %334 = vector.load %arg6[%c0_494, %c10_495] : memref<5x160xf32, #tpu.memory_space<vmem>>, vector<5x10xf32>
    tpu.vector_store %arg6[%c0_494, %c10_495], %333 {strides = array<i32>} : memref<5x160xf32, #tpu.memory_space<vmem>>, vector<5x10xf32>,
    %c0_496 = arith.constant 0 : index
    %c38 = arith.constant 38 : index
    %335 = vector.load %arg4[%c0_496, %c38] : memref<5x256xf32, #tpu.memory_space<vmem>>, vector<5x10xf32>
    %c0_497 = arith.constant 0 : index
    %c20_498 = arith.constant 20 : index
    %336 = vector.load %arg6[%c0_497, %c20_498] : memref<5x160xf32, #tpu.memory_space<vmem>>, vector<5x10xf32>
    tpu.vector_store %arg6[%c0_497, %c20_498], %335 {strides = array<i32>} : memref<5x160xf32, #tpu.memory_space<vmem>>, vector<5x10xf32>,
    %c0_499 = arith.constant 0 : index
    %c54 = arith.constant 54 : index
    %337 = vector.load %arg4[%c0_499, %c54] : memref<5x256xf32, #tpu.memory_space<vmem>>, vector<5x10xf32>
    %c0_500 = arith.constant 0 : index
    %c30_501 = arith.constant 30 : index
    %338 = vector.load %arg6[%c0_500, %c30_501] : memref<5x160xf32, #tpu.memory_space<vmem>>, vector<5x10xf32>
    tpu.vector_store %arg6[%c0_500, %c30_501], %337 {strides = array<i32>} : memref<5x160xf32, #tpu.memory_space<vmem>>, vector<5x10xf32>,
    %c0_502 = arith.constant 0 : index
    %c70_503 = arith.constant 70 : index
    %339 = vector.load %arg4[%c0_502, %c70_503] : memref<5x256xf32, #tpu.memory_space<vmem>>, vector<5x10xf32>
    %c0_504 = arith.constant 0 : index
    %c40_505 = arith.constant 40 : index
    %340 = vector.load %arg6[%c0_504, %c40_505] : memref<5x160xf32, #tpu.memory_space<vmem>>, vector<5x10xf32>
    tpu.vector_store %arg6[%c0_504, %c40_505], %339 {strides = array<i32>} : memref<5x160xf32, #tpu.memory_space<vmem>>, vector<5x10xf32>,
    %c0_506 = arith.constant 0 : index
    %c86 = arith.constant 86 : index
    %341 = vector.load %arg4[%c0_506, %c86] : memref<5x256xf32, #tpu.memory_space<vmem>>, vector<5x10xf32>
    %c0_507 = arith.constant 0 : index
    %c50_508 = arith.constant 50 : index
    %342 = vector.load %arg6[%c0_507, %c50_508] : memref<5x160xf32, #tpu.memory_space<vmem>>, vector<5x10xf32>
    tpu.vector_store %arg6[%c0_507, %c50_508], %341 {strides = array<i32>} : memref<5x160xf32, #tpu.memory_space<vmem>>, vector<5x10xf32>,
    %c0_509 = arith.constant 0 : index
    %c102 = arith.constant 102 : index
    %343 = vector.load %arg4[%c0_509, %c102] : memref<5x256xf32, #tpu.memory_space<vmem>>, vector<5x10xf32>
    %c0_510 = arith.constant 0 : index
    %c60_511 = arith.constant 60 : index
    %344 = vector.load %arg6[%c0_510, %c60_511] : memref<5x160xf32, #tpu.memory_space<vmem>>, vector<5x10xf32>
    tpu.vector_store %arg6[%c0_510, %c60_511], %343 {strides = array<i32>} : memref<5x160xf32, #tpu.memory_space<vmem>>, vector<5x10xf32>,
    %c0_512 = arith.constant 0 : index
    %c118 = arith.constant 118 : index
    %345 = vector.load %arg4[%c0_512, %c118] : memref<5x256xf32, #tpu.memory_space<vmem>>, vector<5x10xf32>
    %c0_513 = arith.constant 0 : index
    %c70_514 = arith.constant 70 : index
    %346 = vector.load %arg6[%c0_513, %c70_514] : memref<5x160xf32, #tpu.memory_space<vmem>>, vector<5x10xf32>
    tpu.vector_store %arg6[%c0_513, %c70_514], %345 {strides = array<i32>} : memref<5x160xf32, #tpu.memory_space<vmem>>, vector<5x10xf32>,
    %c0_515 = arith.constant 0 : index
    %c134 = arith.constant 134 : index
    %347 = vector.load %arg4[%c0_515, %c134] : memref<5x256xf32, #tpu.memory_space<vmem>>, vector<5x10xf32>
    %c0_516 = arith.constant 0 : index
    %c80_517 = arith.constant 80 : index
    %348 = vector.load %arg6[%c0_516, %c80_517] : memref<5x160xf32, #tpu.memory_space<vmem>>, vector<5x10xf32>
    tpu.vector_store %arg6[%c0_516, %c80_517], %347 {strides = array<i32>} : memref<5x160xf32, #tpu.memory_space<vmem>>, vector<5x10xf32>,
    %c0_518 = arith.constant 0 : index
    %c150_519 = arith.constant 150 : index
    %349 = vector.load %arg4[%c0_518, %c150_519] : memref<5x256xf32, #tpu.memory_space<vmem>>, vector<5x10xf32>
    %c0_520 = arith.constant 0 : index
    %c90_521 = arith.constant 90 : index
    %350 = vector.load %arg6[%c0_520, %c90_521] : memref<5x160xf32, #tpu.memory_space<vmem>>, vector<5x10xf32>
    tpu.vector_store %arg6[%c0_520, %c90_521], %349 {strides = array<i32>} : memref<5x160xf32, #tpu.memory_space<vmem>>, vector<5x10xf32>,
    %c0_522 = arith.constant 0 : index
    %c166 = arith.constant 166 : index
    %351 = vector.load %arg4[%c0_522, %c166] : memref<5x256xf32, #tpu.memory_space<vmem>>, vector<5x10xf32>
    %c0_523 = arith.constant 0 : index
    %c100_524 = arith.constant 100 : index
    %352 = vector.load %arg6[%c0_523, %c100_524] : memref<5x160xf32, #tpu.memory_space<vmem>>, vector<5x10xf32>
    tpu.vector_store %arg6[%c0_523, %c100_524], %351 {strides = array<i32>} : memref<5x160xf32, #tpu.memory_space<vmem>>, vector<5x10xf32>,
    %c0_525 = arith.constant 0 : index
    %c182 = arith.constant 182 : index
    %353 = vector.load %arg4[%c0_525, %c182] : memref<5x256xf32, #tpu.memory_space<vmem>>, vector<5x10xf32>
    %c0_526 = arith.constant 0 : index
    %c110_527 = arith.constant 110 : index
    %354 = vector.load %arg6[%c0_526, %c110_527] : memref<5x160xf32, #tpu.memory_space<vmem>>, vector<5x10xf32>
    tpu.vector_store %arg6[%c0_526, %c110_527], %353 {strides = array<i32>} : memref<5x160xf32, #tpu.memory_space<vmem>>, vector<5x10xf32>,
    %c0_528 = arith.constant 0 : index
    %c198 = arith.constant 198 : index
    %355 = vector.load %arg4[%c0_528, %c198] : memref<5x256xf32, #tpu.memory_space<vmem>>, vector<5x10xf32>
    %c0_529 = arith.constant 0 : index
    %c120_530 = arith.constant 120 : index
    %356 = vector.load %arg6[%c0_529, %c120_530] : memref<5x160xf32, #tpu.memory_space<vmem>>, vector<5x10xf32>
    tpu.vector_store %arg6[%c0_529, %c120_530], %355 {strides = array<i32>} : memref<5x160xf32, #tpu.memory_space<vmem>>, vector<5x10xf32>,
    %c0_531 = arith.constant 0 : index
    %c214 = arith.constant 214 : index
    %357 = vector.load %arg4[%c0_531, %c214] : memref<5x256xf32, #tpu.memory_space<vmem>>, vector<5x10xf32>
    %c0_532 = arith.constant 0 : index
    %c130_533 = arith.constant 130 : index
    %358 = vector.load %arg6[%c0_532, %c130_533] : memref<5x160xf32, #tpu.memory_space<vmem>>, vector<5x10xf32>
    tpu.vector_store %arg6[%c0_532, %c130_533], %357 {strides = array<i32>} : memref<5x160xf32, #tpu.memory_space<vmem>>, vector<5x10xf32>,
    %c0_534 = arith.constant 0 : index
    %c230_535 = arith.constant 230 : index
    %359 = vector.load %arg4[%c0_534, %c230_535] : memref<5x256xf32, #tpu.memory_space<vmem>>, vector<5x10xf32>
    %c0_536 = arith.constant 0 : index
    %c140_537 = arith.constant 140 : index
    %360 = vector.load %arg6[%c0_536, %c140_537] : memref<5x160xf32, #tpu.memory_space<vmem>>, vector<5x10xf32>
    tpu.vector_store %arg6[%c0_536, %c140_537], %359 {strides = array<i32>} : memref<5x160xf32, #tpu.memory_space<vmem>>, vector<5x10xf32>,
    %c0_538 = arith.constant 0 : index
    %c246 = arith.constant 246 : index
    %361 = vector.load %arg4[%c0_538, %c246] : memref<5x256xf32, #tpu.memory_space<vmem>>, vector<5x10xf32>
    %c0_539 = arith.constant 0 : index
    %c150_540 = arith.constant 150 : index
    %362 = vector.load %arg6[%c0_539, %c150_540] : memref<5x160xf32, #tpu.memory_space<vmem>>, vector<5x10xf32>
    tpu.vector_store %arg6[%c0_539, %c150_540], %361 {strides = array<i32>} : memref<5x160xf32, #tpu.memory_space<vmem>>, vector<5x10xf32>,
    %c0_541 = arith.constant 0 : index
    %c0_542 = arith.constant 0 : index
    %363 = vector.load %arg6[%c0_541, %c0_542] : memref<5x160xf32, #tpu.memory_space<vmem>>, vector<5x100xf32>
    %c30_543 = arith.constant 30 : index
    %c0_544 = arith.constant 0 : index
    %364 = vector.load %arg7[%c30_543, %c0_544] : memref<245x100xf32, #tpu.memory_space<vmem>>, vector<5x100xf32>
    tpu.vector_store %arg7[%c30_543, %c0_544], %363 {strides = array<i32>} : memref<245x100xf32, #tpu.memory_space<vmem>>, vector<5x100xf32>,
    %c0_545 = arith.constant 0 : index
    %c10_546 = arith.constant 10 : index
    %365 = vector.load %arg6[%c0_545, %c10_546] : memref<5x160xf32, #tpu.memory_space<vmem>>, vector<5x100xf32>
    %c65_547 = arith.constant 65 : index
    %c0_548 = arith.constant 0 : index
    %366 = vector.load %arg7[%c65_547, %c0_548] : memref<245x100xf32, #tpu.memory_space<vmem>>, vector<5x100xf32>
    tpu.vector_store %arg7[%c65_547, %c0_548], %365 {strides = array<i32>} : memref<245x100xf32, #tpu.memory_space<vmem>>, vector<5x100xf32>,
    %c0_549 = arith.constant 0 : index
    %c20_550 = arith.constant 20 : index
    %367 = vector.load %arg6[%c0_549, %c20_550] : memref<5x160xf32, #tpu.memory_space<vmem>>, vector<5x100xf32>
    %c100_551 = arith.constant 100 : index
    %c0_552 = arith.constant 0 : index
    %368 = vector.load %arg7[%c100_551, %c0_552] : memref<245x100xf32, #tpu.memory_space<vmem>>, vector<5x100xf32>
    tpu.vector_store %arg7[%c100_551, %c0_552], %367 {strides = array<i32>} : memref<245x100xf32, #tpu.memory_space<vmem>>, vector<5x100xf32>,
    %c0_553 = arith.constant 0 : index
    %c30_554 = arith.constant 30 : index
    %369 = vector.load %arg6[%c0_553, %c30_554] : memref<5x160xf32, #tpu.memory_space<vmem>>, vector<5x100xf32>
    %c135 = arith.constant 135 : index
    %c0_555 = arith.constant 0 : index
    %370 = vector.load %arg7[%c135, %c0_555] : memref<245x100xf32, #tpu.memory_space<vmem>>, vector<5x100xf32>
    tpu.vector_store %arg7[%c135, %c0_555], %369 {strides = array<i32>} : memref<245x100xf32, #tpu.memory_space<vmem>>, vector<5x100xf32>,
    %c0_556 = arith.constant 0 : index
    %c40_557 = arith.constant 40 : index
    %371 = vector.load %arg6[%c0_556, %c40_557] : memref<5x160xf32, #tpu.memory_space<vmem>>, vector<5x100xf32>
    %c170 = arith.constant 170 : index
    %c0_558 = arith.constant 0 : index
    %372 = vector.load %arg7[%c170, %c0_558] : memref<245x100xf32, #tpu.memory_space<vmem>>, vector<5x100xf32>
    tpu.vector_store %arg7[%c170, %c0_558], %371 {strides = array<i32>} : memref<245x100xf32, #tpu.memory_space<vmem>>, vector<5x100xf32>,
    %c0_559 = arith.constant 0 : index
    %c50_560 = arith.constant 50 : index
    %373 = vector.load %arg6[%c0_559, %c50_560] : memref<5x160xf32, #tpu.memory_space<vmem>>, vector<5x100xf32>
    %c205 = arith.constant 205 : index
    %c0_561 = arith.constant 0 : index
    %374 = vector.load %arg7[%c205, %c0_561] : memref<245x100xf32, #tpu.memory_space<vmem>>, vector<5x100xf32>
    tpu.vector_store %arg7[%c205, %c0_561], %373 {strides = array<i32>} : memref<245x100xf32, #tpu.memory_space<vmem>>, vector<5x100xf32>,
    %c0_562 = arith.constant 0 : index
    %c60_563 = arith.constant 60 : index
    %375 = vector.load %arg6[%c0_562, %c60_563] : memref<5x160xf32, #tpu.memory_space<vmem>>, vector<5x100xf32>
    %c240_564 = arith.constant 240 : index
    %c0_565 = arith.constant 0 : index
    %376 = vector.load %arg7[%c240_564, %c0_565] : memref<245x100xf32, #tpu.memory_space<vmem>>, vector<5x100xf32>
    tpu.vector_store %arg7[%c240_564, %c0_565], %375 {strides = array<i32>} : memref<245x100xf32, #tpu.memory_space<vmem>>, vector<5x100xf32>,
    %c0_566 = arith.constant 0 : index
    %c0_567 = arith.constant 0 : index
    %377 = vector.load %arg5[%c0_566, %c0_567] : memref<5x100xf32, #tpu.memory_space<vmem>>, vector<5x100xf32>
    %c0_568 = arith.constant 0 : index
    %c0_569 = arith.constant 0 : index
    %378 = vector.load %arg7[%c0_568, %c0_569] : memref<245x100xf32, #tpu.memory_space<vmem>>, vector<245x100xf32>
    %cst_570 = arith.constant dense<0.000000e+00> : vector<5x245xf32>
    %379 = tpu.matmul %377, %378, %cst_570 {dimension_numbers = #tpu.dot_dimension_numbers<[1], [1], [0], [0], [0, 0, 1, 0], [], []>, precision = #tpu.contract_precision<fp32>} : vector<5x100xf32>, vector<245x100xf32>, vector<5x245xf32> -> vector<5x245xf32>
    %380 = tpu.iota {dimensions = array<i32: 0>} : vector<245x245xi32>
    %381 = arith.sitofp %380 : vector<245x245xi32> to vector<245x245xf32>
    %382 = tpu.iota {dimensions = array<i32: 1>} : vector<245x245xi32>
    %383 = arith.sitofp %382 : vector<245x245xi32> to vector<245x245xf32>
    %cst_571 = arith.constant 5.000000e-01 : f32
    %384 = vector.broadcast %cst_571 : f32 to vector<245x245xf32>
    %385 = arith.addf %383, %384 : vector<245x245xf32>
    %cst_572 = arith.constant 0.0204081628 : f32
    %386 = vector.broadcast %cst_572 : f32 to vector<245x245xf32>
    %387 = arith.mulf %385, %386 : vector<245x245xf32>
    %388 = math.floor %387 : vector<245x245xf32>
    %cst_573 = arith.constant 4.900000e+01 : f32
    %389 = vector.broadcast %cst_573 : f32 to vector<245x245xf32>
    %390 = arith.mulf %388, %389 : vector<245x245xf32>
    %391 = arith.subf %383, %390 : vector<245x245xf32>
    %cst_574 = arith.constant 5.000000e+00 : f32
    %392 = vector.broadcast %cst_574 : f32 to vector<245x245xf32>
    %393 = arith.mulf %391, %392 : vector<245x245xf32>
    %394 = arith.addf %393, %388 : vector<245x245xf32>
    %395 = arith.cmpf oeq, %381, %394 : vector<245x245xf32>
    %396 = arith.extui %395 : vector<245x245xi1> to vector<245x245xi32>
    %397 = arith.sitofp %396 : vector<245x245xi32> to vector<245x245xf32>
    %cst_575 = arith.constant dense<0.000000e+00> : vector<5x245xf32>
    %398 = tpu.matmul %379, %397, %cst_575 {dimension_numbers = #tpu.dot_dimension_numbers<[1], [0], [0], [1], [0, 0, 1, 1], [], []>, precision = #tpu.contract_precision<fp32>} : vector<5x245xf32>, vector<245x245xf32>, vector<5x245xf32> -> vector<5x245xf32>
    %cst_576 = arith.constant 0.00999999977 : f32
    %399 = vector.broadcast %cst_576 : f32 to vector<5x245xf32>
    %400 = arith.mulf %398, %399 : vector<5x245xf32>
    %c0_577 = arith.constant 0 : index
    %c0_578 = arith.constant 0 : index
    %401 = vector.load %arg3[%c0_577, %c0_578] : memref<5x245xf32, #tpu.memory_space<vmem>>, vector<5x245xf32>
    tpu.vector_store %arg3[%c0_577, %c0_578], %400 {strides = array<i32>} : memref<5x245xf32, #tpu.memory_space<vmem>>, vector<5x245xf32>,
    return
  }
}

</mosaic_0001>

<bundles_post_ra>
// kernel: squeeze.41
= control target key start
LH: loop header
LB: loop body
LE: loop exit
PB: predicated region body
PF: predicated region fallthrough
CT: control target
= control target key end

     0   :  { %s7_s6 = smov 3  ;;  %s21_s9 = smov 3  ;;  %vm4_vm0 = vcmask 130048   ;;  %vm11_vm1 = vcmask 1048448   ;;  %vm18_vm2 = vcmask 917248   ;;  %vm25_vm3 = vcmask 786048   ;;  %s128_s0 = inlined_call_operand.vmem [shape: f32[16,16], index: 0, kind: input, shape index: {}]   ;;  %s129_s1 = inlined_call_operand.vmem [shape: f32[1,256], index: 1, kind: output, shape index: {}]  }
   0x1   :  { %v66_v0 = vld [vmem:[%s128_s0 + $0x7] ss:$8 sm:%s7_s6]   ;;  %s81_s10 = smov 112   ;;  %v68_v1 = vld [vmem:[%s128_s0 + $0x5] ss:$8 sm:%s21_s9]   ;;  %s14_s13 = smov 3 }
   0x2   :  { %9 = vrot.lane.b32.xlu0 %v66_v0, %s81_s10  ;;  %s82_s14 = smov 80   ;;  %v67_v2 = vld [vmem:[%s128_s0 + $0x6] ss:$8 sm:%s14_s13]   ;;  %s28_s17 = smov 3  ;;  %vm32_vm4 = vcmask 654848   ;;  %vm39_vm5 = vcmask 523648  }
   0x3   :  { %23 = vrot.lane.b32.xlu1 %v68_v1, %s82_s14  ;;  %v69_v3 = vld [vmem:[%s128_s0 + $0x4] ss:$8 sm:%s28_s17]   ;;  %s35_s20 = smov 3  ;;  %s42_s21 = smov 3  ;;  %vm46_vm6 = vcmask 392448   ;;  %vm53_vm7 = vcmask 261248  }
   0x4   :  { %s83_s22 = smov 96   ;;  %s84_s23 = smov 64   ;;  %v70_v4 = vld [vmem:[%s128_s0 + $0x3] ss:$8 sm:%s35_s20]   ;;  %v71_v5 = vld [vmem:[%s128_s0 + $0x2] ss:$8 sm:%s42_s21]  }
   0x5   :  { %s2_s26 = smov 3  ;;  %s49_s29 = smov 3 }
   0x6   :  { %16 = vrot.lane.b32.xlu0 %v67_v2, %s83_s22  ;;  %v3_v6 = vld [vmem:[%s128_s0] ss:$8 sm:%s2_s26]   ;;  %s85_s3 = smov 48   ;;  %s86_s4 = smov 32  }
   0x7   :  { %30 = vrot.lane.b32.xlu1 %v69_v3, %s84_s23  ;;  %5 = vst.msk [vmem:[#allocation0] ss:$8 sm:$0x3] %vm4_vm0, %v3_v6   ;;  %v72_v7 = vld [vmem:[%s128_s0 + $0x1] ss:$8 sm:%s49_s29]   ;;  %s87_s0 = smov 16  }
   0xa   :  { %37 = vrot.lane.b32.xlu0 %v70_v4, %s85_s3 }
   0xb   :  { %44 = vrot.lane.b32.xlu1 %v71_v5, %s86_s4 }
   0xe   :  { %51 = vrot.lane.b32.xlu0 %v72_v7, %s87_s0 }
  0x74   :  { %v10_v8 = vpop.permute.xlu0 %9  }
  0x75   :  { %12 = vst.msk [vmem:[#allocation0] ss:$8 sm:$0x3] %vm11_vm1, %v10_v8   ;;  %v24_v9 = vpop.permute.xlu1 %23  }
  0x78   :  { %v17_v10 = vpop.permute.xlu0 %16  }
  0x79   :  { %19 = vst.msk [vmem:[#allocation0] ss:$8 sm:$0x3] %vm18_vm2, %v17_v10   ;;  %v31_v11 = vpop.permute.xlu1 %30  }
  0x7a   :  { %26 = vst.msk [vmem:[#allocation0] ss:$8 sm:$0x3] %vm25_vm3, %v24_v9  }
  0x7b   :  { %33 = vst.msk [vmem:[#allocation0] ss:$8 sm:$0x3] %vm32_vm4, %v31_v11  }
  0x7c   :  { %v38_v12 = vpop.permute.xlu0 %37  }
  0x7d   :  { %40 = vst.msk [vmem:[#allocation0] ss:$8 sm:$0x3] %vm39_vm5, %v38_v12   ;;  %v45_v13 = vpop.permute.xlu1 %44  }
  0x7e   :  { %47 = vst.msk [vmem:[#allocation0] ss:$8 sm:$0x3] %vm46_vm6, %v45_v13  }
  0x80   :  { %v52_v14 = vpop.permute.xlu0 %51  }
  0x81   :  { %54 = vst.msk [vmem:[#allocation0] ss:$8 sm:$0x3] %vm53_vm7, %v52_v14  }
  0x88   :  { %v58_v15 = vld [vmem:[#allocation0] sm:$0x1]  ;;  %v62_v16 = vld [vmem:[#allocation0 + $0x8] sm:$0x1] }
  0x89   :  { %60 = vst [vmem:[%s129_s1] sm:$0x1] %v58_v15  ;;  %73 = vst [vmem:[%s129_s1 + $0x1] sm:$0x1] %v62_v16 }

// kernel: net_forward.1
= control target key start
LH: loop header
LB: loop body
LE: loop exit
PB: predicated region body
PF: predicated region fallthrough
CT: control target
= control target key end

     0   :  { %vm28_vm0 = vcmask 1041408   ;;  %v9193_v3 = vmov 0.0   ;;  %vm24_vm1 = vcmask 146432   ;;  %vm9189_vm3 = vcmask 1044480   ;;  %s5900_s13 = smov 110   ;;  %s5901_s14 = smov 122   ;;  %s9185_s0 = inlined_call_operand.vmem [shape: f32[2,18,256], index: 0, kind: input, shape index: {}]   ;;  %s9186_s1 = inlined_call_operand.vmem [shape: f32[5,18], index: 1, kind: input, shape index: {}]   ;;  %s9187_s2 = inlined_call_operand.vmem [shape: f32[5,256], index: 2, kind: output, shape index: {0}]   ;;  %s9188_s3 = inlined_call_operand.vmem [shape: f32[5,245], index: 3, kind: output, shape index: {1}]  }
   0x1   :  { %v19_v0 = vld [vmem:[%s9185_s0 + $0x8] sm:$0xff]  ;;  %v21_v1 = vld [vmem:[%s9185_s0 + $0x18] sm:$0xff]  ;;  %v18_v2 = vld [vmem:[%s9185_s0] sm:$0xff]  ;;  %105 = vmatprep.mubr.f32.mxu1 %v9193_v3  ;;  %2753 = vmatprep.mubr.f32.mxu0 %v9193_v3  ;;  %s5902_s15 = smov 104   ;;  %s5903_s16 = smov 116   ;;  %vm1140_vm4 = vcmask 77824  }
   0x2   :  { %v35_v4 = vand.u32 4294901760, %v19_v0  ;;  %v39_v5 = vand.u32 4294901760, %v21_v1  ;;  %v20_v6 = vld [vmem:[%s9185_s0 + $0x10] sm:$0xff]  ;;  %v37_v7 = vand.u32 4294901760, %v18_v2  ;;  %v23_v8 = vld [vmem:[%s9185_s0 + $0x28] sm:$0x3] }
   0x3   :  { %v41_v9 = vand.u32 4294901760, %v20_v6  ;;  %v33_v10 = vsel %vm28_vm0, %v23_v8, 0  ;;  %v22_v11 = vld [vmem:[%s9185_s0 + $0x20] sm:$0x3]  ;;  %v4817_v53 = vld [vmem:[%s9185_s0 + $0x38] sm:$0xff]  ;;  %v4819_v54 = vld [vmem:[%s9185_s0 + $0x48] sm:$0xff] }
   0x4   :  { %v13_v12 = vld [vmem:[%s9186_s1] sm:$0x1f]  ;;  %v6044_v13 = vpack.c.bf16 %v39_v5, %v35_v4  ;;  %v118_v14 = vsub.f32 %v19_v0, %v35_v4  ;;  %v130_v15 = vsub.f32 %v21_v1, %v39_v5  ;;  %v6046_v16 = vsub.f32 %v18_v2, %v37_v7  ;;  %v4816_v55 = vld [vmem:[%s9185_s0 + $0x30] sm:$0xff]  ;;  %v4821_v60 = vld [vmem:[%s9185_s0 + $0x58] sm:$0x3]  ;;  %s5904_s17 = smov 92  }
   0x5   :  { %v6048_v17 = vpack.c.bf16 %v41_v9, %v37_v7  ;;  %v136_v18 = vsub.f32 %v20_v6, %v41_v9  ;;  %v6050_v19 = vand.u32 4294901760, %v33_v10  ;;  %v30_v20 = vsel %vm28_vm0, %v22_v11, 0  ;;  %v4818_v56 = vld [vmem:[%s9185_s0 + $0x40] sm:$0xff]  ;;  %v4820_v0 = vld [vmem:[%s9185_s0 + $0x50] sm:$0x3]  ;;  %s5905_s18 = smov 98  }
   0x6   :  { %5071 = vmatprep.subr.bf16.mxu1 %v6044_v13  ;;  %v6054_v21 = vand.u32 4294901760, %v30_v20  ;;  %v26_v22 = vsel %vm24_vm1, %v13_v12, 0  ;;  %v119_v23 = vand.u32 4294901760, %v118_v14  ;;  %v131_v24 = vand.u32 4294901760, %v130_v15  ;;  %s5906_s19 = smov 121   ;;  %s5907_s20 = smov 86  }
   0x7   :  { %5073 = vmatpush1.bf16.msra.mxu1 %v6048_v17  ;;  %v6058_v25 = vand.u32 4294901760, %v26_v22  ;;  %v125_v26 = vand.u32 4294901760, %v6046_v16  ;;  %v137_v27 = vand.u32 4294901760, %v136_v18  ;;  %v142_v28 = vsub.f32 %v33_v10, %v6050_v19  ;;  %s5908_s21 = smov 109   ;;  %s5909_s22 = smov 127  }
   0x8   :  { %44 = vmatprep.subr.mxu1 %v6050_v19  ;;  %v6064_v29 = vsub.f32 %v30_v20, %v6054_v21  ;;  %v120_v30 = vsub.f32 %v118_v14, %v119_v23  ;;  %v132_v31 = vsub.f32 %v130_v15, %v131_v24  ;;  %v5078_v50 = vpack.c.bf16 %v130_v15, %v118_v14  ;;  %s5910_s23 = smov 97   ;;  %s5911_s24 = smov 115  }
   0x9   :  { %v6067_v32 = vsub.f32 %v26_v22, %v6058_v25  ;;  %v126_v33 = vsub.f32 %v6046_v16, %v125_v26  ;;  %v138_v34 = vsub.f32 %v136_v18, %v137_v27  ;;  %v143_v35 = vand.u32 4294901760, %v142_v28  ;;  %s5912_s25 = smov 85   ;;  %s5913_s1 = smov 103  }
   0xa   :  { %v121_v36 = vand.u32 4294901760, %v120_v30  ;;  %v133_v37 = vand.u32 4294901760, %v132_v31  ;;  %v149_v38 = vand.u32 4294901760, %v6064_v29  ;;  %v5080_v51 = vpack.c.bf16 %v136_v18, %v6046_v16  ;;  %s5914_s26 = smov 126   ;;  %s5915_s27 = smov 91  }
   0xb   :  { %46 = vmatpush1.msra.mxu1 %v6054_v21  ;;  %v6073_v39 = vand.u32 4294901760, %v6067_v32  ;;  %v127_v40 = vand.u32 4294901760, %v126_v33  ;;  %v139_v41 = vand.u32 4294901760, %v138_v34  ;;  %v144_v42 = vsub.f32 %v142_v28, %v143_v35  ;;  %s5916_s28 = smov 114   ;;  %s5917_s29 = smov 120  }
   0xc   :  { %v5074_v43 = vpack.c.bf16 %v133_v37, %v121_v36  ;;  %v150_v46 = vsub.f32 %v6064_v29, %v149_v38  ;;  %v5086_v52 = vpack.c.bf16 %v131_v24, %v119_v23  ;;  %v5088_v57 = vpack.c.bf16 %v137_v27, %v125_v26  ;;  %s5918_s30 = smov 102   ;;  %s5919_s4 = smov 108  }
   0xd   :  { %v109_v44 = vsub.f32 %v6067_v32, %v6073_v39  ;;  %v5076_v45 = vpack.c.bf16 %v139_v41, %v127_v40  ;;  %v145_v48 = vand.u32 4294901760, %v144_v42  ;;  %v592_v58 = vand.u32 4294901760, %v4817_v53  ;;  %s5920_s5 = smov 90   ;;  %s5921_s6 = smov 96  }
   0xe   :  { %5075 = vmatprep.subr.bf16.mxu1 %v5074_v43  ;;  %v151_v49 = vand.u32 4294901760, %v150_v46  ;;  %v596_v59 = vand.u32 4294901760, %v4819_v54  ;;  %v594_v61 = vand.u32 4294901760, %v4816_v55  ;;  %v598_v62 = vand.u32 4294901760, %v4818_v56  ;;  %s5922_s7 = smov 119   ;;  %s5923_s8 = smov 84  }
   0xf   :  { %v6078_v47 = vand.u32 4294901760, %v109_v44  ;;  %v590_v63 = vsel %vm28_vm0, %v4821_v60, 0  ;;  %v6113_v1 = vsub.f32 %v4817_v53, %v592_v58  ;;  %v587_v7 = vsel %vm28_vm0, %v4820_v0, 0  ;;  %s5924_s9 = smov 107   ;;  %s5925_s0 = smov 125  }
  0x10   :  { %v6115_v2 = vsub.f32 %v4819_v54, %v596_v59  ;;  %v6117_v4 = vsub.f32 %v4816_v55, %v594_v61  ;;  %v6119_v5 = vsub.f32 %v4818_v56, %v598_v62  ;;  %v6121_v6 = vand.u32 4294901760, %v590_v63  ;;  %s5926_s10 = smov 95   ;;  %s5927_s11 = smov 113  }
  0x11   :  { %111 = vmatmul.mubr.f32.vlgmr.msra.gmra.mrb[0].mxu1 %v6078_v47  ;;  %v676_v8 = vand.u32 4294901760, %v6113_v1  ;;  %v6127_v10 = vand.u32 4294901760, %v587_v7  ;;  %v5096_v24 = vpack.c.bf16 %v598_v62, %v594_v61  ;;  %v5899_v40 = vmov 1.0   ;;  %s5928_s12 = smov 83  }
  0x12   :  { %5077 = vmatpush1.bf16.msra.mxu1 %v5076_v45  ;;  %211 = vmatprep.mubr.f32.mxu1 %v9193_v3  ;;  %v688_v9 = vand.u32 4294901760, %v6115_v2  ;;  %v682_v11 = vand.u32 4294901760, %v6117_v4  ;;  %v694_v12 = vand.u32 4294901760, %v6119_v5  ;;  %v699_v14 = vsub.f32 %v590_v63, %v6121_v6 }
  0x13   :  { %146 = vmatprep.subr.mxu1 %v145_v48  ;;  %v677_v15 = vsub.f32 %v6113_v1, %v676_v8  ;;  %v705_v18 = vsub.f32 %v587_v7, %v6127_v10  ;;  %v5104_v36 = vpack.c.bf16 %v6119_v5, %v6117_v4  ;;  %vm1147_vm5 = vcmask 159824  }
  0x14   :  { %v689_v16 = vsub.f32 %v6115_v2, %v688_v9  ;;  %v683_v20 = vsub.f32 %v6117_v4, %v682_v11  ;;  %v695_v22 = vsub.f32 %v6119_v5, %v694_v12  ;;  %v700_v23 = vand.u32 4294901760, %v699_v14 }
  0x15   :  { %v5110_v37 = vpack.c.bf16 %v688_v9, %v676_v8  ;;  %vm1154_vm6 = vcmask 241824   ;;  %vm9200_vm7 = vcmask 323824   ;;  %vm1168_vm8 = vcmask 405824  }
  0x16   :  { %152 = vmatpush1.msra.mxu1 %v151_v49  ;;  %v690_v26 = vand.u32 4294901760, %v689_v16  ;;  %v684_v27 = vand.u32 4294901760, %v683_v20  ;;  %vm1175_vm9 = vcmask 487824   ;;  %vm1182_vm10 = vcmask 569824  }
  0x17   :  { %5079 = vmatprep.subr.bf16.mxu1 %v5078_v50  ;;  %vm9191_vm11 = vcmask 651824   ;;  %vm1196_vm12 = vcmask 733824   ;;  %vm1203_vm13 = vcmask 815824   ;;  %vm1266_vm14 = vcmask 897824  }
  0x18   :  { %vm1273_vm15 = vcmask 979824   ;;  %vm9190_vm0 = vcmask 12288   ;;  %vm9197_vm1 = vcmask 1045440  }
  0x19   :  { %213 = vmatmul.mubr.f32.vlgmr.msra.gmra.mrb[0].mxu1 %v6058_v25 }
  0x1a   :  { %5081 = vmatpush1.bf16.msra.mxu1 %v5080_v51  ;;  %295 = vmatprep.mubr.f32.mxu1 %v9193_v3 }
  0x1b   :  { %233 = vmatprep.subr.mxu1 %v142_v28  ;;  %v706_v28 = vand.u32 4294901760, %v705_v18 }
  0x1d   :  { %v707_v33 = vsub.f32 %v705_v18, %v706_v28 }
  0x1e   :  { %236 = vmatpush1.msra.mxu1 %v6064_v29  ;;  %v701_v29 = vsub.f32 %v699_v14, %v700_v23 }
  0x1f   :  { %5083 = vmatprep.subr.bf16.mxu1 %v6044_v13 }
  0x20   :  { %v702_v34 = vand.u32 4294901760, %v701_v29 }
  0x21   :  { %298 = vmatmul.mubr.f32.vlgmr.msra.gmra.mrb[0].mxu1 %v6067_v32 }
  0x22   :  { %5085 = vmatpush1.bf16.msra.mxu1 %v6048_v17  ;;  %374 = vmatprep.mubr.f32.mxu1 %v9193_v3 }
  0x23   :  { %313 = vmatprep.subr.mxu1 %v6050_v19 }
  0x26   :  { %315 = vmatpush1.msra.mxu1 %v6054_v21 }
  0x27   :  { %5087 = vmatprep.subr.bf16.mxu1 %v5086_v52 }
  0x29   :  { %378 = vmatmul.mubr.f32.vlgmr.msra.gmra.mrb[0].mxu1 %v6073_v39 }
  0x2a   :  { %5089 = vmatpush1.bf16.msra.mxu1 %v5088_v57  ;;  %466 = vmatprep.mubr.f32.mxu1 %v9193_v3 }
  0x2b   :  { %403 = vmatprep.subr.mxu1 %v143_v35  ;;  %v5102_v35 = vpack.c.bf16 %v6115_v2, %v6113_v1 }
  0x2e   :  { %407 = vmatpush1.msra.mxu1 %v149_v38  ;;  %v5112_v38 = vpack.c.bf16 %v694_v12, %v682_v11 }
  0x2f   :  { %5091 = vmatprep.subr.bf16.mxu1 %v6044_v13  ;;  %v5094_v13 = vpack.c.bf16 %v596_v59, %v592_v58 }
  0x31   :  { %468 = vmatmul.mubr.f32.vlgmr.msra.gmra.mrb[0].mxu1 %v6058_v25 }
  0x32   :  { %5093 = vmatpush1.bf16.msra.mxu1 %v6048_v17  ;;  %544 = vmatprep.mubr.f32.mxu1 %v9193_v3  ;;  %v678_v17 = vand.u32 4294901760, %v677_v15 }
  0x33   :  { %483 = vmatprep.subr.mxu1 %v6050_v19  ;;  %v696_v19 = vand.u32 4294901760, %v695_v22 }
  0x34   :  { %v5098_v30 = vpack.c.bf16 %v690_v26, %v678_v17 }
  0x35   :  { %v5100_v31 = vpack.c.bf16 %v696_v19, %v684_v27 }
  0x36   :  { %485 = vmatpush1.msra.mxu1 %v6054_v21  ;;  %v708_v21 = vand.u32 4294901760, %v707_v33 }
  0x37   :  { %5095 = vmatprep.subr.bf16.mxu1 %v5094_v13 }
  0x39   :  { %546 = vmatmul.mubr.f32.vlgmr.msra.gmra.mrb[0].mxu1 %v6058_v25 }
  0x3a   :  { %5097 = vmatpush1.bf16.msra.mxu1 %v5096_v24  ;;  %662 = vmatprep.mubr.f32.mxu1 %v9193_v3 }
  0x3b   :  { %601 = vmatprep.subr.mxu1 %v6121_v6 }
  0x3e   :  { %603 = vmatpush1.msra.mxu1 %v6127_v10 }
  0x3f   :  { %668 = vmatmul.mubr.f32.vlgmr.msra.gmra.mrb[2].mxu1 %v6078_v47  ;;  %5099 = vmatprep.subr.bf16.mxu1 %v5098_v30 }
  0x40   :  { %5101 = vmatpush1.bf16.msra.mxu1 %v5100_v31  ;;  %768 = vmatprep.mubr.f32.mxu1 %v9193_v3 }
  0x41   :  { %703 = vmatprep.subr.mxu1 %v702_v34 }
  0x44   :  { %709 = vmatpush1.msra.mxu1 %v708_v21 }
  0x45   :  { %5103 = vmatprep.subr.bf16.mxu1 %v5102_v35 }
  0x47   :  { %770 = vmatmul.mubr.f32.vlgmr.msra.gmra.mrb[2].mxu1 %v6058_v25 }
  0x48   :  { %5105 = vmatpush1.bf16.msra.mxu1 %v5104_v36  ;;  %852 = vmatprep.mubr.f32.mxu1 %v9193_v3 }
  0x49   :  { %790 = vmatprep.subr.mxu1 %v699_v14 }
  0x4c   :  { %793 = vmatpush1.msra.mxu1 %v705_v18 }
  0x4d   :  { %5107 = vmatprep.subr.bf16.mxu1 %v5094_v13 }
  0x4f   :  { %855 = vmatmul.mubr.f32.vlgmr.msra.gmra.mrb[2].mxu1 %v6067_v32  ;;  %v9192_v32 = vlaneseq }
  0x50   :  { %5109 = vmatpush1.bf16.msra.mxu1 %v5096_v24  ;;  %931 = vmatprep.mubr.f32.mxu1 %v9193_v3 }
  0x51   :  { %870 = vmatprep.subr.mxu1 %v6121_v6 }
  0x54   :  { %872 = vmatpush1.msra.mxu1 %v6127_v10 }
  0x55   :  { %5111 = vmatprep.subr.bf16.mxu1 %v5110_v37 }
  0x57   :  { %935 = vmatmul.mubr.f32.vlgmr.msra.gmra.mrb[2].mxu1 %v6073_v39  ;;  %v6167_v39 = vshrl.u32 %v9192_v32, 7 }
  0x58   :  { %5113 = vmatpush1.bf16.msra.mxu1 %v5112_v38  ;;  %1023 = vmatprep.mubr.f32.mxu1 %v9193_v3 }
  0x59   :  { %960 = vmatprep.subr.mxu1 %v700_v23  ;;  %9501 = vst [vmem:[#allocation6_spill] sm:$0xff] %v6167_v39  ;;  %vm16_vm2 = vcmp.lt.s32.totalorder %v6167_v39, 3 }
  0x5a   :  { %v17_v41 = vsel %vm16_vm2, 0.5, %v5899_v40  ;;  %vm1306_vm2 = vcmask 815104  }
  0x5c   :  { %964 = vmatpush1.msra.mxu1 %v706_v28 }
  0x5d   :  { %5115 = vmatprep.subr.bf16.mxu1 %v5094_v13 }
  0x5f   :  { %1025 = vmatmul.mubr.f32.vlgmr.msra.gmra.mrb[2].mxu1 %v6058_v25 }
  0x60   :  { %5117 = vmatpush1.bf16.msra.mxu1 %v5096_v24  ;;  %1101 = vmatprep.mubr.f32.mxu1 %v9193_v3 }
  0x61   :  { %1040 = vmatprep.subr.mxu1 %v6121_v6 }
  0x64   :  { %1042 = vmatpush1.msra.mxu1 %v6127_v10 }
  0x67   :  { %1103 = vmatmul.mubr.f32.vlgmr.msra.gmra.mrb[2].mxu1 %v6058_v25 }
  0x68   :  { %2522 = vmatprep.mubr.f32.mxu1 %v9193_v3 }
 0x10c   :  { %v547_v42 = vpop.f32.mrb[0].mxu1 }
 0x10d   :  { %v552_v43 = vmax.f32 %v547_v42, 0.0  ;;  %v549_v44 = vpop.f32.mrb[1].mxu1 }
 0x10e   :  { %v553_v45 = vmax.f32 %v549_v44, 0.0 }
 0x10f   :  { %v554_v46 = vmul.f32 %v552_v43, %v17_v41 }
 0x110   :  { %v555_v47 = vmul.f32 %v553_v45, %v17_v41 }
 0x111   :  { %v557_v48 = vsel %vm9189_vm3, %v554_v46, 0.0 }
 0x112   :  { %v558_v25 = vrot.slane %v557_v48, 4  ;;  %v564_v49 = vsel %vm9189_vm3, %v555_v47, 0.0 }
 0x113   :  { %v565_v50 = vrot.slane %v564_v49, 4 }
 0x114   :  { %v559_v51 = vadd.f32 %v558_v25, %v557_v48 }
 0x115   :  { %v566_v52 = vadd.f32 %v565_v50, %v564_v49 }
 0x116   :  { %v560_v53 = vrot.slane %v559_v51, 2 }
 0x117   :  { %v567_v54 = vrot.slane %v566_v52, 2 }
 0x118   :  { %v561_v55 = vadd.f32 %v560_v53, %v559_v51 }
 0x119   :  { %v568_v56 = vadd.f32 %v567_v54, %v566_v52 }
 0x11a   :  { %v562_v57 = vrot.slane %v561_v55, 1 }
 0x11b   :  { %v569_v58 = vrot.slane %v568_v56, 1 }
 0x11c   :  { %v563_v59 = vadd.f32 %v562_v57, %v561_v55 }
 0x11d   :  { %v570_v60 = vadd.f32 %v569_v58, %v568_v56 }
 0x11e   :  { %v571_v61 = vadd.f32 2.220446e-16, %v563_v59 }
 0x11f   :  { %v572_v62 = vadd.f32 2.220446e-16, %v570_v60 }
 0x120   :  { %5890 = vrcp.f32 %v571_v61 }
 0x121   :  { %5892 = vrcp.f32 %v572_v62 }
 0x12a   :  { %v5891_v63 = vpop.eup %5890 }
 0x12b   :  { %v5893_v0 = vpop.eup %5892  ;;  %v574_v1 = vmul.f32 %v5891_v63, %v554_v46 }
 0x12c   :  { %v576_v2 = vmul.f32 %v5893_v0, %v555_v47 }
 0x12d   :  { %577 = vst [vmem:[%s9187_s2] sm:$0x1f] %v574_v1 }
 0x12e   :  { %578 = vst [vmem:[%s9187_s2 + $0x8] sm:$0x1f] %v576_v2 }
 0x13a   :  { %v1104_v4 = vpop.f32.mrb[2].mxu1 }
 0x13b   :  { %v1109_v5 = vmax.f32 %v1104_v4, 0.0  ;;  %v1106_v6 = vpop.f32.mrb[3].mxu1 }
 0x13c   :  { %v1110_v7 = vmax.f32 %v1106_v6, 0.0 }
 0x13d   :  { %v1111_v8 = vmul.f32 %v1109_v5, %v17_v41 }
 0x13e   :  { %v1112_v9 = vmul.f32 %v1110_v7, %v17_v41 }
 0x13f   :  { %v1113_v10 = vsel %vm9189_vm3, %v1111_v8, 0.0 }
 0x140   :  { %v1114_v11 = vrot.slane %v1113_v10, 4  ;;  %v1120_v12 = vsel %vm9189_vm3, %v1112_v9, 0.0  ;;  %vm9201_vm3 = vcmask 818176  }
 0x141   :  { %v1121_v14 = vrot.slane %v1120_v12, 4 }
 0x142   :  { %v1115_v13 = vadd.f32 %v1114_v11, %v1113_v10 }
 0x143   :  { %v1122_v15 = vadd.f32 %v1121_v14, %v1120_v12 }
 0x144   :  { %v1116_v16 = vrot.slane %v1115_v13, 2 }
 0x145   :  { %v1123_v18 = vrot.slane %v1122_v15, 2 }
 0x146   :  { %v1117_v20 = vadd.f32 %v1116_v16, %v1115_v13 }
 0x147   :  { %v1124_v22 = vadd.f32 %v1123_v18, %v1122_v15 }
 0x148   :  { %v1118_v23 = vrot.slane %v1117_v20, 1 }
 0x149   :  { %v1125_v24 = vrot.slane %v1124_v22, 1 }
 0x14a   :  { %v1119_v17 = vadd.f32 %v1118_v23, %v1117_v20 }
 0x14b   :  { %v1126_v26 = vadd.f32 %v1125_v24, %v1124_v22 }
 0x14c   :  { %v1127_v27 = vadd.f32 2.220446e-16, %v1119_v17 }
 0x14d   :  { %v1128_v19 = vadd.f32 2.220446e-16, %v1126_v26 }
 0x14e   :  { %5894 = vrcp.f32 %v1127_v27 }
 0x14f   :  { %5896 = vrcp.f32 %v1128_v19 }
 0x158   :  { %v5895_v28 = vpop.eup %5894 }
 0x159   :  { %v5897_v29 = vpop.eup %5896  ;;  %v1130_v30 = vmul.f32 %v5895_v28, %v1111_v8 }
 0x15a   :  { %v1132_v31 = vmul.f32 %v5897_v29, %v1112_v9 }
 0x15b   :  { %1133 = vst [vmem:[#allocation2] sm:$0x1f] %v1130_v30 }
 0x15c   :  { %1134 = vst [vmem:[#allocation2 + $0x8] sm:$0x1f] %v1132_v31 }
 0x162   :  { %v1219_v33 = vld [vmem:[#allocation2] sm:$0x1f] }
 0x163   :  { %v1207_v34 = vld [vmem:[#allocation2] sm:$0x1f]  ;;  %1221 = vrot.lane.b32.xlu1 %v1219_v33, %s5900_s13  ;;  %v1249_v11 = vld [vmem:[#allocation2 + $0x8] sm:$0x1f] }
 0x164   :  { %1209 = vrot.lane.b32.xlu0 %v1207_v34, %s5901_s14  ;;  %v1225_v21 = vld [vmem:[#allocation2] sm:$0x1f]  ;;  %v1255_v12 = vld [vmem:[#allocation2 + $0x8] sm:$0x1f] }
 0x165   :  { %v1213_v35 = vld [vmem:[#allocation2] sm:$0x1f]  ;;  %v1261_v14 = vld [vmem:[#allocation2 + $0x8] sm:$0x1f] }
 0x166   :  { %v1237_v36 = vld [vmem:[#allocation2] sm:$0x1f]  ;;  %v1268_v13 = vld [vmem:[#allocation2 + $0x8] sm:$0x1f] }
 0x167   :  { %1227 = vrot.lane.b32.xlu1 %v1225_v21, %s5902_s15  ;;  %v1231_v37 = vld [vmem:[#allocation2] sm:$0x1f]  ;;  %v1275_v15 = vld [vmem:[#allocation2 + $0x8] sm:$0x1f] }
 0x168   :  { %1215 = vrot.lane.b32.xlu0 %v1213_v35, %s5903_s16  ;;  %v1374_v38 = vld [vmem:[#allocation2] sm:$0x1f]  ;;  %v1422_v24 = vld [vmem:[#allocation2 + $0x8] sm:$0x1f] }
 0x169   :  { %v1243_v40 = vld [vmem:[#allocation2] sm:$0x1f]  ;;  %v1416_v17 = vld [vmem:[#allocation2 + $0x8] sm:$0x1f] }
 0x16a   :  { %v1386_v41 = vld [vmem:[#allocation2] sm:$0x1f]  ;;  %v1434_v26 = vld [vmem:[#allocation2 + $0x8] sm:$0x1f] }
 0x16b   :  { %1239 = vrot.lane.b32.xlu1 %v1237_v36, %s5904_s17  ;;  %v1368_v42 = vld [vmem:[#allocation2] sm:$0x1f]  ;;  %v1428_v27 = vld [vmem:[#allocation2 + $0x8] sm:$0x1f] }
 0x16c   :  { %1233 = vrot.lane.b32.xlu0 %v1231_v37, %s5905_s18  ;;  %v1205_v43 = vld [vmem:[#allocation2] sm:$0x1f]  ;;  %v1440_v28 = vld [vmem:[#allocation2 + $0x8] sm:$0x1f] }
 0x16d   :  { %v1398_v44 = vld [vmem:[#allocation2] sm:$0x1f]  ;;  %1206 = vst.msk [vmem:[#allocation4] sm:$0x1f] %vm1140_vm4, %v1205_v43  ;;  %v1571_v29 = vld [vmem:[#allocation2 + $0x8] sm:$0x1f] }
 0x16e   :  { %v1380_v45 = vld [vmem:[#allocation2] sm:$0x1f]  ;;  %v1583_v34 = vld [vmem:[#allocation2 + $0x8] sm:$0x1f] }
 0x16f   :  { %1376 = vrot.lane.b32.xlu1 %v1374_v38, %s5906_s19  ;;  %v1410_v46 = vld [vmem:[#allocation2] sm:$0x1f]  ;;  %s5929_s19 = smov 101  }
 0x170   :  { %1245 = vrot.lane.b32.xlu0 %v1243_v40, %s5907_s20  ;;  %v1392_v47 = vld [vmem:[#allocation2] sm:$0x1f] }
 0x171   :  { %v1523_v48 = vld [vmem:[#allocation2] sm:$0x1f] }
 0x172   :  { %v1404_v25 = vld [vmem:[#allocation2] sm:$0x1f] }
 0x173   :  { %1388 = vrot.lane.b32.xlu1 %v1386_v41, %s5908_s21  ;;  %v1535_v49 = vld [vmem:[#allocation2] sm:$0x1f]  ;;  %s5930_s21 = smov 124   ;;  %v1577_v41 = vld [vmem:[#allocation2 + $0x8] sm:$0x1f] }
 0x174   :  { %1370 = vrot.lane.b32.xlu0 %v1368_v42, %s5909_s22  ;;  %v1529_v50 = vld [vmem:[#allocation2] sm:$0x1f]  ;;  %s5931_s22 = smov 89  }
 0x175   :  { %v1547_v51 = vld [vmem:[#allocation2] sm:$0x1f] }
 0x176   :  { %v1541_v52 = vld [vmem:[#allocation2] sm:$0x1f] }
 0x177   :  { %1400 = vrot.lane.b32.xlu1 %v1398_v44, %s5910_s23  ;;  %v1559_v53 = vld [vmem:[#allocation2] sm:$0x1f]  ;;  %s5932_s23 = smov 112  }
 0x178   :  { %1382 = vrot.lane.b32.xlu0 %v1380_v45, %s5911_s24  ;;  %v1553_v54 = vld [vmem:[#allocation2] sm:$0x1f]  ;;  %s5933_s24 = smov 118   ;;  %v1589_v45 = vld [vmem:[#allocation2 + $0x8] sm:$0x1f] }
 0x179   :  { %v1684_v55 = vld [vmem:[#allocation2] sm:$0x1f] }
 0x17a   :  { %v1565_v56 = vld [vmem:[#allocation2] sm:$0x1f] }
 0x17b   :  { %1412 = vrot.lane.b32.xlu1 %v1410_v46, %s5912_s25  ;;  %v1696_v57 = vld [vmem:[#allocation2] sm:$0x1f]  ;;  %s5934_s25 = smov 100   ;;  %v1595_v46 = vld [vmem:[#allocation2 + $0x8] sm:$0x1f] }
 0x17c   :  { %1394 = vrot.lane.b32.xlu0 %v1392_v47, %s5913_s1  ;;  %v1678_v58 = vld [vmem:[#allocation2] sm:$0x1f]  ;;  %s5935_s1 = smov 106  }
 0x17d   :  { %v1708_v59 = vld [vmem:[#allocation2] sm:$0x1f] }
 0x17e   :  { %v1690_v60 = vld [vmem:[#allocation2] sm:$0x1f] }
 0x17f   :  { %1525 = vrot.lane.b32.xlu1 %v1523_v48, %s5914_s26  ;;  %v1720_v61 = vld [vmem:[#allocation2] sm:$0x1f]  ;;  %s5936_s26 = smov 88  }
 0x180   :  { %1406 = vrot.lane.b32.xlu0 %v1404_v25, %s5915_s27  ;;  %v1702_v62 = vld [vmem:[#allocation2] sm:$0x1f]  ;;  %s5937_s27 = smov 94  }
 0x181   :  { %v1833_v63 = vld [vmem:[#allocation2] sm:$0x1f] }
 0x182   :  { %v1714_v0 = vld [vmem:[#allocation2] sm:$0x1f] }
 0x183   :  { %1537 = vrot.lane.b32.xlu1 %v1535_v49, %s5916_s28  ;;  %v1845_v1 = vld [vmem:[#allocation2] sm:$0x1f]  ;;  %s5938_s28 = smov 123  }
 0x184   :  { %1531 = vrot.lane.b32.xlu0 %v1529_v50, %s5917_s29  ;;  %v1839_v2 = vld [vmem:[#allocation2] sm:$0x1f]  ;;  %s5939_s29 = smov 82  }
 0x185   :  { %v1857_v4 = vld [vmem:[#allocation2] sm:$0x1f] }
 0x186   :  { %v1851_v5 = vld [vmem:[#allocation2] sm:$0x1f] }
 0x187   :  { %1549 = vrot.lane.b32.xlu1 %v1547_v51, %s5918_s30  ;;  %v1869_v6 = vld [vmem:[#allocation2] sm:$0x1f]  ;;  %s5940_s30 = smov 117  }
 0x188   :  { %1543 = vrot.lane.b32.xlu0 %v1541_v52, %s5919_s4  ;;  %v1863_v7 = vld [vmem:[#allocation2] sm:$0x1f] }
 0x189   :  { %v1988_v8 = vld [vmem:[#allocation2] sm:$0x1f] }
 0x18a   :  { %v1875_v9 = vld [vmem:[#allocation2] sm:$0x1f] }
 0x18b   :  { %1561 = vrot.lane.b32.xlu1 %v1559_v53, %s5920_s5  ;;  %v1994_v10 = vld [vmem:[#allocation2] sm:$0x1f]  ;;  %s5941_s5 = smov 80   ;;  %v1732_v53 = vld [vmem:[#allocation2 + $0x8] sm:$0x1f] }
 0x18c   :  { %1555 = vrot.lane.b32.xlu0 %v1553_v54, %s5921_s6  ;;  %s5942_s6 = smov 74   ;;  %v2006_v16 = vld [vmem:[#allocation2] sm:$0x1f] }
 0x18d   :  { %v2000_v18 = vld [vmem:[#allocation2] sm:$0x1f] }
 0x18e   :  { %v2018_v20 = vld [vmem:[#allocation2] sm:$0x1f] }
 0x18f   :  { %1686 = vrot.lane.b32.xlu1 %v1684_v55, %s5922_s7  ;;  %s5943_s7 = smov 68   ;;  %v2012_v22 = vld [vmem:[#allocation2] sm:$0x1f] }
 0x190   :  { %1567 = vrot.lane.b32.xlu0 %v1565_v56, %s5923_s8  ;;  %s5944_s8 = smov 62   ;;  %v2024_v23 = vld [vmem:[#allocation2] sm:$0x1f] }
 0x191   :  { %v2149_v19 = vld [vmem:[#allocation2] sm:$0x1f] }
 0x192   :  { %v2030_v33 = vld [vmem:[#allocation2] sm:$0x1f] }
 0x193   :  { %1698 = vrot.lane.b32.xlu1 %v1696_v57, %s5924_s9  ;;  %s5945_s9 = smov 56   ;;  %v2143_v36 = vld [vmem:[#allocation2] sm:$0x1f]  ;;  %v1744_v57 = vld [vmem:[#allocation2 + $0x8] sm:$0x1f] }
 0x194   :  { %1680 = vrot.lane.b32.xlu0 %v1678_v58, %s5925_s0  ;;  %s5946_s0 = smov 105   ;;  %v2161_v37 = vld [vmem:[#allocation2] sm:$0x1f] }
 0x195   :  { %v2173_v42 = vld [vmem:[#allocation2] sm:$0x1f] }
 0x196   :  { %v2155_v25 = vld [vmem:[#allocation2] sm:$0x1f] }
 0x197   :  { %1710 = vrot.lane.b32.xlu1 %v1708_v59, %s5926_s10  ;;  %s5947_s10 = smov 111   ;;  %v2185_v49 = vld [vmem:[#allocation2] sm:$0x1f] }
 0x198   :  { %1692 = vrot.lane.b32.xlu0 %v1690_v60, %s5927_s11  ;;  %s5948_s11 = smov 93   ;;  %v2167_v52 = vld [vmem:[#allocation2] sm:$0x1f]  ;;  %v1726_v60 = vld [vmem:[#allocation2 + $0x8] sm:$0x1f] }
 0x199   :  { %v2179_v56 = vld [vmem:[#allocation2] sm:$0x1f] }
 0x19b   :  { %1722 = vrot.lane.b32.xlu1 %v1720_v61, %s5928_s12  ;;  %s5949_s12 = smov 99   ;;  %v1881_v61 = vld [vmem:[#allocation2 + $0x8] sm:$0x1f] }
 0x19c   :  { %1704 = vrot.lane.b32.xlu0 %v1702_v62, %s5929_s19  ;;  %s5950_s19 = smov 87  }
 0x19f   :  { %1835 = vrot.lane.b32.xlu1 %v1833_v63, %s5930_s21  ;;  %s5951_s21 = smov 73  }
 0x1a0   :  { %1716 = vrot.lane.b32.xlu0 %v1714_v0, %s5931_s22  ;;  %s5952_s22 = smov 79   ;;  %v1738_v0 = vld [vmem:[#allocation2 + $0x8] sm:$0x1f] }
 0x1a3   :  { %1847 = vrot.lane.b32.xlu1 %v1845_v1, %s5932_s23  ;;  %s5953_s23 = smov 61   ;;  %v1893_v1 = vld [vmem:[#allocation2 + $0x8] sm:$0x1f] }
 0x1a4   :  { %1841 = vrot.lane.b32.xlu0 %v1839_v2, %s5933_s24 }
 0x1a7   :  { %1859 = vrot.lane.b32.xlu1 %v1857_v4, %s5934_s25  ;;  %s5954_s25 = smov 67  }
 0x1a8   :  { %1853 = vrot.lane.b32.xlu0 %v1851_v5, %s5935_s1  ;;  %s5955_s1 = smov 55   ;;  %v1750_v5 = vld [vmem:[#allocation2 + $0x8] sm:$0x1f] }
 0x1ab   :  { %1871 = vrot.lane.b32.xlu1 %v1869_v6, %s5936_s26  ;;  %v1905_v6 = vld [vmem:[#allocation2 + $0x8] sm:$0x1f] }
 0x1ac   :  { %1865 = vrot.lane.b32.xlu0 %v1863_v7, %s5937_s27  ;;  %s5956_s27 = smov 78  }
 0x1af   :  { %1990 = vrot.lane.b32.xlu1 %v1988_v8, %s5938_s28  ;;  %s5957_s28 = smov 81  }
 0x1b0   :  { %1877 = vrot.lane.b32.xlu0 %v1875_v9, %s5939_s29  ;;  %s5958_s29 = smov 66   ;;  %v1887_v9 = vld [vmem:[#allocation2 + $0x8] sm:$0x1f] }
 0x1b3   :  { %1251 = vrot.lane.b32.xlu1 %v1249_v11, %s5941_s5 }
 0x1b4   :  { %1996 = vrot.lane.b32.xlu0 %v1994_v10, %s5940_s30  ;;  %s5964_s30 = smov 77   ;;  %v1291_v10 = vld [vmem:[#allocation2 + $0x8] sm:$0x1f] }
 0x1b7   :  { %1263 = vrot.lane.b32.xlu1 %v1261_v14, %s5943_s7  ;;  %v1899_v14 = vld [vmem:[#allocation2 + $0x8] sm:$0x1f] }
 0x1b8   :  { %1257 = vrot.lane.b32.xlu0 %v1255_v12, %s5942_s6 }
 0x1bb   :  { %1277 = vrot.lane.b32.xlu1 %v1275_v15, %s5945_s9 }
 0x1bc   :  { %1270 = vrot.lane.b32.xlu0 %v1268_v13, %s5944_s8  ;;  %v1447_v13 = vld [vmem:[#allocation2 + $0x8] sm:$0x1f] }
 0x1bf   :  { %2002 = vrot.lane.b32.xlu1 %v2000_v18, %s5947_s10  ;;  %s5968_s10 = smov 53   ;;  %v1284_v18 = vld [vmem:[#allocation2 + $0x8] sm:$0x1f] }
 0x1c0   :  { %2008 = vrot.lane.b32.xlu0 %v2006_v16, %s5946_s0  ;;  %s5967_s0 = smov 64  }
 0x1c3   :  { %2014 = vrot.lane.b32.xlu1 %v2012_v22, %s5949_s12  ;;  %s5970_s12 = smov 70  }
 0x1c4   :  { %2020 = vrot.lane.b32.xlu0 %v2018_v20, %s5948_s11  ;;  %s5969_s11 = smov 52   ;;  %v1453_v20 = vld [vmem:[#allocation2 + $0x8] sm:$0x1f] }
 0x1c7   :  { %1424 = vrot.lane.b32.xlu1 %v1422_v24, %s5951_s21  ;;  %s5972_s21 = smov 58   ;;  %v1298_v24 = vld [vmem:[#allocation2 + $0x8] sm:$0x1f] }
 0x1c8   :  { %2026 = vrot.lane.b32.xlu0 %v2024_v23, %s5950_s19  ;;  %s5971_s19 = smov 44  }
 0x1cb   :  { %1436 = vrot.lane.b32.xlu1 %v1434_v26, %s5953_s23  ;;  %s5974_s23 = smov 50  }
 0x1cc   :  { %1418 = vrot.lane.b32.xlu0 %v1416_v17, %s5952_s22  ;;  %s5973_s22 = smov 49   ;;  %v1459_v17 = vld [vmem:[#allocation2 + $0x8] sm:$0x1f] }
 0x1cf   :  { %2151 = vrot.lane.b32.xlu1 %v2149_v19, %s5903_s16  ;;  %s5959_s16 = smov 72   ;;  %v2036_v19 = vld [vmem:[#allocation2 + $0x8] sm:$0x1f] }
 0x1d0   :  { %1430 = vrot.lane.b32.xlu0 %v1428_v27, %s5954_s25  ;;  %s5975_s25 = smov 43  }
 0x1d3   :  { %1573 = vrot.lane.b32.xlu1 %v1571_v29, %s5956_s27 }
 0x1d4   :  { %1442 = vrot.lane.b32.xlu0 %v1440_v28, %s5955_s1  ;;  %s5976_s1 = smov 38   ;;  %v2042_v28 = vld [vmem:[#allocation2 + $0x8] sm:$0x1f] }
 0x1d5   :  { %v1222_v30 = vpop.permute.xlu1 %1221 }
 0x1d6   :  { %v1210_v31 = vpop.permute.xlu0 %1209 }
 0x1d7   :  { %1212 = vst.msk [vmem:[#allocation4] sm:$0x1f] %vm1147_vm5, %v1210_v31  ;;  %1585 = vrot.lane.b32.xlu1 %v1583_v34, %s5958_s29  ;;  %s5978_s29 = smov 75   ;;  %v2048_v31 = vld [vmem:[#allocation2 + $0x8] sm:$0x1f]  ;;  %v9195_v34 = vmov 0.0|0.0  }
 0x1d8   :  { %2032 = vrot.lane.b32.xlu0 %v2030_v33, %s5957_s28  ;;  %s5977_s28 = smov 37   ;;  %v2054_v33 = vld [vmem:[#allocation2 + $0x8] sm:$0x1f]  ;;  %5118 = vmatprep.subr.bf16.mxu1 %v9195_v34 }
 0x1d9   :  { %v1228_v21 = vpop.permute.xlu1 %1227  ;;  %5163 = vmatprep.subr.bf16.mxu0 %v9195_v34 }
 0x1da   :  { %v1216_v35 = vpop.permute.xlu0 %1215 }
 0x1db   :  { %1218 = vst.msk [vmem:[#allocation4] sm:$0x1f] %vm1154_vm6, %v1216_v35  ;;  %2163 = vrot.lane.b32.xlu1 %v2161_v37, %s5902_s15  ;;  %s5961_s15 = smov 54   ;;  %v1602_v37 = vld [vmem:[#allocation2 + $0x8] sm:$0x1f] }
 0x1dc   :  { %1224 = vst.msk [vmem:[#allocation4] sm:$0x1f] %vm9200_vm7, %v1222_v30  ;;  %2145 = vrot.lane.b32.xlu0 %v2143_v36, %s5901_s14  ;;  %s5960_s14 = smov 60   ;;  %v2060_v36 = vld [vmem:[#allocation2 + $0x8] sm:$0x1f] }
 0x1dd   :  { %1230 = vst.msk [vmem:[#allocation4] sm:$0x1f] %vm1168_vm8, %v1228_v21  ;;  %v1240_v38 = vpop.permute.xlu1 %1239 }
 0x1de   :  { %v1234_v40 = vpop.permute.xlu0 %1233 }
 0x1df   :  { %1236 = vst.msk [vmem:[#allocation4] sm:$0x1f] %vm1175_vm9, %v1234_v40  ;;  %2175 = vrot.lane.b32.xlu1 %v2173_v42, %s5904_s17  ;;  %s5962_s17 = smov 71   ;;  %v1614_v42 = vld [vmem:[#allocation2 + $0x8] sm:$0x1f] }
 0x1e0   :  { %1579 = vrot.lane.b32.xlu0 %v1577_v41, %s5959_s16  ;;  %1242 = vst.msk [vmem:[#allocation4] sm:$0x1f] %vm1182_vm10, %v1240_v38  ;;  %s5979_s16 = smov 69   ;;  %v1608_v41 = vld [vmem:[#allocation2 + $0x8] sm:$0x1f] }
 0x1e1   :  { %v6207_v43 = vpop.permute.xlu1 %1376 }
 0x1e2   :  { %v1246_v44 = vpop.permute.xlu0 %1245 }
 0x1e3   :  { %1248 = vst.msk [vmem:[#allocation4] sm:$0x1f] %vm9191_vm11, %v1246_v44  ;;  %1597 = vrot.lane.b32.xlu1 %v1595_v46, %s5961_s15  ;;  %s5981_s15 = smov 57   ;;  %v1757_v46 = vld [vmem:[#allocation2 + $0x8] sm:$0x1f] }
 0x1e4   :  { %1591 = vrot.lane.b32.xlu0 %v1589_v45, %s5960_s14  ;;  %s5980_s14 = smov 63  }
 0x1e5   :  { %v6210_v47 = vpop.permute.xlu1 %1388 }
 0x1e6   :  { %v6212_v48 = vpop.permute.xlu0 %1370 }
 0x1e7   :  { %2187 = vrot.lane.b32.xlu1 %v2185_v49, %s5941_s5  ;;  %s5965_s5 = smov 76  }
 0x1e8   :  { %2157 = vrot.lane.b32.xlu0 %v2155_v25, %s5900_s13  ;;  %s5963_s13 = smov 59   ;;  %v2191_v25 = vld [vmem:[#allocation2 + $0x8] sm:$0x1f] }
 0x1e9   :  { %v6216_v50 = vpop.permute.xlu1 %1400 }
 0x1ea   :  { %v6218_v51 = vpop.permute.xlu0 %1382 }
 0x1eb   :  { %1734 = vrot.lane.b32.xlu1 %v1732_v53, %s5962_s17  ;;  %v1763_v53 = vld [vmem:[#allocation2 + $0x8] sm:$0x1f] }
 0x1ec   :  { %2169 = vrot.lane.b32.xlu0 %v2167_v52, %s5905_s18 }
 0x1ed   :  { %v6222_v54 = vpop.permute.xlu1 %1412 }
 0x1ee   :  { %v6224_v55 = vpop.permute.xlu0 %1394 }
 0x1ef   :  { %1746 = vrot.lane.b32.xlu1 %v1744_v57, %s5963_s13 }
 0x1f0   :  { %2181 = vrot.lane.b32.xlu0 %v2179_v56, %s5907_s20  ;;  %s5966_s20 = smov 65   ;;  %v2197_v56 = vld [vmem:[#allocation2 + $0x8] sm:$0x1f] }
 0x1f1   :  { %v6228_v58 = vpop.permute.xlu1 %1525 }
 0x1f2   :  { %v6230_v59 = vpop.permute.xlu0 %1406 }
 0x1f3   :  { %1883 = vrot.lane.b32.xlu1 %v1881_v61, %s5965_s5  ;;  %s5983_s5 = smov 51   ;;  %v1769_v61 = vld [vmem:[#allocation2 + $0x8] sm:$0x1f] }
 0x1f4   :  { %1728 = vrot.lane.b32.xlu0 %v1726_v60, %s5964_s30 }
 0x1f5   :  { %v6233_v62 = vpop.permute.xlu1 %1537 }
 0x1f6   :  { %v6235_v63 = vpop.permute.xlu0 %1531 }
 0x1f7   :  { %1895 = vrot.lane.b32.xlu1 %v1893_v1, %s5967_s0  ;;  %s5984_s0 = smov 48  }
 0x1f8   :  { %1740 = vrot.lane.b32.xlu0 %v1738_v0, %s5966_s20  ;;  %v2203_v0 = vld [vmem:[#allocation2 + $0x8] sm:$0x1f] }
 0x1f9   :  { %v6238_v2 = vpop.permute.xlu1 %1549 }
 0x1fa   :  { %v6240_v4 = vpop.permute.xlu0 %1543 }
 0x1fb   :  { %1907 = vrot.lane.b32.xlu1 %v1905_v6, %s5969_s11  ;;  %s5985_s11 = smov 42   ;;  %v2209_v6 = vld [vmem:[#allocation2 + $0x8] sm:$0x1f] }
 0x1fc   :  { %1752 = vrot.lane.b32.xlu0 %v1750_v5, %s5968_s10 }
 0x1fd   :  { %v6243_v7 = vpop.permute.xlu1 %1561 }
 0x1fe   :  { %v6245_v8 = vpop.permute.xlu0 %1555 }
 0x1ff   :  { %1293 = vrot.lane.b32.xlu1 %v1291_v10, %s5971_s19 }
 0x200   :  { %1889 = vrot.lane.b32.xlu0 %v1887_v9, %s5970_s12  ;;  %s5986_s12 = smov 36   ;;  %v2215_v9 = vld [vmem:[#allocation2 + $0x8] sm:$0x1f] }
 0x201   :  { %v6248_v11 = vpop.permute.xlu1 %1686 }
 0x202   :  { %v6250_v12 = vpop.permute.xlu0 %1567 }
 0x203   :  { %1449 = vrot.lane.b32.xlu1 %v1447_v13, %s5973_s22  ;;  %s5988_s22 = smov 41   ;;  %v1912_v13 = vld [vmem:[#allocation2 + $0x8] sm:$0x1f] }
 0x204   :  { %1901 = vrot.lane.b32.xlu0 %v1899_v14, %s5972_s21  ;;  %s5987_s21 = smov 47  }
 0x205   :  { %v6252_v15 = vpop.permute.xlu1 %1698 }
 0x206   :  { %v6254_v16 = vpop.permute.xlu0 %1680 }
 0x207   :  { %1455 = vrot.lane.b32.xlu1 %v1453_v20, %s5975_s25  ;;  %s5991_s25 = smov 40  }
 0x208   :  { %1286 = vrot.lane.b32.xlu0 %v1284_v18, %s5974_s23  ;;  %v1918_v18 = vld [vmem:[#allocation2 + $0x8] sm:$0x1f] }
 0x209   :  { %v6257_v22 = vpop.permute.xlu1 %1710 }
 0x20a   :  { %v6259_v23 = vpop.permute.xlu0 %1692 }
 0x20b   :  { %1461 = vrot.lane.b32.xlu1 %v1459_v17, %s5977_s28  ;;  %v1924_v17 = vld [vmem:[#allocation2 + $0x8] sm:$0x1f]  ;;  %s5994_s28 = smov 39  }
 0x20c   :  { %1300 = vrot.lane.b32.xlu0 %v1298_v24, %s5976_s1 }
 0x20d   :  { %v6262_v26 = vpop.permute.xlu1 %1722 }
 0x20e   :  { %v6264_v27 = vpop.permute.xlu0 %1704 }
 0x20f   :  { %2044 = vrot.lane.b32.xlu1 %v2042_v28, %s5979_s16  ;;  %s5996_s16 = smov 32  }
 0x210   :  { %2038 = vrot.lane.b32.xlu0 %v2036_v19, %s5978_s29  ;;  %v2067_v19 = vld [vmem:[#allocation2 + $0x8] sm:$0x1f]  ;;  %s5995_s29 = smov 33  }
 0x211   :  { %v6266_v29 = vpop.permute.xlu1 %1835 }
 0x212   :  { %v6268_v30 = vpop.permute.xlu0 %1716 }
 0x213   :  { %2056 = vrot.lane.b32.xlu1 %v2054_v33, %s5981_s15  ;;  %v2073_v33 = vld [vmem:[#allocation2 + $0x8] sm:$0x1f]  ;;  %s5997_s15 = smov 29  }
 0x214   :  { %2050 = vrot.lane.b32.xlu0 %v2048_v31, %s5980_s14 }
 0x215   :  { %v6272_v21 = vpop.permute.xlu1 %1847 }
 0x216   :  { %v6274_v35 = vpop.permute.xlu0 %1841 }
 0x217   :  { %1604 = vrot.lane.b32.xlu1 %v1602_v37, %s5984_s0 }
 0x218   :  { %2062 = vrot.lane.b32.xlu0 %v2060_v36, %s5983_s5  ;;  %v2079_v36 = vld [vmem:[#allocation2 + $0x8] sm:$0x1f] }
 0x219   :  { %v6276_v38 = vpop.permute.xlu1 %1859 }
 0x21a   :  { %v6278_v40 = vpop.permute.xlu0 %1853 }
 0x21b   :  { %1616 = vrot.lane.b32.xlu1 %v1614_v42, %s5986_s12 }
 0x21c   :  { %1610 = vrot.lane.b32.xlu0 %v1608_v41, %s5985_s11 }
 0x21d   :  { %v6280_v44 = vpop.permute.xlu1 %1871 }
 0x21e   :  { %v6282_v45 = vpop.permute.xlu0 %1865 }
 0x21f   :  { %2193 = vrot.lane.b32.xlu1 %v2191_v25, %s5942_s6  ;;  %s5989_s6 = smov 35  }
 0x220   :  { %1759 = vrot.lane.b32.xlu0 %v1757_v46, %s5987_s21 }
 0x221   :  { %v6286_v49 = vpop.permute.xlu1 %1990 }
 0x222   :  { %v6288_v52 = vpop.permute.xlu0 %1877 }
 0x223   :  { %2199 = vrot.lane.b32.xlu1 %v2197_v56, %s5943_s7 }
 0x224   :  { %1765 = vrot.lane.b32.xlu0 %v1763_v53, %s5988_s22 }
 0x225   :  { %v1252_v60 = vpop.permute.xlu1 %1251 }
 0x226   :  { %v6292_v57 = vpop.permute.xlu0 %1996  ;;  %1254 = vst.msk [vmem:[#allocation4] sm:$0x1f] %vm1196_vm12, %v1252_v60 }
 0x227   :  { %2205 = vrot.lane.b32.xlu1 %v2203_v0, %s5944_s8  ;;  %s5990_s8 = smov 46   ;;  %v2222_v0 = vld [vmem:[#allocation2 + $0x8] sm:$0x1f] }
 0x228   :  { %1771 = vrot.lane.b32.xlu0 %v1769_v61, %s5989_s6 }
 0x229   :  { %v1264_v5 = vpop.permute.xlu1 %1263 }
 0x22a   :  { %v1258_v1 = vpop.permute.xlu0 %1257 }
 0x22b   :  { %1260 = vst.msk [vmem:[#allocation4] sm:$0x1f] %vm1203_vm13, %v1258_v1  ;;  %2217 = vrot.lane.b32.xlu1 %v2215_v9, %s5974_s23  ;;  %s5993_s23 = smov 45   ;;  %v2228_v1 = vld [vmem:[#allocation2 + $0x8] sm:$0x1f] }
 0x22c   :  { %1267 = vst.msk [vmem:[#allocation4] sm:$0x1f] %vm1266_vm14, %v1264_v5  ;;  %2211 = vrot.lane.b32.xlu0 %v2209_v6, %s5945_s9  ;;  %s5992_s9 = smov 34  }
 0x22d   :  { %v1278_v14 = vpop.permute.xlu1 %1277 }
 0x22e   :  { %v1271_v10 = vpop.permute.xlu0 %1270  ;;  %1283 = vst.msk [vmem:[#allocation4 + $0x8] sm:$0x1f] %vm9190_vm0, %v1278_v14  ;;  %vm1289_vm0 = vcmask 94224  }
 0x22f   :  { %1274 = vst.msk [vmem:[#allocation4] sm:$0x1f] %vm1273_vm15, %v1271_v10  ;;  %1920 = vrot.lane.b32.xlu1 %v1918_v18, %s5991_s25 }
 0x230   :  { %1281 = vst.msk [vmem:[#allocation4] sm:$0x1f] %vm9197_vm1, %v1278_v14  ;;  %1914 = vrot.lane.b32.xlu0 %v1912_v13, %s5990_s8 }
 0x231   :  { %v6306_v24 = vpop.permute.xlu1 %2002 }
 0x232   :  { %v6304_v20 = vpop.permute.xlu0 %2008 }
 0x233   :  { %2069 = vrot.lane.b32.xlu1 %v2067_v19, %s5993_s23 }
 0x234   :  { %1926 = vrot.lane.b32.xlu0 %v1924_v17, %s5992_s9 }
 0x235   :  { %v6310_v31 = vpop.permute.xlu1 %2014 }
 0x236   :  { %v6308_v28 = vpop.permute.xlu0 %2020 }
 0x237   :  { %v1305_v37 = vld [vmem:[#allocation4] sm:$0x1f]  ;;  %2081 = vrot.lane.b32.xlu1 %v2079_v36, %s5995_s29 }
 0x238   :  { %v6312_v41 = vld [vmem:[#allocation4] sm:$0x1f]  ;;  %2075 = vrot.lane.b32.xlu0 %v2073_v33, %s5994_s28  ;;  %1307 = vst.msk [vmem:[#allocation5] sm:$0x1f] %vm1306_vm2, %v1305_v37 }
 0x239   :  { %v6314_v42 = vld [vmem:[#allocation4] sm:$0x1f]  ;;  %v1425_v61 = vpop.permute.xlu1 %1424 }
 0x23a   :  { %v6316_v46 = vld [vmem:[#allocation4] sm:$0x1f]  ;;  %v6327_v60 = vpop.permute.xlu0 %2026 }
 0x23b   :  { %v6318_v25 = vld [vmem:[#allocation4] sm:$0x1f]  ;;  %2230 = vrot.lane.b32.xlu1 %v2228_v1, %s5976_s1 }
 0x23c   :  { %v6320_v53 = vld [vmem:[#allocation4] sm:$0x1f]  ;;  %2224 = vrot.lane.b32.xlu0 %v2222_v0, %s5971_s19 }
 0x23d   :  { %v6323_v56 = vld [vmem:[#allocation4] sm:$0x1f]  ;;  %v1437_v5 = vpop.permute.xlu1 %1436 }
 0x23e   :  { %1373 = vst.msk [vmem:[#allocation4] sm:$0x1f] %vm1140_vm4, %v6212_v48  ;;  %v1419_v48 = vpop.permute.xlu0 %1418 }
 0x23f   :  { %1379 = vst.msk [vmem:[#allocation4] sm:$0x1f] %vm1147_vm5, %v6207_v43  ;;  %v2234_v43 = vld [vmem:[#allocation2 + $0x8] sm:$0x1f] }
 0x240   :  { %1385 = vst.msk [vmem:[#allocation4] sm:$0x1f] %vm1154_vm6, %v6218_v51  ;;  %2236 = vrot.lane.b32.xlu0 %v2234_v43, %s5996_s16 }
 0x241   :  { %1391 = vst.msk [vmem:[#allocation4] sm:$0x1f] %vm9200_vm7, %v6210_v47  ;;  %v6346_v51 = vpop.permute.xlu1 %2151 }
 0x242   :  { %1397 = vst.msk [vmem:[#allocation4] sm:$0x1f] %vm1168_vm8, %v6224_v55  ;;  %v1431_v47 = vpop.permute.xlu0 %1430 }
 0x243   :  { %1403 = vst.msk [vmem:[#allocation4] sm:$0x1f] %vm1175_vm9, %v6216_v50 }
 0x244   :  { %1409 = vst.msk [vmem:[#allocation4] sm:$0x1f] %vm1182_vm10, %v6230_v59 }
 0x245   :  { %1415 = vst.msk [vmem:[#allocation4] sm:$0x1f] %vm9191_vm11, %v6222_v54  ;;  %v1574_v55 = vpop.permute.xlu1 %1573 }
 0x246   :  { %1421 = vst.msk [vmem:[#allocation4] sm:$0x1f] %vm1196_vm12, %v1419_v48  ;;  %v6351_v50 = vpop.permute.xlu0 %1442 }
 0x247   :  { %1427 = vst.msk [vmem:[#allocation4] sm:$0x1f] %vm1203_vm13, %v1425_v61 }
 0x248   :  { %1433 = vst.msk [vmem:[#allocation4] sm:$0x1f] %vm1266_vm14, %v1431_v47 }
 0x249   :  { %1439 = vst.msk [vmem:[#allocation4] sm:$0x1f] %vm1273_vm15, %v1437_v5  ;;  %v1586_v54 = vpop.permute.xlu1 %1585 }
 0x24a   :  { %1445 = vst.msk [vmem:[#allocation4] sm:$0x1f] %vm9197_vm1, %v6351_v50  ;;  %v6355_v59 = vpop.permute.xlu0 %2032 }
 0x24d   :  { %v6363_v13 = vpop.permute.xlu1 %2163 }
 0x24e   :  { %v6361_v14 = vpop.permute.xlu0 %2145 }
 0x251   :  { %v1465_v6 = vld [vmem:[#allocation4] sm:$0x1f]  ;;  %v6378_v37 = vpop.permute.xlu1 %2175 }
 0x252   :  { %v6357_v9 = vld [vmem:[#allocation4] sm:$0x1f]  ;;  %1466 = vst.msk [vmem:[#allocation5 + $0x5] sm:$0x1f] %vm1306_vm2, %v1465_v6  ;;  %v1580_v36 = vpop.permute.xlu0 %1579 }
 0x253   :  { %v6359_v10 = vld [vmem:[#allocation4] sm:$0x1f] }
 0x254   :  { %v6365_v18 = vld [vmem:[#allocation4] sm:$0x1f] }
 0x255   :  { %v6367_v17 = vld [vmem:[#allocation4] sm:$0x1f] }
 0x256   :  { %v6369_v19 = vld [vmem:[#allocation4] sm:$0x1f]  ;;  %v1592_v61 = vpop.permute.xlu0 %1591 }
 0x257   :  { %v6372_v33 = vld [vmem:[#allocation4] sm:$0x1f] }
 0x258   :  { %1528 = vst.msk [vmem:[#allocation4] sm:$0x1f] %vm1140_vm4, %v6228_v58  ;;  %v6388_v58 = vpop.permute.xlu1 %1597 }
 0x259   :  { %1534 = vst.msk [vmem:[#allocation4] sm:$0x1f] %vm1147_vm5, %v6235_v63 }
 0x25a   :  { %1540 = vst.msk [vmem:[#allocation4] sm:$0x1f] %vm1154_vm6, %v6233_v62  ;;  %v6396_v62 = vpop.permute.xlu0 %2157 }
 0x25b   :  { %1546 = vst.msk [vmem:[#allocation4] sm:$0x1f] %vm9200_vm7, %v6240_v4 }
 0x25c   :  { %1552 = vst.msk [vmem:[#allocation4] sm:$0x1f] %vm1168_vm8, %v6238_v2  ;;  %v6398_v63 = vpop.permute.xlu1 %2187 }
 0x25d   :  { %1558 = vst.msk [vmem:[#allocation4] sm:$0x1f] %vm1175_vm9, %v6245_v8 }
 0x25e   :  { %1564 = vst.msk [vmem:[#allocation4] sm:$0x1f] %vm1182_vm10, %v6243_v7  ;;  %v6404_v2 = vpop.permute.xlu0 %2169 }
 0x25f   :  { %1570 = vst.msk [vmem:[#allocation4] sm:$0x1f] %vm9191_vm11, %v6250_v12 }
 0x260   :  { %1576 = vst.msk [vmem:[#allocation4] sm:$0x1f] %vm1196_vm12, %v1574_v55  ;;  %v1735_v4 = vpop.permute.xlu1 %1734 }
 0x261   :  { %1582 = vst.msk [vmem:[#allocation4] sm:$0x1f] %vm1203_vm13, %v1580_v36 }
 0x262   :  { %1588 = vst.msk [vmem:[#allocation4] sm:$0x1f] %vm1266_vm14, %v1586_v54  ;;  %v6406_v7 = vpop.permute.xlu0 %2181 }
 0x263   :  { %1594 = vst.msk [vmem:[#allocation4] sm:$0x1f] %vm1273_vm15, %v1592_v61 }
 0x264   :  { %1600 = vst.msk [vmem:[#allocation4] sm:$0x1f] %vm9197_vm1, %v6388_v58  ;;  %v1747_v8 = vpop.permute.xlu1 %1746 }
 0x266   :  { %v1729_v55 = vpop.permute.xlu0 %1728 }
 0x268   :  { %v1884_v54 = vpop.permute.xlu1 %1883 }
 0x26a   :  { %v1741_v6 = vpop.permute.xlu0 %1740 }
 0x26b   :  { %v1620_v12 = vld [vmem:[#allocation4] sm:$0x1f] }
 0x26c   :  { %v6408_v0 = vld [vmem:[#allocation4] sm:$0x1f]  ;;  %1621 = vst.msk [vmem:[#allocation5 + $0xa] sm:$0x1f] %vm1306_vm2, %v1620_v12  ;;  %v1896_v36 = vpop.permute.xlu1 %1895 }
 0x26d   :  { %v6410_v1 = vld [vmem:[#allocation4] sm:$0x1f] }
 0x26e   :  { %v6412_v48 = vld [vmem:[#allocation4] sm:$0x1f] }
 0x26f   :  { %v6414_v5 = vld [vmem:[#allocation4] sm:$0x1f] }
 0x270   :  { %v6416_v43 = vld [vmem:[#allocation4] sm:$0x1f] }
 0x271   :  { %v6419_v47 = vld [vmem:[#allocation4] sm:$0x1f] }
 0x272   :  { %9502 = vst [vmem:[#allocation7_spill] sm:$0xff] %v6419_v47  ;;  %1683 = vst.msk [vmem:[#allocation4] sm:$0x1f] %vm1140_vm4, %v6254_v16  ;;  %v6439_v16 = vpop.permute.xlu1 %1907 }
 0x273   :  { %1689 = vst.msk [vmem:[#allocation4] sm:$0x1f] %vm1147_vm5, %v6248_v11  ;;  %v6437_v11 = vpop.permute.xlu0 %1752 }
 0x274   :  { %1695 = vst.msk [vmem:[#allocation4] sm:$0x1f] %vm1154_vm6, %v6259_v23 }
 0x275   :  { %1701 = vst.msk [vmem:[#allocation4] sm:$0x1f] %vm9200_vm7, %v6252_v15 }
 0x276   :  { %1707 = vst.msk [vmem:[#allocation4] sm:$0x1f] %vm1168_vm8, %v6264_v27 }
 0x277   :  { %1713 = vst.msk [vmem:[#allocation4] sm:$0x1f] %vm1175_vm9, %v6257_v22  ;;  %v1890_v15 = vpop.permute.xlu0 %1889  ;;  %v1294_v22 = vpop.permute.xlu1 %1293 }
 0x278   :  { %1719 = vst.msk [vmem:[#allocation4] sm:$0x1f] %vm1182_vm10, %v6268_v30 }
 0x279   :  { %1725 = vst.msk [vmem:[#allocation4] sm:$0x1f] %vm9191_vm11, %v6262_v26  ;;  %v2299_v26 = vld [vmem:[#allocation5] sm:$0xff]  ;;  %vm1296_vm11 = vcmask 176224  }
 0x27a   :  { %1731 = vst.msk [vmem:[#allocation4] sm:$0x1f] %vm1196_vm12, %v1729_v55  ;;  %v2335_v30 = vsel %vm9201_vm3, %v2299_v26, 0 }
 0x27b   :  { %1737 = vst.msk [vmem:[#allocation4] sm:$0x1f] %vm1203_vm13, %v1735_v4  ;;  %v1902_v23 = vpop.permute.xlu0 %1901  ;;  %v1450_v27 = vpop.permute.xlu1 %1449  ;;  %v2428_v26 = vand.u32 4294901760, %v2335_v30 }
 0x27c   :  { %1743 = vst.msk [vmem:[#allocation4] sm:$0x1f] %vm1266_vm14, %v1741_v6 }
 0x27d   :  { %1749 = vst.msk [vmem:[#allocation4] sm:$0x1f] %vm1273_vm15, %v1747_v8 }
 0x27e   :  { %1755 = vst.msk [vmem:[#allocation4] sm:$0x1f] %vm9197_vm1, %v6437_v11  ;;  %vm1303_vm1 = vcmask 258224  }
 0x27f   :  { %v1287_v55 = vpop.permute.xlu0 %1286  ;;  %v1456_v8 = vpop.permute.xlu1 %1455 }
 0x280   :  { %1290 = vst.msk [vmem:[#allocation4 + $0x8] sm:$0x1f] %vm1289_vm0, %v1287_v55 }
 0x281   :  { %1297 = vst.msk [vmem:[#allocation4 + $0x8] sm:$0x1f] %vm1296_vm11, %v1294_v22 }
 0x283   :  { %v1301_v39 = vpop.permute.xlu0 %1300  ;;  %v1462_v47 = vpop.permute.xlu1 %1461 }
 0x284   :  { %1304 = vst.msk [vmem:[#allocation4 + $0x8] sm:$0x1f] %vm1303_vm1, %v1301_v39 }
 0x285   :  { %v1775_v61 = vld [vmem:[#allocation4] sm:$0x1f] }
 0x286   :  { %v6448_v12 = vld [vmem:[#allocation4] sm:$0x1f]  ;;  %1776 = vst.msk [vmem:[#allocation5 + $0xf] sm:$0x1f] %vm1306_vm2, %v1775_v61  ;;  %v6472_v61 = vsub.f32 %v2335_v30, %v2428_v26 }
 0x287   :  { %v6450_v4 = vld [vmem:[#allocation4] sm:$0x1f] }
 0x288   :  { %v6452_v6 = vld [vmem:[#allocation4] sm:$0x1f] }
 0x289   :  { %v6454_v32 = vld [vmem:[#allocation4] sm:$0x1f] }
 0x28a   :  { %v6456_v3 = vld [vmem:[#allocation4] sm:$0x1f] }
 0x28b   :  { %v6460_v34 = vld [vmem:[#allocation4] sm:$0x1f]  ;;  %v6490_v30 = vld [vmem:[#allocation4 + $0x8] sm:$0x1f] }
 0x28c   :  { %9503 = vst [vmem:[#allocation8_spill] sm:$0xff] %v6460_v34  ;;  %1838 = vst.msk [vmem:[#allocation4] sm:$0x1f] %vm1140_vm4, %v6266_v29  ;;  %v6478_v29 = vpop.permute.xlu0 %2038 }
 0x28d   :  { %1844 = vst.msk [vmem:[#allocation4] sm:$0x1f] %vm1147_vm5, %v6274_v35  ;;  %v6480_v35 = vpop.permute.xlu1 %2044  ;;  %v2300_v22 = vld [vmem:[#allocation5 + $0x8] sm:$0xff] }
 0x28e   :  { %1850 = vst.msk [vmem:[#allocation4] sm:$0x1f] %vm1154_vm6, %v6272_v21  ;;  %v2338_v39 = vsel %vm9201_vm3, %v2300_v22, 0  ;;  %vm9507_vm3 = vcmask 1045440  }
 0x28f   :  { %1856 = vst.msk [vmem:[#allocation4] sm:$0x1f] %vm9200_vm7, %v6278_v40  ;;  %vm9504_vm7 = vcmask 651824   ;;  %v2431_v21 = vand.u32 4294901760, %v2338_v39  ;;  %v2537_v40 = vand.u32 4294901760, %v6472_v61 }
 0x290   :  { %1862 = vst.msk [vmem:[#allocation4] sm:$0x1f] %vm1168_vm8, %v6276_v38  ;;  %v1321_v38 = vld [vmem:[#allocation4 + $0x8] sm:$0x1f]  ;;  %v6494_v34 = vpop.permute.xlu0 %2050 }
 0x291   :  { %1868 = vst.msk [vmem:[#allocation4] sm:$0x1f] %vm1175_vm9, %v6282_v45  ;;  %v1333_v45 = vld [vmem:[#allocation4 + $0x8] sm:$0x1f]  ;;  %v6492_v55 = vpack.c.bf16 %v2431_v21, %v2428_v26  ;;  %v6498_v22 = vsub.f32 %v2338_v39, %v2431_v21  ;;  %1326 = vrot.lane.b32.xlu1 %v1321_v38, %s5905_s18  ;;  %v9508_v26 = vmov 0.0|0.0  }
 0x292   :  { %1874 = vst.msk [vmem:[#allocation4] sm:$0x1f] %vm1182_vm10, %v6280_v44  ;;  %v6496_v44 = vpop.permute.xlu1 %2056  ;;  %1338 = vrot.lane.b32.xlu0 %v1333_v45, %s5936_s26 }
 0x293   :  { %1880 = vst.msk [vmem:[#allocation4] sm:$0x1f] %vm9504_vm7, %v6288_v52  ;;  %9505 = vst [vmem:[#allocation9_spill] sm:$0xff] %v6492_v55  ;;  %v6501_v52 = vld [vmem:[#allocation4 + $0x8] sm:$0x1f]  ;;  %vm9506_vm7 = vcmask 12288   ;;  %5120 = vmatpush1.bf16.xpose.msra.mxu1 %v6492_v55 }
 0x294   :  { %1886 = vst.msk [vmem:[#allocation4] sm:$0x1f] %vm1196_vm12, %v1884_v54  ;;  %v2538_v54 = vsub.f32 %v6472_v61, %v2537_v40  ;;  %5121 = vmatprep.subr.bf16.mxu1 %v9508_v26 }
 0x295   :  { %1892 = vst.msk [vmem:[#allocation4] sm:$0x1f] %vm1203_vm13, %v1890_v15  ;;  %v2544_v15 = vand.u32 4294901760, %v6498_v22  ;;  %1310 = vrot.lane.b32.xlu1 %v6312_v41, %s5933_s24 }
 0x296   :  { %1898 = vst.msk [vmem:[#allocation4] sm:$0x1f] %vm1266_vm14, %v1896_v36  ;;  %1324 = vrot.lane.b32.xlu0 %v6316_v46, %s5905_s18 }
 0x297   :  { %1904 = vst.msk [vmem:[#allocation4] sm:$0x1f] %vm1273_vm15, %v1902_v23  ;;  %v6518_v23 = vpop.permute.xlu0 %2062  ;;  %v2545_v39 = vsub.f32 %v6498_v22, %v2544_v15  ;;  %v6521_v21 = vpack.c.bf16 %v2544_v15, %v2537_v40 }
 0x298   :  { %1446 = vst.msk [vmem:[#allocation4 + $0x8] sm:$0x1f] %vm9506_vm7, %v6351_v50  ;;  %v1605_v50 = vpop.permute.xlu1 %1604 }
 0x299   :  { %1910 = vst.msk [vmem:[#allocation4] sm:$0x1f] %vm9507_vm3, %v6439_v16  ;;  %9509 = vst [vmem:[#allocation10_spill] sm:$0xff] %v6521_v21  ;;  %v2546_v38 = vand.u32 4294901760, %v2545_v39  ;;  %1316 = vrot.lane.b32.xlu1 %v6314_v42, %s5919_s4 }
 0x29a   :  { %1452 = vst.msk [vmem:[#allocation4 + $0x8] sm:$0x1f] %vm1289_vm0, %v1450_v27  ;;  %v2539_v27 = vand.u32 4294901760, %v2538_v54  ;;  %vm9510_vm3 = vmmov %vm9506_vm7  ;;  %vm9511_vm7 = vcmask 323824  }
 0x29b   :  { %1458 = vst.msk [vmem:[#allocation4 + $0x8] sm:$0x1f] %vm1296_vm11, %v1456_v8  ;;  %v1611_v36 = vpop.permute.xlu0 %1610 }
 0x29c   :  { %1464 = vst.msk [vmem:[#allocation4 + $0x8] sm:$0x1f] %vm1303_vm1, %v1462_v47  ;;  %v5164_v45 = vpack.c.bf16 %v2546_v38, %v2539_v27  ;;  %v1617_v8 = vpop.permute.xlu1 %1616 }
 0x29d   :  { %1336 = vrot.lane.b32.xlu1 %v6318_v25, %s5936_s26 }
 0x29e   :  { %5165 = vmatpush1.bf16.xpose.msra.mxu0 %v5164_v45 }
 0x29f   :  { %5166 = vmatprep.subr.bf16.mxu0 %v9508_v26  ;;  %v1760_v39 = vpop.permute.xlu0 %1759 }
 0x2a0   :  { %v1930_v55 = vld [vmem:[#allocation4] sm:$0x1f] }
 0x2a1   :  { %v6530_v40 = vld [vmem:[#allocation4] sm:$0x1f]  ;;  %1931 = vst.msk [vmem:[#allocation5 + $0x14] sm:$0x1f] %vm1306_vm2, %v1930_v55  ;;  %v6557_v55 = vpop.permute.xlu1 %2193 }
 0x2a2   :  { %v6532_v15 = vld [vmem:[#allocation4] sm:$0x1f] }
 0x2a3   :  { %v6534_v47 = vld [vmem:[#allocation4] sm:$0x1f]  ;;  %v1480_v41 = vld [vmem:[#allocation4 + $0x8] sm:$0x1f]  ;;  %v1766_v45 = vpop.permute.xlu0 %1765 }
 0x2a4   :  { %v6536_v46 = vld [vmem:[#allocation4] sm:$0x1f]  ;;  %v6542_v54 = vld [vmem:[#allocation4 + $0x8] sm:$0x1f]  ;;  %1485 = vrot.lane.b32.xlu1 %v1480_v41, %s5905_s18 }
 0x2a5   :  { %v6538_v21 = vld [vmem:[#allocation4] sm:$0x1f]  ;;  %v6544_v42 = vld [vmem:[#allocation4 + $0x8] sm:$0x1f] }
 0x2a6   :  { %v6546_v27 = vld [vmem:[#allocation4 + $0x8] sm:$0x1f]  ;;  %v6550_v38 = vld [vmem:[#allocation4] sm:$0x1f] }
 0x2a7   :  { %1601 = vst.msk [vmem:[#allocation4 + $0x8] sm:$0x1f] %vm9510_vm3, %v6388_v58  ;;  %vm9512_vm3 = vcmask 651824  }
 0x2a8   :  { %1993 = vst.msk [vmem:[#allocation4] sm:$0x1f] %vm1140_vm4, %v6286_v49  ;;  %v2200_v49 = vpop.permute.xlu1 %2199  ;;  %1624 = vrot.lane.b32.xlu1 %v6408_v0, %s5933_s24 }
 0x2a9   :  { %1607 = vst.msk [vmem:[#allocation4 + $0x8] sm:$0x1f] %vm1289_vm0, %v1605_v50 }
 0x2aa   :  { %1999 = vst.msk [vmem:[#allocation4] sm:$0x1f] %vm1147_vm5, %v6292_v57  ;;  %v1772_v57 = vpop.permute.xlu0 %1771 }
 0x2ab   :  { %1613 = vst.msk [vmem:[#allocation4 + $0x8] sm:$0x1f] %vm1296_vm11, %v1611_v36 }
 0x2ac   :  { %2005 = vst.msk [vmem:[#allocation4] sm:$0x1f] %vm1154_vm6, %v6306_v24  ;;  %1638 = vrot.lane.b32.xlu1 %v6412_v48, %s5905_s18  ;;  %v2206_v25 = vpop.permute.xlu1 %2205 }
 0x2ad   :  { %1619 = vst.msk [vmem:[#allocation4 + $0x8] sm:$0x1f] %vm1303_vm1, %v1617_v8 }
 0x2ae   :  { %2011 = vst.msk [vmem:[#allocation4] sm:$0x1f] %vm9511_vm7, %v6304_v20  ;;  %vm9513_vm7 = vcmask 12288  }
 0x2af   :  { %2017 = vst.msk [vmem:[#allocation4] sm:$0x1f] %vm1168_vm8, %v6310_v31 }
 0x2b0   :  { %2023 = vst.msk [vmem:[#allocation4] sm:$0x1f] %vm1175_vm9, %v6308_v28  ;;  %1785 = vrot.lane.b32.xlu1 %v6450_v4, %s5919_s4 }
 0x2b1   :  { %2029 = vst.msk [vmem:[#allocation4] sm:$0x1f] %vm1182_vm10, %v6327_v60  ;;  %v6606_v60 = vpop.permute.xlu1 %2217 }
 0x2b2   :  { %2035 = vst.msk [vmem:[#allocation4] sm:$0x1f] %vm9512_vm3, %v6355_v59  ;;  %vm9514_vm3 = vcmask 1045440  }
 0x2b3   :  { %2041 = vst.msk [vmem:[#allocation4] sm:$0x1f] %vm1196_vm12, %v6478_v29 }
 0x2b4   :  { %2047 = vst.msk [vmem:[#allocation4] sm:$0x1f] %vm1203_vm13, %v6480_v35  ;;  %v1635_v20 = vld [vmem:[#allocation4 + $0x8] sm:$0x1f]  ;;  %1793 = vrot.lane.b32.xlu1 %v6452_v6, %s5905_s18 }
 0x2b5   :  { %v6582_v24 = vld [vmem:[#allocation4 + $0x8] sm:$0x1f]  ;;  %2053 = vst.msk [vmem:[#allocation4] sm:$0x1f] %vm1266_vm14, %v6494_v34  ;;  %1640 = vrot.lane.b32.xlu0 %v1635_v20, %s5905_s18  ;;  %v2212_v34 = vpop.permute.xlu0 %2211  ;;  %v1921_v36 = vpop.permute.xlu1 %1920 }
 0x2b6   :  { %v6584_v28 = vld [vmem:[#allocation4 + $0x8] sm:$0x1f]  ;;  %2059 = vst.msk [vmem:[#allocation4] sm:$0x1f] %vm1273_vm15, %v6496_v44 }
 0x2b7   :  { %v6588_v31 = vld [vmem:[#allocation4 + $0x8] sm:$0x1f]  ;;  %2065 = vst.msk [vmem:[#allocation4] sm:$0x1f] %vm9514_vm3, %v6518_v23  ;;  %vm9515_vm3 = vcmask 323824  }
 0x2b8   :  { %1756 = vst.msk [vmem:[#allocation4 + $0x8] sm:$0x1f] %vm9513_vm7, %v6437_v11  ;;  %1934 = vrot.lane.b32.xlu1 %v6530_v40, %s5933_s24 }
 0x2b9   :  { %1762 = vst.msk [vmem:[#allocation4 + $0x8] sm:$0x1f] %vm1289_vm0, %v1760_v39  ;;  %1469 = vrot.lane.b32.xlu0 %v6357_v9, %s5933_s24  ;;  %v1915_v48 = vpop.permute.xlu0 %1914 }
 0x2ba   :  { %1768 = vst.msk [vmem:[#allocation4 + $0x8] sm:$0x1f] %vm1296_vm11, %v1766_v45 }
 0x2bb   :  { %1774 = vst.msk [vmem:[#allocation4 + $0x8] sm:$0x1f] %vm1303_vm1, %v1772_v57 }
 0x2bc   :  { %1948 = vrot.lane.b32.xlu1 %v6550_v38, %s5905_s18 }
 0x2bd   :  { %1475 = vrot.lane.b32.xlu0 %v6359_v10, %s5919_s4 }
 0x2be   :  { %v2093_v59 = vld [vmem:[#allocation4] sm:$0x1f] }
 0x2bf   :  { %v6612_v58 = vld [vmem:[#allocation4] sm:$0x1f] }
 0x2c0   :  { %v6614_v0 = vld [vmem:[#allocation4] sm:$0x1f]  ;;  %2095 = vrot.lane.b32.xlu1 %v2093_v59, %s5919_s4 }
 0x2c1   :  { %v6616_v11 = vld [vmem:[#allocation4] sm:$0x1f]  ;;  %1483 = vrot.lane.b32.xlu0 %v6365_v18, %s5905_s18 }
 0x2c2   :  { %v2085_v9 = vld [vmem:[#allocation4] sm:$0x1f]  ;;  %v6621_v35 = vld [vmem:[#allocation4 + $0x8] sm:$0x1f] }
 0x2c3   :  { %v6618_v29 = vld [vmem:[#allocation4] sm:$0x1f]  ;;  %2086 = vst.msk [vmem:[#allocation5 + $0x19] sm:$0x1f] %vm1306_vm2, %v2085_v9  ;;  %v6623_v10 = vld [vmem:[#allocation4 + $0x8] sm:$0x1f] }
 0x2c4   :  { %v2099_v4 = vld [vmem:[#allocation4] sm:$0x1f]  ;;  %v6625_v44 = vld [vmem:[#allocation4 + $0x8] sm:$0x1f] }
 0x2c5   :  { %2148 = vst.msk [vmem:[#allocation4] sm:$0x1f] %vm1140_vm4, %v6361_v14  ;;  %v1790_v6 = vld [vmem:[#allocation4 + $0x8] sm:$0x1f]  ;;  %v1927_v14 = vpop.permute.xlu0 %1926  ;;  %2103 = vrot.lane.b32.xlu1 %v2099_v4, %s5905_s18 }
 0x2c6   :  { %2154 = vst.msk [vmem:[#allocation4] sm:$0x1f] %vm1147_vm5, %v6346_v51  ;;  %1795 = vrot.lane.b32.xlu0 %v1790_v6, %s5905_s18  ;;  %v2070_v51 = vpop.permute.xlu1 %2069 }
 0x2c7   :  { %1911 = vst.msk [vmem:[#allocation4 + $0x8] sm:$0x1f] %vm9513_vm7, %v6439_v16  ;;  %vm9516_vm7 = vcmask 651824  }
 0x2c8   :  { %2160 = vst.msk [vmem:[#allocation4] sm:$0x1f] %vm1154_vm6, %v6396_v62 }
 0x2c9   :  { %1917 = vst.msk [vmem:[#allocation4 + $0x8] sm:$0x1f] %vm1289_vm0, %v1915_v48 }
 0x2ca   :  { %2166 = vst.msk [vmem:[#allocation4] sm:$0x1f] %vm9515_vm3, %v6363_v13  ;;  %vm9517_vm3 = vcmask 1045440  }
 0x2cb   :  { %1923 = vst.msk [vmem:[#allocation4 + $0x8] sm:$0x1f] %vm1296_vm11, %v1921_v36 }
 0x2cc   :  { %2172 = vst.msk [vmem:[#allocation4] sm:$0x1f] %vm1168_vm8, %v6404_v2  ;;  %v2301_v2 = vld [vmem:[#allocation5 + $0x10] sm:$0xff] }
 0x2cd   :  { %1929 = vst.msk [vmem:[#allocation4 + $0x8] sm:$0x1f] %vm1303_vm1, %v1927_v14  ;;  %v1135_v14 = vld [vmem:[%s9187_s2] sm:$0x1f] }
 0x2ce   :  { %2178 = vst.msk [vmem:[#allocation4] sm:$0x1f] %vm1175_vm9, %v6378_v37 }
 0x2cf   :  { %2184 = vst.msk [vmem:[#allocation4] sm:$0x1f] %vm1182_vm10, %v6406_v7  ;;  %v2082_v7 = vpop.permute.xlu1 %2081 }
 0x2d0   :  { %2190 = vst.msk [vmem:[#allocation4] sm:$0x1f] %vm9516_vm7, %v6398_v63  ;;  %vm9518_vm7 = vcmask 12288   ;;  %v2076_v63 = vpop.permute.xlu0 %2075 }
 0x2d1   :  { %2196 = vst.msk [vmem:[#allocation4] sm:$0x1f] %vm1196_vm12, %v6557_v55 }
 0x2d2   :  { %2202 = vst.msk [vmem:[#allocation4] sm:$0x1f] %vm1203_vm13, %v2200_v49 }
 0x2d3   :  { %2208 = vst.msk [vmem:[#allocation4] sm:$0x1f] %vm1266_vm14, %v2206_v25  ;;  %vm9519_vm14 = vcmask 818176  }
 0x2d4   :  { %2214 = vst.msk [vmem:[#allocation4] sm:$0x1f] %vm1273_vm15, %v2212_v34  ;;  %v1945_v13 = vld [vmem:[#allocation4 + $0x8] sm:$0x1f]  ;;  %v2341_v16 = vsel %vm9519_vm14, %v2301_v2, 0  ;;  %v2225_v40 = vpop.permute.xlu0 %2224  ;;  %vm9520_vm15 = vmmov %vm9518_vm7 }
 0x2d5   :  { %v6661_v18 = vld [vmem:[#allocation4 + $0x8] sm:$0x1f]  ;;  %2220 = vst.msk [vmem:[#allocation4] sm:$0x1f] %vm9517_vm3, %v6606_v60  ;;  %1950 = vrot.lane.b32.xlu0 %v1945_v13, %s5905_s18  ;;  %vm9521_vm3 = vmmov %vm9519_vm14 }
 0x2d6   :  { %v6663_v37 = vld [vmem:[#allocation4 + $0x8] sm:$0x1f] }
 0x2d7   :  { %v6667_v62 = vld [vmem:[#allocation4 + $0x8] sm:$0x1f] }
 0x2d8   :  { %2066 = vst.msk [vmem:[#allocation4 + $0x8] sm:$0x1f] %vm9518_vm7, %v6518_v23  ;;  %v2434_v23 = vand.u32 4294901760, %v2341_v16  ;;  %v2237_v49 = vpop.permute.xlu0 %2236 }
 0x2d9   :  { %2072 = vst.msk [vmem:[#allocation4 + $0x8] sm:$0x1f] %vm1289_vm0, %v2070_v51  ;;  %1630 = vrot.lane.b32.xlu0 %v6410_v1, %s5919_s4 }
 0x2da   :  { %2078 = vst.msk [vmem:[#allocation4 + $0x8] sm:$0x1f] %vm1296_vm11, %v2076_v63  ;;  %v6691_v55 = vsub.f32 %v2341_v16, %v2434_v23 }
 0x2db   :  { %2084 = vst.msk [vmem:[#allocation4 + $0x8] sm:$0x1f] %vm1303_vm1, %v2082_v7 }
 0x2dc   :  { %v2242_v50 = vld [vmem:[#allocation4] sm:$0x1f]  ;;  %v2551_v57 = vand.u32 4294901760, %v6691_v55 }
 0x2dd   :  { %v2240_v8 = vld [vmem:[#allocation4] sm:$0x1f]  ;;  %2244 = vrot.lane.b32.xlu1 %v2242_v50, %s5933_s24  ;;  %1779 = vrot.lane.b32.xlu0 %v6448_v12, %s5933_s24  ;;  %v2231_v12 = vpop.permute.xlu1 %2230  ;;  %v1163_v50 = vld [vmem:[%s9187_s2] sm:$0x1f] }
 0x2de   :  { %2241 = vst.msk [vmem:[#allocation5 + $0x1e] sm:$0x1f] %vm1306_vm2, %v2240_v8  ;;  %v2287_v63 = vld [vmem:[#allocation4] sm:$0x1f] }
 0x2e1   :  { %1494 = vrot.lane.b32.xlu1 %v6367_v17, %s5936_s26  ;;  %1940 = vrot.lane.b32.xlu0 %v6532_v15, %s5919_s4 }
 0x2e2   :  { %v2100_v41 = vld [vmem:[#allocation4 + $0x8] sm:$0x1f] }
 0x2e3   :  { %v2111_v39 = vld [vmem:[#allocation4 + $0x8] sm:$0x1f] }
 0x2e4   :  { %v6685_v38 = vld [vmem:[#allocation4 + $0x8] sm:$0x1f] }
 0x2e5   :  { %v6689_v1 = vld [vmem:[#allocation4 + $0x8] sm:$0x1f]  ;;  %1649 = vrot.lane.b32.xlu1 %v6414_v5, %s5936_s26  ;;  %2089 = vrot.lane.b32.xlu0 %v6618_v29, %s5933_s24  ;;  %v2552_v5 = vsub.f32 %v6691_v55, %v2551_v57 }
 0x2e6   :  { %2221 = vst.msk [vmem:[#allocation4 + $0x8] sm:$0x1f] %vm9520_vm15, %v6606_v60  ;;  %v2302_v45 = vld [vmem:[#allocation5 + $0x18] sm:$0xff] }
 0x2e7   :  { %2227 = vst.msk [vmem:[#allocation4 + $0x8] sm:$0x1f] %vm1289_vm0, %v2225_v40  ;;  %v2344_v17 = vsel %vm9521_vm3, %v2302_v45, 0  ;;  %v2553_v9 = vand.u32 4294901760, %v2552_v5  ;;  %vm1340_vm0 = vcmask 719872  }
 0x2e8   :  { %2233 = vst.msk [vmem:[#allocation4 + $0x8] sm:$0x1f] %vm1296_vm11, %v2231_v12  ;;  %v2437_v15 = vand.u32 4294901760, %v2344_v17  ;;  %vm1328_vm11 = vcmask 801792  }
 0x2e9   :  { %2239 = vst.msk [vmem:[#allocation4 + $0x8] sm:$0x1f] %vm1303_vm1, %v2237_v49  ;;  %1804 = vrot.lane.b32.xlu1 %v6454_v32, %s5936_s26  ;;  %2105 = vrot.lane.b32.xlu0 %v2100_v41, %s5905_s18  ;;  %vm9524_vm1 = vmmov %vm9521_vm3 }
 0x2ea   :  { %v6704_v20 = vpack.c.bf16 %v2437_v15, %v2434_v23  ;;  %v6706_v25 = vsub.f32 %v2344_v17, %v2437_v15  ;;  %vm9525_vm7 = vmmov %vm9524_vm1 }
 0x2eb   :  { %vm9526_vm14 = vmmov %vm9524_vm1 }
 0x2ec   :  { %5123 = vmatpush1.bf16.xpose.msra.mxu1 %v6704_v20  ;;  %v2558_v34 = vand.u32 4294901760, %v6706_v25  ;;  %vm9527_vm15 = vmmov %vm9524_vm1 }
 0x2ed   :  { %5124 = vmatprep.subr.bf16.mxu1 %v9508_v26  ;;  %1348 = vrot.lane.b32.xlu1 %v6320_v53, %s5956_s27  ;;  %v2254_v53 = vld [vmem:[#allocation4] sm:$0x1f]  ;;  %vm9528_vm3 = vmmov %vm9524_vm1 }
 0x2ee   :  { %v2559_v59 = vsub.f32 %v6706_v25, %v2558_v34  ;;  %v6718_v48 = vpack.c.bf16 %v2558_v34, %v2551_v57  ;;  %v1191_v34 = vld [vmem:[%s9187_s2 + $0x8] sm:$0x1f] }
 0x2f0   :  { %v2255_v32 = vld [vmem:[#allocation4 + $0x8] sm:$0x1f]  ;;  %v2560_v29 = vand.u32 4294901760, %v2559_v59 }
 0x2f1   :  { %2260 = vrot.lane.b32.xlu0 %v2255_v32, %s5905_s18  ;;  %1959 = vrot.lane.b32.xlu1 %v6534_v47, %s5936_s26  ;;  %v2248_v47 = vld [vmem:[#allocation4] sm:$0x1f]  ;;  %v2288_v15 = vld [vmem:[#allocation4 + $0x8] sm:$0x1f] }
 0x2f2   :  { %v5167_v4 = vpack.c.bf16 %v2560_v29, %v2553_v9  ;;  %v1142_v29 = vld [vmem:[%s9187_s2] sm:$0x1f] }
 0x2f4   :  { %5168 = vmatpush1.bf16.xpose.msra.mxu0 %v5167_v4 }
 0x2f5   :  { %1496 = vrot.lane.b32.xlu0 %v6542_v54, %s5936_s26  ;;  %5169 = vmatprep.subr.bf16.mxu0 %v9508_v26  ;;  %v2266_v54 = vld [vmem:[#allocation4 + $0x8] sm:$0x1f] }
 0x2f6   :  { %2114 = vrot.lane.b32.xlu1 %v6612_v58, %s5936_s26  ;;  %v9523_v58 = vld [vmem:[#allocation8_spill] sm:$0xff] }
 0x2f9   :  { %1651 = vrot.lane.b32.xlu0 %v6582_v24, %s5936_s26 }
 0x2fa   :  { %1505 = vrot.lane.b32.xlu1 %v6369_v19, %s5956_s27  ;;  %v2265_v19 = vld [vmem:[#allocation4] sm:$0x1f] }
 0x2fd   :  { %1806 = vrot.lane.b32.xlu0 %v6621_v35, %s5936_s26 }
 0x2fe   :  { %2258 = vrot.lane.b32.xlu1 %v2254_v53, %s5905_s18 }
 0x301   :  { %2250 = vrot.lane.b32.xlu0 %v2248_v47, %s5919_s4 }
 0x302   :  { %1660 = vrot.lane.b32.xlu1 %v6416_v43, %s5956_s27 }
 0x303   :  { %v1327_v43 = vpop.permute.xlu1 %1326 }
 0x305   :  { %1350 = vrot.lane.b32.xlu0 %v6490_v30, %s5956_s27  ;;  %v2276_v30 = vld [vmem:[#allocation4] sm:$0x1f] }
 0x306   :  { %1815 = vrot.lane.b32.xlu1 %v6456_v3, %s5956_s27  ;;  %v1339_v3 = vpop.permute.xlu0 %1338 }
 0x307   :  { %v1311_v24 = vpop.permute.xlu1 %1310 }
 0x308   :  { %1313 = vst.msk [vmem:[#allocation5 + $0x23] sm:$0x1f] %vm1306_vm2, %v1311_v24 }
 0x309   :  { %1961 = vrot.lane.b32.xlu0 %v6661_v18, %s5936_s26 }
 0x30a   :  { %1970 = vrot.lane.b32.xlu1 %v6536_v46, %s5956_s27  ;;  %v1325_v46 = vpop.permute.xlu0 %1324 }
 0x30d   :  { %2116 = vrot.lane.b32.xlu0 %v2111_v39, %s5936_s26 }
 0x30e   :  { %2269 = vrot.lane.b32.xlu1 %v2265_v19, %s5936_s26 }
 0x30f   :  { %v2303_v13 = vld [vmem:[#allocation5 + $0x20] sm:$0xff] }
 0x311   :  { %2271 = vrot.lane.b32.xlu0 %v2266_v54, %s5936_s26 }
 0x312   :  { %2125 = vrot.lane.b32.xlu1 %v6614_v0, %s5956_s27  ;;  %v2277_v0 = vld [vmem:[#allocation4 + $0x8] sm:$0x1f] }
 0x315   :  { %1507 = vrot.lane.b32.xlu0 %v6544_v42, %s5956_s27  ;;  %v1329_v42 = vsel %vm1328_vm11, %v1325_v46, %v1327_v43 }
 0x316   :  { %1360 = vrot.lane.b32.xlu1 %v6323_v56, %s5943_s7  ;;  %1331 = vst.msk [vmem:[#allocation5 + $0x69] sm:$0x1f] %vm1306_vm2, %v1329_v42  ;;  %v1317_v56 = vpop.permute.xlu1 %1316  ;;  %v1170_v42 = vld [vmem:[%s9187_s2 + $0x8] sm:$0x1f] }
 0x317   :  { %1319 = vst.msk [vmem:[#allocation5 + $0x46] sm:$0x1f] %vm1306_vm2, %v1317_v56 }
 0x319   :  { %1662 = vrot.lane.b32.xlu0 %v6584_v28, %s5956_s27 }
 0x31a   :  { %1516 = vrot.lane.b32.xlu1 %v6372_v33, %s5943_s7  ;;  %v9522_v33 = vld [vmem:[#allocation7_spill] sm:$0xff]  ;;  %v1337_v28 = vpop.permute.xlu1 %1336 }
 0x31b   :  { %v1341_v35 = vsel %vm1340_vm0, %v1337_v28, %v1339_v3  ;;  %v1156_v3 = vld [vmem:[%s9187_s2] sm:$0x1f] }
 0x31c   :  { %1343 = vst.msk [vmem:[#allocation5 + $0x8c] sm:$0x1f] %vm1306_vm2, %v1341_v35 }
 0x31d   :  { %1817 = vrot.lane.b32.xlu0 %v6623_v10, %s5956_s27 }
 0x31e   :  { %2280 = vrot.lane.b32.xlu1 %v2276_v30, %s5956_s27  ;;  %v1486_v10 = vpop.permute.xlu1 %1485 }
 0x321   :  { %1972 = vrot.lane.b32.xlu0 %v6663_v37, %s5956_s27 }
 0x322   :  { %1671 = vrot.lane.b32.xlu1 %v9522_v33, %s5943_s7  ;;  %v1625_v6 = vpop.permute.xlu1 %1624 }
 0x323   :  { %1627 = vst.msk [vmem:[#allocation5 + $0x2d] sm:$0x1f] %vm1306_vm2, %v1625_v6 }
 0x325   :  { %2127 = vrot.lane.b32.xlu0 %v6685_v38, %s5956_s27  ;;  %v1177_v38 = vld [vmem:[%s9187_s2 + $0x8] sm:$0x1f] }
 0x326   :  { %1826 = vrot.lane.b32.xlu1 %v9523_v58, %s5943_s7  ;;  %v1639_v51 = vpop.permute.xlu1 %1638  ;;  %v1184_v58 = vld [vmem:[%s9187_s2 + $0x8] sm:$0x1f] }
 0x327   :  { %v1641_v36 = vpop.permute.xlu0 %1640 }
 0x329   :  { %2282 = vrot.lane.b32.xlu0 %v2277_v0, %s5956_s27 }
 0x32a   :  { %1981 = vrot.lane.b32.xlu1 %v6538_v21, %s5943_s7  ;;  %v2347_v21 = vsel %vm9524_vm1, %v2303_v13, 0  ;;  %v1786_v18 = vpop.permute.xlu1 %1785 }
 0x32b   :  { %1788 = vst.msk [vmem:[#allocation5 + $0x55] sm:$0x1f] %vm1306_vm2, %v1786_v18 }
 0x32d   :  { %1362 = vrot.lane.b32.xlu0 %v6501_v52, %s5943_s7  ;;  %v1642_v52 = vsel %vm1328_vm11, %v1639_v51, %v1641_v36  ;;  %v1198_v51 = vld [vmem:[%s9187_s2 + $0x8] sm:$0x1f] }
 0x32e   :  { %2136 = vrot.lane.b32.xlu1 %v6616_v11, %s5943_s7  ;;  %1644 = vst.msk [vmem:[#allocation5 + $0x73] sm:$0x1f] %vm1306_vm2, %v1642_v52  ;;  %v1470_v11 = vpop.permute.xlu0 %1469  ;;  %v1794_v2 = vpop.permute.xlu1 %1793 }
 0x32f   :  { %1472 = vst.msk [vmem:[#allocation5 + $0x28] sm:$0x1f] %vm1306_vm2, %v1470_v11 }
 0x331   :  { %1518 = vrot.lane.b32.xlu0 %v6546_v27, %s5943_s7  ;;  %v1149_v27 = vld [vmem:[%s9187_s2] sm:$0x1f] }
 0x332   :  { %1137 = vrot.lane.b32.xlu1 %v1135_v14, %s5964_s30  ;;  %v1476_v37 = vpop.permute.xlu0 %1475  ;;  %v1935_v8 = vpop.permute.xlu1 %1934 }
 0x333   :  { %1478 = vst.msk [vmem:[#allocation5 + $0x4b] sm:$0x1f] %vm1306_vm2, %v1476_v37  ;;  %1937 = vst.msk [vmem:[#allocation5 + $0x37] sm:$0x1f] %vm1306_vm2, %v1935_v8 }
 0x335   :  { %1673 = vrot.lane.b32.xlu0 %v6588_v31, %s5943_s7  ;;  %v2440_v31 = vand.u32 4294901760, %v2347_v21 }
 0x336   :  { %1151 = vrot.lane.b32.xlu1 %v1149_v27, %s5966_s20  ;;  %v1484_v16 = vpop.permute.xlu0 %1483  ;;  %v1949_v45 = vpop.permute.xlu1 %1948 }
 0x337   :  { %v6809_v7 = vsub.f32 %v2347_v21, %v2440_v31  ;;  %v1487_v23 = vsel %vm1328_vm11, %v1484_v16, %v1486_v10 }
 0x338   :  { %1489 = vst.msk [vmem:[#allocation5 + $0x6e] sm:$0x1f] %vm1306_vm2, %v1487_v23 }
 0x339   :  { %1828 = vrot.lane.b32.xlu0 %v6625_v44, %s5943_s7  ;;  %v2304_v44 = vld [vmem:[#allocation5 + $0x28] sm:$0xff]  ;;  %v2565_v41 = vand.u32 4294901760, %v6809_v7 }
 0x33a   :  { %2291 = vrot.lane.b32.xlu1 %v2287_v63, %s5943_s7  ;;  %v2350_v40 = vsel %vm9525_vm7, %v2304_v44, 0  ;;  %v1796_v39 = vpop.permute.xlu0 %1795  ;;  %v2096_v59 = vpop.permute.xlu1 %2095  ;;  %v2308_v11 = vld [vmem:[#allocation5 + $0x48] sm:$0xff]  ;;  %vm9530_vm7 = vmmov %vm9524_vm1 }
 0x33b   :  { %v1797_v17 = vsel %vm1328_vm11, %v1794_v2, %v1796_v39  ;;  %2098 = vst.msk [vmem:[#allocation5 + $0x5f] sm:$0x1f] %vm1306_vm2, %v2096_v59  ;;  %v2362_v44 = vsel %vm9530_vm7, %v2308_v11, 0 }
 0x33c   :  { %1799 = vst.msk [vmem:[#allocation5 + $0x78] sm:$0x1f] %vm1306_vm2, %v1797_v17 }
 0x33d   :  { %1983 = vrot.lane.b32.xlu0 %v6667_v62, %s5943_s7  ;;  %v2443_v62 = vand.u32 4294901760, %v2350_v40 }
 0x33e   :  { %1165 = vrot.lane.b32.xlu1 %v1163_v50, %s5968_s10  ;;  %v2104_v43 = vpop.permute.xlu1 %2103 }
 0x33f   :  { %v6825_v12 = vpack.c.bf16 %v2443_v62, %v2440_v31  ;;  %v6827_v49 = vsub.f32 %v2350_v40, %v2443_v62  ;;  %v2313_v30 = vld [vmem:[#allocation5 + $0x70] sm:$0xff] }
 0x340   :  { %v6858_v24 = vsel %vm9526_vm14, %v2313_v30, 0  ;;  %vm9531_vm14 = vmmov %vm9524_vm1 }
 0x341   :  { %2138 = vrot.lane.b32.xlu0 %v6689_v1, %s5943_s7  ;;  %5126 = vmatpush1.bf16.xpose.msra.mxu1 %v6825_v12  ;;  %v2566_v1 = vsub.f32 %v6809_v7, %v2565_v41  ;;  %v2572_v57 = vand.u32 4294901760, %v6827_v49  ;;  %v2470_v33 = vand.u32 4294901760, %v6858_v24 }
 0x342   :  { %1179 = vrot.lane.b32.xlu1 %v1177_v38, %s5988_s22  ;;  %5127 = vmatprep.subr.bf16.mxu1 %v9508_v26  ;;  %v2455_v38 = vand.u32 4294901760, %v2362_v44 }
 0x343   :  { %v2573_v32 = vsub.f32 %v6827_v49, %v2572_v57  ;;  %v6843_v9 = vpack.c.bf16 %v2572_v57, %v2565_v41  ;;  %v2567_v4 = vand.u32 4294901760, %v2566_v1  ;;  %v6879_v36 = vsub.f32 %v6858_v24, %v2470_v33 }
 0x345   :  { %2293 = vrot.lane.b32.xlu0 %v2288_v15, %s5943_s7  ;;  %v2574_v53 = vand.u32 4294901760, %v2573_v32  ;;  %v9207_v27 = vand.u32 4294901760, %v6879_v36  ;;  %v9545_v24 = vand.u32 4294901760, %v6879_v36 }
 0x346   :  { %1193 = vrot.lane.b32.xlu1 %v1191_v34, %s5997_s15 }
 0x347   :  { %v1951_v47 = vpop.permute.xlu0 %1950  ;;  %v5170_v19 = vpack.c.bf16 %v2574_v53, %v2567_v4 }
 0x348   :  { %v1952_v54 = vsel %vm1328_vm11, %v1949_v45, %v1951_v47 }
 0x349   :  { %1144 = vrot.lane.b32.xlu0 %v1142_v29, %s5962_s17  ;;  %1954 = vst.msk [vmem:[#allocation5 + $0x7d] sm:$0x1f] %vm1306_vm2, %v1952_v54  ;;  %5171 = vmatpush1.bf16.xpose.msra.mxu0 %v5170_v19  ;;  %v6930_v19 = vsub.f32 %v2362_v44, %v2455_v38 }
 0x34a   :  { %5172 = vmatprep.subr.bf16.mxu0 %v9508_v26 }
 0x34b   :  { %v1631_v46 = vpop.permute.xlu0 %1630 }
 0x34c   :  { %1633 = vst.msk [vmem:[#allocation5 + $0x50] sm:$0x1f] %vm1306_vm2, %v1631_v46 }
 0x34d   :  { %1158 = vrot.lane.b32.xlu0 %v1156_v3, %s5963_s13 }
 0x34f   :  { %v2245_v56 = vpop.permute.xlu1 %2244  ;;  %v1780_v28 = vpop.permute.xlu0 %1779 }
 0x350   :  { %2247 = vst.msk [vmem:[#allocation5 + $0x41] sm:$0x1f] %vm1306_vm2, %v2245_v56  ;;  %1782 = vst.msk [vmem:[#allocation5 + $0x32] sm:$0x1f] %vm1306_vm2, %v1780_v28  ;;  %v2314_v0 = vld [vmem:[#allocation5 + $0x78] sm:$0xff] }
 0x351   :  { %1172 = vrot.lane.b32.xlu0 %v1170_v42, %s5987_s21  ;;  %v6873_v35 = vsel %vm9527_vm15, %v2314_v0, 0  ;;  %vm9532_vm15 = vmmov %vm9524_vm1 }
 0x352   :  { %v2473_v6 = vand.u32 4294901760, %v6873_v35 }
 0x353   :  { %v1495_v10 = vpop.permute.xlu1 %1494  ;;  %v1941_v14 = vpop.permute.xlu0 %1940  ;;  %v2309_v13 = vld [vmem:[#allocation5 + $0x50] sm:$0xff] }
 0x354   :  { %1943 = vst.msk [vmem:[#allocation5 + $0x5a] sm:$0x1f] %vm1306_vm2, %v1941_v14  ;;  %v6888_v52 = vsub.f32 %v6873_v35, %v2473_v6  ;;  %v6895_v2 = vsel %vm9528_vm3, %v2309_v13, 0  ;;  %vm9533_vm3 = vmmov %vm9524_vm1  ;;  %v2600_v13 = vand.u32 4294901760, %v6930_v19  ;;  %v2636_v35 = vsub.f32 %v6879_v36, %v9545_v24 }
 0x355   :  { %1186 = vrot.lane.b32.xlu0 %v1184_v58, %s5989_s6  ;;  %s5998_s6 = smov 23   ;;  %v2458_v40 = vand.u32 4294901760, %v6895_v2  ;;  %vm9538_vm7 = vmmov %vm9533_vm3 }
 0x356   :  { %v2642_v18 = vand.u32 4294901760, %v6888_v52 }
 0x357   :  { %v1650_v21 = vpop.permute.xlu1 %1649  ;;  %v2090_v37 = vpop.permute.xlu0 %2089  ;;  %v2305_v63 = vld [vmem:[#allocation5 + $0x30] sm:$0xff]  ;;  %v6920_v57 = vsub.f32 %v6895_v2, %v2458_v40 }
 0x358   :  { %2092 = vst.msk [vmem:[#allocation5 + $0x3c] sm:$0x1f] %vm1306_vm2, %v2090_v37  ;;  %v2353_v16 = vsel %vm9524_vm1, %v2305_v63, 0  ;;  %v6903_v50 = vpack.c.bf16 %v2642_v18, %v9207_v27  ;;  %vm1352_vm1 = vcmask 637952  }
 0x359   :  { %1200 = vrot.lane.b32.xlu0 %v1198_v51, %s5998_s6  ;;  %v2446_v8 = vand.u32 4294901760, %v2353_v16  ;;  %v2607_v46 = vand.u32 4294901760, %v6920_v57 }
 0x35a   :  { %9529 = vst [vmem:[#allocation7_spill] sm:$0xff] %v6903_v50 }
 0x35b   :  { %v1805_v23 = vpop.permute.xlu1 %1804  ;;  %v2106_v62 = vpop.permute.xlu0 %2105  ;;  %v2310_v41 = vld [vmem:[#allocation5 + $0x58] sm:$0xff]  ;;  %v6908_v45 = vsub.f32 %v2353_v16, %v2446_v8 }
 0x35c   :  { %v2107_v39 = vsel %vm1328_vm11, %v2104_v43, %v2106_v62  ;;  %v6911_v17 = vsel %vm9531_vm14, %v2310_v41, 0  ;;  %vm9539_vm14 = vmmov %vm9533_vm3 }
 0x35d   :  { %2109 = vst.msk [vmem:[#allocation5 + $0x82] sm:$0x1f] %vm1306_vm2, %v2107_v39  ;;  %v2461_v15 = vand.u32 4294901760, %v6911_v17  ;;  %v2579_v47 = vand.u32 4294901760, %v6908_v45 }
 0x35f   :  { %v6915_v1 = vpop.permute.xlu1 %1348  ;;  %v2306_v59 = vld [vmem:[#allocation5 + $0x38] sm:$0xff]  ;;  %v2307_v32 = vld [vmem:[#allocation5 + $0x40] sm:$0xff]  ;;  %v6925_v29 = vsub.f32 %v6911_v17, %v2461_v15  ;;  %v2580_v51 = vsub.f32 %v6908_v45, %v2579_v47 }
 0x360   :  { %v2356_v4 = vsel %vm9532_vm15, %v2306_v59, 0  ;;  %v2359_v53 = vsel %vm9533_vm3, %v2307_v32, 0  ;;  %vm9540_vm15 = vmmov %vm9533_vm3 }
 0x361   :  { %v2449_v54 = vand.u32 4294901760, %v2356_v4  ;;  %v2452_v3 = vand.u32 4294901760, %v2359_v53  ;;  %v2614_v43 = vand.u32 4294901760, %v6925_v29  ;;  %v2581_v32 = vand.u32 4294901760, %v2580_v51 }
 0x363   :  { %v2261_v34 = vpop.permute.xlu0 %2260  ;;  %v6933_v30 = vpop.permute.xlu1 %1959  ;;  %v6938_v28 = vpack.c.bf16 %v2449_v54, %v2446_v8  ;;  %v6940_v58 = vsub.f32 %v2356_v4, %v2449_v54  ;;  %v6942_v0 = vsub.f32 %v2359_v53, %v2452_v3  ;;  %v6947_v11 = vpack.c.bf16 %v2614_v43, %v2607_v46 }
 0x365   :  { %9534 = vst [vmem:[#allocation8_spill] sm:$0xff] %v6947_v11  ;;  %5129 = vmatpush1.bf16.xpose.msra.mxu1 %v6938_v28  ;;  %v2586_v37 = vand.u32 4294901760, %v6940_v58  ;;  %v2593_v63 = vand.u32 4294901760, %v6942_v0 }
 0x366   :  { %5130 = vmatprep.subr.bf16.mxu1 %v9508_v26 }
 0x367   :  { %v1497_v56 = vpop.permute.xlu0 %1496  ;;  %v2587_v62 = vsub.f32 %v6940_v58, %v2586_v37  ;;  %v6961_v41 = vpack.c.bf16 %v2586_v37, %v2579_v47  ;;  %v6963_v39 = vpack.c.bf16 %v2600_v13, %v2593_v63  ;;  %v2594_v31 = vsub.f32 %v6942_v0, %v2593_v63 }
 0x368   :  { %v1498_v14 = vsel %vm1340_vm0, %v1495_v10, %v1497_v56  ;;  %v6957_v8 = vpop.permute.xlu1 %2114  ;;  %v6969_v56 = vpack.c.bf16 %v2455_v38, %v2452_v3 }
 0x369   :  { %1500 = vst.msk [vmem:[#allocation5 + $0x91] sm:$0x1f] %vm1306_vm2, %v1498_v14  ;;  %9535 = vst [vmem:[#allocation11_spill] sm:$0xff] %v6961_v41  ;;  %v2588_v4 = vand.u32 4294901760, %v2587_v62  ;;  %v2595_v3 = vand.u32 4294901760, %v2594_v31  ;;  %v2608_v31 = vsub.f32 %v6920_v57, %v2607_v46 }
 0x36a   :  { %9536 = vst [vmem:[#allocation12_spill] sm:$0xff] %v6963_v39 }
 0x36b   :  { %v1652_v44 = vpop.permute.xlu0 %1651  ;;  %v5173_v14 = vpack.c.bf16 %v2588_v4, %v2581_v32  ;;  %v2609_v4 = vand.u32 4294901760, %v2608_v31 }
 0x36c   :  { %v1653_v59 = vsel %vm1340_vm0, %v1650_v21, %v1652_v44  ;;  %v6967_v53 = vpop.permute.xlu1 %1505  ;;  %v2601_v21 = vsub.f32 %v6930_v19, %v2600_v13  ;;  %v2615_v13 = vsub.f32 %v6925_v29, %v2614_v43  ;;  %v6988_v44 = vpack.c.bf16 %v2461_v15, %v2458_v40 }
 0x36d   :  { %1655 = vst.msk [vmem:[#allocation5 + $0x96] sm:$0x1f] %vm1306_vm2, %v1653_v59  ;;  %5132 = vmatpush1.bf16.xpose.msra.mxu1 %v6969_v56  ;;  %5174 = vmatpush1.bf16.xpose.msra.mxu0 %v5173_v14 }
 0x36e   :  { %5133 = vmatprep.subr.bf16.mxu1 %v9508_v26  ;;  %5175 = vmatprep.subr.bf16.mxu0 %v9508_v26  ;;  %v2616_v17 = vand.u32 4294901760, %v2615_v13 }
 0x36f   :  { %v1807_v54 = vpop.permute.xlu0 %1806 }
 0x370   :  { %v1808_v42 = vsel %vm1340_vm0, %v1805_v23, %v1807_v54  ;;  %v2259_v47 = vpop.permute.xlu1 %2258  ;;  %v2602_v23 = vand.u32 4294901760, %v2601_v21 }
 0x371   :  { %1810 = vst.msk [vmem:[#allocation5 + $0x9b] sm:$0x1f] %vm1306_vm2, %v1808_v42  ;;  %v2262_v38 = vsel %vm1328_vm11, %v2259_v47, %v2261_v34  ;;  %vm9537_vm11 = vmmov %vm9533_vm3 }
 0x372   :  { %2264 = vst.msk [vmem:[#allocation5 + $0x87] sm:$0x1f] %vm1306_vm2, %v2262_v38  ;;  %v5176_v34 = vpack.c.bf16 %v2602_v23, %v2595_v3 }
 0x373   :  { %v2251_v51 = vpop.permute.xlu0 %2250 }
 0x374   :  { %2253 = vst.msk [vmem:[#allocation5 + $0x64] sm:$0x1f] %vm1306_vm2, %v2251_v51  ;;  %v2317_v42 = vld [vmem:[#allocation5 + $0x90] sm:$0xff]  ;;  %v6981_v37 = vpop.permute.xlu1 %1660 }
 0x375   :  { %v6994_v32 = vsel %vm9537_vm11, %v2317_v42, 0  ;;  %5135 = vmatpush1.bf16.xpose.msra.mxu1 %v6988_v44  ;;  %5177 = vmatpush1.bf16.xpose.msra.mxu0 %v5176_v34  ;;  %vm9541_vm11 = vmmov %vm9533_vm3 }
 0x376   :  { %5136 = vmatprep.subr.bf16.mxu1 %v9508_v26  ;;  %5178 = vmatprep.subr.bf16.mxu0 %v9508_v26  ;;  %v9205_v14 = vand.u32 4294901760, %v6994_v32 }
 0x377   :  { %v1351_v63 = vpop.permute.xlu0 %1350 }
 0x378   :  { %v1353_v62 = vsel %vm1352_vm1, %v6915_v1, %v1351_v63  ;;  %v2318_v59 = vld [vmem:[#allocation5 + $0x98] sm:$0xff]  ;;  %v7001_v40 = vpop.permute.xlu1 %1815 }
 0x379   :  { %1355 = vst.msk [vmem:[#allocation5 + $0xaf] sm:$0x1f] %vm1306_vm2, %v1353_v62  ;;  %v6999_v2 = vsel %vm9538_vm7, %v2318_v59, 0  ;;  %v2315_v54 = vld [vmem:[#allocation5 + $0x80] sm:$0xff]  ;;  %v2316_v38 = vld [vmem:[#allocation5 + $0x88] sm:$0xff] }
 0x37a   :  { %v9204_v15 = vand.u32 4294901760, %v6999_v2  ;;  %v7012_v3 = vsel %vm9533_vm3, %v2315_v54, 0  ;;  %v7016_v13 = vsel %vm9541_vm11, %v2316_v38, 0 }
 0x37b   :  { %v1962_v1 = vpop.permute.xlu0 %1961  ;;  %v2311_v43 = vld [vmem:[#allocation5 + $0x60] sm:$0xff]  ;;  %v2312_v46 = vld [vmem:[#allocation5 + $0x68] sm:$0xff]  ;;  %v9206_v63 = vand.u32 4294901760, %v7012_v3  ;;  %v2479_v31 = vand.u32 4294901760, %v7016_v13 }
 0x37c   :  { %v1963_v21 = vsel %vm1340_vm0, %v6933_v30, %v1962_v1  ;;  %v2371_v47 = vsel %vm9539_vm14, %v2311_v43, 0  ;;  %v2374_v51 = vsel %vm9540_vm15, %v2312_v46, 0  ;;  %v7019_v34 = vpop.permute.xlu1 %1970  ;;  %v5179_v30 = vpack.c.bf16 %v2616_v17, %v2609_v4 }
 0x37d   :  { %1965 = vst.msk [vmem:[#allocation5 + $0xa0] sm:$0x1f] %vm1306_vm2, %v1963_v21  ;;  %v2464_v23 = vand.u32 4294901760, %v2371_v47  ;;  %v2467_v42 = vand.u32 4294901760, %v2374_v51  ;;  %v7025_v62 = vsub.f32 %v6999_v2, %v9204_v15  ;;  %v7036_v54 = vsub.f32 %v7012_v3, %v9206_v63 }
 0x37e   :  { %v7041_v4 = vsub.f32 %v7016_v13, %v2479_v31  ;;  %v7046_v21 = vsub.f32 %v6994_v32, %v9205_v14  ;;  %5180 = vmatpush1.bf16.xpose.msra.mxu0 %v5179_v30 }
 0x37f   :  { %v2117_v59 = vpop.permute.xlu0 %2116  ;;  %v7027_v1 = vpack.c.bf16 %v2467_v42, %v2464_v23  ;;  %v7029_v43 = vsub.f32 %v2371_v47, %v2464_v23  ;;  %v7031_v46 = vsub.f32 %v2374_v51, %v2467_v42  ;;  %v2649_v38 = vand.u32 4294901760, %v7036_v54  ;;  %5181 = vmatprep.subr.bf16.mxu0 %v9508_v26 }
 0x380   :  { %v2118_v17 = vsel %vm1340_vm0, %v6957_v8, %v2117_v59  ;;  %v9209_v8 = vand.u32 4294901760, %v7025_v62  ;;  %v2270_v23 = vpop.permute.xlu1 %2269  ;;  %v2656_v42 = vand.u32 4294901760, %v7041_v4  ;;  %v9208_v60 = vand.u32 4294901760, %v7046_v21 }
 0x381   :  { %2120 = vst.msk [vmem:[#allocation5 + $0xa5] sm:$0x1f] %vm1306_vm2, %v2118_v17  ;;  %5138 = vmatpush1.bf16.xpose.msra.mxu1 %v7027_v1  ;;  %v2621_v47 = vand.u32 4294901760, %v7029_v43  ;;  %v2628_v51 = vand.u32 4294901760, %v7031_v46 }
 0x382   :  { %5139 = vmatprep.subr.bf16.mxu1 %v9508_v26  ;;  %v7069_v14 = vpack.c.bf16 %v2656_v42, %v2649_v38  ;;  %v7076_v59 = vpack.c.bf16 %v9209_v8, %v9208_v60 }
 0x383   :  { %v2272_v17 = vpop.permute.xlu0 %2271  ;;  %v2622_v10 = vsub.f32 %v7029_v43, %v2621_v47  ;;  %v2629_v16 = vsub.f32 %v7031_v46, %v2628_v51  ;;  %v7067_v15 = vpack.c.bf16 %v2628_v51, %v2621_v47  ;;  %v7082_v47 = vpack.c.bf16 %v2473_v6, %v2470_v33 }
 0x384   :  { %v2273_v5 = vsel %vm1340_vm0, %v2270_v23, %v2272_v17  ;;  %9543 = vst [vmem:[#allocation14_spill] sm:$0xff] %v7069_v14  ;;  %v2126_v63 = vpop.permute.xlu1 %2125  ;;  %9544 = vst [vmem:[#allocation15_spill] sm:$0xff] %v7076_v59  ;;  %v9551_v59 = vand.u32 4294901760, %v6994_v32  ;;  %v9552_v14 = vand.u32 4294901760, %v6999_v2 }
 0x385   :  { %9542 = vst [vmem:[#allocation13_spill] sm:$0xff] %v7067_v15  ;;  %2275 = vst.msk [vmem:[#allocation5 + $0xaa] sm:$0x1f] %vm1306_vm2, %v2273_v5  ;;  %v2623_v13 = vand.u32 4294901760, %v2622_v10  ;;  %v2630_v30 = vand.u32 4294901760, %v2629_v16  ;;  %v2643_v5 = vsub.f32 %v6888_v52, %v2642_v18 }
 0x386   :  { %vm9546_vm0 = vmmov %vm9533_vm3  ;;  %vm1364_vm3 = vcmask 556032  }
 0x387   :  { %v1508_v27 = vpop.permute.xlu0 %1507  ;;  %v5182_v51 = vpack.c.bf16 %v2630_v30, %v2623_v13  ;;  %v2637_v30 = vand.u32 4294901760, %v2636_v35  ;;  %vm9547_vm7 = vmmov %vm9546_vm0  ;;  %v2657_v35 = vsub.f32 %v7041_v4, %v2656_v42 }
 0x388   :  { %v1509_v16 = vsel %vm1352_vm1, %v6967_v53, %v1508_v27  ;;  %v2319_v10 = vld [vmem:[#allocation5 + $0xa0] sm:$0xff]  ;;  %v7097_v6 = vpop.permute.xlu1 %1360  ;;  %v2644_v53 = vand.u32 4294901760, %v2643_v5  ;;  %v9548_v5 = vand.u32 4294901760, %v7012_v3  ;;  %vm9549_vm14 = vmmov %vm9546_vm0 }
 0x389   :  { %1511 = vst.msk [vmem:[#allocation5 + $0xb4] sm:$0x1f] %vm1306_vm2, %v1509_v16  ;;  %5141 = vmatpush1.bf16.xpose.msra.mxu1 %v7082_v47  ;;  %5183 = vmatpush1.bf16.xpose.msra.mxu0 %v5182_v51  ;;  %v7095_v33 = vsel %vm9546_vm0, %v2319_v10, 0  ;;  %vm9555_vm15 = vmmov %vm9546_vm0 }
 0x38a   :  { %5142 = vmatprep.subr.bf16.mxu1 %v9508_v26  ;;  %5184 = vmatprep.subr.bf16.mxu0 %v9508_v26  ;;  %v9210_v27 = vand.u32 4294901760, %v7095_v33  ;;  %v7115_v60 = vpack.c.bf16 %v2479_v31, %v9548_v5  ;;  %vm9559_vm11 = vmmov %vm9546_vm0 }
 0x38b   :  { %v1663_v18 = vpop.permute.xlu0 %1662 }
 0x38c   :  { %v1664_v23 = vsel %vm1352_vm1, %v6981_v37, %v1663_v18  ;;  %v2320_v13 = vld [vmem:[#allocation5 + $0xa8] sm:$0xff]  ;;  %v7106_v51 = vpop.permute.xlu1 %1516  ;;  %v7111_v10 = vsub.f32 %v7095_v33, %v9210_v27  ;;  %v5185_v37 = vpack.c.bf16 %v2644_v53, %v2637_v30  ;;  %v2650_v18 = vsub.f32 %v7036_v54, %v2649_v38 }
 0x38d   :  { %1666 = vst.msk [vmem:[#allocation5 + $0xb9] sm:$0x1f] %vm1306_vm2, %v1664_v23  ;;  %v2398_v17 = vsel %vm9547_vm7, %v2320_v13, 0  ;;  %v2658_v53 = vand.u32 4294901760, %v2657_v35  ;;  %v9553_v35 = vand.u32 4294901760, %v7025_v62  ;;  %vm9563_vm7 = vmmov %vm9546_vm0 }
 0x38e   :  { %v2491_v16 = vand.u32 4294901760, %v2398_v17  ;;  %v2677_v3 = vand.u32 4294901760, %v7111_v10  ;;  %v2651_v42 = vand.u32 4294901760, %v2650_v18 }
 0x38f   :  { %v1818_v24 = vpop.permute.xlu0 %1817 }
 0x390   :  { %v1819_v23 = vsel %vm1352_vm1, %v7001_v40, %v1818_v24  ;;  %v2321_v13 = vld [vmem:[#allocation5 + $0xb0] sm:$0xff]  ;;  %v7121_v8 = vsub.f32 %v2398_v17, %v2491_v16  ;;  %v2281_v27 = vpop.permute.xlu1 %2280  ;;  %v7141_v40 = vpack.c.bf16 %v9552_v14, %v9551_v59  ;;  %v5188_v18 = vpack.c.bf16 %v2658_v53, %v2651_v42 }
 0x391   :  { %1821 = vst.msk [vmem:[#allocation5 + $0xbe] sm:$0x1f] %vm1306_vm2, %v1819_v23  ;;  %5144 = vmatpush1.bf16.xpose.msra.mxu1 %v7115_v60  ;;  %5186 = vmatpush1.bf16.xpose.msra.mxu0 %v5185_v37  ;;  %v2401_v30 = vsel %vm9549_vm14, %v2321_v13, 0  ;;  %v2671_v13 = vsub.f32 %v7025_v62, %v9553_v35  ;;  %vm9565_vm14 = vcmask 323824  }
 0x392   :  { %5145 = vmatprep.subr.bf16.mxu1 %v9508_v26  ;;  %5187 = vmatprep.subr.bf16.mxu0 %v9508_v26  ;;  %v2684_v31 = vand.u32 4294901760, %v7121_v8  ;;  %v2494_v37 = vand.u32 4294901760, %v2401_v30 }
 0x393   :  { %v1973_v38 = vpop.permute.xlu0 %1972  ;;  %v2672_v53 = vand.u32 4294901760, %v2671_v13  ;;  %v9556_v13 = vand.u32 4294901760, %v7095_v33 }
 0x394   :  { %v1974_v17 = vsel %vm1352_vm1, %v7019_v34, %v1973_v38  ;;  %v7134_v24 = vpack.c.bf16 %v2684_v31, %v2677_v3  ;;  %v1672_v5 = vpop.permute.xlu1 %1671  ;;  %v7155_v42 = vsub.f32 %v2401_v30, %v2494_v37  ;;  %v2678_v30 = vsub.f32 %v7111_v10, %v2677_v3 }
 0x395   :  { %1976 = vst.msk [vmem:[#allocation5 + $0xc3] sm:$0x1f] %vm1306_vm2, %v1974_v17  ;;  %v9554_v17 = vand.u32 4294901760, %v7046_v21  ;;  %v7167_v15 = vpack.c.bf16 %v2491_v16, %v9556_v13 }
 0x396   :  { %9550 = vst [vmem:[#allocation16_spill] sm:$0xff] %v7134_v24 }
 0x397   :  { %v2128_v23 = vpop.permute.xlu0 %2127  ;;  %v2664_v32 = vsub.f32 %v7046_v21, %v9554_v17  ;;  %v2691_v17 = vand.u32 4294901760, %v7155_v42 }
 0x398   :  { %v2129_v34 = vsel %vm1352_vm1, %v2126_v63, %v2128_v23  ;;  %v2322_v38 = vld [vmem:[#allocation5 + $0xb8] sm:$0xff]  ;;  %v1827_v14 = vpop.permute.xlu1 %1826 }
 0x399   :  { %2131 = vst.msk [vmem:[#allocation5 + $0xc8] sm:$0x1f] %vm1306_vm2, %v2129_v34  ;;  %5147 = vmatpush1.bf16.xpose.msra.mxu1 %v7141_v40  ;;  %5189 = vmatpush1.bf16.xpose.msra.mxu0 %v5188_v18  ;;  %v2404_v2 = vsel %vm9555_vm15, %v2322_v38, 0  ;;  %v2665_v34 = vand.u32 4294901760, %v2664_v32 }
 0x39a   :  { %5148 = vmatprep.subr.bf16.mxu1 %v9508_v26  ;;  %5190 = vmatprep.subr.bf16.mxu0 %v9508_v26  ;;  %v2497_v59 = vand.u32 4294901760, %v2404_v2 }
 0x39b   :  { %v2283_v63 = vpop.permute.xlu0 %2282 }
 0x39c   :  { %v2284_v23 = vsel %vm1352_vm1, %v2281_v27, %v2283_v63  ;;  %v2323_v35 = vld [vmem:[#allocation5 + $0xc0] sm:$0xff]  ;;  %v7158_v18 = vsub.f32 %v2404_v2, %v2497_v59  ;;  %v1982_v38 = vpop.permute.xlu1 %1981  ;;  %v5191_v27 = vpack.c.bf16 %v2672_v53, %v2665_v34  ;;  %v2685_v2 = vsub.f32 %v7121_v8, %v2684_v31  ;;  %vm9557_vm1 = vmmov %vm9546_vm0 }
 0x39d   :  { %2286 = vst.msk [vmem:[#allocation5 + $0xcd] sm:$0x1f] %vm1306_vm2, %v2284_v23  ;;  %v2407_v63 = vsel %vm9557_vm1, %v2323_v35, 0  ;;  %v2679_v35 = vand.u32 4294901760, %v2678_v30  ;;  %v2692_v30 = vsub.f32 %v7155_v42, %v2691_v17 }
 0x39e   :  { %v2698_v24 = vand.u32 4294901760, %v7158_v18  ;;  %v2500_v16 = vand.u32 4294901760, %v2407_v63  ;;  %v2686_v53 = vand.u32 4294901760, %v2685_v2 }
 0x39f   :  { %v1363_v50 = vpop.permute.xlu0 %1362 }
 0x3a0   :  { %v1365_v32 = vsel %vm1364_vm3, %v7097_v6, %v1363_v50  ;;  %v7173_v23 = vpack.c.bf16 %v2698_v24, %v2691_v17  ;;  %v2137_v33 = vpop.permute.xlu1 %2136  ;;  %v7184_v3 = vsub.f32 %v2407_v63, %v2500_v16  ;;  %v5194_v11 = vpack.c.bf16 %v2686_v53, %v2679_v35 }
 0x3a1   :  { %1367 = vst.msk [vmem:[#allocation5 + $0xd2] sm:$0x1f] %vm1306_vm2, %v1365_v32  ;;  %5150 = vmatpush1.bf16.xpose.msra.mxu1 %v7167_v15  ;;  %5192 = vmatpush1.bf16.xpose.msra.mxu0 %v5191_v27  ;;  %v2699_v2 = vsub.f32 %v7158_v18, %v2698_v24 }
 0x3a2   :  { %9558 = vst [vmem:[#allocation17_spill] sm:$0xff] %v7173_v23  ;;  %5151 = vmatprep.subr.bf16.mxu1 %v9508_v26  ;;  %5193 = vmatprep.subr.bf16.mxu0 %v9508_v26  ;;  %v7187_v23 = vpack.c.bf16 %v2497_v59, %v2494_v37  ;;  %v2705_v37 = vand.u32 4294901760, %v7184_v3 }
 0x3a3   :  { %v1519_v31 = vpop.permute.xlu0 %1518  ;;  %v2700_v63 = vand.u32 4294901760, %v2699_v2 }
 0x3a4   :  { %v1520_v50 = vsel %vm1364_vm3, %v7106_v51, %v1519_v31  ;;  %v2324_v6 = vld [vmem:[#allocation5 + $0xc8] sm:$0xff]  ;;  %v1138_v13 = vpop.permute.xlu1 %1137 }
 0x3a5   :  { %1522 = vst.msk [vmem:[#allocation5 + $0xd7] sm:$0x1f] %vm1306_vm2, %v1520_v50  ;;  %v2410_v34 = vsel %vm9559_vm11, %v2324_v6, 0 }
 0x3a6   :  { %v2503_v27 = vand.u32 4294901760, %v2410_v34  ;;  %1141 = vst.msk [vmem:[#allocation3] sm:$0x1f] %vm1140_vm4, %v1138_v13  ;;  %vm9561_vm4 = vmmov %vm9546_vm0 }
 0x3a7   :  { %v1674_v32 = vpop.permute.xlu0 %1673 }
 0x3a8   :  { %v1675_v51 = vsel %vm1364_vm3, %v1672_v5, %v1674_v32  ;;  %v7191_v31 = vsub.f32 %v2410_v34, %v2503_v27  ;;  %v7207_v13 = vpack.c.bf16 %v2503_v27, %v2500_v16  ;;  %v1152_v24 = vpop.permute.xlu1 %1151 }
 0x3a9   :  { %1677 = vst.msk [vmem:[#allocation5 + $0xdc] sm:$0x1f] %vm1306_vm2, %v1675_v51  ;;  %5153 = vmatpush1.bf16.xpose.msra.mxu1 %v7187_v23  ;;  %5195 = vmatpush1.bf16.xpose.msra.mxu0 %v5194_v11  ;;  %v2693_v11 = vand.u32 4294901760, %v2692_v30  ;;  %v2706_v30 = vsub.f32 %v7184_v3, %v2705_v37 }
 0x3aa   :  { %5154 = vmatprep.subr.bf16.mxu1 %v9508_v26  ;;  %5196 = vmatprep.subr.bf16.mxu0 %v9508_v26  ;;  %v2712_v59 = vand.u32 4294901760, %v7191_v31 }
 0x3ab   :  { %v1829_v5 = vpop.permute.xlu0 %1828  ;;  %v5197_v32 = vpack.c.bf16 %v2700_v63, %v2693_v11 }
 0x3ac   :  { %v1830_v53 = vsel %vm1364_vm3, %v1827_v14, %v1829_v5  ;;  %v2325_v50 = vld [vmem:[#allocation5 + $0xd0] sm:$0xff]  ;;  %v7203_v6 = vpack.c.bf16 %v2712_v59, %v2705_v37  ;;  %v2713_v51 = vsub.f32 %v7191_v31, %v2712_v59 }
 0x3ad   :  { %1832 = vst.msk [vmem:[#allocation5 + $0xe1] sm:$0x1f] %vm1306_vm2, %v1830_v53  ;;  %v2413_v17 = vsel %vm9561_vm4, %v2325_v50, 0  ;;  %v2707_v53 = vand.u32 4294901760, %v2706_v30  ;;  %v2292_v50 = vpop.permute.xlu1 %2291 }
 0x3ae   :  { %9560 = vst [vmem:[#allocation18_spill] sm:$0xff] %v7203_v6  ;;  %v2506_v35 = vand.u32 4294901760, %v2413_v17  ;;  %v2714_v59 = vand.u32 4294901760, %v2713_v51 }
 0x3af   :  { %v1984_v34 = vpop.permute.xlu0 %1983 }
 0x3b0   :  { %v1985_v2 = vsel %vm1364_vm3, %v1982_v38, %v1984_v34  ;;  %v2326_v39 = vld [vmem:[#allocation5 + $0xd8] sm:$0xff]  ;;  %v7215_v5 = vsub.f32 %v2413_v17, %v2506_v35 }
 0x3b1   :  { %1987 = vst.msk [vmem:[#allocation5 + $0xe6] sm:$0x1f] %vm1306_vm2, %v1985_v2  ;;  %5156 = vmatpush1.bf16.xpose.msra.mxu1 %v7207_v13  ;;  %5198 = vmatpush1.bf16.xpose.msra.mxu0 %v5197_v32  ;;  %v2416_v14 = vsel %vm9546_vm0, %v2326_v39, 0  ;;  %v5200_v32 = vpack.c.bf16 %v2714_v59, %v2707_v53 }
 0x3b2   :  { %5157 = vmatprep.subr.bf16.mxu1 %v9508_v26  ;;  %5199 = vmatprep.subr.bf16.mxu0 %v9508_v26  ;;  %v2509_v16 = vand.u32 4294901760, %v2416_v14  ;;  %v2719_v39 = vand.u32 4294901760, %v7215_v5 }
 0x3b3   :  { %v2139_v27 = vpop.permute.xlu0 %2138 }
 0x3b4   :  { %v2140_v38 = vsel %vm1364_vm3, %v2137_v33, %v2139_v27  ;;  %v7220_v63 = vsub.f32 %v2416_v14, %v2509_v16  ;;  %v7227_v34 = vpack.c.bf16 %v2509_v16, %v2506_v35  ;;  %v2720_v30 = vsub.f32 %v7215_v5, %v2719_v39 }
 0x3b5   :  { %2142 = vst.msk [vmem:[#allocation5 + $0xeb] sm:$0x1f] %vm1306_vm2, %v2140_v38  ;;  %v1166_v38 = vpop.permute.xlu1 %1165 }
 0x3b6   :  { %v2726_v37 = vand.u32 4294901760, %v7220_v63 }
 0x3b7   :  { %v2294_v17 = vpop.permute.xlu0 %2293 }
 0x3b8   :  { %v2295_v51 = vsel %vm1364_vm3, %v2292_v50, %v2294_v17  ;;  %v2727_v33 = vsub.f32 %v7220_v63, %v2726_v37  ;;  %v2327_v2 = vld [vmem:[#allocation5 + $0xe0] sm:$0xff]  ;;  %v7231_v14 = vpack.c.bf16 %v2726_v37, %v2719_v39  ;;  %v2721_v37 = vand.u32 4294901760, %v2720_v30 }
 0x3b9   :  { %2297 = vst.msk [vmem:[#allocation5 + $0xf0] sm:$0x1f] %vm1306_vm2, %v2295_v51  ;;  %5159 = vmatpush1.bf16.xpose.msra.mxu1 %v7227_v34  ;;  %5201 = vmatpush1.bf16.xpose.msra.mxu0 %v5200_v32  ;;  %v2419_v27 = vsel %vm9563_vm7, %v2327_v2, 0  ;;  %vm9564_vm2 = vmmov %vm9546_vm0  ;;  %v1180_v30 = vpop.permute.xlu1 %1179 }
 0x3ba   :  { %9562 = vst [vmem:[#allocation19_spill] sm:$0xff] %v7231_v14  ;;  %5202 = vmatprep.subr.bf16.mxu0 %v9508_v26  ;;  %5160 = vmatprep.subr.bf16.mxu1 %v9508_v26  ;;  %v2512_v35 = vand.u32 4294901760, %v2419_v27  ;;  %v2728_v59 = vand.u32 4294901760, %v2727_v33 }
 0x3bb   :  { %v1145_v16 = vpop.permute.xlu0 %1144 }
 0x3bc   :  { %1148 = vst.msk [vmem:[#allocation3] sm:$0x1f] %vm1147_vm5, %v1145_v16  ;;  %v2328_v53 = vld [vmem:[#allocation5 + $0xe8] sm:$0xff]  ;;  %v7240_v50 = vsub.f32 %v2419_v27, %v2512_v35  ;;  %v5203_v2 = vpack.c.bf16 %v2728_v59, %v2721_v37  ;;  %vm9566_vm5 = vmmov %vm9546_vm0  ;;  %v9567_v37 = vmov 0.0  }
 0x3bd   :  { %1155 = vst.msk [vmem:[#allocation3] sm:$0x1f] %vm1154_vm6, %v1152_v24  ;;  %v2422_v39 = vsel %vm9564_vm2, %v2328_v53, 0  ;;  %v1194_v6 = vpop.permute.xlu1 %1193  ;;  %vm9568_vm6 = vcmask 651824  }
 0x3be   :  { %v2515_v17 = vand.u32 4294901760, %v2422_v39  ;;  %v2733_v32 = vand.u32 4294901760, %v7240_v50 }
 0x3bf   :  { %v1159_v51 = vpop.permute.xlu0 %1158 }
 0x3c0   :  { %1162 = vst.msk [vmem:[#allocation3] sm:$0x1f] %vm9565_vm14, %v1159_v51  ;;  %v7246_v11 = vpack.c.bf16 %v2515_v17, %v2512_v35  ;;  %v2329_v33 = vld [vmem:[#allocation5 + $0xf0] sm:$0x1f]  ;;  %v7248_v14 = vsub.f32 %v2422_v39, %v2515_v17  ;;  %v2734_v16 = vsub.f32 %v7240_v50, %v2733_v32 }
 0x3c1   :  { %1169 = vst.msk [vmem:[#allocation3] sm:$0x1f] %vm1168_vm8, %v1166_v38  ;;  %5204 = vmatpush1.bf16.xpose.msra.mxu0 %v5203_v2  ;;  %v2425_v24 = vsel %vm9566_vm5, %v2329_v33, 0  ;;  %vm9569_vm8 = vmmov %vm9546_vm0 }
 0x3c2   :  { %5162 = vmatpush1.bf16.xpose.msra.mxu1 %v7246_v11  ;;  %5205 = vmatprep.subr.bf16.mxu0 %v9508_v26  ;;  %v7254_v27 = vand.u32 4294901760, %v2425_v24  ;;  %v2740_v35 = vand.u32 4294901760, %v7248_v14  ;;  %v5251_v59 = vpack.c.bf16 %v7248_v14, %v7240_v50  ;;  %v2735_v51 = vand.u32 4294901760, %v2734_v16 }
 0x3c3   :  { %v1173_v53 = vpop.permute.xlu0 %1172  ;;  %2517 = vmatprep.subr.mxu1 %v9567_v37 }
 0x3c4   :  { %1176 = vst.msk [vmem:[#allocation3] sm:$0x1f] %vm1175_vm9, %v1173_v53  ;;  %v2741_v38 = vsub.f32 %v7248_v14, %v2740_v35  ;;  %v7264_v39 = vsub.f32 %v2425_v24, %v7254_v27  ;;  %v7266_v17 = vpack.c.bf16 %v2740_v35, %v2733_v32  ;;  %v9570_v53 = vpack.c.bf16 %v6498_v22, %v6472_v61 }
 0x3c5   :  { %1183 = vst.msk [vmem:[#allocation3] sm:$0x1f] %vm1182_vm10, %v1180_v30  ;;  %v9572_v61 = vpack.c.bf16 %v6827_v49, %v6809_v7  ;;  %v9573_v22 = vpack.c.bf16 %v6940_v58, %v6908_v45  ;;  %v9577_v7 = vpack.c.bf16 %v6888_v52, %v6879_v36  ;;  %v9578_v49 = vpack.c.bf16 %v7041_v4, %v7036_v54  ;;  %v9590_v54 = vld [vmem:[#allocation8_spill] sm:$0xff]  ;;  %v9591_v4 = vld [vmem:[#allocation13_spill] sm:$0xff] }
 0x3c6   :  { %v2742_v2 = vand.u32 4294901760, %v2741_v38  ;;  %v2747_v41 = vand.u32 4294901760, %v7264_v39  ;;  %v9579_v45 = vpack.c.bf16 %v7025_v62, %v7046_v21  ;;  %v9581_v36 = vpack.c.bf16 %v7158_v18, %v7155_v42  ;;  %v9587_v62 = vld [vmem:[#allocation10_spill] sm:$0xff]  ;;  %v9594_v21 = vld [vmem:[#allocation15_spill] sm:$0xff] }
 0x3c7   :  { %v1187_v33 = vpop.permute.xlu0 %1186  ;;  %v9582_v52 = vpack.c.bf16 %v7191_v31, %v7184_v3  ;;  %v9597_v42 = vld [vmem:[#allocation18_spill] sm:$0xff]  ;;  %v9598_v18 = vld [vmem:[#allocation19_spill] sm:$0xff]  ;;  %v9599_v3 = vlaneseq }
 0x3c8   :  { %1190 = vst.msk [vmem:[#allocation3] sm:$0x1f] %vm9568_vm6, %v1187_v33  ;;  %v5206_v50 = vpack.c.bf16 %v2742_v2, %v2735_v51  ;;  %v2748_v32 = vsub.f32 %v7264_v39, %v2747_v41  ;;  %v9571_v33 = vpack.c.bf16 %v6706_v25, %v6691_v55  ;;  %v9575_v55 = vpack.c.bf16 %v6925_v29, %v6920_v57 }
 0x3c9   :  { %1197 = vst.msk [vmem:[#allocation3] sm:$0x1f] %vm1196_vm12, %v1194_v6  ;;  %v9576_v25 = vpack.c.bf16 %v7031_v46, %v7029_v43  ;;  %v9580_v57 = vpack.c.bf16 %v7121_v8, %v7111_v10  ;;  %v9583_v29 = vpack.c.bf16 %v7220_v63, %v7215_v5  ;;  %v9588_v43 = vld [vmem:[#allocation11_spill] sm:$0xff]  ;;  %v9589_v46 = vld [vmem:[#allocation12_spill] sm:$0xff]  ;;  %v9596_v10 = vld [vmem:[#allocation17_spill] sm:$0xff]  ;;  %v3331_v31 = vand.u32 127, %v9599_v3 }
 0x3ca   :  { %2519 = vmatpush1.xpose.msra.mxu1 %v7254_v27  ;;  %5207 = vmatpush1.bf16.xpose.msra.mxu0 %v5206_v50  ;;  %v2749_v24 = vand.u32 4294901760, %v2748_v32  ;;  %v9574_v50 = vpack.c.bf16 %v6930_v19, %v6942_v0  ;;  %v9584_v19 = vld [vmem:[#allocation9_spill] sm:$0xff]  ;;  %v9595_v8 = vld [vmem:[#allocation16_spill] sm:$0xff] }
 0x3cb   :  { %v1201_v14 = vpop.permute.xlu0 %1200  ;;  %2744 = vmatprep.subr.mxu0 %v9567_v37  ;;  %v3332_v5 = vadd.s32 128, %v3331_v31  ;;  %v3333_v63 = vcvt.s32.f32 %v3331_v31 }
 0x3cc   :  { %1204 = vst.msk [vmem:[#allocation3] sm:$0x1f] %vm1203_vm13, %v1201_v14 }
 0x3cd   :  { %v3335_v14 = vadd.f32 0.5, %v3333_v63 }
 0x3cf   :  { %v3337_v32 = vmul.f32 0.020408163, %v3335_v14  ;;  %v9631_v14 = vmov 0 }
 0x3d2   :  { %2750 = vmatpush1.xpose.msra.mxu0 %v2749_v24 }
 0x3d3   :  { %5208 = vmatprep.subr.bf16.mxu0 %v9508_v26  ;;  %v2298_v30 = vld [vmem:[#allocation3] sm:$0x1f] }
 0x3d4   :  { %v2332_v16 = vsel %vm9569_vm8, %v2298_v30, 0  ;;  %v3339_v30 = vfloor.f32 %v3337_v32  ;;  %v9636_v32 = vmov 0 }
 0x3d5   :  { %v7280_v6 = vand.u32 4294901760, %v2332_v16 }
 0x3d7   :  { %v7283_v35 = vsub.f32 %v2332_v16, %v7280_v6  ;;  %2755 = vmatmul.mubr.f32.vlgmr.msra.gmra.mrb[0].mxu0 %v7280_v6 }
 0x3d8   :  { %5210 = vmatpush1.bf16.xpose.msra.mxu0 %v9570_v53  ;;  %2887 = vmatprep.mubr.f32.mxu0 %v9567_v37 }
 0x3d9   :  { %5211 = vmatprep.subr.bf16.mxu0 %v9508_v26  ;;  %v2525_v38 = vand.u32 4294901760, %v7283_v35 }
 0x3db   :  { %v2526_v51 = vsub.f32 %v7283_v35, %v2525_v38 }
 0x3dd   :  { %v2527_v2 = vand.u32 4294901760, %v2526_v51 }
 0x3df   :  { %2528 = vmatmul.mubr.f32.vlgmr.msra.gmra.mrb[4].mxu1 %v2527_v2 }
 0x3e0   :  { %5213 = vmatpush1.bf16.xpose.msra.mxu0 %v9571_v33 }
 0x3e1   :  { %5214 = vmatprep.subr.bf16.mxu0 %v9508_v26 }
 0x3e8   :  { %5216 = vmatpush1.bf16.xpose.msra.mxu0 %v9572_v61 }
 0x3e9   :  { %5217 = vmatprep.subr.bf16.mxu0 %v9508_v26 }
 0x3f0   :  { %5219 = vmatpush1.bf16.xpose.msra.mxu0 %v9573_v22 }
 0x3f1   :  { %5220 = vmatprep.subr.bf16.mxu0 %v9508_v26 }
 0x3f8   :  { %5222 = vmatpush1.bf16.xpose.msra.mxu0 %v9574_v50 }
 0x3f9   :  { %5223 = vmatprep.subr.bf16.mxu0 %v9508_v26 }
 0x400   :  { %5225 = vmatpush1.bf16.xpose.msra.mxu0 %v9575_v55 }
 0x401   :  { %5226 = vmatprep.subr.bf16.mxu0 %v9508_v26 }
 0x408   :  { %5228 = vmatpush1.bf16.xpose.msra.mxu0 %v9576_v25 }
 0x409   :  { %5229 = vmatprep.subr.bf16.mxu0 %v9508_v26 }
 0x410   :  { %5231 = vmatpush1.bf16.xpose.msra.mxu0 %v9577_v7 }
 0x411   :  { %5232 = vmatprep.subr.bf16.mxu0 %v9508_v26 }
 0x418   :  { %5234 = vmatpush1.bf16.xpose.msra.mxu0 %v9578_v49 }
 0x419   :  { %5235 = vmatprep.subr.bf16.mxu0 %v9508_v26 }
 0x420   :  { %5237 = vmatpush1.bf16.xpose.msra.mxu0 %v9579_v45 }
 0x421   :  { %5238 = vmatprep.subr.bf16.mxu0 %v9508_v26 }
 0x428   :  { %5240 = vmatpush1.bf16.xpose.msra.mxu0 %v9580_v57 }
 0x429   :  { %5241 = vmatprep.subr.bf16.mxu0 %v9508_v26 }
 0x430   :  { %5243 = vmatpush1.bf16.xpose.msra.mxu0 %v9581_v36 }
 0x431   :  { %5244 = vmatprep.subr.bf16.mxu0 %v9508_v26 }
 0x438   :  { %5246 = vmatpush1.bf16.xpose.msra.mxu0 %v9582_v52 }
 0x439   :  { %5247 = vmatprep.subr.bf16.mxu0 %v9508_v26 }
 0x440   :  { %5249 = vmatpush1.bf16.xpose.msra.mxu0 %v9583_v29 }
 0x441   :  { %5250 = vmatprep.subr.bf16.mxu0 %v9508_v26 }
 0x448   :  { %5252 = vmatpush1.bf16.xpose.msra.mxu0 %v5251_v59  ;;  %v3334_v59 = vcvt.s32.f32 %v3332_v5 }
 0x449   :  { %2881 = vmatprep.subr.mxu0 %v9567_v37 }
 0x450   :  { %2884 = vmatpush1.xpose.msra.mxu0 %v7264_v39  ;;  %v9600_v39 = vld [vmem:[#allocation6_spill] sm:$0xff] }
 0x451   :  { %5253 = vmatprep.subr.bf16.mxu0 %v9508_v26  ;;  %v3270_v51 = vadd.s32 16, %v9600_v39  ;;  %v3271_v2 = vadd.s32 24, %v9600_v39  ;;  %v3299_v33 = vcvt.s32.f32 %v9600_v39  ;;  %v3272_v7 = vadd.s32 32, %v9600_v39 }
 0x452   :  { %v3273_v49 = vadd.s32 40, %v9600_v39  ;;  %v3274_v29 = vadd.s32 48, %v9600_v39  ;;  %v3277_v3 = vadd.s32 72, %v9600_v39 }
 0x453   :  { %2890 = vmatmul.mubr.f32.vlgmr.msra.gmra.mrb[0].mxu0 %v7283_v35  ;;  %v3341_v35 = vmul.f32 49.0, %v3339_v30  ;;  %v3301_v45 = vcvt.s32.f32 %v3270_v51  ;;  %v9644_v51 = vmov 0 }
 0x454   :  { %5255 = vmatpush1.bf16.xpose.msra.mxu0 %v9584_v19  ;;  %2991 = vmatprep.mubr.f32.mxu0 %v9567_v37  ;;  %v3305_v31 = vcvt.s32.f32 %v3274_v29  ;;  %v9664_v29 = vmov 0 }
 0x455   :  { %5256 = vmatprep.subr.bf16.mxu0 %v9508_v26 }
 0x45c   :  { %5258 = vmatpush1.bf16.xpose.msra.mxu0 %v6704_v20 }
 0x45d   :  { %5259 = vmatprep.subr.bf16.mxu0 %v9508_v26 }
 0x464   :  { %5261 = vmatpush1.bf16.xpose.msra.mxu0 %v6825_v12 }
 0x465   :  { %5262 = vmatprep.subr.bf16.mxu0 %v9508_v26 }
 0x46c   :  { %5264 = vmatpush1.bf16.xpose.msra.mxu0 %v6938_v28 }
 0x46d   :  { %5265 = vmatprep.subr.bf16.mxu0 %v9508_v26 }
 0x474   :  { %5267 = vmatpush1.bf16.xpose.msra.mxu0 %v6969_v56 }
 0x475   :  { %5268 = vmatprep.subr.bf16.mxu0 %v9508_v26 }
 0x47c   :  { %5270 = vmatpush1.bf16.xpose.msra.mxu0 %v6988_v44 }
 0x47d   :  { %5271 = vmatprep.subr.bf16.mxu0 %v9508_v26 }
 0x484   :  { %5273 = vmatpush1.bf16.xpose.msra.mxu0 %v7027_v1 }
 0x485   :  { %5274 = vmatprep.subr.bf16.mxu0 %v9508_v26 }
 0x48c   :  { %5276 = vmatpush1.bf16.xpose.msra.mxu0 %v7082_v47 }
 0x48d   :  { %5277 = vmatprep.subr.bf16.mxu0 %v9508_v26 }
 0x494   :  { %5279 = vmatpush1.bf16.xpose.msra.mxu0 %v7115_v60 }
 0x495   :  { %5280 = vmatprep.subr.bf16.mxu0 %v9508_v26 }
 0x49c   :  { %5282 = vmatpush1.bf16.xpose.msra.mxu0 %v7141_v40 }
 0x49d   :  { %5283 = vmatprep.subr.bf16.mxu0 %v9508_v26 }
 0x4a4   :  { %5285 = vmatpush1.bf16.xpose.msra.mxu0 %v7167_v15 }
 0x4a5   :  { %5286 = vmatprep.subr.bf16.mxu0 %v9508_v26 }
 0x4ac   :  { %5288 = vmatpush1.bf16.xpose.msra.mxu0 %v7187_v23 }
 0x4ad   :  { %5289 = vmatprep.subr.bf16.mxu0 %v9508_v26 }
 0x4b2   :  { %v7376_v58 = vpop.f32.mrb[4].mxu1 }
 0x4b3   :  { %9585 = vst [vmem:[#allocation9_spill] sm:$0xff] %v7376_v58  ;;  %v7378_v0 = vpop.f32.mrb[5].mxu1  ;;  %v9727_v58 = vmov 0 }
 0x4b4   :  { %9586 = vst [vmem:[#allocation20_spill] sm:$0xff] %v7378_v0  ;;  %5291 = vmatpush1.bf16.xpose.msra.mxu0 %v7207_v13  ;;  %v3291_v0 = vadd.s32 184, %v9600_v39 }
 0x4b5   :  { %5292 = vmatprep.subr.bf16.mxu0 %v9508_v26 }
 0x4bc   :  { %5294 = vmatpush1.bf16.xpose.msra.mxu0 %v7227_v34 }
 0x4bd   :  { %5295 = vmatprep.subr.bf16.mxu0 %v9508_v26 }
 0x4c4   :  { %5297 = vmatpush1.bf16.xpose.msra.mxu0 %v7246_v11 }
 0x4c5   :  { %2986 = vmatprep.subr.mxu0 %v9567_v37 }
 0x4cc   :  { %2988 = vmatpush1.xpose.msra.mxu0 %v7254_v27 }
 0x4cd   :  { %5298 = vmatprep.subr.bf16.mxu0 %v9508_v26 }
 0x4cf   :  { %2995 = vmatmul.mubr.f32.vlgmr.msra.gmra.mrb[0].mxu0 %v2525_v38  ;;  %v3343_v38 = vsub.f32 %v3333_v63, %v3341_v35  ;;  %v9626_v63 = vmov 0  ;;  %v3279_v35 = vadd.s32 88, %v9600_v39 }
 0x4d0   :  { %5300 = vmatpush1.bf16.xpose.msra.mxu0 %v9587_v62  ;;  %3158 = vmatprep.mubr.f32.mxu0 %v9567_v37 }
 0x4d1   :  { %5301 = vmatprep.subr.bf16.mxu0 %v9508_v26  ;;  %v3345_v50 = vmul.f32 5.0, %v3343_v38  ;;  %v9642_v38 = vmov 0 }
 0x4d3   :  { %v7435_v25 = vadd.f32 %v3345_v50, %v3339_v30  ;;  %v3278_v30 = vadd.s32 80, %v9600_v39  ;;  %v9654_v50 = vmov 0 }
 0x4d5   :  { %vm7442_vm9 = vcmp.eq.f32.partialorder %v3299_v33, %v7435_v25  ;;  %vm7491_vm4 = vcmp.eq.f32.partialorder %v3301_v45, %v7435_v25 }
 0x4d8   :  { %5303 = vmatpush1.bf16.xpose.msra.mxu0 %v6718_v48  ;;  %v9592_v48 = vld [vmem:[#allocation7_spill] sm:$0xff] }
 0x4d9   :  { %5304 = vmatprep.subr.bf16.mxu0 %v9508_v26 }
 0x4e0   :  { %5306 = vmatpush1.bf16.xpose.msra.mxu0 %v6843_v9  ;;  %v9593_v9 = vld [vmem:[#allocation14_spill] sm:$0xff] }
 0x4e1   :  { %5307 = vmatprep.subr.bf16.mxu0 %v9508_v26 }
 0x4e8   :  { %5309 = vmatpush1.bf16.xpose.msra.mxu0 %v9588_v43 }
 0x4e9   :  { %5310 = vmatprep.subr.bf16.mxu0 %v9508_v26 }
 0x4f0   :  { %5312 = vmatpush1.bf16.xpose.msra.mxu0 %v9589_v46  ;;  %v9609_v46 = vmov 0 }
 0x4f1   :  { %5313 = vmatprep.subr.bf16.mxu0 %v9508_v26 }
 0x4f8   :  { %5315 = vmatpush1.bf16.xpose.msra.mxu0 %v9590_v54  ;;  %v3303_v54 = vcvt.s32.f32 %v3272_v7  ;;  %v3310_v7 = vcvt.s32.f32 %v3279_v35  ;;  %v9680_v35 = vmov 0 }
 0x4f9   :  { %5316 = vmatprep.subr.bf16.mxu0 %v9508_v26 }
 0x4fa   :  { %vm7547_vm8 = vcmp.eq.f32.partialorder %v3303_v54, %v7435_v25 }
 0x4fb   :  { %v9637_v32 = vsel %vm7547_vm8, 4294967295, %v9636_v32 }
 0x500   :  { %5318 = vmatpush1.bf16.xpose.msra.mxu0 %v9591_v4  ;;  %v3304_v4 = vcvt.s32.f32 %v3273_v49  ;;  %v3281_v49 = vadd.s32 104, %v9600_v39 }
 0x501   :  { %5319 = vmatprep.subr.bf16.mxu0 %v9508_v26 }
 0x508   :  { %5321 = vmatpush1.bf16.xpose.msra.mxu0 %v9592_v48  ;;  %v9612_v48 = vmov 0 }
 0x509   :  { %5322 = vmatprep.subr.bf16.mxu0 %v9508_v26 }
 0x510   :  { %5324 = vmatpush1.bf16.xpose.msra.mxu0 %v9593_v9 }
 0x511   :  { %5325 = vmatprep.subr.bf16.mxu0 %v9508_v26 }
 0x518   :  { %5327 = vmatpush1.bf16.xpose.msra.mxu0 %v9594_v21 }
 0x519   :  { %5328 = vmatprep.subr.bf16.mxu0 %v9508_v26 }
 0x520   :  { %5330 = vmatpush1.bf16.xpose.msra.mxu0 %v9595_v8 }
 0x521   :  { %5331 = vmatprep.subr.bf16.mxu0 %v9508_v26 }
 0x528   :  { %5333 = vmatpush1.bf16.xpose.msra.mxu0 %v9596_v10  ;;  %v9241_v10 = vmov 1.0|1.0  }
 0x529   :  { %5334 = vmatprep.subr.bf16.mxu0 %v9508_v26 }
 0x530   :  { %5336 = vmatpush1.bf16.xpose.msra.mxu0 %v9597_v42  ;;  %v9623_v42 = vmov 0 }
 0x531   :  { %5337 = vmatprep.subr.bf16.mxu0 %v9508_v26 }
 0x538   :  { %5339 = vmatpush1.bf16.xpose.msra.mxu0 %v9598_v18  ;;  %v3276_v18 = vadd.s32 64, %v9600_v39 }
 0x539   :  { %5340 = vmatprep.subr.bf16.mxu0 %v9508_v26 }
 0x540   :  { %5342 = vmatpush1.bf16.xpose.msra.mxu0 %v7266_v17  ;;  %v3336_v17 = vadd.f32 0.5, %v3334_v59 }
 0x541   :  { %3151 = vmatprep.subr.mxu0 %v9567_v37 }
 0x542   :  { %v3338_v24 = vmul.f32 0.020408163, %v3336_v17  ;;  %v9633_v17 = vmov 0 }
 0x544   :  { %v3340_v16 = vfloor.f32 %v3338_v24  ;;  %v9638_v24 = vmov 0 }
 0x546   :  { %v3342_v53 = vmul.f32 49.0, %v3340_v16 }
 0x548   :  { %3155 = vmatpush1.xpose.msra.mxu0 %v2747_v41  ;;  %v3269_v41 = vadd.s32 8, %v9600_v39  ;;  %v3344_v22 = vsub.f32 %v3334_v59, %v3342_v53  ;;  %v9629_v59 = vmov 0  ;;  %v9640_v53 = vmov 0 }
 0x549   :  { %5343 = vmatprep.subr.bf16.mxu0 %v9508_v26 }
 0x54a   :  { %v3300_v61 = vcvt.s32.f32 %v3269_v41  ;;  %v3346_v55 = vmul.f32 5.0, %v3344_v22  ;;  %v3307_v41 = vcvt.s32.f32 %v3276_v18  ;;  %v3309_v22 = vcvt.s32.f32 %v3278_v30 }
 0x54b   :  { %3160 = vmatmul.mubr.f32.vlgmr.msra.gmra.mrb[0].mxu0 %v7280_v6  ;;  %v9668_v18 = vmov 0  ;;  %v9672_v30 = vmov 0 }
 0x54c   :  { %5345 = vmatpush1.bf16.xpose.msra.mxu0 %v9584_v19  ;;  %3261 = vmatprep.mubr.f32.mxu0 %v9567_v37  ;;  %v7439_v57 = vadd.f32 %v3346_v55, %v3340_v16  ;;  %vm7447_vm10 = vcmp.eq.f32.partialorder %v3300_v61, %v7435_v25  ;;  %v3275_v19 = vadd.s32 56, %v9600_v39  ;;  %v3308_v16 = vcvt.s32.f32 %v3277_v3 }
 0x54d   :  { %5346 = vmatprep.subr.bf16.mxu0 %v9508_v26  ;;  %vm7467_vm15 = vmpackc.low %vm7447_vm10, %vm7442_vm9  ;;  %v9656_v55 = vmov 0  ;;  %v9670_v3 = vmov 0 }
 0x54e   :  { %vm7454_vm12 = vcmp.eq.f32.partialorder %v3299_v33, %v7439_v57  ;;  %vm7459_vm13 = vcmp.eq.f32.partialorder %v3300_v61, %v7439_v57  ;;  %v9610_v46 = vsel %vm7467_vm15, 4294967295, %v9609_v46  ;;  %vm7481_vm1 = vcmp.eq.f32.partialorder %v3301_v45, %v7439_v57 }
 0x54f   :  { %9611 = vst [vmem:[#allocation10_spill] sm:$0xff] %v9610_v46  ;;  %vm7476_vm3 = vmpackc.low %vm7459_vm13, %vm7454_vm12  ;;  %v3306_v5 = vcvt.s32.f32 %v3275_v19  ;;  %vm7529_vm14 = vcmp.eq.f32.partialorder %v3303_v54, %v7439_v57  ;;  %vm7534_vm5 = vcmp.eq.f32.partialorder %v3304_v4, %v7439_v57  ;;  %v9650_v33 = vmov 0 }
 0x550   :  { %v9613_v48 = vsel %vm7476_vm3, 4294967295, %v9612_v48  ;;  %5389 = vmatprep.subr.msk.bf16.mxu1 %vm7476_vm3, %v9241_v10  ;;  %v9630_v59 = vsel %vm7529_vm14, 4294967295, %v9629_v59  ;;  %v9632_v14 = vsel %vm7534_vm5, 4294967295, %v9631_v14  ;;  %vm7542_vm6 = vmpackc.low %vm7534_vm5, %vm7529_vm14  ;;  %v9652_v61 = vmov 0 }
 0x551   :  { %9614 = vst [vmem:[#allocation11_spill] sm:$0xff] %v9613_v48  ;;  %5391 = vmatpush1.bf16.msk.msra.mxu1 %vm7467_vm15, %v9241_v10  ;;  %v9634_v17 = vsel %vm7542_vm6, 4294967295, %v9633_v17  ;;  %vm7562_vm15 = vcmp.eq.f32.partialorder %v3305_v31, %v7439_v57  ;;  %vm7567_vm3 = vcmp.eq.f32.partialorder %v3306_v5, %v7439_v57  ;;  %v9658_v45 = vmov 0 }
 0x552   :  { %9635 = vst [vmem:[#allocation13_spill] sm:$0xff] %v9634_v17  ;;  %v9641_v53 = vsel %vm7562_vm15, 4294967295, %v9640_v53  ;;  %v9643_v38 = vsel %vm7567_vm3, 4294967295, %v9642_v38  ;;  %v9666_v19 = vmov 0  ;;  %v9699_v17 = vmov 0 }
 0x553   :  { %v3290_v48 = vadd.s32 176, %v9600_v39 }
 0x554   :  { %5348 = vmatpush1.bf16.xpose.msra.mxu0 %v6704_v20  ;;  %v3302_v20 = vcvt.s32.f32 %v3271_v2  ;;  %v9647_v2 = vmov 0 }
 0x555   :  { %5349 = vmatprep.subr.bf16.mxu0 %v9508_v26 }
 0x556   :  { %vm7486_vm11 = vcmp.eq.f32.partialorder %v3302_v20, %v7439_v57  ;;  %vm7496_vm0 = vcmp.eq.f32.partialorder %v3302_v20, %v7435_v25  ;;  %v9661_v20 = vmov 0 }
 0x557   :  { %vm7508_vm7 = vmpackc.low %vm7486_vm11, %vm7481_vm1 }
 0x558   :  { %v9624_v42 = vsel %vm7508_vm7, 4294967295, %v9623_v42  ;;  %5393 = vmatprep.subr.msk.bf16.mxu1 %vm7508_vm7, %v9241_v10  ;;  %vm7524_vm2 = vmpackc.low %vm7496_vm0, %vm7491_vm4  ;;  %vm7552_vm7 = vcmp.eq.f32.partialorder %v3304_v4, %v7435_v25  ;;  %v3282_v4 = vadd.s32 112, %v9600_v39 }
 0x559   :  { %9625 = vst [vmem:[#allocation12_spill] sm:$0xff] %v9624_v42  ;;  %v9627_v63 = vsel %vm7524_vm2, 4294967295, %v9626_v63  ;;  %v9639_v24 = vsel %vm7552_vm7, 4294967295, %v9638_v24  ;;  %5395 = vmatpush1.bf16.msk.msra.mxu1 %vm7524_vm2, %v9241_v10  ;;  %vm7578_vm5 = vmpackc.low %vm7552_vm7, %vm7547_vm8  ;;  %vm7597_vm7 = vcmp.eq.f32.partialorder %v3306_v5, %v7435_v25  ;;  %v3283_v5 = vadd.s32 120, %v9600_v39 }
 0x55a   :  { %9628 = vst [vmem:[#allocation8_spill] sm:$0xff] %v9627_v63  ;;  %5397 = vmatprep.subr.msk.bf16.mxu1 %vm7542_vm6, %v9241_v10  ;;  %v9645_v51 = vsel %vm7578_vm5, 4294967295, %v9644_v51  ;;  %vm7587_vm2 = vmpackc.low %vm7567_vm3, %vm7562_vm15  ;;  %vm7592_vm6 = vcmp.eq.f32.partialorder %v3305_v31, %v7435_v25  ;;  %v9653_v61 = vsel %vm7597_vm7, 4294967295, %v9652_v61  ;;  %vm7604_vm3 = vcmp.eq.f32.partialorder %v3307_v41, %v7439_v57 }
 0x55b   :  { %9646 = vst [vmem:[#allocation7_spill] sm:$0xff] %v9645_v51  ;;  %v9648_v2 = vsel %vm7587_vm2, 4294967295, %v9647_v2  ;;  %v9651_v33 = vsel %vm7592_vm6, 4294967295, %v9650_v33  ;;  %v9655_v50 = vsel %vm7604_vm3, 4294967295, %v9654_v50  ;;  %vm7609_vm15 = vcmp.eq.f32.partialorder %v3308_v16, %v7439_v57  ;;  %vm7624_vm8 = vmpackc.low %vm7597_vm7, %vm7592_vm6 }
 0x55c   :  { %5351 = vmatpush1.bf16.xpose.msra.mxu0 %v6825_v12  ;;  %9649 = vst [vmem:[#allocation14_spill] sm:$0xff] %v9648_v2  ;;  %v9657_v55 = vsel %vm7609_vm15, 4294967295, %v9656_v55  ;;  %v9659_v45 = vsel %vm7624_vm8, 4294967295, %v9658_v45  ;;  %vm7632_vm14 = vmpackc.low %vm7609_vm15, %vm7604_vm3  ;;  %vm7648_vm7 = vcmp.eq.f32.partialorder %v3309_v22, %v7439_v57  ;;  %vm7653_vm15 = vcmp.eq.f32.partialorder %v3310_v7, %v7439_v57 }
 0x55d   :  { %5352 = vmatprep.subr.bf16.mxu0 %v9508_v26  ;;  %5399 = vmatpush1.bf16.msk.msra.mxu1 %vm7578_vm5, %v9241_v10  ;;  %9660 = vst [vmem:[#allocation15_spill] sm:$0xff] %v9659_v45  ;;  %v9662_v20 = vsel %vm7632_vm14, 4294967295, %v9661_v20  ;;  %vm7637_vm5 = vcmp.eq.f32.partialorder %v3307_v41, %v7435_v25  ;;  %v9669_v18 = vsel %vm7648_vm7, 4294967295, %v9668_v18  ;;  %v9671_v3 = vsel %vm7653_vm15, 4294967295, %v9670_v3  ;;  %vm7677_vm6 = vmpackc.low %vm7653_vm15, %vm7648_vm7 }
 0x55e   :  { %5401 = vmatprep.subr.msk.bf16.mxu1 %vm7587_vm2, %v9241_v10  ;;  %9663 = vst [vmem:[#allocation16_spill] sm:$0xff] %v9662_v20  ;;  %v9665_v29 = vsel %vm7637_vm5, 4294967295, %v9664_v29  ;;  %vm7642_vm2 = vcmp.eq.f32.partialorder %v3308_v16, %v7435_v25  ;;  %v3312_v31 = vcvt.s32.f32 %v3281_v49  ;;  %v9675_v41 = vmov 0 }
 0x55f   :  { %v9667_v19 = vsel %vm7642_vm2, 4294967295, %v9666_v19  ;;  %vm7668_vm3 = vmpackc.low %vm7642_vm2, %vm7637_vm5  ;;  %v9676_v41 = vsel %vm7677_vm6, 4294967295, %v9675_v41  ;;  %v9678_v16 = vmov 0  ;;  %v9682_v49 = vmov 0 }
 0x560   :  { %v9673_v30 = vsel %vm7668_vm3, 4294967295, %v9672_v30  ;;  %9677 = vst [vmem:[#allocation18_spill] sm:$0xff] %v9676_v41  ;;  %vm7700_vm7 = vcmp.eq.f32.partialorder %v3312_v31, %v7439_v57  ;;  %v9686_v20 = vmov 1.0|1.0   ;;  %v9687_v45 = vmov 0 }
 0x561   :  { %5403 = vmatpush1.bf16.msk.msra.mxu1 %vm7624_vm8, %v9241_v10  ;;  %9674 = vst [vmem:[#allocation17_spill] sm:$0xff] %v9673_v30  ;;  %vm7687_vm8 = vcmp.eq.f32.partialorder %v3310_v7, %v7435_v25  ;;  %v3313_v7 = vcvt.s32.f32 %v3282_v4  ;;  %v9690_v4 = vmov 0  ;;  %v9695_v41 = vmov 0 }
 0x562   :  { %5405 = vmatprep.subr.msk.bf16.mxu1 %vm7632_vm14, %v9241_v10  ;;  %vm7682_vm14 = vcmp.eq.f32.partialorder %v3309_v22, %v7435_v25  ;;  %v9681_v35 = vsel %vm7687_vm8, 4294967295, %v9680_v35  ;;  %v9684_v22 = vmov 0  ;;  %v3314_v10 = vcvt.s32.f32 %v3283_v5 }
 0x563   :  { %v9679_v16 = vsel %vm7682_vm14, 4294967295, %v9678_v16  ;;  %v9685_v22 = vsel %vm7700_vm7, 4294967295, %v9684_v22  ;;  %vm7714_vm2 = vmpackc.low %vm7687_vm8, %vm7682_vm14  ;;  %v9693_v5 = vmov 0  ;;  %v3286_v2 = vadd.s32 144, %v9600_v39 }
 0x564   :  { %5354 = vmatpush1.bf16.xpose.msra.mxu0 %v6938_v28  ;;  %v3280_v28 = vadd.s32 96, %v9600_v39  ;;  %v9688_v45 = vsel %vm7714_vm2, 4294967295, %v9687_v45  ;;  %vm7738_vm8 = vcmp.eq.f32.partialorder %v3313_v7, %v7439_v57  ;;  %v9697_v51 = vmov 0 }
 0x565   :  { %5355 = vmatprep.subr.bf16.mxu0 %v9508_v26  ;;  %5407 = vmatpush1.bf16.msk.msra.mxu1 %vm7668_vm3, %v9686_v20  ;;  %9689 = vst [vmem:[#allocation19_spill] sm:$0xff] %v9688_v45  ;;  %v9698_v51 = vsel %vm7738_vm8, 4294967295, %v9697_v51  ;;  %v3287_v63 = vadd.s32 152, %v9600_v39  ;;  %v3317_v45 = vcvt.s32.f32 %v3286_v2  ;;  %v9711_v42 = vmov 0 }
 0x566   :  { %v3311_v54 = vcvt.s32.f32 %v3280_v28  ;;  %v3285_v28 = vadd.s32 136, %v9600_v39  ;;  %5409 = vmatprep.subr.msk.bf16.mxu1 %vm7677_vm6, %v9686_v20  ;;  %vm7732_vm6 = vcmp.eq.f32.partialorder %v3312_v31, %v7435_v25  ;;  %v9701_v31 = vmov 0 }
 0x567   :  { %v9696_v41 = vsel %vm7732_vm6, 4294967295, %v9695_v41  ;;  %v3318_v46 = vcvt.s32.f32 %v3287_v63  ;;  %v9717_v2 = vmov 0  ;;  %v9720_v63 = vmov 0 }
 0x568   :  { %vm7695_vm15 = vcmp.eq.f32.partialorder %v3311_v54, %v7439_v57  ;;  %vm7727_vm3 = vcmp.eq.f32.partialorder %v3311_v54, %v7435_v25  ;;  %v3316_v54 = vcvt.s32.f32 %v3285_v28  ;;  %v9707_v28 = vmov 0 }
 0x569   :  { %v9683_v49 = vsel %vm7695_vm15, 4294967295, %v9682_v49  ;;  %vm7722_vm5 = vmpackc.low %vm7700_vm7, %vm7695_vm15  ;;  %v9694_v5 = vsel %vm7727_vm3, 4294967295, %v9693_v5  ;;  %vm7743_vm7 = vcmp.eq.f32.partialorder %v3314_v10, %v7439_v57  ;;  %5411 = vmatpush1.bf16.msk.msra.mxu1 %vm7714_vm2, %v9686_v20  ;;  %vm7777_vm2 = vcmp.eq.f32.partialorder %v3314_v10, %v7435_v25 }
 0x56a   :  { %v9691_v4 = vsel %vm7722_vm5, 4294967295, %v9690_v4  ;;  %v9700_v17 = vsel %vm7743_vm7, 4294967295, %v9699_v17  ;;  %5413 = vmatprep.subr.msk.bf16.mxu1 %vm7722_vm5, %v9686_v20  ;;  %vm7758_vm15 = vmpackc.low %vm7732_vm6, %vm7727_vm3  ;;  %vm7772_vm5 = vcmp.eq.f32.partialorder %v3313_v7, %v7435_v25  ;;  %v9714_v7 = vmov 0 }
 0x56b   :  { %9692 = vst [vmem:[#allocation21_spill] sm:$0xff] %v9691_v4  ;;  %v9702_v31 = vsel %vm7758_vm15, 4294967295, %v9701_v31  ;;  %vm7767_vm14 = vmpackc.low %vm7743_vm7, %vm7738_vm8  ;;  %v9708_v28 = vsel %vm7772_vm5, 4294967295, %v9707_v28  ;;  %v9709_v4 = vmov 0  ;;  %vm7789_vm8 = vcmp.eq.f32.partialorder %v3316_v54, %v7439_v57 }
 0x56c   :  { %5357 = vmatpush1.bf16.xpose.msra.mxu0 %v6969_v56  ;;  %v3284_v56 = vadd.s32 128, %v9600_v39  ;;  %9703 = vst [vmem:[#allocation22_spill] sm:$0xff] %v9702_v31  ;;  %v9710_v4 = vsel %vm7777_vm2, 4294967295, %v9709_v4  ;;  %v9715_v7 = vsel %vm7789_vm8, 4294967295, %v9714_v7  ;;  %v3289_v10 = vadd.s32 168, %v9600_v39  ;;  %vm7804_vm6 = vmpackc.low %vm7777_vm2, %vm7772_vm5 }
 0x56d   :  { %5358 = vmatprep.subr.bf16.mxu0 %v9508_v26  ;;  %9716 = vst [vmem:[#allocation25_spill] sm:$0xff] %v9715_v7  ;;  %5415 = vmatpush1.bf16.msk.msra.mxu1 %vm7758_vm15, %v9686_v20  ;;  %v9718_v2 = vsel %vm7804_vm6, 4294967295, %v9717_v2  ;;  %v9725_v31 = vmov 0  ;;  %vm7829_vm2 = vcmp.eq.f32.partialorder %v3317_v45, %v7439_v57 }
 0x56e   :  { %v3315_v30 = vcvt.s32.f32 %v3284_v56  ;;  %v9704_v56 = vmov 0  ;;  %5417 = vmatprep.subr.msk.bf16.mxu1 %vm7767_vm14, %v9686_v20  ;;  %9719 = vst [vmem:[#allocation26_spill] sm:$0xff] %v9718_v2  ;;  %v9728_v58 = vsel %vm7829_vm2, 4294967295, %v9727_v58  ;;  %v9743_v2 = vmov 0 }
 0x56f   :  { %v9705_v56 = vsel %vm7767_vm14, 4294967295, %v9704_v56  ;;  %vm7822_vm14 = vcmp.eq.f32.partialorder %v3316_v54, %v7435_v25  ;;  %v9731_v54 = vmov 0 }
 0x570   :  { %9706 = vst [vmem:[#allocation23_spill] sm:$0xff] %v9705_v56  ;;  %vm7784_vm7 = vcmp.eq.f32.partialorder %v3315_v30, %v7439_v57  ;;  %vm7817_vm15 = vcmp.eq.f32.partialorder %v3315_v30, %v7435_v25  ;;  %v9723_v56 = vmov 0  ;;  %v9726_v31 = vsel %vm7822_vm14, 4294967295, %v9725_v31 }
 0x571   :  { %v9712_v42 = vsel %vm7784_vm7, 4294967295, %v9711_v42  ;;  %vm7812_vm3 = vmpackc.low %vm7789_vm8, %vm7784_vm7  ;;  %v9724_v56 = vsel %vm7817_vm15, 4294967295, %v9723_v56  ;;  %vm7834_vm8 = vcmp.eq.f32.partialorder %v3318_v46, %v7439_v57  ;;  %v9729_v30 = vmov 0  ;;  %5419 = vmatpush1.bf16.msk.msra.mxu1 %vm7804_vm6, %v9686_v20 }
 0x572   :  { %9713 = vst [vmem:[#allocation24_spill] sm:$0xff] %v9712_v42  ;;  %v9721_v63 = vsel %vm7812_vm3, 4294967295, %v9720_v63  ;;  %v9730_v30 = vsel %vm7834_vm8, 4294967295, %v9729_v30  ;;  %v3320_v42 = vcvt.s32.f32 %v3289_v10  ;;  %5421 = vmatprep.subr.msk.bf16.mxu1 %vm7812_vm3, %v9686_v20  ;;  %vm7848_vm7 = vmpackc.low %vm7822_vm14, %vm7817_vm15  ;;  %vm7862_vm3 = vcmp.eq.f32.partialorder %v3317_v45, %v7435_v25 }
 0x573   :  { %9722 = vst [vmem:[#allocation27_spill] sm:$0xff] %v9721_v63  ;;  %v9732_v54 = vsel %vm7848_vm7, 4294967295, %v9731_v54  ;;  %vm7857_vm5 = vmpackc.low %vm7834_vm8, %vm7829_vm2  ;;  %v9737_v10 = vmov 0  ;;  %vm7867_vm6 = vcmp.eq.f32.partialorder %v3318_v46, %v7435_v25  ;;  %v9739_v63 = vmov 0 }
 0x574   :  { %5360 = vmatpush1.bf16.xpose.msra.mxu0 %v6988_v44  ;;  %v3288_v44 = vadd.s32 160, %v9600_v39  ;;  %9733 = vst [vmem:[#allocation28_spill] sm:$0xff] %v9732_v54  ;;  %v9738_v10 = vsel %vm7862_vm3, 4294967295, %v9737_v10  ;;  %v9740_v63 = vsel %vm7867_vm6, 4294967295, %v9739_v63  ;;  %vm7878_vm8 = vcmp.eq.f32.partialorder %v3320_v42, %v7439_v57  ;;  %vm7892_vm2 = vmpackc.low %vm7867_vm6, %vm7862_vm3 }
 0x575   :  { %5361 = vmatprep.subr.bf16.mxu0 %v9508_v26  ;;  %v9744_v2 = vsel %vm7878_vm8, 4294967295, %v9743_v2  ;;  %v3321_v45 = vcvt.s32.f32 %v3290_v48  ;;  %v3322_v39 = vcvt.s32.f32 %v3291_v0  ;;  %5423 = vmatpush1.bf16.msk.msra.mxu1 %vm7848_vm7, %v9686_v20  ;;  %v9746_v46 = vmov 0 }
 0x576   :  { %v3319_v7 = vcvt.s32.f32 %v3288_v44  ;;  %v9734_v44 = vmov 0  ;;  %9745 = vst [vmem:[#allocation30_spill] sm:$0xff] %v9744_v2  ;;  %5425 = vmatprep.subr.msk.bf16.mxu1 %vm7857_vm5, %v9686_v20  ;;  %v9747_v46 = vsel %vm7892_vm2, 4294967295, %v9746_v46  ;;  %v9749_v0 = vmov 0 }
 0x577   :  { %v9735_v44 = vsel %vm7857_vm5, 4294967295, %v9734_v44  ;;  %9748 = vst [vmem:[#allocation31_spill] sm:$0xff] %v9747_v46  ;;  %vm7910_vm5 = vcmp.eq.f32.partialorder %v3320_v42, %v7435_v25  ;;  %vm7915_vm6 = vcmp.eq.f32.partialorder %v3321_v45, %v7439_v57  ;;  %v9758_v2 = vmov 0 }
 0x578   :  { %9736 = vst [vmem:[#allocation29_spill] sm:$0xff] %v9735_v44  ;;  %vm7873_vm14 = vcmp.eq.f32.partialorder %v3319_v7, %v7439_v57  ;;  %vm7905_vm7 = vcmp.eq.f32.partialorder %v3319_v7, %v7435_v25  ;;  %v9760_v42 = vmov 0  ;;  %v9763_v7 = vmov 0 }
 0x579   :  { %vm7900_vm15 = vmpackc.low %vm7878_vm8, %vm7873_vm14  ;;  %vm7920_vm8 = vcmp.eq.f32.partialorder %v3322_v39, %v7439_v57  ;;  %5427 = vmatpush1.bf16.msk.msra.mxu1 %vm7892_vm2, %v9686_v20  ;;  %vm7953_vm2 = vcmp.eq.f32.partialorder %v3322_v39, %v7435_v25  ;;  %v4867_v48 = vsel %vm7915_vm6, 1.0, %v9567_v37 }
 0x57a   :  { %v9750_v0 = vsel %vm7900_vm15, 4294967295, %v9749_v0  ;;  %v9759_v2 = vsel %vm7920_vm8, 4294967295, %v9758_v2  ;;  %5429 = vmatprep.subr.msk.bf16.mxu1 %vm7900_vm15, %v9686_v20  ;;  %vm7943_vm3 = vmpackc.low %vm7920_vm8, %vm7915_vm6  ;;  %vm7948_vm15 = vcmp.eq.f32.partialorder %v3321_v45, %v7435_v25 }
 0x57b   :  { %9751 = vst [vmem:[#allocation32_spill] sm:$0xff] %v9750_v0  ;;  %v9764_v7 = vsel %vm7943_vm3, 4294967295, %v9763_v7  ;;  %vm7968_vm8 = vmpackc.low %vm7953_vm2, %vm7948_vm15 }
 0x57c   :  { %5363 = vmatpush1.bf16.xpose.msra.mxu0 %v7027_v1  ;;  %v9741_v1 = vmov 0  ;;  %9765 = vst [vmem:[#allocation34_spill] sm:$0xff] %v9764_v7 }
 0x57d   :  { %5364 = vmatprep.subr.bf16.mxu0 %v9508_v26  ;;  %v9742_v1 = vsel %vm7873_vm14, 4294967295, %v9741_v1  ;;  %vm7934_vm14 = vmpackc.low %vm7910_vm5, %vm7905_vm7 }
 0x57e   :  { %v9761_v42 = vsel %vm7934_vm14, 4294967295, %v9760_v42  ;;  %5431 = vmatpush1.bf16.msk.msra.mxu1 %vm7934_vm14, %v9686_v20 }
 0x57f   :  { %9762 = vst [vmem:[#allocation33_spill] sm:$0xff] %v9761_v42  ;;  %5433 = vmatprep.subr.msk.bf16.mxu1 %vm7943_vm3, %v9686_v20 }
 0x582   :  { %5435 = vmatpush1.bf16.msk.msra.mxu1 %vm7968_vm8, %v9686_v20 }
 0x584   :  { %5366 = vmatpush1.bf16.xpose.msra.mxu0 %v7082_v47  ;;  %v9770_v47 = vmov 0 }
 0x585   :  { %5367 = vmatprep.subr.bf16.mxu0 %v9508_v26  ;;  %v9771_v47 = vsel %vm7968_vm8, 4294967295, %v9770_v47 }
 0x586   :  { %9772 = vst [vmem:[#allocation35_spill] sm:$0xff] %v9771_v47 }
 0x58c   :  { %5369 = vmatpush1.bf16.xpose.msra.mxu0 %v7115_v60  ;;  %v4822_v60 = vsel %vm7442_vm9, 1.0, %v9567_v37  ;;  %vm9775_vm9 = vnez %v9630_v59 }
 0x58d   :  { %5370 = vmatprep.subr.bf16.mxu0 %v9508_v26  ;;  %v4831_v62 = vsel %vm9775_vm9, 1.0, %v9567_v37  ;;  %vm9785_vm9 = vnez %v9655_v50 }
 0x594   :  { %5372 = vmatpush1.bf16.xpose.msra.mxu0 %v7141_v40  ;;  %v4825_v40 = vsel %vm7459_vm13, 1.0, %v9567_v37  ;;  %vm9780_vm13 = vnez %v9639_v24  ;;  %v4839_v24 = vsel %vm9785_vm9, 1.0, %v9567_v37  ;;  %vm9794_vm9 = vnez %v9683_v49 }
 0x595   :  { %5373 = vmatprep.subr.bf16.mxu0 %v9508_v26  ;;  %v8021_v36 = vsub.f32 %v4825_v40, %v4825_v40  ;;  %v4832_v45 = vsel %vm9780_vm13, 1.0, %v9567_v37  ;;  %vm9788_vm13 = vnez %v9667_v19 }
 0x596   :  { %v8073_v40 = vsub.f32 %v4832_v45, %v4832_v45 }
 0x597   :  { %9774 = vst [vmem:[#allocation37_spill] sm:$0xff] %v8021_v36 }
 0x59c   :  { %5375 = vmatpush1.bf16.xpose.msra.mxu0 %v7167_v15  ;;  %v4824_v15 = vsel %vm7447_vm10, 1.0, %v9567_v37  ;;  %vm9778_vm10 = vnez %v9632_v14 }
 0x59d   :  { %5376 = vmatprep.subr.bf16.mxu0 %v9508_v26  ;;  %v4833_v12 = vsel %vm9778_vm10, 1.0, %v9567_v37  ;;  %vm9786_vm10 = vnez %v9657_v55 }
 0x5a4   :  { %5378 = vmatpush1.bf16.xpose.msra.mxu0 %v7187_v23  ;;  %v4827_v23 = vsel %vm7481_vm1, 1.0, %v9567_v37  ;;  %vm9781_vm1 = vnez %v9641_v53  ;;  %v8060_v53 = vsub.f32 %v4833_v12, %v4833_v12 }
 0x5a5   :  { %5379 = vmatprep.subr.bf16.mxu0 %v9508_v26  ;;  %v8023_v52 = vsub.f32 %v4827_v23, %v4827_v23  ;;  %v4835_v59 = vsel %vm9781_vm1, 1.0, %v9567_v37  ;;  %vm9790_vm1 = vnez %v9669_v18  ;;  %v4847_v18 = vsel %vm9794_vm9, 1.0, %v9567_v37 }
 0x5a6   :  { %v8075_v50 = vsub.f32 %v4835_v59, %v4835_v59 }
 0x5ac   :  { %5381 = vmatpush1.bf16.xpose.msra.mxu0 %v7207_v13  ;;  %v4829_v13 = vsel %vm7486_vm11, 1.0, %v9567_v37  ;;  %vm9782_vm11 = vnez %v9643_v38  ;;  %v4841_v38 = vsel %vm9786_vm10, 1.0, %v9567_v37  ;;  %vm9795_vm10 = vnez %v9685_v22 }
 0x5ad   :  { %5382 = vmatprep.subr.bf16.mxu0 %v9508_v26  ;;  %v8028_v43 = vsub.f32 %v4829_v13, %v4829_v13  ;;  %v8088_v19 = vsub.f32 %v4841_v38, %v4841_v38  ;;  %v4849_v59 = vsel %vm9795_vm10, 1.0, %v9567_v37 }
 0x5b4   :  { %5384 = vmatpush1.bf16.xpose.msra.mxu0 %v7227_v34  ;;  %v4828_v34 = vsel %vm7496_vm0, 1.0, %v9567_v37  ;;  %vm9784_vm0 = vnez %v9653_v61 }
 0x5b5   :  { %5385 = vmatprep.subr.bf16.mxu0 %v9508_v26  ;;  %v4823_v26 = vsel %vm7454_vm12, 1.0, %v9567_v37  ;;  %v8032_v21 = vsub.f32 %v4828_v34, %v4828_v34  ;;  %vm9779_vm12 = vnez %v9637_v32  ;;  %v4836_v32 = vsel %vm9784_vm0, 1.0, %v9567_v37 }
 0x5b6   :  { %v8019_v39 = vsub.f32 %v4823_v26, %v4823_v26  ;;  %v4830_v8 = vsel %vm9779_vm12, 1.0, %v9567_v37  ;;  %vm9787_vm12 = vnez %v9665_v29  ;;  %v8081_v55 = vsub.f32 %v4836_v32, %v4836_v32 }
 0x5b7   :  { %9777 = vst [vmem:[#allocation39_spill] sm:$0xff] %v8032_v21  ;;  %v4838_v26 = vsel %vm9787_vm12, 1.0, %v9567_v37  ;;  %v8071_v61 = vsub.f32 %v4830_v8, %v4830_v8  ;;  %v4843_v29 = vsel %vm9790_vm1, 1.0, %v9567_v37  ;;  %vm9793_vm0 = vnez %v9681_v35 }
 0x5b8   :  { %9773 = vst [vmem:[#allocation36_spill] sm:$0xff] %v8019_v39  ;;  %9789 = vst [vmem:[#allocation40_spill] sm:$0xff] %v8081_v55  ;;  %v8090_v34 = vsub.f32 %v4838_v26, %v4838_v26  ;;  %v4844_v45 = vsel %vm9793_vm0, 1.0, %v9567_v37  ;;  %vm9796_vm12 = vnez %v9694_v5  ;;  %vm9798_vm1 = vnez %v9698_v51 }
 0x5b9   :  { %v4851_v35 = vsel %vm9798_vm1, 1.0, %v9567_v37  ;;  %vm9801_vm0 = vnez %v9710_v4  ;;  %v8133_v32 = vsub.f32 %v4844_v45, %v4844_v45  ;;  %v8135_v51 = vsub.f32 %v4847_v18, %v4847_v18 }
 0x5ba   :  { %v4852_v5 = vsel %vm9801_vm0, 1.0, %v9567_v37  ;;  %v8143_v26 = vsub.f32 %v4851_v35, %v4851_v35  ;;  %vm9810_vm1 = vnez %v9728_v58  ;;  %vm9814_vm0 = vnez %v9740_v63 }
 0x5bc   :  { %5387 = vmatpush1.bf16.xpose.msra.mxu0 %v7246_v11  ;;  %v4826_v11 = vsel %vm7491_vm4, 1.0, %v9567_v37  ;;  %vm9783_vm4 = vnez %v9651_v33  ;;  %v4840_v33 = vsel %vm9788_vm13, 1.0, %v9567_v37  ;;  %vm9797_vm13 = vnez %v9696_v41 }
 0x5bd   :  { %3256 = vmatprep.subr.mxu0 %v9567_v37  ;;  %v8030_v9 = vsub.f32 %v4826_v11, %v4826_v11  ;;  %v4834_v14 = vsel %vm9783_vm4, 1.0, %v9567_v37  ;;  %v8083_v11 = vsub.f32 %v4839_v24, %v4839_v24  ;;  %vm9792_vm4 = vnez %v9679_v16 }
 0x5be   :  { %v8079_v13 = vsub.f32 %v4834_v14, %v4834_v14  ;;  %v4842_v8 = vsel %vm9792_vm4, 1.0, %v9567_v37  ;;  %v4848_v16 = vsel %vm9797_vm13, 1.0, %v9567_v37  ;;  %vm9800_vm4 = vnez %v9708_v28  ;;  %v9802_v28 = vld [vmem:[#allocation24_spill] sm:$0xff] }
 0x5bf   :  { %9776 = vst [vmem:[#allocation38_spill] sm:$0xff] %v8030_v9  ;;  %v4850_v14 = vsel %vm9800_vm4, 1.0, %v9567_v37  ;;  %v8131_v41 = vsub.f32 %v4842_v8, %v4842_v8  ;;  %v8137_v24 = vsub.f32 %v4849_v59, %v4849_v59  ;;  %vm9803_vm9 = vnez %v9802_v28  ;;  %v9806_v8 = vld [vmem:[#allocation25_spill] sm:$0xff] }
 0x5c0   :  { %vm9807_vm10 = vnez %v9806_v8  ;;  %vm9809_vm13 = vnez %v9726_v31  ;;  %vm9813_vm4 = vnez %v9738_v10  ;;  %v4864_v10 = vsel %vm7910_vm5, 1.0, %v9567_v37 }
 0x5c1   :  { %v4857_v45 = vsel %vm9807_vm10, 1.0, %v9567_v37  ;;  %v4856_v59 = vsel %vm9809_vm13, 1.0, %v9567_v37 }
 0x5c2   :  { %v8180_v58 = vsub.f32 %v4857_v45, %v4857_v45  ;;  %v8193_v28 = vsub.f32 %v4856_v59, %v4856_v59  ;;  %v8212_v59 = vsub.f32 %v4864_v10, %v4864_v10 }
 0x5c4   :  { %3258 = vmatpush1.xpose.msra.mxu0 %v7254_v27  ;;  %v8015_v27 = vsub.f32 %v4822_v60, %v4822_v60  ;;  %v4837_v60 = vsel %vm9782_vm11, 1.0, %v9567_v37  ;;  %vm9791_vm11 = vnez %v9671_v3  ;;  %v4846_v3 = vsel %vm9796_vm12, 1.0, %v9567_v37  ;;  %9816 = vst [vmem:[#allocation42_spill] sm:$0xff] %v8180_v58  ;;  %9820 = vst [vmem:[#allocation43_spill] sm:$0xff] %v8193_v28 }
 0x5c5   :  { %v8077_v23 = vsub.f32 %v4837_v60, %v4837_v60  ;;  %v4845_v12 = vsel %vm9791_vm11, 1.0, %v9567_v37  ;;  %v8109_v60 = vsub.f32 %v4843_v29, %v4843_v29  ;;  %vm9799_vm11 = vnez %v9700_v17  ;;  %9827 = vst [vmem:[#allocation50_spill] sm:$0xff] %v8212_v59 }
 0x5c6   :  { %v8120_v49 = vsub.f32 %v4845_v12, %v4845_v12  ;;  %v4853_v22 = vsel %vm9799_vm11, 1.0, %v9567_v37  ;;  %v8139_v38 = vsub.f32 %v4846_v3, %v4846_v3  ;;  %v8141_v17 = vsub.f32 %v4848_v16, %v4848_v16 }
 0x5c7   :  { %3263 = vmatmul.mubr.f32.vlgmr.msra.gmra.mrb[0].mxu0 %v7280_v6  ;;  %v8017_v6 = vsub.f32 %v4824_v15, %v4824_v15  ;;  %v8049_v15 = vsub.f32 %v4831_v62, %v4831_v62  ;;  %v8092_v62 = vsub.f32 %v4840_v33, %v4840_v33  ;;  %v4855_v33 = vsel %vm9803_vm9, 1.0, %v9567_v37 }
 0x5c8   :  { %v8148_v4 = vsub.f32 %v4853_v22, %v4853_v22  ;;  %v8150_v29 = vsub.f32 %v4850_v14, %v4850_v14  ;;  %v8152_v12 = vsub.f32 %v4852_v5, %v4852_v5  ;;  %vm9808_vm12 = vnez %v9724_v56  ;;  %v9817_v14 = vld [vmem:[#allocation30_spill] sm:$0xff] }
 0x5c9   :  { %v4854_v18 = vsel %vm9808_vm12, 1.0, %v9567_v37  ;;  %v4859_v3 = vsel %vm9810_vm1, 1.0, %v9567_v37  ;;  %vm9811_vm11 = vnez %v9730_v30  ;;  %v8169_v35 = vsub.f32 %v4855_v33, %v4855_v33 }
 0x5ca   :  { %9804 = vst [vmem:[#allocation24_spill] sm:$0xff] %v8150_v29  ;;  %9805 = vst [vmem:[#allocation41_spill] sm:$0xff] %v8152_v12  ;;  %v4861_v16 = vsel %vm9811_vm11, 1.0, %v9567_v37  ;;  %v4858_v22 = vsel %vm9813_vm4, 1.0, %v9567_v37  ;;  %v4860_v56 = vsel %vm9814_vm0, 1.0, %v9567_v37  ;;  %vm9815_vm9 = vnez %v9742_v1 }
 0x5cb   :  { %9812 = vst [vmem:[#allocation25_spill] sm:$0xff] %v8169_v35  ;;  %v4863_v31 = vsel %vm9815_vm9, 1.0, %v9567_v37  ;;  %vm9818_vm10 = vnez %v9817_v14  ;;  %v4862_v5 = vsel %vm7905_vm7, 1.0, %v9567_v37  ;;  %v8191_v63 = vsub.f32 %v4854_v18, %v4854_v18 }
 0x5cc   :  { %v4865_v30 = vsel %vm9818_vm10, 1.0, %v9567_v37  ;;  %v8195_v1 = vsub.f32 %v4859_v3, %v4859_v3  ;;  %v8197_v33 = vsub.f32 %v4861_v16, %v4861_v16  ;;  %v8199_v8 = vsub.f32 %v4858_v22, %v4858_v22  ;;  %v9829_v22 = vld [vmem:[#allocation6_spill] sm:$0xff] }
 0x5cd   :  { %9819 = vst [vmem:[#allocation30_spill] sm:$0xff] %v8191_v63  ;;  %v8201_v45 = vsub.f32 %v4860_v56, %v4860_v56  ;;  %v8203_v14 = vsub.f32 %v4863_v31, %v4863_v31  ;;  %v8208_v44 = vsub.f32 %v4865_v30, %v4865_v30  ;;  %v8210_v18 = vsub.f32 %v4862_v5, %v4862_v5 }
 0x5ce   :  { %9821 = vst [vmem:[#allocation44_spill] sm:$0xff] %v8197_v33  ;;  %9822 = vst [vmem:[#allocation45_spill] sm:$0xff] %v8199_v8  ;;  %vm9828_vm7 = vnez %v9759_v2  ;;  %v4866_v16 = vsel %vm7948_vm15, 1.0, %v9567_v37  ;;  %v3292_v56 = vadd.s32 192, %v9829_v22  ;;  %v3293_v31 = vadd.s32 200, %v9829_v22 }
 0x5cf   :  { %9823 = vst [vmem:[#allocation46_spill] sm:$0xff] %v8201_v45  ;;  %9824 = vst [vmem:[#allocation47_spill] sm:$0xff] %v8203_v14  ;;  %v4869_v3 = vsel %vm9828_vm7, 1.0, %v9567_v37  ;;  %v3294_v54 = vadd.s32 208, %v9829_v22  ;;  %v8223_v30 = vsub.f32 %v4867_v48, %v4867_v48  ;;  %v3295_v5 = vadd.s32 216, %v9829_v22 }
 0x5d0   :  { %9825 = vst [vmem:[#allocation48_spill] sm:$0xff] %v8208_v44  ;;  %9826 = vst [vmem:[#allocation49_spill] sm:$0xff] %v8210_v18  ;;  %v3296_v10 = vadd.s32 224, %v9829_v22  ;;  %v3297_v47 = vadd.s32 232, %v9829_v22  ;;  %v4868_v2 = vsel %vm7953_vm2, 1.0, %v9567_v37  ;;  %v3323_v0 = vcvt.s32.f32 %v3292_v56 }
 0x5d1   :  { %9830 = vst [vmem:[#allocation6_spill] sm:$0xff] %v8223_v30  ;;  %v3324_v7 = vcvt.s32.f32 %v3293_v31  ;;  %v3298_v42 = vadd.s32 240, %v9829_v22  ;;  %v8232_v59 = vsub.f32 %v4869_v3, %v4869_v3  ;;  %v8234_v18 = vsub.f32 %v4866_v16, %v4866_v16 }
 0x5d2   :  { %v3325_v48 = vcvt.s32.f32 %v3294_v54  ;;  %v3326_v30 = vcvt.s32.f32 %v3295_v5  ;;  %vm3398_vm15 = vcmp.eq.f32.partialorder %v3323_v0, %v7439_v57  ;;  %vm3397_vm6 = vcmp.eq.f32.partialorder %v3323_v0, %v7435_v25 }
 0x5d3   :  { %9831 = vst [vmem:[#allocation51_spill] sm:$0xff] %v8232_v59  ;;  %9832 = vst [vmem:[#allocation52_spill] sm:$0xff] %v8234_v18  ;;  %vm3400_vm5 = vcmp.eq.f32.partialorder %v3324_v7, %v7439_v57  ;;  %vm3399_vm12 = vcmp.eq.f32.partialorder %v3324_v7, %v7435_v25  ;;  %v8240_v46 = vsub.f32 %v4868_v2, %v4868_v2  ;;  %v4871_v56 = vsel %vm3398_vm15, 1.0, %v9567_v37 }
 0x5d4   :  { %vm8243_vm2 = vmpackc.low %vm3400_vm5, %vm3398_vm15  ;;  %v9834_v22 = vmov 0  ;;  %v3327_v3 = vcvt.s32.f32 %v3296_v10  ;;  %v3328_v16 = vcvt.s32.f32 %v3297_v47  ;;  %v4873_v31 = vsel %vm3400_vm5, 1.0, %v9567_v37 }
 0x5d5   :  { %9833 = vst [vmem:[#allocation53_spill] sm:$0xff] %v8240_v46  ;;  %v9835_v22 = vsel %vm8243_vm2, 4294967295, %v9834_v22  ;;  %5437 = vmatprep.subr.msk.bf16.mxu1 %vm8243_vm2, %v9686_v20  ;;  %v4870_v54 = vsel %vm3397_vm6, 1.0, %v9567_v37  ;;  %v4872_v7 = vsel %vm3399_vm12, 1.0, %v9567_v37  ;;  %vm8253_vm13 = vmpackc.low %vm3399_vm12, %vm3397_vm6  ;;  %v9837_v5 = vmov 0 }
 0x5d6   :  { %9836 = vst [vmem:[#allocation54_spill] sm:$0xff] %v9835_v22  ;;  %v9838_v5 = vsel %vm8253_vm13, 4294967295, %v9837_v5  ;;  %v3329_v2 = vcvt.s32.f32 %v3298_v42  ;;  %5439 = vmatpush1.bf16.msk.msra.mxu1 %vm8253_vm13, %v9686_v20  ;;  %vm3402_vm1 = vcmp.eq.f32.partialorder %v3325_v48, %v7439_v57  ;;  %vm3404_vm11 = vcmp.eq.f32.partialorder %v3326_v30, %v7439_v57 }
 0x5d7   :  { %9839 = vst [vmem:[#allocation55_spill] sm:$0xff] %v9838_v5  ;;  %vm3401_vm4 = vcmp.eq.f32.partialorder %v3325_v48, %v7435_v25  ;;  %vm3403_vm0 = vcmp.eq.f32.partialorder %v3326_v30, %v7435_v25  ;;  %v8264_v47 = vsub.f32 %v4871_v56, %v4871_v56  ;;  %v4875_v10 = vsel %vm3402_vm1, 1.0, %v9567_v37  ;;  %vm8268_vm9 = vmpackc.low %vm3404_vm11, %vm3402_vm1 }
 0x5d8   :  { %v4877_v0 = vsel %vm3404_vm11, 1.0, %v9567_v37  ;;  %v9841_v42 = vmov 0  ;;  %v4874_v5 = vsel %vm3401_vm4, 1.0, %v9567_v37  ;;  %v8273_v22 = vsub.f32 %v4873_v31, %v4873_v31  ;;  %5441 = vmatprep.subr.msk.bf16.mxu1 %vm8268_vm9, %v9686_v20  ;;  %vm8283_vm10 = vmpackc.low %vm3403_vm0, %vm3401_vm4 }
 0x5d9   :  { %9840 = vst [vmem:[#allocation56_spill] sm:$0xff] %v8264_v47  ;;  %v9842_v42 = vsel %vm8268_vm9, 4294967295, %v9841_v42  ;;  %v8275_v46 = vsub.f32 %v4870_v54, %v4870_v54  ;;  %v8277_v18 = vsub.f32 %v4872_v7, %v4872_v7  ;;  %v4876_v30 = vsel %vm3403_vm0, 1.0, %v9567_v37 }
 0x5da   :  { %9843 = vst [vmem:[#allocation57_spill] sm:$0xff] %v9842_v42  ;;  %9844 = vst [vmem:[#allocation58_spill] sm:$0xff] %v8273_v22  ;;  %v9847_v48 = vmov 0  ;;  %vm3406_vm7 = vcmp.eq.f32.partialorder %v3327_v3, %v7439_v57  ;;  %vm3408_vm15 = vcmp.eq.f32.partialorder %v3328_v16, %v7439_v57  ;;  %vm3405_vm5 = vcmp.eq.f32.partialorder %v3327_v3, %v7435_v25  ;;  %5443 = vmatpush1.bf16.msk.msra.mxu1 %vm8283_vm10, %v9686_v20 }
 0x5db   :  { %9845 = vst [vmem:[#allocation59_spill] sm:$0xff] %v8275_v46  ;;  %9846 = vst [vmem:[#allocation60_spill] sm:$0xff] %v8277_v18  ;;  %v9848_v48 = vsel %vm8283_vm10, 4294967295, %v9847_v48  ;;  %vm3407_vm6 = vcmp.eq.f32.partialorder %v3328_v16, %v7435_v25  ;;  %v8291_v56 = vsub.f32 %v4875_v10, %v4875_v10  ;;  %v8293_v31 = vsub.f32 %v4877_v0, %v4877_v0 }
 0x5dc   :  { %9849 = vst [vmem:[#allocation61_spill] sm:$0xff] %v9848_v48  ;;  %v8298_v54 = vsub.f32 %v4874_v5, %v4874_v5  ;;  %v4879_v7 = vsel %vm3406_vm7, 1.0, %v9567_v37  ;;  %vm8301_vm12 = vmpackc.low %vm3408_vm15, %vm3406_vm7  ;;  %v9853_v42 = vmov 0  ;;  %v8305_v18 = vsub.f32 %v4876_v30, %v4876_v30 }
 0x5dd   :  { %9850 = vst [vmem:[#allocation62_spill] sm:$0xff] %v8291_v56  ;;  %9851 = vst [vmem:[#allocation63_spill] sm:$0xff] %v8293_v31  ;;  %v9854_v42 = vsel %vm8301_vm12, 4294967295, %v9853_v42  ;;  %v4881_v3 = vsel %vm3408_vm15, 1.0, %v9567_v37  ;;  %5445 = vmatprep.subr.msk.bf16.mxu1 %vm8301_vm12, %v9686_v20  ;;  %v4878_v16 = vsel %vm3405_vm5, 1.0, %v9567_v37  ;;  %v4880_v10 = vsel %vm3407_vm6, 1.0, %v9567_v37 }
 0x5de   :  { %9852 = vst [vmem:[#allocation64_spill] sm:$0xff] %v8298_v54  ;;  %9855 = vst [vmem:[#allocation65_spill] sm:$0xff] %v9854_v42  ;;  %v9857_v5 = vmov 0  ;;  %vm3410_vm11 = vcmp.eq.f32.partialorder %v3329_v2, %v7439_v57  ;;  %vm3409_vm4 = vcmp.eq.f32.partialorder %v3329_v2, %v7435_v25  ;;  %v9361_v0 = vand.u32 4294901760, %v8019_v39 }
 0x5df   :  { %9856 = vst [vmem:[#allocation66_spill] sm:$0xff] %v8305_v18  ;;  %vm8313_vm1 = vmpackc.low %vm3407_vm6, %vm3405_vm5  ;;  %v9365_v30 = vand.u32 4294901760, %v8021_v36  ;;  %v8321_v48 = vsub.f32 %v4879_v7, %v4879_v7  ;;  %v8324_v42 = vsel %vm3410_vm11, 1.0, %v9567_v37  ;;  %v9372_v18 = vand.u32 4294901760, %v8015_v27 }
 0x5e0   :  { %v9858_v5 = vsel %vm8313_vm1, 4294967295, %v9857_v5  ;;  %9860 = vst [vmem:[#allocation68_spill] sm:$0xff] %v8324_v42  ;;  %v9373_v54 = vand.u32 4294901760, %v8017_v6  ;;  %v8328_v31 = vsub.f32 %v4881_v3, %v4881_v3  ;;  %5447 = vmatpush1.bf16.msk.msra.mxu1 %vm8313_vm1, %v9686_v20  ;;  %v8333_v25 = vsub.f32 %v4878_v16, %v4878_v16 }
 0x5e1   :  { %9859 = vst [vmem:[#allocation67_spill] sm:$0xff] %v9858_v5  ;;  %v3691_v57 = vsub.f32 %v8019_v39, %v9361_v0  ;;  %v3703_v2 = vsub.f32 %v8021_v36, %v9365_v30  ;;  %v8341_v7 = vsub.f32 %v4880_v10, %v4880_v10  ;;  %vm9864_vm0 = vcmask 1044480  }
 0x5e2   :  { %9861 = vst [vmem:[#allocation69_spill] sm:$0xff] %v8328_v31  ;;  %9862 = vst [vmem:[#allocation70_spill] sm:$0xff] %v8333_v25  ;;  %4944 = vmatprep.subr.msk.mxu1 %vm9864_vm0, %v8324_v42  ;;  %v8346_v3 = vsel %vm3409_vm4, 1.0, %v9567_v37  ;;  %v3697_v16 = vsub.f32 %v8015_v27, %v9372_v18  ;;  %v3709_v0 = vsub.f32 %v8017_v6, %v9373_v54  ;;  %v9374_v30 = vand.u32 4294901760, %v8023_v52 }
 0x5e3   :  { %9863 = vst [vmem:[#allocation71_spill] sm:$0xff] %v8341_v7  ;;  %9865 = vst [vmem:[#allocation72_spill] sm:$0xff] %v8346_v3  ;;  %v3692_v5 = vand.u32 4294901760, %v3691_v57  ;;  %v3704_v20 = vand.u32 4294901760, %v3703_v2  ;;  %v9377_v10 = vand.u32 4294901760, %v8028_v43  ;;  %v9378_v42 = vand.u32 4294901760, %v8030_v9 }
 0x5e4   :  { %v3698_v36 = vand.u32 4294901760, %v3697_v16  ;;  %v3710_v39 = vand.u32 4294901760, %v3709_v0  ;;  %v9381_v37 = vand.u32 4294901760, %v8032_v21  ;;  %vm9866_vm7 = vmmov %vm9864_vm0  ;;  %v3715_v54 = vsub.f32 %v8023_v52, %v9374_v30 }
 0x5e5   :  { %4945 = vmatpush1.msk.msra.mxu1 %vm9866_vm7, %v8346_v3  ;;  %v5448_v18 = vpack.c.bf16 %v3704_v20, %v3692_v5  ;;  %v3727_v57 = vsub.f32 %v8028_v43, %v9377_v10  ;;  %v9384_v2 = vand.u32 4294901760, %v8049_v15  ;;  %v3721_v0 = vsub.f32 %v8030_v9, %v9378_v42  ;;  %vm9942_vm5 = vmmov %vm9864_vm0 }
 0x5e6   :  { %v8367_v16 = vpack.c.bf16 %v3710_v39, %v3698_v36  ;;  %v3733_v20 = vsub.f32 %v8032_v21, %v9381_v37  ;;  %v9385_v5 = vand.u32 4294901760, %v8060_v53  ;;  %v3716_v30 = vand.u32 4294901760, %v3715_v54  ;;  %vm9946_vm6 = vmmov %vm9864_vm0 }
 0x5e7   :  { %5449 = vmatprep.subr.bf16.mxu1 %v5448_v18  ;;  %v3728_v3 = vand.u32 4294901760, %v3727_v57  ;;  %v3739_v10 = vsub.f32 %v8049_v15, %v9384_v2  ;;  %v9386_v39 = vand.u32 4294901760, %v8071_v61  ;;  %v3722_v36 = vand.u32 4294901760, %v3721_v0 }
 0x5e8   :  { %9867 = vst [vmem:[#allocation73_spill] sm:$0xff] %v8367_v16  ;;  %v3734_v16 = vand.u32 4294901760, %v3733_v20  ;;  %v3751_v42 = vsub.f32 %v8060_v53, %v9385_v5  ;;  %v9387_v9 = vand.u32 4294901760, %v8073_v40  ;;  %v9388_v54 = vand.u32 4294901760, %v8075_v50 }
 0x5e9   :  { %v8384_v37 = vpack.c.bf16 %v3728_v3, %v3716_v30  ;;  %v3740_v21 = vand.u32 4294901760, %v3739_v10  ;;  %v3745_v18 = vsub.f32 %v8071_v61, %v9386_v39  ;;  %v9389_v20 = vand.u32 4294901760, %v8077_v23 }
 0x5ea   :  { %v8390_v57 = vpack.c.bf16 %v3734_v16, %v3722_v36  ;;  %v3752_v2 = vand.u32 4294901760, %v3751_v42  ;;  %v3757_v0 = vsub.f32 %v8073_v40, %v9387_v9  ;;  %v3763_v30 = vsub.f32 %v8075_v50, %v9388_v54 }
 0x5eb   :  { %9868 = vst [vmem:[#allocation74_spill] sm:$0xff] %v8384_v37  ;;  %v3746_v5 = vand.u32 4294901760, %v3745_v18  ;;  %v9390_v3 = vand.u32 4294901760, %v8079_v13  ;;  %v9391_v10 = vand.u32 4294901760, %v8081_v55  ;;  %v3775_v42 = vsub.f32 %v8077_v23, %v9389_v20 }
 0x5ec   :  { %9869 = vst [vmem:[#allocation75_spill] sm:$0xff] %v8390_v57  ;;  %v8401_v39 = vpack.c.bf16 %v3752_v2, %v3740_v21  ;;  %v3758_v16 = vand.u32 4294901760, %v3757_v0  ;;  %v9394_v36 = vand.u32 4294901760, %v8083_v11  ;;  %v3764_v9 = vand.u32 4294901760, %v3763_v30 }
 0x5ed   :  { %v3769_v18 = vsub.f32 %v8079_v13, %v9390_v3  ;;  %v3781_v54 = vsub.f32 %v8081_v55, %v9391_v10  ;;  %v9395_v57 = vand.u32 4294901760, %v8088_v19  ;;  %v3776_v2 = vand.u32 4294901760, %v3775_v42 }
 0x5ee   :  { %9870 = vst [vmem:[#allocation76_spill] sm:$0xff] %v8401_v39  ;;  %v8414_v21 = vpack.c.bf16 %v3758_v16, %v3746_v5  ;;  %v3787_v0 = vsub.f32 %v8083_v11, %v9394_v36  ;;  %v9396_v20 = vand.u32 4294901760, %v8090_v34  ;;  %v9397_v37 = vand.u32 4294901760, %v8092_v62 }
 0x5ef   :  { %v3770_v30 = vand.u32 4294901760, %v3769_v18  ;;  %v3782_v39 = vand.u32 4294901760, %v3781_v54  ;;  %v3799_v3 = vsub.f32 %v8088_v19, %v9395_v57  ;;  %v8424_v10 = vpack.c.bf16 %v3776_v2, %v3764_v9 }
 0x5f0   :  { %9871 = vst [vmem:[#allocation77_spill] sm:$0xff] %v8414_v21  ;;  %v3788_v55 = vand.u32 4294901760, %v3787_v0  ;;  %v3793_v5 = vsub.f32 %v8090_v34, %v9396_v20  ;;  %v9398_v16 = vand.u32 4294901760, %v8109_v60  ;;  %v3805_v54 = vsub.f32 %v8092_v62, %v9397_v37 }
 0x5f1   :  { %9872 = vst [vmem:[#allocation78_spill] sm:$0xff] %v8424_v10  ;;  %v8430_v42 = vpack.c.bf16 %v3782_v39, %v3770_v30  ;;  %v3800_v36 = vand.u32 4294901760, %v3799_v3  ;;  %v9399_v18 = vand.u32 4294901760, %v8120_v49  ;;  %v9400_v2 = vand.u32 4294901760, %v8131_v41 }
 0x5f2   :  { %v3794_v57 = vand.u32 4294901760, %v3793_v5  ;;  %v3811_v9 = vsub.f32 %v8109_v60, %v9398_v16  ;;  %v9401_v0 = vand.u32 4294901760, %v8133_v32  ;;  %v3806_v39 = vand.u32 4294901760, %v3805_v54 }
 0x5f3   :  { %9873 = vst [vmem:[#allocation79_spill] sm:$0xff] %v8430_v42  ;;  %v8441_v20 = vpack.c.bf16 %v3800_v36, %v3788_v55  ;;  %v3823_v3 = vsub.f32 %v8120_v49, %v9399_v18  ;;  %v9402_v30 = vand.u32 4294901760, %v8135_v51  ;;  %v3817_v5 = vsub.f32 %v8131_v41, %v9400_v2 }
 0x5f4   :  { %v3812_v37 = vand.u32 4294901760, %v3811_v9  ;;  %v3829_v16 = vsub.f32 %v8133_v32, %v9401_v0  ;;  %v9403_v42 = vand.u32 4294901760, %v8137_v24  ;;  %v8454_v55 = vpack.c.bf16 %v3806_v39, %v3794_v57 }
 0x5f5   :  { %9874 = vst [vmem:[#allocation80_spill] sm:$0xff] %v8441_v20  ;;  %v3824_v36 = vand.u32 4294901760, %v3823_v3  ;;  %v3835_v54 = vsub.f32 %v8135_v51, %v9402_v30  ;;  %v9404_v18 = vand.u32 4294901760, %v8139_v38  ;;  %v3818_v9 = vand.u32 4294901760, %v3817_v5 }
 0x5f6   :  { %9875 = vst [vmem:[#allocation81_spill] sm:$0xff] %v8454_v55  ;;  %v3830_v20 = vand.u32 4294901760, %v3829_v16  ;;  %v3847_v2 = vsub.f32 %v8137_v24, %v9403_v42  ;;  %v9405_v10 = vand.u32 4294901760, %v8141_v17  ;;  %v9406_v39 = vand.u32 4294901760, %v8143_v26 }
 0x5f7   :  { %v8464_v0 = vpack.c.bf16 %v3824_v36, %v3812_v37  ;;  %v3836_v21 = vand.u32 4294901760, %v3835_v54  ;;  %v3841_v57 = vsub.f32 %v8139_v38, %v9404_v18  ;;  %v9407_v5 = vand.u32 4294901760, %v8148_v4 }
 0x5f8   :  { %v8470_v3 = vpack.c.bf16 %v3830_v20, %v3818_v9  ;;  %v3848_v30 = vand.u32 4294901760, %v3847_v2  ;;  %v3853_v16 = vsub.f32 %v8141_v17, %v9405_v10  ;;  %v3859_v37 = vsub.f32 %v8143_v26, %v9406_v39 }
 0x5f9   :  { %9876 = vst [vmem:[#allocation82_spill] sm:$0xff] %v8464_v0  ;;  %v3842_v42 = vand.u32 4294901760, %v3841_v57  ;;  %v9408_v36 = vand.u32 4294901760, %v8150_v29  ;;  %v9409_v54 = vand.u32 4294901760, %v8152_v12  ;;  %v3871_v2 = vsub.f32 %v8148_v4, %v9407_v5 }
 0x5fa   :  { %9877 = vst [vmem:[#allocation83_spill] sm:$0xff] %v8470_v3  ;;  %v8481_v18 = vpack.c.bf16 %v3848_v30, %v3836_v21  ;;  %v3854_v20 = vand.u32 4294901760, %v3853_v16  ;;  %v9410_v9 = vand.u32 4294901760, %v8169_v35  ;;  %v3860_v10 = vand.u32 4294901760, %v3859_v37 }
 0x5fb   :  { %v3865_v57 = vsub.f32 %v8150_v29, %v9408_v36  ;;  %v3877_v39 = vsub.f32 %v8152_v12, %v9409_v54  ;;  %v9411_v3 = vand.u32 4294901760, %v8180_v58  ;;  %v3872_v30 = vand.u32 4294901760, %v3871_v2  ;;  %v9910_v12 = vld [vmem:[#allocation52_spill] sm:$0xff] }
 0x5fc   :  { %9878 = vst [vmem:[#allocation84_spill] sm:$0xff] %v8481_v18  ;;  %v8494_v21 = vpack.c.bf16 %v3854_v20, %v3842_v42  ;;  %v3883_v16 = vsub.f32 %v8169_v35, %v9410_v9  ;;  %v9412_v5 = vand.u32 4294901760, %v8191_v63  ;;  %v9413_v0 = vand.u32 4294901760, %v8193_v28  ;;  %v9916_v29 = vld [vmem:[#allocation20_spill] sm:$0xff] }
 0x5fd   :  { %v3866_v37 = vand.u32 4294901760, %v3865_v57  ;;  %v3878_v18 = vand.u32 4294901760, %v3877_v39  ;;  %v3895_v36 = vsub.f32 %v8180_v58, %v9411_v3  ;;  %v8504_v54 = vpack.c.bf16 %v3872_v30, %v3860_v10 }
 0x5fe   :  { %9879 = vst [vmem:[#allocation85_spill] sm:$0xff] %v8494_v21  ;;  %v3884_v55 = vand.u32 4294901760, %v3883_v16  ;;  %v3889_v42 = vsub.f32 %v8191_v63, %v9412_v5  ;;  %v9414_v20 = vand.u32 4294901760, %v8195_v1  ;;  %v3901_v39 = vsub.f32 %v8193_v28, %v9413_v0  ;;  %v9885_v21 = vld [vmem:[#allocation50_spill] sm:$0xff]  ;;  %v9912_v63 = vld [vmem:[#allocation59_spill] sm:$0xff] }
 0x5ff   :  { %9880 = vst [vmem:[#allocation86_spill] sm:$0xff] %v8504_v54  ;;  %v8510_v2 = vpack.c.bf16 %v3878_v18, %v3866_v37  ;;  %v3896_v9 = vand.u32 4294901760, %v3895_v36  ;;  %v9415_v57 = vand.u32 4294901760, %v8197_v33  ;;  %v9416_v30 = vand.u32 4294901760, %v8199_v8 }
 0x600   :  { %v3890_v3 = vand.u32 4294901760, %v3889_v42  ;;  %v3907_v10 = vsub.f32 %v8195_v1, %v9414_v20  ;;  %v9419_v16 = vand.u32 4294901760, %v8201_v45  ;;  %v3902_v18 = vand.u32 4294901760, %v3901_v39 }
 0x601   :  { %9881 = vst [vmem:[#allocation87_spill] sm:$0xff] %v8510_v2  ;;  %v8521_v5 = vpack.c.bf16 %v3896_v9, %v3884_v55  ;;  %v3919_v36 = vsub.f32 %v8197_v33, %v9415_v57  ;;  %v9422_v37 = vand.u32 4294901760, %v8203_v14  ;;  %v3913_v42 = vsub.f32 %v8199_v8, %v9416_v30  ;;  %v9884_v57 = vld [vmem:[#allocation49_spill] sm:$0xff] }
 0x602   :  { %v3908_v0 = vand.u32 4294901760, %v3907_v10  ;;  %v3925_v20 = vsub.f32 %v8201_v45, %v9419_v16  ;;  %v9423_v2 = vand.u32 4294901760, %v8208_v44  ;;  %v8534_v55 = vpack.c.bf16 %v3902_v18, %v3890_v3  ;;  %v9887_v18 = vld [vmem:[#allocation6_spill] sm:$0xff] }
 0x603   :  { %9882 = vst [vmem:[#allocation88_spill] sm:$0xff] %v8521_v5  ;;  %v3920_v9 = vand.u32 4294901760, %v3919_v36  ;;  %v3931_v39 = vsub.f32 %v8203_v14, %v9422_v37  ;;  %v9424_v5 = vand.u32 4294901760, %v9884_v57  ;;  %v3914_v10 = vand.u32 4294901760, %v3913_v42  ;;  %v9914_v14 = vld [vmem:[#allocation66_spill] sm:$0xff] }
 0x604   :  { %9883 = vst [vmem:[#allocation89_spill] sm:$0xff] %v8534_v55  ;;  %v3926_v54 = vand.u32 4294901760, %v3925_v20  ;;  %v3943_v30 = vsub.f32 %v8208_v44, %v9423_v2  ;;  %v9426_v8 = vand.u32 4294901760, %v9885_v21  ;;  %v9427_v36 = vand.u32 4294901760, %v9887_v18  ;;  %v9923_v44 = vld [vmem:[#allocation75_spill] sm:$0xff] }
 0x605   :  { %v8544_v16 = vpack.c.bf16 %v3920_v9, %v3908_v0  ;;  %v3932_v45 = vand.u32 4294901760, %v3931_v39  ;;  %v3937_v3 = vsub.f32 %v9884_v57, %v9424_v5  ;;  %v9428_v42 = vand.u32 4294901760, %v8232_v59  ;;  %v9889_v9 = vld [vmem:[#allocation52_spill] sm:$0xff] }
 0x606   :  { %v8550_v37 = vpack.c.bf16 %v3926_v54, %v3914_v10  ;;  %v3944_v55 = vand.u32 4294901760, %v3943_v30  ;;  %v3949_v20 = vsub.f32 %v9885_v21, %v9426_v8  ;;  %v3955_v0 = vsub.f32 %v9887_v18, %v9427_v36 }
 0x607   :  { %9886 = vst [vmem:[#allocation90_spill] sm:$0xff] %v8544_v16  ;;  %v3938_v2 = vand.u32 4294901760, %v3937_v3  ;;  %v9429_v39 = vand.u32 4294901760, %v9889_v9  ;;  %v9890_v16 = vld [vmem:[#allocation53_spill] sm:$0xff]  ;;  %v3967_v30 = vsub.f32 %v8232_v59, %v9428_v42  ;;  %v9435_v10 = vand.u32 4294901760, %v8264_v47 }
 0x608   :  { %9888 = vst [vmem:[#allocation91_spill] sm:$0xff] %v8550_v37  ;;  %v9433_v5 = vand.u32 4294901760, %v9890_v16  ;;  %v8561_v57 = vpack.c.bf16 %v3944_v55, %v3932_v45  ;;  %v3950_v54 = vand.u32 4294901760, %v3949_v20  ;;  %v3956_v8 = vand.u32 4294901760, %v3955_v0 }
 0x609   :  { %v3961_v3 = vsub.f32 %v9889_v9, %v9429_v39  ;;  %v9436_v37 = vand.u32 4294901760, %v8273_v22  ;;  %v3968_v55 = vand.u32 4294901760, %v3967_v30  ;;  %v3979_v20 = vsub.f32 %v8264_v47, %v9435_v10  ;;  %v9893_v9 = vld [vmem:[#allocation60_spill] sm:$0xff]  ;;  %v9921_v47 = vld [vmem:[#allocation73_spill] sm:$0xff] }
 0x60a   :  { %9891 = vst [vmem:[#allocation92_spill] sm:$0xff] %v8561_v57  ;;  %v3973_v36 = vsub.f32 %v9890_v16, %v9433_v5  ;;  %v8574_v45 = vpack.c.bf16 %v3950_v54, %v3938_v2  ;;  %v9437_v42 = vand.u32 4294901760, %v8275_v46  ;;  %v9440_v59 = vand.u32 4294901760, %v9893_v9 }
 0x60b   :  { %v3962_v0 = vand.u32 4294901760, %v3961_v3  ;;  %v3991_v39 = vsub.f32 %v8273_v22, %v9436_v37  ;;  %v8584_v5 = vpack.c.bf16 %v3968_v55, %v3956_v8  ;;  %v3980_v16 = vand.u32 4294901760, %v3979_v20  ;;  %v9896_v3 = vld [vmem:[#allocation63_spill] sm:$0xff]  ;;  %v9897_v55 = vld [vmem:[#allocation64_spill] sm:$0xff] }
 0x60c   :  { %9892 = vst [vmem:[#allocation93_spill] sm:$0xff] %v8574_v45  ;;  %v3974_v57 = vand.u32 4294901760, %v3973_v36  ;;  %v3985_v2 = vsub.f32 %v8275_v46, %v9437_v42  ;;  %v9441_v54 = vand.u32 4294901760, %v8291_v56  ;;  %v3997_v36 = vsub.f32 %v9893_v9, %v9440_v59 }
 0x60d   :  { %9894 = vst [vmem:[#allocation60_spill] sm:$0xff] %v8584_v5  ;;  %v3992_v10 = vand.u32 4294901760, %v3991_v39  ;;  %v9442_v37 = vand.u32 4294901760, %v9896_v3  ;;  %v9443_v20 = vand.u32 4294901760, %v9897_v55  ;;  %v9898_v5 = vld [vmem:[#allocation66_spill] sm:$0xff]  ;;  %vm3535_vm15 = vcmask 957440  }
 0x60e   :  { %v8590_v30 = vpack.c.bf16 %v3974_v57, %v3962_v0  ;;  %v3986_v45 = vand.u32 4294901760, %v3985_v2  ;;  %v4003_v8 = vsub.f32 %v8291_v56, %v9441_v54  ;;  %v9445_v42 = vand.u32 4294901760, %v9898_v5 }
 0x60f   :  { %v8601_v46 = vpack.c.bf16 %v3992_v10, %v3980_v16  ;;  %v3998_v57 = vand.u32 4294901760, %v3997_v36  ;;  %v4015_v39 = vsub.f32 %v9896_v3, %v9442_v37  ;;  %v9447_v0 = vand.u32 4294901760, %v8321_v48 }
 0x610   :  { %9895 = vst [vmem:[#allocation94_spill] sm:$0xff] %v8590_v30  ;;  %v4004_v59 = vand.u32 4294901760, %v4003_v8  ;;  %v4009_v2 = vsub.f32 %v9897_v55, %v9443_v20  ;;  %v4021_v54 = vsub.f32 %v9898_v5, %v9445_v42  ;;  %v9448_v30 = vand.u32 4294901760, %v8328_v31 }
 0x611   :  { %9899 = vst [vmem:[#allocation63_spill] sm:$0xff] %v8601_v46  ;;  %v8614_v16 = vpack.c.bf16 %v3998_v57, %v3986_v45  ;;  %v4016_v10 = vand.u32 4294901760, %v4015_v39  ;;  %v4027_v36 = vsub.f32 %v8321_v48, %v9447_v0  ;;  %v9451_v37 = vand.u32 4294901760, %v8333_v25 }
 0x612   :  { %v4010_v8 = vand.u32 4294901760, %v4009_v2  ;;  %v4022_v46 = vand.u32 4294901760, %v4021_v54  ;;  %v4039_v20 = vsub.f32 %v8328_v31, %v9448_v30  ;;  %v9452_v55 = vand.u32 4294901760, %v8341_v7  ;;  %v9902_v31 = vld [vmem:[#allocation37_spill] sm:$0xff] }
 0x613   :  { %9900 = vst [vmem:[#allocation95_spill] sm:$0xff] %v8614_v16  ;;  %v8624_v42 = vpack.c.bf16 %v4016_v10, %v4004_v59  ;;  %v4028_v5 = vand.u32 4294901760, %v4027_v36  ;;  %v4033_v45 = vsub.f32 %v8333_v25, %v9451_v37  ;;  %v9901_v16 = vld [vmem:[#allocation36_spill] sm:$0xff]  ;;  %v9918_v37 = vld [vmem:[#allocation69_spill] sm:$0xff] }
 0x614   :  { %v8629_v57 = vpack.c.bf16 %v4022_v46, %v4010_v8  ;;  %v4040_v39 = vand.u32 4294901760, %v4039_v20  ;;  %v4045_v54 = vsub.f32 %v8341_v7, %v9452_v55  ;;  %v9903_v20 = vld [vmem:[#allocation38_spill] sm:$0xff]  ;;  %v9904_v8 = vld [vmem:[#allocation39_spill] sm:$0xff]  ;;  %v9915_v55 = vld [vmem:[#allocation9_spill] sm:$0xff] }
 0x615   :  { %v4034_v2 = vand.u32 4294901760, %v4033_v45  ;;  %v9924_v25 = vld [vmem:[#allocation76_spill] sm:$0xff]  ;;  %v9925_v7 = vld [vmem:[#allocation77_spill] sm:$0xff] }
 0x616   :  { %v8634_v0 = vpack.c.bf16 %v4040_v39, %v4028_v5  ;;  %v4046_v30 = vand.u32 4294901760, %v4045_v54  ;;  %v9905_v54 = vld [vmem:[#allocation40_spill] sm:$0xff]  ;;  %v9907_v5 = vld [vmem:[#allocation46_spill] sm:$0xff] }
 0x617   :  { %v9913_v39 = vld [vmem:[#allocation64_spill] sm:$0xff] }
 0x618   :  { %v8640_v36 = vpack.c.bf16 %v4046_v30, %v4034_v2  ;;  %v9909_v30 = vld [vmem:[#allocation51_spill] sm:$0xff]  ;;  %v9911_v2 = vld [vmem:[#allocation53_spill] sm:$0xff] }
 0x69a   :  { %v3264_v46 = vpop.f32.mrb[0].mxu0 }
 0x69b   :  { %v5748_v59 = vadd.f32 %v3264_v46, %v9915_v55  ;;  %v3266_v21 = vpop.f32.mrb[1].mxu0 }
 0x69c   :  { %v5749_v18 = vadd.f32 %v3266_v21, %v9916_v29 }
 0x69d   :  { %v8696_v35 = vand.u32 4294901760, %v5748_v59 }
 0x69e   :  { %v3537_v22 = vsel %vm3535_vm15, %v5749_v18, 0 }
 0x69f   :  { %9917 = vst [vmem:[#allocation36_spill] sm:$0xff] %v8696_v35  ;;  %v8703_v10 = vsub.f32 %v5748_v59, %v8696_v35  ;;  %v8705_v56 = vand.u32 4294901760, %v3537_v22 }
 0x6a1   :  { %9919 = vst [vmem:[#allocation37_spill] sm:$0xff] %v8703_v10  ;;  %9920 = vst [vmem:[#allocation38_spill] sm:$0xff] %v8705_v56  ;;  %v9477_v55 = vand.u32 4294901760, %v8703_v10  ;;  %v8709_v46 = vsub.f32 %v3537_v22, %v8705_v56  ;;  %v9922_v22 = vld [vmem:[#allocation74_spill] sm:$0xff] }
 0x6a3   :  { %v9480_v29 = vand.u32 4294901760, %v8709_v46  ;;  %v3680_v21 = vsub.f32 %v8703_v10, %v9477_v55  ;;  %v9926_v55 = vld [vmem:[#allocation78_spill] sm:$0xff]  ;;  %v9927_v10 = vld [vmem:[#allocation79_spill] sm:$0xff] }
 0x6a5   :  { %v3674_v18 = vsub.f32 %v8709_v46, %v9480_v29  ;;  %v3681_v59 = vand.u32 4294901760, %v3680_v21  ;;  %v9930_v21 = vld [vmem:[#allocation82_spill] sm:$0xff]  ;;  %v9947_v29 = vld [vmem:[#allocation60_spill] sm:$0xff] }
 0x6a7   :  { %v3675_v45 = vand.u32 4294901760, %v3674_v18  ;;  %v9928_v18 = vld [vmem:[#allocation80_spill] sm:$0xff] }
 0x6a9   :  { %3676 = vmatprep.mubr.f32.mxu1 %v3675_v45  ;;  %v9929_v45 = vld [vmem:[#allocation81_spill] sm:$0xff] }
 0x6aa   :  { %3682 = vmatmul.mubr.f32.vlgmr.msra.gmra.mrb[6].mxu1 %v3681_v59  ;;  %v9932_v59 = vld [vmem:[#allocation84_spill] sm:$0xff] }
 0x6ab   :  { %5451 = vmatpush1.bf16.msra.mxu1 %v9921_v47  ;;  %4063 = vmatprep.mubr.f32.mxu1 %v8705_v56  ;;  %v9931_v47 = vld [vmem:[#allocation83_spill] sm:$0xff] }
 0x6ac   :  { %5453 = vmatprep.subr.bf16.mxu1 %v9922_v22  ;;  %v9933_v22 = vld [vmem:[#allocation85_spill] sm:$0xff] }
 0x6af   :  { %5455 = vmatpush1.bf16.msra.mxu1 %v9923_v44  ;;  %v9934_v44 = vld [vmem:[#allocation86_spill] sm:$0xff] }
 0x6b0   :  { %5457 = vmatprep.subr.bf16.mxu1 %v9924_v25  ;;  %v9935_v25 = vld [vmem:[#allocation87_spill] sm:$0xff] }
 0x6b3   :  { %5459 = vmatpush1.bf16.msra.mxu1 %v9925_v7  ;;  %v9936_v7 = vld [vmem:[#allocation88_spill] sm:$0xff] }
 0x6b4   :  { %5461 = vmatprep.subr.bf16.mxu1 %v9926_v55  ;;  %v9937_v55 = vld [vmem:[#allocation89_spill] sm:$0xff] }
 0x6b7   :  { %5463 = vmatpush1.bf16.msra.mxu1 %v9927_v10  ;;  %v9938_v10 = vld [vmem:[#allocation90_spill] sm:$0xff] }
 0x6b8   :  { %5465 = vmatprep.subr.bf16.mxu1 %v9928_v18  ;;  %v9939_v18 = vld [vmem:[#allocation91_spill] sm:$0xff] }
 0x6bb   :  { %5467 = vmatpush1.bf16.msra.mxu1 %v9929_v45  ;;  %v9940_v45 = vld [vmem:[#allocation92_spill] sm:$0xff] }
 0x6bc   :  { %5469 = vmatprep.subr.bf16.mxu1 %v9930_v21  ;;  %v9941_v21 = vld [vmem:[#allocation68_spill] sm:$0xff] }
 0x6bf   :  { %5471 = vmatpush1.bf16.msra.mxu1 %v9931_v47  ;;  %v3543_v47 = vsel %vm9942_vm5, %v9941_v21, 0 }
 0x6c0   :  { %5473 = vmatprep.subr.bf16.mxu1 %v9932_v59  ;;  %v9943_v59 = vld [vmem:[#allocation93_spill] sm:$0xff] }
 0x6c3   :  { %5475 = vmatpush1.bf16.msra.mxu1 %v9933_v22  ;;  %v8742_v22 = vsub.f32 %v3543_v47, %v3543_v47 }
 0x6c4   :  { %5477 = vmatprep.subr.bf16.mxu1 %v9934_v44  ;;  %v9945_v44 = vld [vmem:[#allocation72_spill] sm:$0xff] }
 0x6c5   :  { %9944 = vst [vmem:[#allocation39_spill] sm:$0xff] %v8742_v22 }
 0x6c7   :  { %5479 = vmatpush1.bf16.msra.mxu1 %v9935_v25  ;;  %v3540_v25 = vsel %vm9946_vm6, %v9945_v44, 0 }
 0x6c8   :  { %5481 = vmatprep.subr.bf16.mxu1 %v9936_v7  ;;  %v8747_v7 = vsub.f32 %v3540_v25, %v3540_v25 }
 0x6ca   :  { %9948 = vst [vmem:[#allocation40_spill] sm:$0xff] %v8747_v7  ;;  %v9483_v56 = vand.u32 4294901760, %v8747_v7 }
 0x6cb   :  { %5483 = vmatpush1.bf16.msra.mxu1 %v9937_v55  ;;  %v9949_v55 = vld [vmem:[#allocation94_spill] sm:$0xff] }
 0x6cc   :  { %5485 = vmatprep.subr.bf16.mxu1 %v9938_v10  ;;  %v9950_v10 = vld [vmem:[#allocation63_spill] sm:$0xff] }
 0x6cf   :  { %5487 = vmatpush1.bf16.msra.mxu1 %v9939_v18  ;;  %v9484_v18 = vand.u32 4294901760, %v8742_v22 }
 0x6d0   :  { %5489 = vmatprep.subr.bf16.mxu1 %v9940_v45  ;;  %v9951_v45 = vld [vmem:[#allocation95_spill] sm:$0xff] }
 0x6d1   :  { %v4051_v47 = vsub.f32 %v8742_v22, %v9484_v18 }
 0x6d3   :  { %5491 = vmatpush1.bf16.msra.mxu1 %v9943_v59  ;;  %v4052_v59 = vand.u32 4294901760, %v4051_v47  ;;  %v9959_v47 = vpack.c.bf16 %v9905_v54, %v8079_v13 }
 0x6d4   :  { %5493 = vmatprep.subr.bf16.mxu1 %v9947_v29  ;;  %v4057_v29 = vsub.f32 %v8747_v7, %v9483_v56  ;;  %v9978_v56 = vld [vmem:[#allocation47_spill] sm:$0xff] }
 0x6d6   :  { %v4058_v25 = vand.u32 4294901760, %v4057_v29  ;;  %v9960_v29 = vpack.c.bf16 %v8088_v19, %v8083_v11 }
 0x6d7   :  { %5495 = vmatpush1.bf16.msra.mxu1 %v9949_v55  ;;  %v9956_v55 = vpack.c.bf16 %v8060_v53, %v8049_v15 }
 0x6d8   :  { %5497 = vmatprep.subr.bf16.mxu1 %v9950_v10  ;;  %v9957_v10 = vpack.c.bf16 %v8073_v40, %v8071_v61 }
 0x6db   :  { %5499 = vmatpush1.bf16.msra.mxu1 %v9951_v45  ;;  %v9958_v45 = vpack.c.bf16 %v8077_v23, %v8075_v50 }
 0x6dc   :  { %5501 = vmatprep.subr.bf16.mxu1 %v8624_v42  ;;  %v9952_v42 = vpack.c.bf16 %v9902_v31, %v9901_v16 }
 0x6df   :  { %5503 = vmatpush1.bf16.msra.mxu1 %v8629_v57  ;;  %v9953_v57 = vpack.c.bf16 %v8017_v6, %v8015_v27 }
 0x6e0   :  { %5505 = vmatprep.subr.bf16.mxu1 %v8634_v0  ;;  %v9954_v0 = vpack.c.bf16 %v8028_v43, %v8023_v52 }
 0x6e3   :  { %5507 = vmatpush1.bf16.msra.mxu1 %v8640_v36  ;;  %v9955_v36 = vpack.c.bf16 %v9904_v8, %v9903_v20 }
 0x6e4   :  { %4053 = vmatprep.subr.mxu1 %v4052_v59  ;;  %v9961_v59 = vpack.c.bf16 %v8092_v62, %v8090_v34 }
 0x6e7   :  { %4059 = vmatpush1.msra.mxu1 %v4058_v25  ;;  %v9962_v25 = vpack.c.bf16 %v8120_v49, %v8109_v60 }
 0x6e8   :  { %4065 = vmatmul.mubr.f32.vlgmr.msra.gmra.mrb[6].mxu1 %v8696_v35  ;;  %5509 = vmatprep.subr.bf16.mxu1 %v9952_v42  ;;  %v9963_v42 = vpack.c.bf16 %v8133_v32, %v8131_v41  ;;  %v9981_v35 = vld [vmem:[#allocation49_spill] sm:$0xff] }
 0x6e9   :  { %5511 = vmatpush1.bf16.msra.mxu1 %v9953_v57  ;;  %4261 = vmatprep.mubr.f32.mxu1 %v8709_v46  ;;  %v9964_v57 = vpack.c.bf16 %v8137_v24, %v8135_v51 }
 0x6ea   :  { %5513 = vmatprep.subr.bf16.mxu1 %v9954_v0  ;;  %v9965_v0 = vpack.c.bf16 %v8141_v17, %v8139_v38 }
 0x6ed   :  { %5515 = vmatpush1.bf16.msra.mxu1 %v9955_v36  ;;  %v9966_v36 = vpack.c.bf16 %v8148_v4, %v8143_v26 }
 0x6ee   :  { %5517 = vmatprep.subr.bf16.mxu1 %v9956_v55  ;;  %v9967_v55 = vld [vmem:[#allocation41_spill] sm:$0xff] }
 0x6f1   :  { %5519 = vmatpush1.bf16.msra.mxu1 %v9957_v10  ;;  %v9968_v10 = vld [vmem:[#allocation24_spill] sm:$0xff] }
 0x6f2   :  { %5521 = vmatprep.subr.bf16.mxu1 %v9958_v45  ;;  %v9969_v45 = vpack.c.bf16 %v9967_v55, %v9968_v10 }
 0x6f5   :  { %5523 = vmatpush1.bf16.msra.mxu1 %v9959_v47  ;;  %v9970_v47 = vld [vmem:[#allocation25_spill] sm:$0xff] }
 0x6f6   :  { %5525 = vmatprep.subr.bf16.mxu1 %v9960_v29  ;;  %v9971_v29 = vpack.c.bf16 %v8180_v58, %v9970_v47 }
 0x6f9   :  { %5527 = vmatpush1.bf16.msra.mxu1 %v9961_v59  ;;  %v9972_v59 = vld [vmem:[#allocation30_spill] sm:$0xff] }
 0x6fa   :  { %5529 = vmatprep.subr.bf16.mxu1 %v9962_v25  ;;  %v9973_v25 = vpack.c.bf16 %v8193_v28, %v9972_v59 }
 0x6fd   :  { %5531 = vmatpush1.bf16.msra.mxu1 %v9963_v42  ;;  %v9974_v42 = vpack.c.bf16 %v8197_v33, %v8195_v1  ;;  %v9987_v33 = vld [vmem:[#allocation56_spill] sm:$0xff] }
 0x6fe   :  { %5533 = vmatprep.subr.bf16.mxu1 %v9964_v57  ;;  %v9975_v57 = vld [vmem:[#allocation45_spill] sm:$0xff] }
 0x701   :  { %5535 = vmatpush1.bf16.msra.mxu1 %v9965_v0  ;;  %v9976_v0 = vpack.c.bf16 %v9907_v5, %v9975_v57 }
 0x702   :  { %5537 = vmatprep.subr.bf16.mxu1 %v9966_v36  ;;  %v9977_v36 = vld [vmem:[#allocation48_spill] sm:$0xff] }
 0x703   :  { %v9979_v18 = vpack.c.bf16 %v9977_v36, %v9978_v56 }
 0x705   :  { %5539 = vmatpush1.bf16.msra.mxu1 %v9969_v45  ;;  %v9980_v45 = vld [vmem:[#allocation50_spill] sm:$0xff] }
 0x706   :  { %5541 = vmatprep.subr.bf16.mxu1 %v9971_v29  ;;  %v9982_v58 = vpack.c.bf16 %v9980_v45, %v9981_v35  ;;  %v9983_v29 = vld [vmem:[#allocation6_spill] sm:$0xff] }
 0x707   :  { %v9984_v28 = vpack.c.bf16 %v9909_v30, %v9983_v29 }
 0x709   :  { %5543 = vmatpush1.bf16.msra.mxu1 %v9973_v25  ;;  %v9985_v25 = vpack.c.bf16 %v9911_v2, %v9910_v12  ;;  %v9995_v2 = vld [vmem:[#allocation70_spill] sm:$0xff] }
 0x70a   :  { %5545 = vmatprep.subr.bf16.mxu1 %v9974_v42  ;;  %v9986_v42 = vld [vmem:[#allocation58_spill] sm:$0xff] }
 0x70b   :  { %v9988_v5 = vpack.c.bf16 %v9986_v42, %v9987_v33 }
 0x70d   :  { %5547 = vmatpush1.bf16.msra.mxu1 %v9976_v0  ;;  %v9989_v0 = vpack.c.bf16 %v9893_v9, %v9912_v63 }
 0x70e   :  { %5549 = vmatprep.subr.bf16.mxu1 %v9979_v18  ;;  %v9990_v18 = vld [vmem:[#allocation62_spill] sm:$0xff] }
 0x70f   :  { %v9991_v45 = vpack.c.bf16 %v9896_v3, %v9990_v18 }
 0x711   :  { %5551 = vmatpush1.bf16.msra.mxu1 %v9982_v58  ;;  %v9992_v58 = vpack.c.bf16 %v9914_v14, %v9913_v39 }
 0x712   :  { %5553 = vmatprep.subr.bf16.mxu1 %v9984_v28  ;;  %v9993_v28 = vpack.c.bf16 %v9918_v37, %v8321_v48 }
 0x715   :  { %5555 = vmatpush1.bf16.msra.mxu1 %v9985_v25  ;;  %v9994_v25 = vld [vmem:[#allocation71_spill] sm:$0xff] }
 0x716   :  { %5557 = vmatprep.subr.bf16.mxu1 %v9988_v5  ;;  %v9996_v42 = vpack.c.bf16 %v9994_v25, %v9995_v2  ;;  %v9997_v5 = vld [vmem:[#allocation37_spill] sm:$0xff]  ;;  %v10004_v25 = vld [vmem:[#allocation12_spill] sm:$0xff]  ;;  %v10057_v2 = vand.u32 4294901760, %v8028_v43  ;;  %v10064_v43 = vand.u32 4294901760, %v8060_v53  ;;  %v10071_v53 = vand.u32 4294901760, %v8083_v11 }
 0x717   :  { %vm10005_vm0 = vnez %v10004_v25  ;;  %v10054_v25 = vand.u32 4294901760, %v8015_v27  ;;  %v10061_v27 = vand.u32 4294901760, %v9903_v20  ;;  %v10068_v20 = vand.u32 4294901760, %v8077_v23 }
 0x718   :  { %v10075_v23 = vand.u32 4294901760, %v8109_v60  ;;  %v10078_v11 = vand.u32 4294901760, %v8133_v32  ;;  %v10082_v60 = vand.u32 4294901760, %v8141_v17  ;;  %v10085_v32 = vand.u32 4294901760, %v9968_v10 }
 0x719   :  { %5559 = vmatpush1.bf16.msra.mxu1 %v9989_v0  ;;  %v9998_v0 = vmov 1.0|1.0   ;;  %v10090_v17 = vand.u32 4294901760, %v9972_v59  ;;  %v10100_v59 = vand.u32 4294901760, %v9977_v36  ;;  %v10109_v36 = vand.u32 4294901760, %v9987_v33 }
 0x71a   :  { %5561 = vmatprep.subr.bf16.mxu1 %v9991_v45  ;;  %v9999_v45 = vld [vmem:[#allocation11_spill] sm:$0xff]  ;;  %v10117_v33 = vand.u32 4294901760, %v9914_v14 }
 0x71b   :  { %vm10000_vm11 = vnez %v9999_v45  ;;  %v10010_v45 = vld [vmem:[#allocation7_spill] sm:$0xff] }
 0x71c   :  { %vm10011_vm5 = vnez %v10010_v45  ;;  %v10022_v45 = vld [vmem:[#allocation19_spill] sm:$0xff] }
 0x71d   :  { %5563 = vmatpush1.bf16.msra.mxu1 %v9992_v58  ;;  %v10001_v58 = vld [vmem:[#allocation10_spill] sm:$0xff] }
 0x71e   :  { %5565 = vmatprep.subr.bf16.mxu1 %v9993_v28  ;;  %vm10002_vm4 = vnez %v10001_v58  ;;  %v10003_v28 = vand.u32 4294901760, %v8709_v46  ;;  %v10012_v58 = vld [vmem:[#allocation14_spill] sm:$0xff]  ;;  %v10014_v46 = vld [vmem:[#allocation15_spill] sm:$0xff] }
 0x71f   :  { %vm10013_vm6 = vnez %v10012_v58  ;;  %v10024_v58 = vld [vmem:[#allocation21_spill] sm:$0xff] }
 0x721   :  { %5567 = vmatpush1.bf16.msra.mxu1 %v9996_v42  ;;  %v10006_v42 = vld [vmem:[#allocation8_spill] sm:$0xff] }
 0x722   :  { %4253 = vmatprep.subr.mxu1 %v8742_v22  ;;  %vm10007_vm7 = vnez %v10006_v42  ;;  %v10018_v42 = vld [vmem:[#allocation17_spill] sm:$0xff] }
 0x725   :  { %4256 = vmatpush1.msra.mxu1 %v8747_v7  ;;  %v10008_v7 = vld [vmem:[#allocation13_spill] sm:$0xff] }
 0x726   :  { %4264 = vmatmul.mubr.f32.vlgmr.msra.gmra.mrb[6].mxu1 %v9997_v5  ;;  %5569 = vmatprep.subr.msk.bf16.mxu1 %vm10000_vm11, %v9998_v0  ;;  %vm10009_vm15 = vnez %v10008_v7  ;;  %v10020_v7 = vld [vmem:[#allocation18_spill] sm:$0xff] }
 0x727   :  { %5571 = vmatpush1.bf16.msk.msra.mxu1 %vm10002_vm4, %v9998_v0  ;;  %4399 = vmatprep.mubr.f32.mxu1 %v10003_v28  ;;  %vm10015_vm4 = vnez %v10014_v46  ;;  %v10016_v28 = vld [vmem:[#allocation16_spill] sm:$0xff]  ;;  %v10026_v46 = vld [vmem:[#allocation22_spill] sm:$0xff] }
 0x728   :  { %5573 = vmatprep.subr.msk.bf16.mxu1 %vm10005_vm0, %v9998_v0  ;;  %vm10017_vm0 = vnez %v10016_v28  ;;  %v10028_v28 = vld [vmem:[#allocation23_spill] sm:$0xff] }
 0x72b   :  { %5575 = vmatpush1.bf16.msk.msra.mxu1 %vm10007_vm7, %v9998_v0  ;;  %vm10019_vm7 = vnez %v10018_v42  ;;  %v10030_v42 = vld [vmem:[#allocation26_spill] sm:$0xff] }
 0x72c   :  { %5577 = vmatprep.subr.msk.bf16.mxu1 %vm10009_vm15, %v9998_v0  ;;  %vm10021_vm15 = vnez %v10020_v7  ;;  %v10032_v7 = vld [vmem:[#allocation27_spill] sm:$0xff] }
 0x72f   :  { %5579 = vmatpush1.bf16.msk.msra.mxu1 %vm10011_vm5, %v9998_v0  ;;  %vm10023_vm5 = vnez %v10022_v45  ;;  %v10034_v45 = vld [vmem:[#allocation28_spill] sm:$0xff] }
 0x730   :  { %5581 = vmatprep.subr.msk.bf16.mxu1 %vm10013_vm6, %v9998_v0  ;;  %vm10025_vm6 = vnez %v10024_v58  ;;  %v10036_v58 = vld [vmem:[#allocation29_spill] sm:$0xff] }
 0x733   :  { %5583 = vmatpush1.bf16.msk.msra.mxu1 %vm10015_vm4, %v9998_v0  ;;  %vm10027_vm4 = vnez %v10026_v46  ;;  %v10038_v46 = vld [vmem:[#allocation31_spill] sm:$0xff] }
 0x734   :  { %5585 = vmatprep.subr.msk.bf16.mxu1 %vm10017_vm0, %v9998_v0  ;;  %vm10029_vm0 = vnez %v10028_v28  ;;  %v10040_v28 = vld [vmem:[#allocation32_spill] sm:$0xff] }
 0x737   :  { %5587 = vmatpush1.bf16.msk.msra.mxu1 %vm10019_vm7, %v9998_v0  ;;  %vm10031_vm7 = vnez %v10030_v42  ;;  %v10055_v42 = vand.u32 4294901760, %v8017_v6  ;;  %v10062_v6 = vand.u32 4294901760, %v9904_v8 }
 0x738   :  { %5589 = vmatprep.subr.msk.bf16.mxu1 %vm10021_vm15, %v9998_v0  ;;  %vm10033_vm15 = vnez %v10032_v7  ;;  %v10056_v7 = vand.u32 4294901760, %v8023_v52  ;;  %v10063_v52 = vand.u32 4294901760, %v8049_v15  ;;  %v10070_v15 = vand.u32 4294901760, %v9905_v54 }
 0x739   :  { %v5630_v22 = vpack.c.bf16 %v10055_v42, %v10054_v25  ;;  %v10077_v54 = vand.u32 4294901760, %v8131_v41  ;;  %v10084_v41 = vand.u32 4294901760, %v8148_v4  ;;  %v10093_v4 = vand.u32 4294901760, %v8195_v1 }
 0x73a   :  { %v5632_v37 = vpack.c.bf16 %v10057_v2, %v10056_v7  ;;  %v5636_v2 = vpack.c.bf16 %v10064_v43, %v10063_v52  ;;  %v10065_v7 = vand.u32 4294901760, %v8071_v61  ;;  %v10072_v61 = vand.u32 4294901760, %v8088_v19  ;;  %v10088_v43 = vld [vmem:[#allocation42_spill] sm:$0xff] }
 0x73b   :  { %5591 = vmatpush1.bf16.msk.msra.mxu1 %vm10023_vm5, %v9998_v0  ;;  %vm10035_vm5 = vnez %v10034_v45  ;;  %v10050_v45 = vld [vmem:[#allocation67_spill] sm:$0xff]  ;;  %v10079_v19 = vand.u32 4294901760, %v8135_v51  ;;  %v10086_v51 = vand.u32 4294901760, %v9967_v55  ;;  %v10096_v55 = vand.u32 4294901760, %v9975_v57 }
 0x73c   :  { %5593 = vmatprep.subr.msk.bf16.mxu1 %vm10025_vm6, %v9998_v0  ;;  %vm10037_vm6 = vnez %v10036_v58  ;;  %v10105_v57 = vand.u32 4294901760, %v9909_v30  ;;  %v10114_v30 = vand.u32 4294901760, %v9990_v18 }
 0x73d   :  { %v5658_v52 = vpack.c.bf16 %v10086_v51, %v10085_v32  ;;  %v10129_v32 = vld [vmem:[#allocation36_spill] sm:$0xff]  ;;  %v10131_v51 = vld [vmem:[#allocation10_spill] sm:$0xff] }
 0x73f   :  { %5595 = vmatpush1.bf16.msk.msra.mxu1 %vm10027_vm4, %v9998_v0  ;;  %vm10039_vm4 = vnez %v10038_v46  ;;  %v10052_v46 = vand.u32 4294901760, %v9901_v16  ;;  %v5634_v16 = vpack.c.bf16 %v10062_v6, %v10061_v27 }
 0x740   :  { %5597 = vmatprep.subr.msk.bf16.mxu1 %vm10029_vm0, %v9998_v0  ;;  %vm10041_vm0 = vnez %v10040_v28  ;;  %v10053_v28 = vand.u32 4294901760, %v9902_v31  ;;  %v10060_v31 = vld [vmem:[#allocation38_spill] sm:$0xff] }
 0x742   :  { %v5628_v58 = vpack.c.bf16 %v10053_v28, %v10052_v46  ;;  %v5650_v28 = vpack.c.bf16 %v10078_v11, %v10077_v54  ;;  %v10112_v54 = vand.u32 4294901760, %v9912_v63 }
 0x743   :  { %5599 = vmatpush1.bf16.msk.msra.mxu1 %vm10031_vm7, %v9998_v0 }
 0x744   :  { %5601 = vmatprep.subr.msk.bf16.mxu1 %vm10033_vm15, %v9998_v0 }
 0x747   :  { %5603 = vmatpush1.bf16.msk.msra.mxu1 %vm10035_vm5, %v9998_v0 }
 0x748   :  { %5605 = vmatprep.subr.msk.bf16.mxu1 %vm10037_vm6, %v9998_v0 }
 0x74b   :  { %5607 = vmatpush1.bf16.msk.msra.mxu1 %vm10039_vm4, %v9998_v0 }
 0x74c   :  { %5609 = vmatprep.subr.msk.bf16.mxu1 %vm10041_vm0, %v9998_v0 }
 0x74f   :  { %5611 = vmatpush1.bf16.msk.msra.mxu1 %vm7934_vm14, %v9998_v0 }
 0x750   :  { %5613 = vmatprep.subr.msk.bf16.mxu1 %vm7943_vm3, %v9998_v0 }
 0x753   :  { %5615 = vmatpush1.bf16.msk.msra.mxu1 %vm7968_vm8, %v9998_v0 }
 0x754   :  { %5617 = vmatprep.subr.msk.bf16.mxu1 %vm8243_vm2, %v9998_v0  ;;  %vm10051_vm2 = vcmask 1044480  }
 0x757   :  { %5619 = vmatpush1.bf16.msk.msra.mxu1 %vm8253_vm13, %v9998_v0 }
 0x758   :  { %5621 = vmatprep.subr.msk.bf16.mxu1 %vm8268_vm9, %v9998_v0 }
 0x75b   :  { %5623 = vmatpush1.bf16.msk.msra.mxu1 %vm8283_vm10, %v9998_v0 }
 0x75c   :  { %5625 = vmatprep.subr.msk.bf16.mxu1 %vm8301_vm12, %v9998_v0 }
 0x75f   :  { %5627 = vmatpush1.bf16.msk.msra.mxu1 %vm8313_vm1, %v9998_v0  ;;  %vm10058_vm1 = vmmov %vm10051_vm2 }
 0x760   :  { %5006 = vmatprep.subr.msk.mxu1 %vm10051_vm2, %v9941_v21  ;;  %v10059_v21 = vand.u32 4294901760, %v9997_v5  ;;  %vm10132_vm2 = vnez %v10131_v51 }
 0x763   :  { %5007 = vmatpush1.msk.msra.mxu1 %vm10058_vm1, %v9945_v44 }
 0x764   :  { %4403 = vmatmul.mubr.f32.vlgmr.msra.gmra.mrb[6].mxu1 %v10059_v21  ;;  %5629 = vmatprep.subr.bf16.mxu1 %v5628_v58  ;;  %v10066_v21 = vand.u32 4294901760, %v8073_v40  ;;  %v5644_v58 = vpack.c.bf16 %v10072_v61, %v10071_v53  ;;  %v10073_v40 = vand.u32 4294901760, %v8090_v34  ;;  %v10080_v34 = vand.u32 4294901760, %v8137_v24  ;;  %v10102_v53 = vld [vmem:[#allocation50_spill] sm:$0xff] }
 0x765   :  { %5631 = vmatpush1.bf16.msra.mxu1 %v5630_v22  ;;  %4660 = vmatprep.mubr.f32.mxu1 %v10060_v31  ;;  %v10067_v22 = vand.u32 4294901760, %v8075_v50  ;;  %v10074_v50 = vand.u32 4294901760, %v8092_v62  ;;  %v10081_v62 = vand.u32 4294901760, %v8139_v38  ;;  %v10087_v24 = vand.u32 4294901760, %v9970_v47 }
 0x766   :  { %5633 = vmatprep.subr.bf16.mxu1 %v5632_v37  ;;  %v5638_v25 = vpack.c.bf16 %v10066_v21, %v10065_v7  ;;  %v10069_v37 = vand.u32 4294901760, %v8079_v13  ;;  %v10076_v13 = vand.u32 4294901760, %v8120_v49  ;;  %v5652_v27 = vpack.c.bf16 %v10080_v34, %v10079_v19  ;;  %v10091_v7 = vld [vmem:[#allocation43_spill] sm:$0xff] }
 0x767   :  { %v5640_v5 = vpack.c.bf16 %v10068_v20, %v10067_v22  ;;  %v5646_v42 = vpack.c.bf16 %v10074_v50, %v10073_v40  ;;  %v5654_v6 = vpack.c.bf16 %v10082_v60, %v10081_v62  ;;  %v10083_v49 = vand.u32 4294901760, %v8143_v26  ;;  %v10097_v20 = vld [vmem:[#allocation46_spill] sm:$0xff]  ;;  %v10119_v62 = vld [vmem:[#allocation69_spill] sm:$0xff] }
 0x768   :  { %v5642_v8 = vpack.c.bf16 %v10070_v15, %v10069_v37  ;;  %v5648_v46 = vpack.c.bf16 %v10076_v13, %v10075_v23  ;;  %v10089_v38 = vand.u32 4294901760, %v10088_v43  ;;  %v10092_v26 = vand.u32 4294901760, %v10091_v7  ;;  %v10110_v13 = vld [vmem:[#allocation58_spill] sm:$0xff]  ;;  %v10137_v43 = vld [vmem:[#allocation13_spill] sm:$0xff] }
 0x769   :  { %5635 = vmatpush1.bf16.msra.mxu1 %v5634_v16  ;;  %v5656_v16 = vpack.c.bf16 %v10084_v41, %v10083_v49  ;;  %v10098_v47 = vand.u32 4294901760, %v10097_v20  ;;  %v10099_v37 = vand.u32 4294901760, %v9978_v56  ;;  %v10103_v1 = vand.u32 4294901760, %v10102_v53  ;;  %v10123_v49 = vld [vmem:[#allocation71_spill] sm:$0xff]  ;;  %v10147_v7 = vld [vmem:[#allocation17_spill] sm:$0xff]  ;;  %v10168_v53 = vld [vmem:[#allocation54_spill] sm:$0xff] }
 0x76a   :  { %5637 = vmatprep.subr.bf16.mxu1 %v5636_v2  ;;  %v5660_v2 = vpack.c.bf16 %v10089_v38, %v10087_v24  ;;  %v5662_v21 = vpack.c.bf16 %v10092_v26, %v10090_v17  ;;  %v10106_v50 = vand.u32 4294901760, %v9910_v12  ;;  %v10115_v12 = vand.u32 4294901760, %v9896_v3  ;;  %v10125_v3 = vld [vmem:[#allocation39_spill] sm:$0xff]  ;;  %v10135_v24 = vld [vmem:[#allocation8_spill] sm:$0xff]  ;;  %v10149_v26 = vld [vmem:[#allocation18_spill] sm:$0xff] }
 0x76b   :  { %v5668_v15 = vpack.c.bf16 %v10100_v59, %v10099_v37  ;;  %v10116_v19 = vand.u32 4294901760, %v9913_v39  ;;  %v10120_v63 = vand.u32 4294901760, %v10119_v62  ;;  %v10124_v18 = vand.u32 4294901760, %v10123_v49  ;;  %v10127_v39 = vld [vmem:[#allocation40_spill] sm:$0xff]  ;;  %v10139_v38 = vld [vmem:[#allocation7_spill] sm:$0xff] }
 0x76c   :  { %v10128_v14 = vand.u32 4294901760, %v10127_v39  ;;  %vm10136_vm12 = vnez %v10135_v24  ;;  %vm10138_vm10 = vnez %v10137_v43  ;;  %v10145_v17 = vld [vmem:[#allocation16_spill] sm:$0xff] }
 0x76d   :  { %5639 = vmatpush1.bf16.msra.mxu1 %v5638_v25  ;;  %v10094_v25 = vld [vmem:[#allocation44_spill] sm:$0xff]  ;;  %v5682_v34 = vpack.c.bf16 %v10117_v33, %v10116_v19 }
 0x76e   :  { %5641 = vmatprep.subr.bf16.mxu1 %v5640_v5  ;;  %v10095_v10 = vand.u32 4294901760, %v10094_v25  ;;  %v5666_v5 = vpack.c.bf16 %v10098_v47, %v10096_v55  ;;  %v10155_v25 = vld [vmem:[#allocation22_spill] sm:$0xff] }
 0x770   :  { %v5664_v22 = vpack.c.bf16 %v10095_v10, %v10093_v4  ;;  %v10153_v4 = vld [vmem:[#allocation21_spill] sm:$0xff]  ;;  %v10157_v10 = vld [vmem:[#allocation23_spill] sm:$0xff] }
 0x771   :  { %5643 = vmatpush1.bf16.msra.mxu1 %v5642_v8  ;;  %v10101_v8 = vand.u32 4294901760, %v9981_v35  ;;  %v10111_v35 = vand.u32 4294901760, %v10110_v13 }
 0x772   :  { %5645 = vmatprep.subr.bf16.mxu1 %v5644_v58  ;;  %v10104_v58 = vand.u32 4294901760, %v9983_v29  ;;  %v10113_v29 = vand.u32 4294901760, %v9893_v9  ;;  %v10121_v9 = vld [vmem:[#allocation70_spill] sm:$0xff] }
 0x773   :  { %v5670_v61 = vpack.c.bf16 %v10103_v1, %v10101_v8 }
 0x774   :  { %v5672_v40 = vpack.c.bf16 %v10105_v57, %v10104_v58  ;;  %v5678_v11 = vpack.c.bf16 %v10113_v29, %v10112_v54  ;;  %v10173_v58 = vld [vmem:[#allocation61_spill] sm:$0xff] }
 0x775   :  { %5647 = vmatpush1.bf16.msra.mxu1 %v5646_v42  ;;  %v10107_v42 = vld [vmem:[#allocation53_spill] sm:$0xff] }
 0x776   :  { %5649 = vmatprep.subr.bf16.mxu1 %v5648_v46  ;;  %v10108_v56 = vand.u32 4294901760, %v10107_v42  ;;  %v5676_v46 = vpack.c.bf16 %v10111_v35, %v10109_v36  ;;  %v10175_v57 = vld [vmem:[#allocation65_spill] sm:$0xff] }
 0x778   :  { %v5674_v23 = vpack.c.bf16 %v10108_v56, %v10106_v50 }
 0x779   :  { %5651 = vmatpush1.bf16.msra.mxu1 %v5650_v28  ;;  %v5680_v28 = vpack.c.bf16 %v10115_v12, %v10114_v30 }
 0x77a   :  { %5653 = vmatprep.subr.bf16.mxu1 %v5652_v27  ;;  %v10118_v27 = vand.u32 4294901760, %v8321_v48 }
 0x77c   :  { %v5684_v60 = vpack.c.bf16 %v10120_v63, %v10118_v27 }
 0x77d   :  { %5655 = vmatpush1.bf16.msra.mxu1 %v5654_v6  ;;  %v10122_v6 = vand.u32 4294901760, %v10121_v9 }
 0x77e   :  { %5657 = vmatprep.subr.bf16.mxu1 %v5656_v16  ;;  %v10126_v16 = vand.u32 4294901760, %v10125_v3 }
 0x77f   :  { %v5686_v41 = vpack.c.bf16 %v10124_v18, %v10122_v6 }
 0x781   :  { %5659 = vmatpush1.bf16.msra.mxu1 %v5658_v52  ;;  %v10133_v52 = vld [vmem:[#allocation12_spill] sm:$0xff] }
 0x782   :  { %5661 = vmatprep.subr.bf16.mxu1 %v5660_v2  ;;  %vm10134_vm1 = vnez %v10133_v52  ;;  %v10141_v2 = vld [vmem:[#allocation14_spill] sm:$0xff] }
 0x785   :  { %5663 = vmatpush1.bf16.msra.mxu1 %v5662_v21  ;;  %v10151_v21 = vld [vmem:[#allocation19_spill] sm:$0xff] }
 0x786   :  { %5665 = vmatprep.subr.bf16.mxu1 %v5664_v22 }
 0x789   :  { %5667 = vmatpush1.bf16.msra.mxu1 %v5666_v5 }
 0x78a   :  { %5669 = vmatprep.subr.bf16.mxu1 %v5668_v15 }
 0x78d   :  { %5671 = vmatpush1.bf16.msra.mxu1 %v5670_v61  ;;  %v10171_v61 = vld [vmem:[#allocation57_spill] sm:$0xff] }
 0x78e   :  { %5673 = vmatprep.subr.bf16.mxu1 %v5672_v40  ;;  %v10178_v40 = vld [vmem:[#allocation68_spill] sm:$0xff] }
 0x791   :  { %5675 = vmatpush1.bf16.msra.mxu1 %v5674_v23 }
 0x792   :  { %5677 = vmatprep.subr.bf16.mxu1 %v5676_v46 }
 0x795   :  { %5679 = vmatpush1.bf16.msra.mxu1 %v5678_v11 }
 0x796   :  { %5681 = vmatprep.subr.bf16.mxu1 %v5680_v28 }
 0x799   :  { %5683 = vmatpush1.bf16.msra.mxu1 %v5682_v34 }
 0x79a   :  { %5685 = vmatprep.subr.bf16.mxu1 %v5684_v60 }
 0x79d   :  { %5687 = vmatpush1.bf16.msra.mxu1 %v5686_v41 }
 0x79e   :  { %4652 = vmatprep.subr.mxu1 %v10126_v16 }
 0x7a1   :  { %4656 = vmatpush1.msra.mxu1 %v10128_v14 }
 0x7a2   :  { %4662 = vmatmul.mubr.f32.vlgmr.msra.gmra.mrb[6].mxu1 %v10129_v32  ;;  %5689 = vmatprep.subr.msk.bf16.mxu1 %vm10000_vm11, %v9998_v0  ;;  %vm10140_vm11 = vnez %v10139_v38 }
 0x7a3   :  { %5691 = vmatpush1.bf16.msk.msra.mxu1 %vm10132_vm2, %v9998_v0  ;;  %4795 = vmatprep.mubr.f32.mxu1 %v10060_v31  ;;  %vm10142_vm2 = vnez %v10141_v2  ;;  %v10143_v31 = vld [vmem:[#allocation15_spill] sm:$0xff] }
 0x7a4   :  { %5693 = vmatprep.subr.msk.bf16.mxu1 %vm10134_vm1, %v9998_v0  ;;  %vm10144_vm9 = vnez %v10143_v31  ;;  %vm10146_vm1 = vnez %v10145_v17 }
 0x7a7   :  { %5695 = vmatpush1.bf16.msk.msra.mxu1 %vm10136_vm12, %v9998_v0  ;;  %vm10148_vm12 = vnez %v10147_v7 }
 0x7a8   :  { %5697 = vmatprep.subr.msk.bf16.mxu1 %vm10138_vm10, %v9998_v0  ;;  %vm10150_vm10 = vnez %v10149_v26 }
 0x7ab   :  { %5699 = vmatpush1.bf16.msk.msra.mxu1 %vm10140_vm11, %v9998_v0  ;;  %vm10152_vm11 = vnez %v10151_v21 }
 0x7ac   :  { %5701 = vmatprep.subr.msk.bf16.mxu1 %vm10142_vm2, %v9998_v0  ;;  %vm10154_vm2 = vnez %v10153_v4 }
 0x7af   :  { %5703 = vmatpush1.bf16.msk.msra.mxu1 %vm10144_vm9, %v9998_v0  ;;  %vm10156_vm9 = vnez %v10155_v25 }
 0x7b0   :  { %5705 = vmatprep.subr.msk.bf16.mxu1 %vm10146_vm1, %v9998_v0  ;;  %vm10158_vm1 = vnez %v10157_v10 }
 0x7b3   :  { %5707 = vmatpush1.bf16.msk.msra.mxu1 %vm10148_vm12, %v9998_v0 }
 0x7b4   :  { %5709 = vmatprep.subr.msk.bf16.mxu1 %vm10150_vm10, %v9998_v0 }
 0x7b7   :  { %5711 = vmatpush1.bf16.msk.msra.mxu1 %vm10152_vm11, %v9998_v0 }
 0x7b8   :  { %5713 = vmatprep.subr.msk.bf16.mxu1 %vm10154_vm2, %v9998_v0 }
 0x7bb   :  { %5715 = vmatpush1.bf16.msk.msra.mxu1 %vm10156_vm9, %v9998_v0 }
 0x7bc   :  { %5717 = vmatprep.subr.msk.bf16.mxu1 %vm10158_vm1, %v9998_v0 }
 0x7bf   :  { %5719 = vmatpush1.bf16.msk.msra.mxu1 %vm10031_vm7, %v9998_v0  ;;  %vm10169_vm7 = vnez %v10168_v53 }
 0x7c0   :  { %5721 = vmatprep.subr.msk.bf16.mxu1 %vm10033_vm15, %v9998_v0  ;;  %vm4806_vm15 = vcmask 954368  }
 0x7c3   :  { %5723 = vmatpush1.bf16.msk.msra.mxu1 %vm10035_vm5, %v9998_v0 }
 0x7c4   :  { %5725 = vmatprep.subr.msk.bf16.mxu1 %vm10037_vm6, %v9998_v0 }
 0x7c7   :  { %5727 = vmatpush1.bf16.msk.msra.mxu1 %vm10039_vm4, %v9998_v0  ;;  %vm10172_vm4 = vnez %v10171_v61 }
 0x7c8   :  { %5729 = vmatprep.subr.msk.bf16.mxu1 %vm10041_vm0, %v9998_v0  ;;  %vm10179_vm0 = vcmask 1044480  }
 0x7cb   :  { %5731 = vmatpush1.bf16.msk.msra.mxu1 %vm7934_vm14, %v9998_v0  ;;  %vm10174_vm14 = vnez %v10173_v58 }
 0x7cc   :  { %5733 = vmatprep.subr.msk.bf16.mxu1 %vm7943_vm3, %v9998_v0  ;;  %vm10176_vm3 = vnez %v10175_v57 }
 0x7cf   :  { %5735 = vmatpush1.bf16.msk.msra.mxu1 %vm7968_vm8, %v9998_v0  ;;  %vm10177_vm8 = vnez %v10050_v45 }
 0x7d0   :  { %5737 = vmatprep.subr.msk.bf16.mxu1 %vm10169_vm7, %v9998_v0 }
 0x7d3   :  { %5739 = vmatpush1.bf16.msk.msra.mxu1 %vm8253_vm13, %v9998_v0  ;;  %vm10180_vm13 = vmmov %vm10179_vm0 }
 0x7d4   :  { %5741 = vmatprep.subr.msk.bf16.mxu1 %vm10172_vm4, %v9998_v0 }
 0x7d7   :  { %5743 = vmatpush1.bf16.msk.msra.mxu1 %vm10174_vm14, %v9998_v0 }
 0x7d8   :  { %5745 = vmatprep.subr.msk.bf16.mxu1 %vm10176_vm3, %v9998_v0 }
 0x7db   :  { %5747 = vmatpush1.bf16.msk.msra.mxu1 %vm10177_vm8, %v9998_v0 }
 0x7dc   :  { %5068 = vmatprep.subr.msk.mxu1 %vm10179_vm0, %v10178_v40 }
 0x7df   :  { %5069 = vmatpush1.msk.msra.mxu1 %vm10180_vm13, %v9945_v44 }
 0x7e0   :  { %4797 = vmatmul.mubr.f32.vlgmr.msra.gmra.mrb[6].mxu1 %v10129_v32 }
 0x8b3   :  { %v4798_v50 = vpop.f32.mrb[6].mxu1 }
 0x8b4   :  { %v4803_v42 = vmul.f32 0.01, %v4798_v50  ;;  %v4800_v56 = vpop.f32.mrb[7].mxu1 }
 0x8b5   :  { %v4804_v23 = vmul.f32 0.01, %v4800_v56 }
 0x8b6   :  { %4805 = vst [vmem:[%s9188_s3] sm:$0x1f] %v4803_v42 }
 0x8b7   :  { %4807 = vst.msk [vmem:[%s9188_s3 + $0x8] sm:$0x1f] %vm4806_vm15, %v4804_v23 }

</bundles_post_ra>
